<compile_context>
chip_gen: v5e
topology: v5e:2x2
jax: 0.10.0
libtpu: 0.0.40
codegen_flags: <defaults>
</compile_context>

<pallas_src>
import jax
import jax.numpy as jnp
from jax import lax
from jax.experimental import pallas as pl
from jax.experimental.pallas import tpu as pltpu


# ----------------------------- small helpers --------------------------------

def _silu(z):
    # z * sigmoid(z); exp / reciprocal of the sigmoid land on the EUP slot.
    return z * jax.nn.sigmoid(z)


def _conv3x3_im2col(xin, rows_out, width, w_flat, bias):
    """3x3 conv ('same' in W, valid in H) as ONE im2col MXU matmul.

    xin:    (rows_out + 2, width, C) bf16; rows outside the image already zero.
    w_flat: (9*C, Cout) bf16  (HWIO weight reshaped, tap-major).
    bias:   (1, Cout) f32.
    returns (rows_out*width, Cout) f32.
    """
    # TODO(synk): if a bundle dump ever shows vld/vst or XLU saturation, rework
    # the patch build with pltpu.roll + boundary-column masks instead of the
    # nine strided slices + channel concat.
    rows_in, _, cin = xin.shape
    zcol = jnp.zeros((rows_in, 1, cin), xin.dtype)
    xp = jnp.concatenate([zcol, xin, zcol], axis=1)          # zero-pad W by 1
    taps = [xp[dy:dy + rows_out, dx:dx + width, :].reshape(rows_out * width, cin)
            for dy in range(3) for dx in range(3)]
    patch = jnp.concatenate(taps, axis=-1)                   # (M, 9*C) im2col
    return jnp.dot(patch, w_flat, preferred_element_type=jnp.float32) + bias


def _fold_conv_bn(w_oihw, bn, eps=1e-3):
    """Fold eval-mode BN into the conv weight: bf16 HWIO weight + f32 bias."""
    gamma, beta, mean, var = bn
    scale = gamma / jnp.sqrt(var + eps)                      # (Cout,)
    bias = beta - mean * scale
    w_hwio = jnp.transpose(w_oihw, (2, 3, 1, 0)) * scale     # scale over O (last)
    return w_hwio.astype(jnp.bfloat16), bias.astype(jnp.float32)


# Conservative per-step live-VMEM budget.  Sized for v7x (64 MiB physical,
# 32 MiB scoped default); on v5e/v6e this could be raised to ~2x.
_VMEM_BUDGET = 20 * 1024 * 1024


def _tile_vmem_bytes(TH, W, Cin, half, PC, PR, Ccat, Cout, out_bytes):
    """Rough per-grid-step live VMEM for a TH-row tile (im2col patches dominate)."""
    RE, R2 = TH + 4, TH + 2
    return (2 * RE * W * Cin * 2          # input window (double-buffered) bf16
            + RE * W * PC * 4             # t1 f32
            + RE * W * half * 2           # x2 bf16
            + R2 * W * 9 * half * 2       # conv2 im2col patch bf16
            + R2 * W * PR * 6             # x3 f32 + bf16
            + TH * W * 9 * PR * 2         # conv3 im2col patch bf16
            + TH * W * (PR + Ccat) * 2    # x4 + concat bf16
            + TH * W * Cout * 4           # conv4 f32 accumulator
            + 2 * TH * W * Cout * out_bytes)   # output block (double-buffered)


# ------------------------------- forward pass --------------------------------

def elan_forward(x_nchw, params, *, tile_h=None, out_dtype=jnp.bfloat16):
    x = jnp.transpose(x_nchw, (0, 2, 3, 1)).astype(jnp.float32)   # -> NHWC
    N, H, W, Cin = x.shape

    w1h, b1 = _fold_conv_bn(params["c1_w"], params["c1_bn"])
    w2h, b2 = _fold_conv_bn(params["c2_w"], params["c2_bn"])
    w3h, b3 = _fold_conv_bn(params["c3_w"], params["c3_bn"])
    w4h, b4 = _fold_conv_bn(params["c4_w"], params["c4_bn"])

    PC = w1h.shape[-1]          # part_channels
    half = PC // 2
    PR = w2h.shape[-1]          # process_channels
    Ccat = PC + 2 * PR
    Cout = w4h.shape[-1]
    assert w2h.shape[2] == half and w3h.shape[2] == PR and w4h.shape[2] == Ccat

    # Kernel weight layouts: 1x1 -> (Cin, Cout); 3x3 -> im2col (9*Cin, Cout).
    w1 = w1h[0, 0]
    w2 = w2h.reshape(9 * half, PR)
    w3 = w3h.reshape(9 * PR, PR)
    w4 = w4h[0, 0]
    b1r, b2r, b3r, b4r = [b.reshape(1, -1) for b in (b1, b2, b3, b4)]
    weights = (w1, b1r, w2, b2r, w3, b3r, w4, b4r)

    out_bytes = jnp.dtype(out_dtype).itemsize

    # ---------------------------- row-tile selection --------------------------
    if tile_h is not None:
        TH = tile_h
    elif _tile_vmem_bytes(H, W, Cin, half, PC, PR, Ccat, Cout, out_bytes) <= _VMEM_BUDGET:
        TH = H                    # whole image per grid step (preferred)
    else:
        TH = max(d for d in range(1, H + 1)
                 if H % d == 0 and _tile_vmem_bytes(d, W, Cin, half, PC, PR,
                                                    Ccat, Cout, out_bytes)
                 <= _VMEM_BUDGET)
    assert H % TH == 0, "H must be divisible by the row tile"
    NH = H // TH
    RE = TH + 4                   # input rows per tile (2-row halo per side)
    R2 = TH + 2                   # conv2 rows kept (1-row halo for conv3)

    # Only XLA-side prep: a 2-row H halo on the (small) input so every window
    # is in bounds.  Halo rows are re-masked to zero in-kernel after conv1, so
    # the 3x3 "same"-padding semantics are exact; intermediates never leave
    # VMEM and are never padded.
    x_bf = jnp.pad(x.astype(jnp.bfloat16), ((0, 0), (2, 2), (0, 0), (0, 0)))

    def compute_tile(xw, hi, w1_ref, b1_ref, w2_ref, b2_ref, w3_ref, b3_ref,
                     w4_ref, b4_ref, o_ref):
        # xw: (RE, W, Cin) bf16 = original image rows [hi*TH-2, hi*TH+TH+2);
        # out-of-image rows are zero (HBM-side halo padding).
        row0 = hi * TH - 2

        # conv1: 1x1 + folded-BN bias + SiLU over all RE rows (f32 accumulate).
        t1 = jnp.dot(xw.reshape(RE * W, Cin), w1_ref[...],
                     preferred_element_type=jnp.float32) + b1_ref[...]
        t1 = _silu(t1)                                         # (RE*W, PC) f32

        # x2 = second channel half; re-zero out-of-image rows (conv1 of a zero
        # halo row is SiLU(bias) != 0) so conv2 sees exact zero padding.
        # Mask on f32 *before* the bf16 cast (cheaper select on v5e).
        rr = lax.broadcasted_iota(jnp.int32, (RE, 1, 1), 0) + row0
        x2 = jnp.where((rr >= 0) & (rr < H),
                       t1[:, half:].reshape(RE, W, half), 0.0)
        x2 = x2.astype(jnp.bfloat16)

        # conv2: 3x3 over the extended window -> TH+2 rows (halo for conv3).
        x3 = _silu(_conv3x3_im2col(x2, R2, W, w2_ref[...], b2_ref[...]))
        rr3 = lax.broadcasted_iota(jnp.int32, (R2, 1, 1), 0) + row0 + 1
        x3 = jnp.where((rr3 >= 0) & (rr3 < H), x3.reshape(R2, W, PR), 0.0)
        x3 = x3.astype(jnp.bfloat16)

        # conv3: 3x3 -> exactly the TH centre rows (all in-image).
        x4 = _silu(_conv3x3_im2col(x3, TH, W, w3_ref[...], b3_ref[...]))
        x4 = x4.astype(jnp.bfloat16)                           # (TH*W, PR)

        # concat([x1, x2, x3, x4]) on the centre rows + conv4 (1x1) + SiLU.
        # Centre-row invariant ("same"-padding correctness): output row r
        # (0 <= r < TH) corresponds to xw row r+2 and x3 row r+1; any change to
        # the tiling must preserve RE == TH + 4 and R2 == TH + 2.
        t1_c = t1[2 * W:(2 + TH) * W, :].astype(jnp.bfloat16)  # x1 || x2
        x3_c = x3.reshape(R2 * W, PR)[1 * W:(1 + TH) * W, :]
        cat = jnp.concatenate([t1_c, x3_c, x4], axis=-1)       # (TH*W, Ccat)
        z = jnp.dot(cat, w4_ref[...],
                    preferred_element_type=jnp.float32) + b4_ref[...]
        o_ref[...] = _silu(z).reshape(1, TH, W, Cout).astype(o_ref.dtype)

    pix = N * H * W
    cost = pl.CostEstimate(
        flops=2 * pix * (Cin * PC + 9 * half * PR + 9 * PR * PR + Ccat * Cout),
        transcendentals=pix * (PC + 2 * PR + Cout),
        bytes_accessed=(x_bf.size * 2 + pix * Cout * out_bytes
                        + 2 * (w1.size + w2.size + w3.size + w4.size)
                        + 4 * (b1r.size + b2r.size + b3r.size + b4r.size)))

    if NH == 1:
        # ----- whole-image path: plain auto-pipelined BlockSpecs, grid=(N,) --
        # No manual DMA: the Pallas pipeline prefetches image n+1 while image n
        # computes.  TODO(synk): for N == 1 on v7x this leaves one TensorCore
        # idle; feeding both would need an overlapping-window row split.
        def kernel(x_ref, w1_r, b1_r, w2_r, b2_r, w3_r, b3_r, w4_r, b4_r,
                   o_ref):
            compute_tile(x_ref[0], 0, w1_r, b1_r, w2_r, b2_r, w3_r, b3_r,
                         w4_r, b4_r, o_ref)

        def _resident(a):
            nd = len(a.shape)
            return pl.BlockSpec(a.shape, lambda n: (0,) * nd)

        out_nhwc = pl.pallas_call(
            kernel,
            out_shape=jax.ShapeDtypeStruct((N, H, W, Cout), out_dtype),
            grid=(N,),
            in_specs=[pl.BlockSpec((1, H + 4, W, Cin), lambda n: (n, 0, 0, 0))]
                     + [_resident(a) for a in weights],
            out_specs=pl.BlockSpec((1, H, W, Cout), lambda n: (n, 0, 0, 0)),
            compiler_params=pltpu.CompilerParams(
                dimension_semantics=("parallel",),
                vmem_limit_bytes=32 * 1024 * 1024),
            cost_estimate=cost,
        )(x_bf, *weights)
    else:
        # ----- row-tiled path: double-buffered manual DMA of halo windows ----
        def kernel(x_hbm, w1_r, b1_r, w2_r, b2_r, w3_r, b3_r, w4_r, b4_r,
                   o_ref, xbuf, sem):
            n = pl.program_id(0)
            hi = pl.program_id(1)
            slot = hi & 1

            def start_fetch(h_idx, s):
                pltpu.make_async_copy(
                    x_hbm.at[n, pl.ds(h_idx * TH, RE)],
                    xbuf.at[s], sem.at[s]).start()

            @pl.when(hi == 0)            # prime at the start of each image
            def _():
                start_fetch(0, 0)

            @pl.when(hi + 1 < NH)        # prefetch the NEXT tile before compute
            def _():
                start_fetch(hi + 1, (hi + 1) & 1)

            # Wait only on the current slot; the prefetch overlaps compute.
            pltpu.make_async_copy(
                x_hbm.at[n, pl.ds(0, RE)], xbuf.at[slot], sem.at[slot]).wait()

            compute_tile(xbuf[slot], hi, w1_r, b1_r, w2_r, b2_r, w3_r, b3_r,
                         w4_r, b4_r, o_ref)

        def _resident(a):
            nd = len(a.shape)
            return pl.BlockSpec(a.shape, lambda n, hi: (0,) * nd)

        out_nhwc = pl.pallas_call(
            kernel,
            out_shape=jax.ShapeDtypeStruct((N, H, W, Cout), out_dtype),
            grid=(N, NH),
            in_specs=[pl.BlockSpec(memory_space=pl.ANY)]       # x: raw HBM ref
                     + [_resident(a) for a in weights],
            out_specs=pl.BlockSpec((1, TH, W, Cout), lambda n, hi: (n, hi, 0, 0)),
            scratch_shapes=[pltpu.VMEM((2, RE, W, Cin), jnp.bfloat16),
                            pltpu.SemaphoreType.DMA((2,))],
            compiler_params=pltpu.CompilerParams(
                # hi is "arbitrary": the slot rotation of the in-kernel double
                # buffering assumes one image's row tiles run in order on one
                # core; batch stays "parallel" for megacore sharding.
                dimension_semantics=("parallel", "arbitrary"),
                vmem_limit_bytes=32 * 1024 * 1024),
            cost_estimate=cost,
        )(x_bf, *weights)

    return jnp.transpose(out_nhwc, (0, 3, 1, 2))              # -> NCHW


# ---------------------------- pure-JAX reference ------------------------------

def elan_reference(x_nchw, params):
    """Reference with the same bf16-intermediate / f32-accumulate numerics
    as the kernel (x1/x2, x3 and x4 are all bf16 going into the concat)."""
    x = jnp.transpose(x_nchw, (0, 2, 3, 1)).astype(jnp.float32)

    w1h, b1 = _fold_conv_bn(params["c1_w"], params["c1_bn"])
    w2h, b2 = _fold_conv_bn(params["c2_w"], params["c2_bn"])
    w3h, b3 = _fold_conv_bn(params["c3_w"], params["c3_bn"])
    w4h, b4 = _fold_conv_bn(params["c4_w"], params["c4_bn"])
    half = w1h.shape[-1] // 2

    def conv_bn_silu(inp, w_hwio, bias, pad):
        y = lax.conv_general_dilated(
            inp, w_hwio, window_strides=(1, 1),
            padding=[(pad, pad), (pad, pad)],
            dimension_numbers=("NHWC", "HWIO", "NHWC"),
            preferred_element_type=jnp.float32)
        y = y + bias.reshape(1, 1, 1, -1)
        return _silu(y)

    t1 = conv_bn_silu(x.astype(jnp.bfloat16), w1h, b1, 0).astype(jnp.bfloat16)
    x1, x2 = t1[..., :half], t1[..., half:]
    x3 = conv_bn_silu(x2, w2h, b2, 1).astype(jnp.bfloat16)
    x4 = conv_bn_silu(x3, w3h, b3, 1).astype(jnp.bfloat16)
    cat = jnp.concatenate([x1, x2, x3, x4], axis=-1)
    out = conv_bn_silu(cat, w4h, b4, 0)
    return jnp.transpose(out, (0, 3, 1, 2))


# ------------------------------- parameters ----------------------------------

def init_elan_params(key, in_channels, out_channels, part_channels,
                     process_channels=None):
    """Deterministic synthetic parameters (PyTorch OIHW conv weights + BN)."""
    if process_channels is None:
        process_channels = part_channels // 2
    half = part_channels // 2
    ks = jax.random.split(key, 8)

    def conv_w(k, cout, cin, kh, kw):
        return 0.1 * jax.random.normal(k, (cout, cin, kh, kw), jnp.float32)

    def bn(k, c):
        k1, k2, k3 = jax.random.split(k, 3)
        gamma = 1.0 + 0.1 * jax.random.normal(k1, (c,), jnp.float32)
        beta = 0.1 * jax.random.normal(k2, (c,), jnp.float32)
        mean = 0.1 * jax.random.normal(k3, (c,), jnp.float32)
        var = jnp.ones((c,), jnp.float32)
        return gamma, beta, mean, var

    return {
        "c1_w": conv_w(ks[0], part_channels, in_channels, 1, 1),
        "c1_bn": bn(ks[1], part_channels),
        "c2_w": conv_w(ks[2], process_channels, half, 3, 3),
        "c2_bn": bn(ks[3], process_channels),
        "c3_w": conv_w(ks[4], process_channels, process_channels, 3, 3),
        "c3_bn": bn(ks[5], process_channels),
        "c4_w": conv_w(ks[6], out_channels,
                       part_channels + 2 * process_channels, 1, 1),
        "c4_bn": bn(ks[7], out_channels),
    }


# ----------------------------------- main -------------------------------------

if __name__ == "__main__":
    key = jax.random.PRNGKey(0)
    kx, kp, kx2 = jax.random.split(key, 3)

    # ELAN(in=64, part=64, process=32, out=128); concat = 128, output = 128
    # channels -> lane-dense (128-wide) MXU operands and stores.
    N, Cin, Hs, Ws = 2, 64, 16, 16
    part_channels, out_channels = 64, 128
    params = init_elan_params(kp, Cin, out_channels, part_channels)

    # Output is bf16 by default; 5e-2 tolerance covers one bf16 ulp at the
    # observed output magnitudes (~4) plus accumulation-order differences.
    TOL = 5e-2

    # 1) Demo size: whole-image-per-step path (auto-pipelined, grid=(N,)).
    x = jax.random.normal(kx, (N, Cin, Hs, Ws), jnp.float32)      # NCHW
    fwd = jax.jit(elan_forward)
    out = jax.block_until_ready(fwd(x, params))
    ref = elan_reference(x, params)
    assert out.shape == (N, out_channels, Hs, Ws), out.shape
    err = float(jnp.max(jnp.abs(out.astype(jnp.float32) - ref)))
    assert err < TOL, err

    # 2) Taller image, forced row tiling: exercises the double-buffered manual
    #    halo-DMA fallback path.
    H2 = 64
    x2 = jax.random.normal(kx2, (N, Cin, H2, Ws), jnp.float32)
    fwd_tiled = jax.jit(lambda a, p: elan_forward(a, p, tile_h=16))
    out2 = jax.block_until_ready(fwd_tiled(x2, params))
    ref2 = elan_reference(x2, params)
    assert out2.shape == (N, out_channels, H2, Ws), out2.shape
    err2 = float(jnp.max(jnp.abs(out2.astype(jnp.float32) - ref2)))
    assert err2 < TOL, err2

    print("KERNEL_OK")
</pallas_src>

<mosaic_0001>
module attributes {stable_mosaic.version = 11 : i64} {
  func.func @kernel(%arg0: i32, %arg1: memref<1x20x16x64xbf16, #tpu.memory_space<vmem>>, %arg2: memref<64x64xbf16, #tpu.memory_space<vmem>>, %arg3: memref<1x64xf32, #tpu.memory_space<vmem>>, %arg4: memref<288x32xbf16, #tpu.memory_space<vmem>>, %arg5: memref<1x32xf32, #tpu.memory_space<vmem>>, %arg6: memref<288x32xbf16, #tpu.memory_space<vmem>>, %arg7: memref<1x32xf32, #tpu.memory_space<vmem>>, %arg8: memref<128x128xbf16, #tpu.memory_space<vmem>>, %arg9: memref<1x128xf32, #tpu.memory_space<vmem>>, %arg10: memref<1x16x16x128xbf16, #tpu.memory_space<vmem>>) attributes {dimension_semantics = [#tpu.dimension_semantics<parallel>], iteration_bounds = array<i64: 2>, scalar_prefetch = 0 : i64, scratch_operands = 0 : i64, tpu.core_type = #tpu.core_type<tc>, window_params = [{transform_indices = @transform_0, window_bounds = array<i64: 1, 20, 16, 64>}, {pipeline_mode = #tpu.pipeline_mode<synchronous>, transform_indices = @transform_1, window_bounds = array<i64: 64, 64>}, {pipeline_mode = #tpu.pipeline_mode<synchronous>, transform_indices = @transform_2, window_bounds = array<i64: 1, 64>}, {pipeline_mode = #tpu.pipeline_mode<synchronous>, transform_indices = @transform_3, window_bounds = array<i64: 288, 32>}, {pipeline_mode = #tpu.pipeline_mode<synchronous>, transform_indices = @transform_4, window_bounds = array<i64: 1, 32>}, {pipeline_mode = #tpu.pipeline_mode<synchronous>, transform_indices = @transform_5, window_bounds = array<i64: 288, 32>}, {pipeline_mode = #tpu.pipeline_mode<synchronous>, transform_indices = @transform_6, window_bounds = array<i64: 1, 32>}, {pipeline_mode = #tpu.pipeline_mode<synchronous>, transform_indices = @transform_7, window_bounds = array<i64: 128, 128>}, {pipeline_mode = #tpu.pipeline_mode<synchronous>, transform_indices = @transform_8, window_bounds = array<i64: 1, 128>}, {transform_indices = @transform_9, window_bounds = array<i64: 1, 16, 16, 128>}]} {
    %c0 = arith.constant 0 : index
    %c0_0 = arith.constant 0 : index
    %c0_1 = arith.constant 0 : index
    %c0_2 = arith.constant 0 : index
    %0 = vector.load %arg1[%c0, %c0_0, %c0_1, %c0_2] : memref<1x20x16x64xbf16, #tpu.memory_space<vmem>>, vector<1x20x16x64xbf16>
    %1 = vector.shape_cast %0 : vector<1x20x16x64xbf16> to vector<20x16x64xbf16>
    %2 = vector.shape_cast %1 : vector<20x16x64xbf16> to vector<320x64xbf16>
    %c0_3 = arith.constant 0 : index
    %c0_4 = arith.constant 0 : index
    %3 = vector.load %arg2[%c0_3, %c0_4] : memref<64x64xbf16, #tpu.memory_space<vmem>>, vector<64x64xbf16>
    %cst = arith.constant dense<0.000000e+00> : vector<320x64xf32>
    %4 = tpu.matmul %2, %3, %cst {dimension_numbers = #tpu.dot_dimension_numbers<[1], [0], [0], [1], [0, 0, 1, 1], [], []>} : vector<320x64xbf16>, vector<64x64xbf16>, vector<320x64xf32> -> vector<320x64xf32>
    %c0_5 = arith.constant 0 : index
    %c0_6 = arith.constant 0 : index
    %5 = vector.load %arg3[%c0_5, %c0_6] : memref<1x64xf32, #tpu.memory_space<vmem>>, vector<1x64xf32>
    %6 = vector.broadcast %5 : vector<1x64xf32> to vector<320x64xf32>
    %7 = arith.addf %4, %6 : vector<320x64xf32>
    %8 = arith.negf %7 : vector<320x64xf32>
    %9 = math.exp %8 : vector<320x64xf32>
    %cst_7 = arith.constant 1.000000e+00 : f32
    %10 = vector.broadcast %cst_7 : f32 to vector<320x64xf32>
    %11 = arith.addf %10, %9 : vector<320x64xf32>
    %12 = arith.divf %10, %11 : vector<320x64xf32>
    %13 = arith.mulf %7, %12 : vector<320x64xf32>
    %14 = tpu.iota {dimensions = array<i32: 0>} : vector<20x1x1xi32>
    %c-2_i32 = arith.constant -2 : i32
    %15 = vector.broadcast %c-2_i32 : i32 to vector<20x1x1xi32>
    %16 = arith.addi %14, %15 : vector<20x1x1xi32>
    %c0_i32 = arith.constant 0 : i32
    %17 = vector.broadcast %c0_i32 : i32 to vector<20x1x1xi32>
    %18 = arith.cmpi sge, %16, %17 : vector<20x1x1xi32>
    %c16_i32 = arith.constant 16 : i32
    %19 = vector.broadcast %c16_i32 : i32 to vector<20x1x1xi32>
    %20 = arith.cmpi slt, %16, %19 : vector<20x1x1xi32>
    %21 = arith.andi %18, %20 : vector<20x1x1xi1>
    %22 = vector.extract_strided_slice %13 {offsets = [0, 32], sizes = [320, 32], strides = [1, 1]} : vector<320x64xf32> to vector<320x32xf32>
    %23 = vector.shape_cast %22 : vector<320x32xf32> to vector<20x16x32xf32>
    %cst_8 = arith.constant 0.000000e+00 : f32
    %24 = vector.shape_cast %21 : vector<20x1x1xi1> to vector<20x1x1xi1>
    %25 = vector.broadcast %24 : vector<20x1x1xi1> to vector<20x16x32xi1>
    %26 = vector.broadcast %cst_8 : f32 to vector<20x16x32xf32>
    %27 = arith.select %25, %23, %26 : vector<20x16x32xi1>, vector<20x16x32xf32>
    %28 = arith.truncf %27 : vector<20x16x32xf32> to vector<20x16x32xbf16>
    %c0_9 = arith.constant 0 : index
    %c0_10 = arith.constant 0 : index
    %29 = vector.load %arg4[%c0_9, %c0_10] : memref<288x32xbf16, #tpu.memory_space<vmem>>, vector<288x32xbf16>
    %c0_11 = arith.constant 0 : index
    %c0_12 = arith.constant 0 : index
    %30 = vector.load %arg5[%c0_11, %c0_12] : memref<1x32xf32, #tpu.memory_space<vmem>>, vector<1x32xf32>
    %cst_13 = arith.constant 0.000000e+00 : bf16
    %31 = vector.broadcast %cst_13 : bf16 to vector<20x1x32xbf16>
    %32 = tpu.concatenate %31, %28, %31 in 1 : vector<20x1x32xbf16>, vector<20x16x32xbf16>, vector<20x1x32xbf16> -> vector<20x18x32xbf16>
    %33 = vector.extract_strided_slice %32 {offsets = [0, 0, 0], sizes = [18, 16, 32], strides = [1, 1, 1]} : vector<20x18x32xbf16> to vector<18x16x32xbf16>
    %34 = vector.shape_cast %33 : vector<18x16x32xbf16> to vector<288x32xbf16>
    %35 = vector.extract_strided_slice %32 {offsets = [0, 1, 0], sizes = [18, 16, 32], strides = [1, 1, 1]} : vector<20x18x32xbf16> to vector<18x16x32xbf16>
    %36 = vector.shape_cast %35 : vector<18x16x32xbf16> to vector<288x32xbf16>
    %37 = vector.extract_strided_slice %32 {offsets = [0, 2, 0], sizes = [18, 16, 32], strides = [1, 1, 1]} : vector<20x18x32xbf16> to vector<18x16x32xbf16>
    %38 = vector.shape_cast %37 : vector<18x16x32xbf16> to vector<288x32xbf16>
    %39 = vector.extract_strided_slice %32 {offsets = [1, 0, 0], sizes = [18, 16, 32], strides = [1, 1, 1]} : vector<20x18x32xbf16> to vector<18x16x32xbf16>
    %40 = vector.shape_cast %39 : vector<18x16x32xbf16> to vector<288x32xbf16>
    %41 = vector.extract_strided_slice %32 {offsets = [1, 1, 0], sizes = [18, 16, 32], strides = [1, 1, 1]} : vector<20x18x32xbf16> to vector<18x16x32xbf16>
    %42 = vector.shape_cast %41 : vector<18x16x32xbf16> to vector<288x32xbf16>
    %43 = vector.extract_strided_slice %32 {offsets = [1, 2, 0], sizes = [18, 16, 32], strides = [1, 1, 1]} : vector<20x18x32xbf16> to vector<18x16x32xbf16>
    %44 = vector.shape_cast %43 : vector<18x16x32xbf16> to vector<288x32xbf16>
    %45 = vector.extract_strided_slice %32 {offsets = [2, 0, 0], sizes = [18, 16, 32], strides = [1, 1, 1]} : vector<20x18x32xbf16> to vector<18x16x32xbf16>
    %46 = vector.shape_cast %45 : vector<18x16x32xbf16> to vector<288x32xbf16>
    %47 = vector.extract_strided_slice %32 {offsets = [2, 1, 0], sizes = [18, 16, 32], strides = [1, 1, 1]} : vector<20x18x32xbf16> to vector<18x16x32xbf16>
    %48 = vector.shape_cast %47 : vector<18x16x32xbf16> to vector<288x32xbf16>
    %49 = vector.extract_strided_slice %32 {offsets = [2, 2, 0], sizes = [18, 16, 32], strides = [1, 1, 1]} : vector<20x18x32xbf16> to vector<18x16x32xbf16>
    %50 = vector.shape_cast %49 : vector<18x16x32xbf16> to vector<288x32xbf16>
    %51 = tpu.concatenate %34, %36, %38, %40, %42, %44, %46, %48, %50 in 1 : vector<288x32xbf16>, vector<288x32xbf16>, vector<288x32xbf16>, vector<288x32xbf16>, vector<288x32xbf16>, vector<288x32xbf16>, vector<288x32xbf16>, vector<288x32xbf16>, vector<288x32xbf16> -> vector<288x288xbf16>
    %cst_14 = arith.constant dense<0.000000e+00> : vector<288x32xf32>
    %52 = tpu.matmul %51, %29, %cst_14 {dimension_numbers = #tpu.dot_dimension_numbers<[1], [0], [0], [1], [0, 0, 1, 1], [], []>} : vector<288x288xbf16>, vector<288x32xbf16>, vector<288x32xf32> -> vector<288x32xf32>
    %53 = vector.broadcast %30 : vector<1x32xf32> to vector<288x32xf32>
    %54 = arith.addf %52, %53 : vector<288x32xf32>
    %55 = arith.negf %54 : vector<288x32xf32>
    %56 = math.exp %55 : vector<288x32xf32>
    %cst_15 = arith.constant 1.000000e+00 : f32
    %57 = vector.broadcast %cst_15 : f32 to vector<288x32xf32>
    %58 = arith.addf %57, %56 : vector<288x32xf32>
    %59 = arith.divf %57, %58 : vector<288x32xf32>
    %60 = arith.mulf %54, %59 : vector<288x32xf32>
    %61 = tpu.iota {dimensions = array<i32: 0>} : vector<18x1x1xi32>
    %c-2_i32_16 = arith.constant -2 : i32
    %62 = vector.broadcast %c-2_i32_16 : i32 to vector<18x1x1xi32>
    %63 = arith.addi %61, %62 : vector<18x1x1xi32>
    %c1_i32 = arith.constant 1 : i32
    %64 = vector.broadcast %c1_i32 : i32 to vector<18x1x1xi32>
    %65 = arith.addi %63, %64 : vector<18x1x1xi32>
    %c0_i32_17 = arith.constant 0 : i32
    %66 = vector.broadcast %c0_i32_17 : i32 to vector<18x1x1xi32>
    %67 = arith.cmpi sge, %65, %66 : vector<18x1x1xi32>
    %c16_i32_18 = arith.constant 16 : i32
    %68 = vector.broadcast %c16_i32_18 : i32 to vector<18x1x1xi32>
    %69 = arith.cmpi slt, %65, %68 : vector<18x1x1xi32>
    %70 = arith.andi %67, %69 : vector<18x1x1xi1>
    %71 = vector.shape_cast %60 : vector<288x32xf32> to vector<18x16x32xf32>
    %cst_19 = arith.constant 0.000000e+00 : f32
    %72 = vector.shape_cast %70 : vector<18x1x1xi1> to vector<18x1x1xi1>
    %73 = vector.broadcast %72 : vector<18x1x1xi1> to vector<18x16x32xi1>
    %74 = vector.broadcast %cst_19 : f32 to vector<18x16x32xf32>
    %75 = arith.select %73, %71, %74 : vector<18x16x32xi1>, vector<18x16x32xf32>
    %76 = arith.truncf %75 : vector<18x16x32xf32> to vector<18x16x32xbf16>
    %c0_20 = arith.constant 0 : index
    %c0_21 = arith.constant 0 : index
    %77 = vector.load %arg6[%c0_20, %c0_21] : memref<288x32xbf16, #tpu.memory_space<vmem>>, vector<288x32xbf16>
    %c0_22 = arith.constant 0 : index
    %c0_23 = arith.constant 0 : index
    %78 = vector.load %arg7[%c0_22, %c0_23] : memref<1x32xf32, #tpu.memory_space<vmem>>, vector<1x32xf32>
    %cst_24 = arith.constant 0.000000e+00 : bf16
    %79 = vector.broadcast %cst_24 : bf16 to vector<18x1x32xbf16>
    %80 = tpu.concatenate %79, %76, %79 in 1 : vector<18x1x32xbf16>, vector<18x16x32xbf16>, vector<18x1x32xbf16> -> vector<18x18x32xbf16>
    %81 = vector.extract_strided_slice %80 {offsets = [0, 0, 0], sizes = [16, 16, 32], strides = [1, 1, 1]} : vector<18x18x32xbf16> to vector<16x16x32xbf16>
    %82 = vector.shape_cast %81 : vector<16x16x32xbf16> to vector<256x32xbf16>
    %83 = vector.extract_strided_slice %80 {offsets = [0, 1, 0], sizes = [16, 16, 32], strides = [1, 1, 1]} : vector<18x18x32xbf16> to vector<16x16x32xbf16>
    %84 = vector.shape_cast %83 : vector<16x16x32xbf16> to vector<256x32xbf16>
    %85 = vector.extract_strided_slice %80 {offsets = [0, 2, 0], sizes = [16, 16, 32], strides = [1, 1, 1]} : vector<18x18x32xbf16> to vector<16x16x32xbf16>
    %86 = vector.shape_cast %85 : vector<16x16x32xbf16> to vector<256x32xbf16>
    %87 = vector.extract_strided_slice %80 {offsets = [1, 0, 0], sizes = [16, 16, 32], strides = [1, 1, 1]} : vector<18x18x32xbf16> to vector<16x16x32xbf16>
    %88 = vector.shape_cast %87 : vector<16x16x32xbf16> to vector<256x32xbf16>
    %89 = vector.extract_strided_slice %80 {offsets = [1, 1, 0], sizes = [16, 16, 32], strides = [1, 1, 1]} : vector<18x18x32xbf16> to vector<16x16x32xbf16>
    %90 = vector.shape_cast %89 : vector<16x16x32xbf16> to vector<256x32xbf16>
    %91 = vector.extract_strided_slice %80 {offsets = [1, 2, 0], sizes = [16, 16, 32], strides = [1, 1, 1]} : vector<18x18x32xbf16> to vector<16x16x32xbf16>
    %92 = vector.shape_cast %91 : vector<16x16x32xbf16> to vector<256x32xbf16>
    %93 = vector.extract_strided_slice %80 {offsets = [2, 0, 0], sizes = [16, 16, 32], strides = [1, 1, 1]} : vector<18x18x32xbf16> to vector<16x16x32xbf16>
    %94 = vector.shape_cast %93 : vector<16x16x32xbf16> to vector<256x32xbf16>
    %95 = vector.extract_strided_slice %80 {offsets = [2, 1, 0], sizes = [16, 16, 32], strides = [1, 1, 1]} : vector<18x18x32xbf16> to vector<16x16x32xbf16>
    %96 = vector.shape_cast %95 : vector<16x16x32xbf16> to vector<256x32xbf16>
    %97 = vector.extract_strided_slice %80 {offsets = [2, 2, 0], sizes = [16, 16, 32], strides = [1, 1, 1]} : vector<18x18x32xbf16> to vector<16x16x32xbf16>
    %98 = vector.shape_cast %97 : vector<16x16x32xbf16> to vector<256x32xbf16>
    %99 = tpu.concatenate %82, %84, %86, %88, %90, %92, %94, %96, %98 in 1 : vector<256x32xbf16>, vector<256x32xbf16>, vector<256x32xbf16>, vector<256x32xbf16>, vector<256x32xbf16>, vector<256x32xbf16>, vector<256x32xbf16>, vector<256x32xbf16>, vector<256x32xbf16> -> vector<256x288xbf16>
    %cst_25 = arith.constant dense<0.000000e+00> : vector<256x32xf32>
    %100 = tpu.matmul %99, %77, %cst_25 {dimension_numbers = #tpu.dot_dimension_numbers<[1], [0], [0], [1], [0, 0, 1, 1], [], []>} : vector<256x288xbf16>, vector<288x32xbf16>, vector<256x32xf32> -> vector<256x32xf32>
    %101 = vector.broadcast %78 : vector<1x32xf32> to vector<256x32xf32>
    %102 = arith.addf %100, %101 : vector<256x32xf32>
    %103 = arith.negf %102 : vector<256x32xf32>
    %104 = math.exp %103 : vector<256x32xf32>
    %cst_26 = arith.constant 1.000000e+00 : f32
    %105 = vector.broadcast %cst_26 : f32 to vector<256x32xf32>
    %106 = arith.addf %105, %104 : vector<256x32xf32>
    %107 = arith.divf %105, %106 : vector<256x32xf32>
    %108 = arith.mulf %102, %107 : vector<256x32xf32>
    %109 = arith.truncf %108 : vector<256x32xf32> to vector<256x32xbf16>
    %110 = vector.extract_strided_slice %13 {offsets = [32, 0], sizes = [256, 64], strides = [1, 1]} : vector<320x64xf32> to vector<256x64xf32>
    %111 = arith.truncf %110 : vector<256x64xf32> to vector<256x64xbf16>
    %112 = vector.shape_cast %76 : vector<18x16x32xbf16> to vector<288x32xbf16>
    %113 = vector.extract_strided_slice %112 {offsets = [16, 0], sizes = [256, 32], strides = [1, 1]} : vector<288x32xbf16> to vector<256x32xbf16>
    %114 = tpu.concatenate %111, %113, %109 in 1 : vector<256x64xbf16>, vector<256x32xbf16>, vector<256x32xbf16> -> vector<256x128xbf16>
    %c0_27 = arith.constant 0 : index
    %c0_28 = arith.constant 0 : index
    %115 = vector.load %arg8[%c0_27, %c0_28] : memref<128x128xbf16, #tpu.memory_space<vmem>>, vector<128x128xbf16>
    %cst_29 = arith.constant dense<0.000000e+00> : vector<256x128xf32>
    %116 = tpu.matmul %114, %115, %cst_29 {dimension_numbers = #tpu.dot_dimension_numbers<[1], [0], [0], [1], [0, 0, 1, 1], [], []>} : vector<256x128xbf16>, vector<128x128xbf16>, vector<256x128xf32> -> vector<256x128xf32>
    %c0_30 = arith.constant 0 : index
    %c0_31 = arith.constant 0 : index
    %117 = vector.load %arg9[%c0_30, %c0_31] : memref<1x128xf32, #tpu.memory_space<vmem>>, vector<1x128xf32>
    %118 = vector.broadcast %117 : vector<1x128xf32> to vector<256x128xf32>
    %119 = arith.addf %116, %118 : vector<256x128xf32>
    %120 = arith.negf %119 : vector<256x128xf32>
    %121 = math.exp %120 : vector<256x128xf32>
    %cst_32 = arith.constant 1.000000e+00 : f32
    %122 = vector.broadcast %cst_32 : f32 to vector<256x128xf32>
    %123 = arith.addf %122, %121 : vector<256x128xf32>
    %124 = arith.divf %122, %123 : vector<256x128xf32>
    %125 = arith.mulf %119, %124 : vector<256x128xf32>
    %126 = vector.shape_cast %125 : vector<256x128xf32> to vector<1x16x16x128xf32>
    %127 = arith.truncf %126 : vector<1x16x16x128xf32> to vector<1x16x16x128xbf16>
    %c0_33 = arith.constant 0 : index
    %c0_34 = arith.constant 0 : index
    %c0_35 = arith.constant 0 : index
    %c0_36 = arith.constant 0 : index
    %128 = vector.load %arg10[%c0_33, %c0_34, %c0_35, %c0_36] : memref<1x16x16x128xbf16, #tpu.memory_space<vmem>>, vector<1x16x16x128xbf16>
    tpu.vector_store %arg10[%c0_33, %c0_34, %c0_35, %c0_36], %127 {strides = array<i32>} : memref<1x16x16x128xbf16, #tpu.memory_space<vmem>>, vector<1x16x16x128xbf16>,
    return
  }
  func.func @transform_0(%arg0: i32) -> (i32, i32, i32, i32) {
    %c0_i32 = arith.constant 0 : i32
    %c0_i32_0 = arith.constant 0 : i32
    %c0_i32_1 = arith.constant 0 : i32
    %c0_i32_2 = arith.constant 0 : i32
    return %arg0, %c0_i32, %c0_i32_0, %c0_i32_1 : i32, i32, i32, i32
  }
  func.func @transform_1(%arg0: i32) -> (i32, i32) {
    %c0_i32 = arith.constant 0 : i32
    %c0_i32_0 = arith.constant 0 : i32
    %c0_i32_1 = arith.constant 0 : i32
    return %c0_i32, %c0_i32_0 : i32, i32
  }
  func.func @transform_2(%arg0: i32) -> (i32, i32) {
    %c0_i32 = arith.constant 0 : i32
    %c0_i32_0 = arith.constant 0 : i32
    %c0_i32_1 = arith.constant 0 : i32
    return %c0_i32, %c0_i32_0 : i32, i32
  }
  func.func @transform_3(%arg0: i32) -> (i32, i32) {
    %c0_i32 = arith.constant 0 : i32
    %c0_i32_0 = arith.constant 0 : i32
    %c0_i32_1 = arith.constant 0 : i32
    return %c0_i32, %c0_i32_0 : i32, i32
  }
  func.func @transform_4(%arg0: i32) -> (i32, i32) {
    %c0_i32 = arith.constant 0 : i32
    %c0_i32_0 = arith.constant 0 : i32
    %c0_i32_1 = arith.constant 0 : i32
    return %c0_i32, %c0_i32_0 : i32, i32
  }
  func.func @transform_5(%arg0: i32) -> (i32, i32) {
    %c0_i32 = arith.constant 0 : i32
    %c0_i32_0 = arith.constant 0 : i32
    %c0_i32_1 = arith.constant 0 : i32
    return %c0_i32, %c0_i32_0 : i32, i32
  }
  func.func @transform_6(%arg0: i32) -> (i32, i32) {
    %c0_i32 = arith.constant 0 : i32
    %c0_i32_0 = arith.constant 0 : i32
    %c0_i32_1 = arith.constant 0 : i32
    return %c0_i32, %c0_i32_0 : i32, i32
  }
  func.func @transform_7(%arg0: i32) -> (i32, i32) {
    %c0_i32 = arith.constant 0 : i32
    %c0_i32_0 = arith.constant 0 : i32
    %c0_i32_1 = arith.constant 0 : i32
    return %c0_i32, %c0_i32_0 : i32, i32
  }
  func.func @transform_8(%arg0: i32) -> (i32, i32) {
    %c0_i32 = arith.constant 0 : i32
    %c0_i32_0 = arith.constant 0 : i32
    %c0_i32_1 = arith.constant 0 : i32
    return %c0_i32, %c0_i32_0 : i32, i32
  }
  func.func @transform_9(%arg0: i32) -> (i32, i32, i32, i32) {
    %c0_i32 = arith.constant 0 : i32
    %c0_i32_0 = arith.constant 0 : i32
    %c0_i32_1 = arith.constant 0 : i32
    %c0_i32_2 = arith.constant 0 : i32
    return %arg0, %c0_i32, %c0_i32_0, %c0_i32_1 : i32, i32, i32, i32
  }
}

</mosaic_0001>

<bundles_post_ra>
// kernel: elan_forward.1
= control target key start
LH: loop header
LB: loop body
LE: loop exit
PB: predicated region body
PF: predicated region fallthrough
CT: control target
= control target key end

     0   :  { %14 = vsyncpa [#allocation3], 0  ;;  %s13171_s0 = inlined_call_operand.vmem [shape: bf16[2,20,16,64], index: 0, kind: input, shape index: {}]   ;;  %s13172_s1 = inlined_call_operand.vmem [shape: bf16[64,64], index: 1, kind: input, shape index: {}]   ;;  %s13173_s2 = inlined_call_operand.vmem [shape: f32[1,64], index: 2, kind: input, shape index: {}]   ;;  %s13174_s3 = inlined_call_operand.vmem [shape: bf16[288,32], index: 3, kind: input, shape index: {}]   ;;  %s13175_s4 = inlined_call_operand.vmem [shape: f32[1,32], index: 4, kind: input, shape index: {}]   ;;  %s13176_s5 = inlined_call_operand.vmem [shape: bf16[288,32], index: 5, kind: input, shape index: {}]   ;;  %s13177_s6 = inlined_call_operand.vmem [shape: f32[1,32], index: 6, kind: input, shape index: {}]   ;;  %s13178_s7 = inlined_call_operand.vmem [shape: bf16[128,128], index: 7, kind: input, shape index: {}]   ;;  %s13179_s8 = inlined_call_operand.vmem [shape: f32[1,128], index: 8, kind: input, shape index: {}]   ;;  %s13180_s9 = inlined_call_operand.hbm [shape: bf16[2,16,16,128], index: 9, kind: output, shape index: {}]  }
   0x1   :  { %16 = vsyncpa [#allocation3 + $0x1], 0  ;;  %s8865_s30 = smov 0   ;;  %s8867_s10 = smov 0  }
   0x2   :  { %s8869_s11 = smov 0   ;;  %s8871_s12 = smov 0  }
   0x3 LB: > { %s8886_s13 = sadd.s32 4294967295, %s8808_s12   ;;  %s7534_s14 = sadd.s32 4294967294, %s8808_s12   ;;  %s8808_s12 = sphi %s8871_s12, %s13413_s12   ;;  %s8804_s11 = sphi %s8869_s11, %s13412_s11   ;;  %s8800_s10 = sphi %s8867_s10, %s13411_s10   ;;  %s8796_s30 = sphi %s8865_s30, %s13410_s30  }
   0x4   : > { %s8890_s15 = sadd.s32 1, %s8808_s12   ;;  %s223_s16 = sadd.s32 1, %s8804_s11 }
   0x5   : > { %s220_s17 = ssub.s32 %s8808_s12, %s8890_s15  ;;  %p233_p0 = scmp.ne.s32.totalorder %s8804_s11, %s8800_s10 }
   0x6   : > { %p221_p1 = scmp.eq.s32.totalorder %s220_s17, 0  ;;  %p234_p2 = scmp.eq.s32.totalorder %s8886_s13, 1 }
   0x7   : > { %p239_p3 = scmp.ne.s32.totalorder %s8800_s10, %s8796_s30  ;;  %p240_p4 = scmp.eq.s32.totalorder %s7534_s14, 1 }
   0x8   : > { %s8901_s18 = scalar_select %p221_p1, %s8804_s11, %s223_s16  }
   0x9   : > { %p8903_p5 = por %p234_p2, %p233_p0  ;;  %p8907_p6 = por %p240_p4, %p239_p3 }
   0xa   : > { %p7537_p7 = scmp.ge.s32.totalorder %s8808_s12, 1  ;;  %p290_p8 = scmp.lt.s32.totalorder %s8808_s12, 3 }
   0xc   : > { %p291_p9 = pnand %p7537_p7, %p290_p8 }
   0xe   : > { %294 = sbr.rel (%p291_p9) target bundleno = 1645 (0x66d), region = 56 }
  0x13   : > { %v8034_v0 = vld [vmem:[%s13172_s1 + $0x18] sm:$0xff]  ;;  %p326_p10 = scmp.lt.s32.totalorder %s8886_s13, 1  ;;  %v8810_v1 = vmov 0.0|0.0   ;;  %v8033_v3 = vld [vmem:[%s13172_s1 + $0x10] sm:$0xff]  ;;  %v8032_v7 = vld [vmem:[%s13172_s1 + $0x8] sm:$0xff]  ;;  %s8811_s29 = smov 96  }
  0x14   : > { %v1635_v2 = vunpack.c.l.b16 %v8810_v1  ;;  %573 = vmatpush.bf16.msra.mxu0 %v8034_v0  ;;  %8175 = vmatpush.bf16.msra.mxu3 %v8034_v0  ;;  %v8031_v10 = vld [vmem:[%s13172_s1] sm:$0xff]  ;;  %vm508_vm0 = vcmask 523264   ;;  %vm1955_vm1 = vcmask 1040384   ;;  %vm1956_vm2 = vsmask.f32 256  ;;  %s8812_s23 = smov 32  }
  0x15   : > { %s327_s25 = scalar_select %p326_p10, %s8886_s13, 1  ;;  %vm8959_vm3 = vmand %vm1955_vm1, %vm1956_vm2  ;;  %vm2251_vm4 = vcmask 1046528   ;;  %vm1998_vm5 = vsmask.f32 7424  ;;  %v9004_v54 = vld [vmem:[%s13173_s2] ss:$0 sm:$0xff] }
  0x16   : > { %v1675_v4 = vpack.c.b16 %v1635_v2, %v1635_v2  ;;  %s8813_s24 = smov 64   ;;  %s323_s21 = sand.u32 1, %s8800_s10  }
  0x17   : > { %s8179_s28 = smul.u32 160, %s327_s25  ;;  %s7538_s25 = sshll.u32 %s323_s21, 7 }
  0x18   : > { %v1696_v5 = vshrl.u32 %v1675_v4, 16  ;;  %v1699_v6 = vshll.u32 %v1675_v4, 16  ;;  %574 = vmatpush.bf16.msra.mxu0 %v8033_v3  ;;  %8176 = vmatpush.bf16.msra.mxu3 %v8033_v3  ;;  %s8079_s27 = sshll.u32 %s8886_s13, 7  ;;  %s7457_s17 = scalar_lea.sflag [#allocation3], %s323_s21 }
  0x19   : > { %s8939_s22 = scalar_lea.vmem %s13171_s0, %s8179_s28  ;;  %s7468_s16 = scalar_lea.hbm %s13180_s9, %s8079_s27 }
  0x1a   : > { %v8924_v8 = vrot.slane %v1696_v5, 7  ;;  %v8011_v11 = vld [vmem:[%s8939_s22] sm:$0xff]  ;;  %v8012_v12 = vld [vmem:[%s8939_s22 + $0x8] sm:$0xff]  ;;  %v8013_v13 = vld [vmem:[%s8939_s22 + $0x10] sm:$0xff]  ;;  %s8766_s28 = scalar_lea.hbm %s13180_s9, 256 }
  0x1b   : > { %v8014_v14 = vld [vmem:[%s8939_s22 + $0x18] sm:$0xff]  ;;  %v8015_v15 = vld [vmem:[%s8939_s22 + $0x20] sm:$0xff]  ;;  %v8016_v16 = vld [vmem:[%s8939_s22 + $0x28] sm:$0xff] }
  0x1c   : > { %1841 = vrot.lane.b32.xlu1 %v8924_v8, %s8811_s29  ;;  %v8929_v9 = vor.u32 %v1699_v6, %v8924_v8  ;;  %1837 = vrot.lane.b32.xlu2 %v8924_v8, %s8811_s29  ;;  %v8017_v17 = vld [vmem:[%s8939_s22 + $0x30] sm:$0xff]  ;;  %v8018_v21 = vld [vmem:[%s8939_s22 + $0x38] sm:$0xff] }
  0x1d   : > { %575 = vmatpush.bf16.msra.mxu0 %v8032_v7  ;;  %8177 = vmatpush.bf16.msra.mxu3 %v8032_v7  ;;  %v8019_v44 = vld [vmem:[%s8939_s22 + $0x40] sm:$0xff]  ;;  %v8020_v51 = vld [vmem:[%s8939_s22 + $0x48] sm:$0xff]  ;;  %v8021_v55 = vld [vmem:[%s8939_s22 + $0x50] sm:$0xff] }
  0x1e   : > { %1835 = vrot.lane.b32.xlu0 %v8929_v9, %s8811_s29  ;;  %v8022_v0 = vld [vmem:[%s8939_s22 + $0x58] sm:$0xff] }
  0x21   : > { %576 = vmatpush.bf16.msra.mxu0 %v8031_v10  ;;  %8178 = vmatpush.bf16.msra.mxu3 %v8031_v10 }
  0x24   : > { %1839 = vrot.lane.b32.xlu1 %v8929_v9, %s8811_s29  ;;  %7636 = vmatmul.msk.bf16.vlgmr.msra.gmra.mxu0 %vm508_vm0, %v8011_v11 }
  0x34   : > { %7637 = vmatmul.msk.bf16.gmra.mxu0 %vm508_vm0, %v8012_v12  ;;  %v8042_v12 = vld [vmem:[%s13174_s3 + $0x38] sm:$0xff] }
  0x35   : > { %2993 = vmatpush.bf16.msra.mxu1 %v8042_v12 }
  0x44   : > { %7638 = vmatmul.msk.bf16.gmra.mxu0 %vm508_vm0, %v8013_v13 }
  0x54   : > { %7639 = vmatmul.msk.bf16.gmra.mxu0 %vm508_vm0, %v8014_v14 }
  0x64   : > { %7640 = vmatmul.msk.bf16.gmra.mxu0 %vm508_vm0, %v8015_v15 }
  0x74   : > { %7641 = vmatmul.msk.bf16.gmra.mxu0 %vm508_vm0, %v8016_v16 }
  0x76   : > { %v1838_v20 = vpop.permute.xlu2 %1837 }
  0x77   : > { %v1978_v25 = vsel %vm8959_vm3, %v1838_v20, 0 }
  0x78   : > { %v2007_v29 = vshll.u32 %v1978_v25, 16  ;;  %v2253_v39 = vrot.slane %v1978_v25, 1 }
  0x7a   : > { %v2009_v34 = vrot.slane %v2007_v29, 1  ;;  %v8023_v29 = vld [vmem:[%s8939_s22 + $0x60] sm:$0xff] }
  0x84   : > { %7642 = vmatmul.msk.bf16.gmra.mxu0 %vm508_vm0, %v8017_v17 }
  0x8e   : > { %v1842_v19 = vpop.permute.xlu1 %1841 }
  0x8f   : > { %v1979_v26 = vsel %vm8959_vm3, %v1842_v19, 0 }
  0x90   : > { %v1836_v22 = vpop.permute.xlu0 %1835  ;;  %v2256_v30 = vrot.slane %v1979_v26, 1  ;;  %v2019_v41 = vshll.u32 %v1979_v26, 16 }
  0x91   : > { %v8966_v23 = vsel %vm8959_vm3, 0, %v1836_v22 }
  0x92   : > { %v2002_v24 = vshll.u32 %v8966_v23, 16  ;;  %v2000_v27 = vshrl.u32 %v8966_v23, 16  ;;  %v2252_v38 = vrot.slane %v8966_v23, 1  ;;  %v2021_v47 = vrot.slane %v2019_v41, 1 }
  0x94   : > { %7643 = vmatmul.msk.bf16.gmra.mxu0 %vm508_vm0, %v8018_v21  ;;  %v2004_v28 = vrot.slane %v2002_v24, 1  ;;  %v2254_v43 = vsel %vm2251_vm4, %v2252_v38, %v2253_v39  ;;  %v8041_v24 = vld [vmem:[%s13174_s3 + $0x30] sm:$0xff] }
  0x95   : > { %2994 = vmatpush.bf16.msra.mxu1 %v8041_v24 }
  0x96   : > { %v1840_v31 = vpop.permute.xlu1 %1839  ;;  %v2005_v35 = vor.u32 %v2004_v28, %v2000_v27 }
  0x97   : > { %v8977_v32 = vsel %vm8959_vm3, 0, %v1840_v31 }
  0x98   : > { %2412 = vrot.lane.b32.xlu2 %v8977_v32, %s8811_s29  ;;  %v2255_v33 = vrot.slane %v8977_v32, 1  ;;  %v2014_v37 = vshll.u32 %v8977_v32, 16  ;;  %v2010_v40 = vsel %vm1998_vm5, %v2005_v35, %v2009_v34  ;;  %v2012_v42 = vshrl.u32 %v8977_v32, 16  ;;  %v8040_v34 = vld [vmem:[%s13174_s3 + $0x28] sm:$0xff] }
  0x99   : > { %2995 = vmatpush.bf16.msra.mxu1 %v8040_v34 }
  0x9a   : > { %v2257_v36 = vsel %vm2251_vm4, %v2255_v33, %v2256_v30  ;;  %v2016_v45 = vrot.slane %v2014_v37, 1 }
  0x9b   : > { %2448 = vrot.lane.b32.xlu1 %v2257_v36, %s8812_s23  ;;  %2378 = vrot.lane.b32.xlu0 %v2257_v36, %s8813_s24 }
  0x9c   : > { %v2017_v48 = vor.u32 %v2016_v45, %v2012_v42  ;;  %v8039_v45 = vld [vmem:[%s13174_s3 + $0x20] sm:$0xff] }
  0x9d   : > { %2996 = vmatpush.bf16.msra.mxu1 %v8039_v45 }
  0x9e   : > { %v8995_v49 = vsel %vm1998_vm5, %v2017_v48, %v2021_v47 }
  0xa0   : > { %2340 = vrot.lane.b32.xlu2 %v2010_v40, %s8812_s23 }
  0xa1   : > { %v578_v46 = vpop.f32.mrf.mxu0 }
  0xa3   : > { %2376 = vrot.lane.b32.xlu1 %v2254_v43, %s8813_s24 }
  0xa4   : > { %7644 = vmatmul.msk.bf16.gmra.mxu0 %vm508_vm0, %v8019_v44 }
  0xa9   : > { %v580_v50 = vpop.f32.mrf.mxu0 }
  0xab   : > { %2342 = vrot.lane.b32.xlu1 %v8995_v49, %s8812_s23 }
  0xb1   : > { %v583_v52 = vpop.f32.mrf.mxu0 }
  0xb4   : > { %7645 = vmatmul.msk.bf16.gmra.mxu0 %vm508_vm0, %v8020_v51 }
  0xb9   : > { %v585_v53 = vpop.f32.mrf.mxu0 }
  0xc1   : > { %v588_v56 = vpop.f32.mrf.mxu0 }
  0xc2   : > { %v589_v57 = vadd.f32 %v9004_v54, %v588_v56 }
  0xc4   : > { %v7660_v58 = vmul.f32 -1.442695, %v589_v57  ;;  %7646 = vmatmul.msk.bf16.gmra.mxu0 %vm508_vm0, %v8021_v55  ;;  %v8038_v55 = vld [vmem:[%s13174_s3 + $0x18] sm:$0xff] }
  0xc5   : > { %2997 = vmatpush.bf16.msra.mxu1 %v8038_v55 }
  0xc6   : > { %8228 = vpow2.f32 %v7660_v58 }
  0xc9   : > { %v590_v59 = vpop.f32.mrf.mxu0 }
  0xca   : > { %v9010_v60 = vadd.f32 %v9004_v54, %v590_v59 }
  0xcc   : > { %v8229_v61 = vpop.eup %8228  ;;  %v7661_v62 = vmul.f32 -1.442695, %v9010_v60 }
  0xcd   : > { %v802_v63 = vadd.f32 1.0, %v8229_v61 }
  0xce   : > { %8230 = vpow2.f32 %v7661_v62 }
  0xcf   : > { %8232 = vrcp.f32 %v802_v63  ;;  %v909_v15 = vand.u32 2147483648, %v802_v63  ;;  %vm903_vm7 = vweird.f32 %v802_v63  ;;  %v907_v19 = vand.u32 2147483647, %v802_v63 }
  0xd1   : > { %v593_v1 = vpop.f32.mrf.mxu0  ;;  %v910_v27 = vor.u32 1.1754944e-38, %v909_v15  ;;  %vm908_vm9 = vcmp.eq.f32.partialorder %v907_v19, 8.507059e+37 }
  0xd2   : > { %v9015_v2 = vadd.f32 %v9004_v54, %v593_v1 }
  0xd4   : > { %v8231_v3 = vpop.eup %8230  ;;  %v7662_v4 = vmul.f32 -1.442695, %v9015_v2  ;;  %7647 = vmatmul.msk.bf16.gmra.mxu0 %vm508_vm0, %v8022_v0 }
  0xd5   : > { %v8233_v5 = vpop.eup %8232  ;;  %v803_v6 = vadd.f32 1.0, %v8231_v3 }
  0xd6   : > { %v899_v7 = vmul.f32 %v8233_v5, %v802_v63  ;;  %8234 = vpow2.f32 %v7662_v4  ;;  %vm904_vm6 = vweird.f32 %v8233_v5 }
  0xd7   : > { %8236 = vrcp.f32 %v803_v6  ;;  %vm905_vm8 = vmor %vm903_vm7, %vm904_vm6  ;;  %v924_v31 = vand.u32 2147483648, %v803_v6  ;;  %v922_v36 = vand.u32 2147483647, %v803_v6  ;;  %vm918_vm11 = vweird.f32 %v803_v6 }
  0xd8   : > { %v900_v10 = vsub.f32 1.0, %v899_v7 }
  0xd9   : > { %v595_v11 = vpop.f32.mrf.mxu0  ;;  %v925_v43 = vor.u32 1.1754944e-38, %v924_v31  ;;  %vm923_vm13 = vcmp.eq.f32.partialorder %v922_v36, 8.507059e+37 }
  0xda   : > { %v901_v13 = vmul.f32 %v8233_v5, %v900_v10  ;;  %v9023_v14 = vadd.f32 %v9004_v54, %v595_v11  ;;  %v8037_v11 = vld [vmem:[%s13174_s3 + $0x10] sm:$0xff] }
  0xdb   : > { %2998 = vmatpush.bf16.msra.mxu1 %v8037_v11 }
  0xdc   : > { %v8235_v16 = vpop.eup %8234  ;;  %v902_v17 = vadd.f32 %v8233_v5, %v901_v13  ;;  %v7663_v20 = vmul.f32 -1.442695, %v9023_v14  ;;  %v8024_v13 = vld [vmem:[%s8939_s22 + $0x68] sm:$0xff] }
  0xdd   : > { %v8237_v21 = vpop.eup %8236  ;;  %v9026_v22 = vadd.f32 1.0, %v8235_v16 }
  0xde   : > { %v906_v25 = vsel %vm905_vm8, %v8233_v5, %v902_v17  ;;  %v914_v26 = vmul.f32 %v8237_v21, %v803_v6  ;;  %8238 = vpow2.f32 %v7663_v20  ;;  %vm919_vm10 = vweird.f32 %v8237_v21 }
  0xdf   : > { %8240 = vrcp.f32 %v9026_v22  ;;  %v911_v30 = vsel %vm908_vm9, %v910_v27, %v906_v25  ;;  %vm920_vm12 = vmor %vm918_vm11, %vm919_vm10  ;;  %vm933_vm15 = vweird.f32 %v9026_v22  ;;  %v937_v59 = vand.u32 2147483647, %v9026_v22 }
  0xe0   : > { %v915_v28 = vsub.f32 1.0, %v914_v26  ;;  %v1442_v39 = vmul.f32 %v911_v30, %v589_v57  ;;  %v939_v61 = vand.u32 2147483648, %v9026_v22  ;;  %v8036_v26 = vld [vmem:[%s13174_s3 + $0x8] sm:$0xff] }
  0xe1   : > { %v598_v33 = vpop.f32.mrf.mxu0  ;;  %vm938_vm2 = vcmp.eq.f32.partialorder %v937_v59, 8.507059e+37  ;;  %2999 = vmatpush.bf16.msra.mxu1 %v8036_v26 }
  0xe2   : > { %v916_v35 = vmul.f32 %v8237_v21, %v915_v28  ;;  %v9037_v37 = vadd.f32 %v9004_v54, %v598_v33  ;;  %v1522_v50 = vpack.c.bf16 %v1442_v39, %v1442_v39  ;;  %v940_v10 = vor.u32 1.1754944e-38, %v939_v61  ;;  %v8035_v39 = vld [vmem:[%s13174_s3] sm:$0xff] }
  0xe4   : > { %v8239_v38 = vpop.eup %8238  ;;  %v917_v40 = vadd.f32 %v8237_v21, %v916_v35  ;;  %v7664_v41 = vmul.f32 -1.442695, %v9037_v37  ;;  %7648 = vmatmul.msk.bf16.gmra.mxu0 %vm508_vm0, %v8023_v29  ;;  %v1639_v62 = vunpack.c.l.b16 %v1522_v50 }
  0xe5   : > { %v8241_v42 = vpop.eup %8240  ;;  %v9041_v44 = vadd.f32 1.0, %v8239_v38  ;;  %3000 = vmatpush.bf16.msra.mxu1 %v8035_v39 }
  0xe6   : > { %v921_v46 = vsel %vm920_vm12, %v8237_v21, %v917_v40  ;;  %v929_v47 = vmul.f32 %v8241_v42, %v9026_v22  ;;  %8242 = vpow2.f32 %v7664_v41  ;;  %vm934_vm14 = vweird.f32 %v8241_v42 }
  0xe7   : > { %v926_v48 = vsel %vm923_vm13, %v925_v43, %v921_v46  ;;  %8244 = vrcp.f32 %v9041_v44  ;;  %vm935_vm1 = vmor %vm933_vm15, %vm934_vm14  ;;  %v954_v16 = vand.u32 2147483648, %v9041_v44  ;;  %v952_v21 = vand.u32 2147483647, %v9041_v44 }
  0xe8   : > { %v1443_v51 = vmul.f32 %v926_v48, %v9010_v60  ;;  %v930_v52 = vsub.f32 1.0, %v929_v47  ;;  %vm948_vm7 = vweird.f32 %v9041_v44 }
  0xe9   : > { %v600_v53 = vpop.f32.mrf.mxu0  ;;  %v955_v31 = vor.u32 1.1754944e-38, %v954_v16  ;;  %vm953_vm9 = vcmp.eq.f32.partialorder %v952_v21, 8.507059e+37 }
  0xea   : > { %v1523_v56 = vpack.c.bf16 %v1443_v51, %v1443_v51  ;;  %v931_v57 = vmul.f32 %v8241_v42, %v930_v52  ;;  %v9053_v58 = vadd.f32 %v9004_v54, %v600_v53 }
  0xec   : > { %v8243_v60 = vpop.eup %8242  ;;  %v1640_v63 = vunpack.c.l.b16 %v1523_v56  ;;  %v932_v0 = vadd.f32 %v8241_v42, %v931_v57  ;;  %v7665_v1 = vmul.f32 -1.442695, %v9053_v58 }
  0xed   : > { %v8245_v3 = vpop.eup %8244  ;;  %v9059_v4 = vadd.f32 1.0, %v8243_v60 }
  0xee   : > { %v9061_v5 = vpack.c.b16 %v1640_v63, %v1639_v62  ;;  %v936_v6 = vsel %vm935_vm1, %v8241_v42, %v932_v0  ;;  %v944_v7 = vmul.f32 %v8245_v3, %v9041_v44  ;;  %vm949_vm6 = vweird.f32 %v8245_v3  ;;  %v8025_v62 = vld [vmem:[%s8939_s22 + $0x70] sm:$0xff] }
  0xef   : > { %8246 = vrcp.f32 %v9059_v4  ;;  %v941_v15 = vsel %vm938_vm2, %v940_v10, %v936_v6  ;;  %vm950_vm8 = vmor %vm948_vm7, %vm949_vm6  ;;  %v969_v47 = vand.u32 2147483648, %v9059_v4  ;;  %vm963_vm11 = vweird.f32 %v9059_v4 }
  0xf0   : > { %13222 = vst [vmem:[#allocation5_spill] sm:$0xff] %v9061_v5  ;;  %v945_v12 = vsub.f32 1.0, %v944_v7  ;;  %8248 = vpow2.f32 %v7665_v1  ;;  %v1710_v19 = vshrl.u32 %v9061_v5, 16  ;;  %v1713_v25 = vshll.u32 %v9061_v5, 16 }
  0xf1   : > { %v603_v17 = vpop.f32.mrf.mxu0  ;;  %v1444_v27 = vmul.f32 %v941_v15, %v9015_v2  ;;  %v970_v61 = vor.u32 1.1754944e-38, %v969_v47 }
  0xf2   : > { %v946_v20 = vmul.f32 %v8245_v3, %v945_v12  ;;  %v9073_v22 = vadd.f32 %v9004_v54, %v603_v17  ;;  %v1712_v24 = vrot.slane %v1710_v19, 7 }
  0xf3   : > { %v1524_v40 = vpack.c.bf16 %v1444_v27, %v1444_v27  ;;  %v9117_v27 = vpop.permute.xlu2 %2412 }
  0xf4   : > { %v947_v28 = vadd.f32 %v8245_v3, %v946_v20  ;;  %v7666_v29 = vmul.f32 -1.442695, %v9073_v22  ;;  %7649 = vmatmul.msk.bf16.gmra.mxu0 %vm508_vm0, %v8024_v13  ;;  %1845 = vrot.lane.b32.xlu2 %v1712_v24, %s8811_s29  ;;  %v1715_v33 = vor.u32 %v1713_v25, %v1712_v24 }
  0xf5   : > { %v8247_v30 = vpop.eup %8246  ;;  %v1641_v50 = vunpack.c.l.b16 %v1524_v40 }
  0xf6   : > { %v8249_v34 = vpop.eup %8248  ;;  %v951_v35 = vsel %vm950_vm8, %v8245_v3, %v947_v28  ;;  %v959_v36 = vmul.f32 %v8247_v30, %v9059_v4  ;;  %8250 = vpow2.f32 %v7666_v29  ;;  %1843 = vrot.lane.b32.xlu0 %v1715_v33, %s8811_s29  ;;  %vm964_vm10 = vweird.f32 %v8247_v30 }
  0xf7   : > { %v956_v2 = vsel %vm953_vm9, %v955_v31, %v951_v35  ;;  %v807_v38 = vadd.f32 1.0, %v8249_v34  ;;  %vm965_vm12 = vmor %vm963_vm11, %vm964_vm10  ;;  %vm2556_vm10 = vcmask 261120  }
  0xf8   : > { %v1445_v41 = vmul.f32 %v956_v2, %v9023_v14  ;;  %v960_v42 = vsub.f32 1.0, %v959_v36  ;;  %v967_v14 = vand.u32 2147483647, %v9059_v4 }
  0xf9   : > { %8252 = vrcp.f32 %v807_v38  ;;  %v605_v43 = vpop.f32.mrf.mxu0  ;;  %v984_v6 = vand.u32 2147483648, %v807_v38  ;;  %v982_v13 = vand.u32 2147483647, %v807_v38  ;;  %vm978_vm15 = vweird.f32 %v807_v38 }
  0xfa   : > { %v1525_v44 = vpack.c.bf16 %v1445_v41, %v1445_v41  ;;  %v961_v45 = vmul.f32 %v8247_v30, %v960_v42  ;;  %v9091_v46 = vadd.f32 %v9004_v54, %v605_v43  ;;  %vm968_vm13 = vcmp.eq.f32.partialorder %v967_v14, 8.507059e+37 }
  0xfb   : > { %v985_v25 = vor.u32 1.1754944e-38, %v984_v6  ;;  %vm983_vm2 = vcmp.eq.f32.partialorder %v982_v13, 8.507059e+37 }
  0xfc   : > { %v8251_v48 = vpop.eup %8250  ;;  %v1642_v51 = vunpack.c.l.b16 %v1525_v44  ;;  %v962_v52 = vadd.f32 %v8247_v30, %v961_v45  ;;  %v7667_v53 = vmul.f32 -1.442695, %v9091_v46 }
  0xfd   : > { %v9097_v55 = vadd.f32 1.0, %v8251_v48 }
  0xfe   : > { %v9099_v56 = vpack.c.b16 %v1642_v51, %v1641_v50  ;;  %8254 = vpow2.f32 %v7667_v53  ;;  %v966_v59 = vsel %vm965_vm12, %v8247_v30, %v962_v52  ;;  %v8026_v53 = vld [vmem:[%s8939_s22 + $0x78] sm:$0xff] }
  0xff   : > { %v8253_v57 = vpop.eup %8252  ;;  %8256 = vrcp.f32 %v9097_v55  ;;  %v971_v1 = vsel %vm968_vm13, %v970_v61, %v966_v59  ;;  %v999_v30 = vand.u32 2147483648, %v9097_v55  ;;  %v997_v36 = vand.u32 2147483647, %v9097_v55 }
 0x100   : > { %13223 = vst [vmem:[#allocation6_spill] sm:$0xff] %v9099_v56  ;;  %v974_v60 = vmul.f32 %v8253_v57, %v807_v38  ;;  %v1717_v0 = vshrl.u32 %v9099_v56, 16  ;;  %v1720_v10 = vshll.u32 %v9099_v56, 16  ;;  %vm979_vm14 = vweird.f32 %v8253_v57 }
 0x101   : > { %v608_v63 = vpop.f32.mrf.mxu0  ;;  %v1446_v17 = vmul.f32 %v971_v1, %v9037_v37  ;;  %vm980_vm1 = vmor %vm978_vm15, %vm979_vm14  ;;  %vm993_vm7 = vweird.f32 %v9097_v55  ;;  %v1000_v41 = vor.u32 1.1754944e-38, %v999_v30  ;;  %vm998_vm9 = vcmp.eq.f32.partialorder %v997_v36, 8.507059e+37 }
 0x102   : > { %v975_v3 = vsub.f32 1.0, %v974_v60  ;;  %v9105_v4 = vadd.f32 %v9004_v54, %v608_v63  ;;  %v1719_v7 = vrot.slane %v1717_v0, 7  ;;  %vm2629_vm13 = vcmask 785408  }
 0x103   : > { %v1526_v28 = vpack.c.bf16 %v1446_v17, %v1446_v17 }
 0x104   : > { %v8255_v11 = vpop.eup %8254  ;;  %v976_v12 = vmul.f32 %v8253_v57, %v975_v3  ;;  %v7668_v15 = vmul.f32 -1.442695, %v9105_v4  ;;  %7650 = vmatmul.msk.bf16.gmra.mxu0 %vm508_vm0, %v8025_v62  ;;  %1849 = vrot.lane.b32.xlu1 %v1719_v7, %s8811_s29  ;;  %v1722_v20 = vor.u32 %v1720_v10, %v1719_v7 }
 0x105   : > { %v8257_v16 = vpop.eup %8256  ;;  %v9111_v19 = vadd.f32 1.0, %v8255_v11  ;;  %v1643_v44 = vunpack.c.l.b16 %v1526_v28 }
 0x106   : > { %v977_v21 = vadd.f32 %v8253_v57, %v976_v12  ;;  %v989_v24 = vmul.f32 %v8257_v16, %v9097_v55  ;;  %8258 = vpow2.f32 %v7668_v15  ;;  %1847 = vrot.lane.b32.xlu0 %v1722_v20, %s8811_s29  ;;  %vm994_vm6 = vweird.f32 %v8257_v16 }
 0x107   : > { %8260 = vrcp.f32 %v9111_v19  ;;  %vm995_vm8 = vmor %vm993_vm7, %vm994_vm6  ;;  %v1014_v14 = vand.u32 2147483648, %v9111_v19  ;;  %v1012_v61 = vand.u32 2147483647, %v9111_v19  ;;  %vm1008_vm12 = vweird.f32 %v9111_v19 }
 0x108   : > { %v981_v26 = vsel %vm980_vm1, %v8253_v57, %v977_v21  ;;  %v990_v37 = vsub.f32 1.0, %v989_v24  ;;  %v2341_v57 = vpop.permute.xlu2 %2340 }
 0x109   : > { %v986_v29 = vsel %vm983_vm2, %v985_v25, %v981_v26  ;;  %v610_v31 = vpop.f32.mrf.mxu0  ;;  %v2558_v6 = vsel %vm2556_vm10, %v8966_v23, %v2341_v57  ;;  %v1015_v7 = vor.u32 1.1754944e-38, %v1014_v14  ;;  %vm1013_vm15 = vcmp.eq.f32.partialorder %v1012_v61, 8.507059e+37 }
 0x10a   : > { %v1447_v33 = vmul.f32 %v986_v29, %v9053_v58  ;;  %v991_v34 = vmul.f32 %v8257_v16, %v990_v37  ;;  %v9122_v35 = vadd.f32 %v9004_v54, %v610_v31 }
 0x10c   : > { %v8259_v2 = vpop.eup %8258  ;;  %v1527_v38 = vpack.c.bf16 %v1447_v33, %v1447_v33  ;;  %v992_v39 = vadd.f32 %v8257_v16, %v991_v34  ;;  %v7669_v58 = vmul.f32 -1.442695, %v9122_v35 }
 0x10d   : > { %v8261_v40 = vpop.eup %8260  ;;  %v9126_v42 = vadd.f32 1.0, %v8259_v2  ;;  %v9129_v43 = vpop.permute.xlu1 %2448 }
 0x10e   : > { %v1644_v45 = vunpack.c.l.b16 %v1527_v38  ;;  %v996_v47 = vsel %vm995_vm8, %v8257_v16, %v992_v39  ;;  %v1004_v48 = vmul.f32 %v8261_v40, %v9111_v19  ;;  %vm1009_vm11 = vweird.f32 %v8261_v40 }
 0x10f   : > { %8262 = vrcp.f32 %v9126_v42  ;;  %v1001_v51 = vsel %vm998_vm9, %v1000_v41, %v996_v47  ;;  %vm1010_vm14 = vmor %vm1008_vm12, %vm1009_vm11  ;;  %v1029_v2 = vand.u32 2147483648, %v9126_v42  ;;  %vm1023_vm2 = vweird.f32 %v9126_v42 }
 0x110   : > { %v9133_v50 = vpack.c.b16 %v1644_v45, %v1643_v44  ;;  %v1005_v52 = vsub.f32 1.0, %v1004_v48  ;;  %8264 = vpow2.f32 %v7669_v58  ;;  %v1448_v62 = vmul.f32 %v1001_v51, %v9073_v22 }
 0x111   : > { %v613_v55 = vpop.f32.mrf.mxu0  ;;  %v1027_v38 = vand.u32 2147483647, %v9126_v42  ;;  %v1030_v47 = vor.u32 1.1754944e-38, %v1029_v2 }
 0x112   : > { %13224 = vst [vmem:[#allocation7_spill] sm:$0xff] %v9133_v50  ;;  %v1006_v59 = vmul.f32 %v8261_v40, %v1005_v52  ;;  %v9139_v60 = vadd.f32 %v9004_v54, %v613_v55  ;;  %v1724_v63 = vshrl.u32 %v9133_v50, 16  ;;  %v1727_v22 = vshll.u32 %v9133_v50, 16 }
 0x113   : > { %v1528_v16 = vpack.c.bf16 %v1448_v62, %v1448_v62  ;;  %vm1028_vm7 = vcmp.eq.f32.partialorder %v1027_v38, 8.507059e+37 }
 0x114   : > { %v1007_v0 = vadd.f32 %v8261_v40, %v1006_v59  ;;  %v7670_v1 = vmul.f32 -1.442695, %v9139_v60  ;;  %7651 = vmatmul.msk.bf16.gmra.mxu0 %vm508_vm0, %v8026_v53  ;;  %v1726_v11 = vrot.slane %v1724_v63, 7 }
 0x115   : > { %v8263_v3 = vpop.eup %8262  ;;  %v2377_v10 = vpop.permute.xlu1 %2376  ;;  %v1645_v31 = vunpack.c.l.b16 %v1528_v16 }
 0x116   : > { %v1011_v12 = vsel %vm1010_vm14, %v8261_v40, %v1007_v0  ;;  %v1019_v13 = vmul.f32 %v8263_v3, %v9126_v42  ;;  %8266 = vpow2.f32 %v7670_v1  ;;  %v8265_v15 = vpop.eup %8264  ;;  %v2594_v19 = vsel %vm508_vm0, %v2558_v6, %v2377_v10  ;;  %1853 = vrot.lane.b32.xlu0 %v1726_v11, %s8811_s29  ;;  %v8027_v40 = vld [vmem:[%s8939_s22 + $0x80] sm:$0xff] }
 0x117   : > { %v1016_v17 = vsel %vm1013_vm15, %v1015_v7, %v1011_v12  ;;  %v1729_v20 = vor.u32 %v1727_v22, %v1726_v11  ;;  %v811_v24 = vadd.f32 1.0, %v8265_v15  ;;  %v2631_v25 = vsel %vm2629_vm13, %v2594_v19, %v9117_v27 }
 0x118   : > { %v1449_v23 = vmul.f32 %v1016_v17, %v9091_v46  ;;  %v1020_v21 = vsub.f32 1.0, %v1019_v13  ;;  %3001 = vmatmul.bf16.vlgmr.msra.gmra.mxu1 %v2631_v25  ;;  %vm1024_vm1 = vweird.f32 %v8263_v3 }
 0x119   : > { %1851 = vrot.lane.b32.xlu2 %v1729_v20, %s8811_s29  ;;  %v615_v26 = vpop.f32.mrf.mxu0  ;;  %8268 = vrcp.f32 %v811_v24  ;;  %vm1025_vm6 = vmor %vm1023_vm2, %vm1024_vm1  ;;  %v1044_v14 = vand.u32 2147483648, %v811_v24  ;;  %v1042_v61 = vand.u32 2147483647, %v811_v24  ;;  %vm1038_vm9 = vweird.f32 %v811_v24 }
 0x11a   : > { %v1529_v37 = vpack.c.bf16 %v1449_v23, %v1449_v23  ;;  %v1021_v28 = vmul.f32 %v8263_v3, %v1020_v21  ;;  %v9157_v29 = vadd.f32 %v9004_v54, %v615_v26 }
 0x11b   : > { %v1045_v7 = vor.u32 1.1754944e-38, %v1044_v14  ;;  %vm1043_vm12 = vcmp.eq.f32.partialorder %v1042_v61, 8.507059e+37 }
 0x11c   : > { %v8267_v30 = vpop.eup %8266  ;;  %v1646_v33 = vunpack.c.l.b16 %v1529_v37  ;;  %v1022_v46 = vadd.f32 %v8263_v3, %v1021_v28  ;;  %v7671_v27 = vmul.f32 -1.442695, %v9157_v29 }
 0x11d   : > { %v9159_v34 = vadd.f32 1.0, %v8267_v30 }
 0x11e   : > { %v9162_v36 = vpack.c.b16 %v1646_v33, %v1645_v31  ;;  %v1026_v41 = vsel %vm1025_vm6, %v8263_v3, %v1022_v46  ;;  %v8028_v33 = vld [vmem:[%s8939_s22 + $0x88] sm:$0xff] }
 0x11f   : > { %8270 = vrcp.f32 %v9159_v34  ;;  %v8269_v39 = vpop.eup %8268  ;;  %v1031_v53 = vsel %vm1028_vm7, %v1030_v47, %v1026_v41  ;;  %v1059_v20 = vand.u32 2147483648, %v9159_v34  ;;  %vm1053_vm15 = vweird.f32 %v9159_v34 }
 0x120   : > { %13225 = vst [vmem:[#allocation8_spill] sm:$0xff] %v9162_v36  ;;  %8272 = vpow2.f32 %v7671_v27  ;;  %v1034_v58 = vmul.f32 %v8269_v39, %v811_v24  ;;  %v1731_v45 = vshrl.u32 %v9162_v36, 16  ;;  %v1734_v42 = vshll.u32 %v9162_v36, 16 }
 0x121   : > { %v618_v44 = vpop.f32.mrf.mxu0  ;;  %vm1039_vm8 = vweird.f32 %v8269_v39  ;;  %v1450_v1 = vmul.f32 %v1031_v53, %v9105_v4  ;;  %v1057_v24 = vand.u32 2147483647, %v9159_v34  ;;  %v1060_v30 = vor.u32 1.1754944e-38, %v1059_v20 }
 0x122   : > { %v9171_v48 = vadd.f32 %v9004_v54, %v618_v44  ;;  %v1035_v51 = vsub.f32 1.0, %v1034_v58  ;;  %v1733_v52 = vrot.slane %v1731_v45, 7  ;;  %vm1040_vm11 = vmor %vm1038_vm9, %vm1039_vm8 }
 0x123   : > { %v1530_v16 = vpack.c.bf16 %v1450_v1, %v1450_v1  ;;  %vm1058_vm2 = vcmp.eq.f32.partialorder %v1057_v24, 8.507059e+37 }
 0x124   : > { %v7672_v55 = vmul.f32 -1.442695, %v9171_v48  ;;  %7652 = vmatmul.msk.bf16.gmra.mxu0 %vm508_vm0, %v8027_v40  ;;  %v1036_v59 = vmul.f32 %v8269_v39, %v1035_v51  ;;  %1857 = vrot.lane.b32.xlu0 %v1733_v52, %s8811_s29  ;;  %v1736_v62 = vor.u32 %v1734_v42, %v1733_v52 }
 0x125   : > { %v8271_v57 = vpop.eup %8270  ;;  %v1647_v37 = vunpack.c.l.b16 %v1530_v16 }
 0x126   : > { %v8273_v63 = vpop.eup %8272  ;;  %v1049_v0 = vmul.f32 %v8271_v57, %v9159_v34  ;;  %8274 = vpow2.f32 %v7672_v55  ;;  %v1037_v3 = vadd.f32 %v8269_v39, %v1036_v59  ;;  %1855 = vrot.lane.b32.xlu1 %v1736_v62, %s8811_s29  ;;  %vm1054_vm14 = vweird.f32 %v8271_v57 }
 0x127   : > { %v813_v6 = vadd.f32 1.0, %v8273_v63  ;;  %vm1055_vm1 = vmor %vm1053_vm15, %vm1054_vm14 }
 0x128   : > { %v1050_v10 = vsub.f32 1.0, %v1049_v0  ;;  %v1041_v11 = vsel %vm1040_vm11, %v8269_v39, %v1037_v3 }
 0x129   : > { %8276 = vrcp.f32 %v813_v6  ;;  %v620_v22 = vpop.f32.mrf.mxu0  ;;  %v1046_v12 = vsel %vm1043_vm12, %v1045_v7, %v1041_v11  ;;  %v1074_v39 = vand.u32 2147483648, %v813_v6  ;;  %v1072_v44 = vand.u32 2147483647, %v813_v6 }
 0x12a   : > { %v1051_v13 = vmul.f32 %v8271_v57, %v1050_v10  ;;  %v9181_v15 = vadd.f32 %v9004_v54, %v620_v22  ;;  %v1451_v4 = vmul.f32 %v1046_v12, %v9122_v35  ;;  %vm1068_vm7 = vweird.f32 %v813_v6 }
 0x12b   : > { %vm1073_vm9 = vcmp.eq.f32.partialorder %v1072_v44, 8.507059e+37 }
 0x12c   : > { %v8275_v17 = vpop.eup %8274  ;;  %v1052_v19 = vadd.f32 %v8271_v57, %v1051_v13  ;;  %v7673_v23 = vmul.f32 -1.442695, %v9181_v15  ;;  %v1531_v21 = vpack.c.bf16 %v1451_v4, %v1451_v4 }
 0x12d   : > { %v9188_v25 = vadd.f32 1.0, %v8275_v17 }
 0x12e   : > { %8278 = vpow2.f32 %v7673_v23  ;;  %v1648_v35 = vunpack.c.l.b16 %v1531_v21  ;;  %v1056_v28 = vsel %vm1055_vm1, %v8271_v57, %v1052_v19  ;;  %v1075_v57 = vor.u32 1.1754944e-38, %v1074_v39  ;;  %v8030_v21 = vld [vmem:[%s8939_s22 + $0x98] sm:$0xff] }
 0x12f   : > { %v8277_v26 = vpop.eup %8276  ;;  %8280 = vrcp.f32 %v9188_v25  ;;  %v1061_v2 = vsel %vm1058_vm2, %v1060_v30, %v1056_v28  ;;  %v1089_v7 = vand.u32 2147483648, %v9188_v25  ;;  %vm1083_vm12 = vweird.f32 %v9188_v25  ;;  %7655 = vmatmul.msk.bf16.vlgmr.msra.gmra.mxu3 %vm508_vm0, %v8030_v21 }
 0x130   : > { %v1064_v31 = vmul.f32 %v8277_v26, %v813_v6  ;;  %v9192_v46 = vpack.c.b16 %v1648_v35, %v1647_v37  ;;  %vm1069_vm6 = vweird.f32 %v8277_v26  ;;  %v1452_v51 = vmul.f32 %v1061_v2, %v9139_v60 }
 0x131   : > { %v623_v27 = vpop.f32.mrf.mxu0  ;;  %vm1070_vm8 = vmor %vm1068_vm7, %vm1069_vm6  ;;  %v1087_v12 = vand.u32 2147483647, %v9188_v25  ;;  %v1090_v23 = vor.u32 1.1754944e-38, %v1089_v7 }
 0x132   : > { %13226 = vst [vmem:[#allocation9_spill] sm:$0xff] %v9192_v46  ;;  %v1065_v38 = vsub.f32 1.0, %v1064_v31  ;;  %v9195_v34 = vadd.f32 %v9004_v54, %v623_v27  ;;  %v1738_v40 = vshrl.u32 %v9192_v46, 16  ;;  %v1741_v55 = vshll.u32 %v9192_v46, 16 }
 0x133   : > { %v1532_v62 = vpack.c.bf16 %v1452_v51, %v1452_v51  ;;  %vm1088_vm15 = vcmp.eq.f32.partialorder %v1087_v12, 8.507059e+37 }
 0x134   : > { %v8279_v41 = vpop.eup %8278  ;;  %v1066_v58 = vmul.f32 %v8277_v26, %v1065_v38  ;;  %v7674_v45 = vmul.f32 -1.442695, %v9195_v34  ;;  %7653 = vmatmul.msk.bf16.gmra.mxu0 %vm508_vm0, %v8028_v33  ;;  %v1740_v42 = vrot.slane %v1738_v40, 7 }
 0x135   : > { %v8281_v47 = vpop.eup %8280  ;;  %v9201_v52 = vadd.f32 1.0, %v8279_v41  ;;  %v1649_v4 = vunpack.c.l.b16 %v1532_v62 }
 0x136   : > { %v1067_v53 = vadd.f32 %v8277_v26, %v1066_v58  ;;  %v1079_v14 = vmul.f32 %v8281_v47, %v9188_v25  ;;  %8282 = vpow2.f32 %v7674_v45  ;;  %1861 = vrot.lane.b32.xlu2 %v1740_v42, %s8811_s29  ;;  %v1743_v60 = vor.u32 %v1741_v55, %v1740_v42  ;;  %v8052_v55 = vld [vmem:[%s13174_s3 + $0x88] sm:$0xff] }
 0x137   : > { %8284 = vrcp.f32 %v9201_v52  ;;  %vm1084_vm11 = vweird.f32 %v8281_v47  ;;  %v1104_v37 = vand.u32 2147483648, %v9201_v52  ;;  %v1102_v30 = vand.u32 2147483647, %v9201_v52  ;;  %3197 = vmatpush.bf16.msrb.mxu3 %v8052_v55 }
 0x138   : > { %v1071_v59 = vsel %vm1070_vm8, %v8277_v26, %v1067_v53  ;;  %v1080_v61 = vsub.f32 1.0, %v1079_v14  ;;  %1859 = vrot.lane.b32.xlu0 %v1743_v60, %s8811_s29  ;;  %vm1085_vm14 = vmor %vm1083_vm12, %vm1084_vm11  ;;  %vm1098_vm2 = vweird.f32 %v9201_v52 }
 0x139   : > { %v1076_v63 = vsel %vm1073_vm9, %v1075_v57, %v1071_v59  ;;  %v625_v0 = vpop.f32.mrf.mxu0  ;;  %v1105_v40 = vor.u32 1.1754944e-38, %v1104_v37  ;;  %vm1103_vm7 = vcmp.eq.f32.partialorder %v1102_v30, 8.507059e+37 }
 0x13a   : > { %v1453_v1 = vmul.f32 %v1076_v63, %v9157_v29  ;;  %v1081_v3 = vmul.f32 %v8281_v47, %v1080_v61  ;;  %v9210_v6 = vadd.f32 %v9004_v54, %v625_v0 }
 0x13c   : > { %v8283_v10 = vpop.eup %8282  ;;  %v1533_v11 = vpack.c.bf16 %v1453_v1, %v1453_v1  ;;  %v1082_v22 = vadd.f32 %v8281_v47, %v1081_v3  ;;  %v7675_v16 = vmul.f32 -1.442695, %v9210_v6 }
 0x13d   : > { %v8285_v13 = vpop.eup %8284  ;;  %v9215_v29 = vadd.f32 1.0, %v8283_v10 }
 0x13e   : > { %v1650_v17 = vunpack.c.l.b16 %v1533_v11  ;;  %v1086_v19 = vsel %vm1085_vm14, %v8281_v47, %v1082_v22  ;;  %v1094_v20 = vmul.f32 %v8285_v13, %v9201_v52  ;;  %vm1099_vm1 = vweird.f32 %v8285_v13 }
 0x13f   : > { %8286 = vrcp.f32 %v9215_v29  ;;  %v1091_v25 = vsel %vm1088_vm15, %v1090_v23, %v1086_v19  ;;  %vm1100_vm6 = vmor %vm1098_vm2, %vm1099_vm1  ;;  %v1119_v10 = vand.u32 2147483648, %v9215_v29  ;;  %vm1113_vm9 = vweird.f32 %v9215_v29 }
 0x140   : > { %v9221_v24 = vpack.c.b16 %v1650_v17, %v1649_v4  ;;  %v1095_v26 = vsub.f32 1.0, %v1094_v20  ;;  %8288 = vpow2.f32 %v7675_v16  ;;  %v1454_v27 = vmul.f32 %v1091_v25, %v9171_v48 }
 0x141   : > { %v628_v35 = vpop.f32.mrf.mxu0  ;;  %v1117_v22 = vand.u32 2147483647, %v9215_v29  ;;  %v1120_v17 = vor.u32 1.1754944e-38, %v1119_v10 }
 0x142   : > { %13227 = vst [vmem:[#allocation10_spill] sm:$0xff] %v9221_v24  ;;  %v1096_v28 = vmul.f32 %v8285_v13, %v1095_v26  ;;  %v9227_v31 = vadd.f32 %v9004_v54, %v628_v35  ;;  %v1745_v33 = vshrl.u32 %v9221_v24, 16  ;;  %v1748_v58 = vshll.u32 %v9221_v24, 16 }
 0x143   : > { %v1534_v42 = vpack.c.bf16 %v1454_v27, %v1454_v27  ;;  %vm1118_vm12 = vcmp.eq.f32.partialorder %v1117_v22, 8.507059e+37 }
 0x144   : > { %v1097_v2 = vadd.f32 %v8285_v13, %v1096_v28  ;;  %v7676_v38 = vmul.f32 -1.442695, %v9227_v31  ;;  %v1747_v41 = vrot.slane %v1745_v33, 7 }
 0x145   : > { %v8287_v39 = vpop.eup %8286  ;;  %v1651_v63 = vunpack.c.l.b16 %v1534_v42 }
 0x146   : > { %v1101_v44 = vsel %vm1100_vm6, %v8285_v13, %v1097_v2  ;;  %v1109_v45 = vmul.f32 %v8287_v39, %v9215_v29  ;;  %8290 = vpow2.f32 %v7676_v38  ;;  %v8289_v47 = vpop.eup %8288  ;;  %1865 = vrot.lane.b32.xlu1 %v1747_v41, %s8811_s29  ;;  %v1750_v48 = vor.u32 %v1748_v58, %v1747_v41 }
 0x147   : > { %v1106_v51 = vsel %vm1103_vm7, %v1105_v40, %v1101_v44  ;;  %v817_v14 = vadd.f32 1.0, %v8289_v47  ;;  %vm1114_vm8 = vweird.f32 %v8287_v39 }
 0x148   : > { %v1455_v52 = vmul.f32 %v1106_v51, %v9181_v15  ;;  %v1110_v53 = vsub.f32 1.0, %v1109_v45  ;;  %1863 = vrot.lane.b32.xlu2 %v1750_v48, %s8811_s29  ;;  %v8051_v15 = vld [vmem:[%s13174_s3 + $0x80] sm:$0xff]  ;;  %vm1115_vm11 = vmor %vm1113_vm9, %vm1114_vm8 }
 0x149   : > { %v630_v57 = vpop.f32.mrf.mxu0  ;;  %8292 = vrcp.f32 %v817_v14  ;;  %3198 = vmatpush.bf16.msrb.mxu3 %v8051_v15  ;;  %v1132_v26 = vand.u32 2147483647, %v817_v14  ;;  %v1134_v25 = vand.u32 2147483648, %v817_v14  ;;  %vm1128_vm15 = vweird.f32 %v817_v14 }
 0x14a   : > { %v1535_v59 = vpack.c.bf16 %v1455_v52, %v1455_v52  ;;  %v1111_v61 = vmul.f32 %v8287_v39, %v1110_v53  ;;  %v9242_v60 = vadd.f32 %v9004_v54, %v630_v57 }
 0x14b   : > { %v1135_v41 = vor.u32 1.1754944e-38, %v1134_v25  ;;  %vm1133_vm2 = vcmp.eq.f32.partialorder %v1132_v26, 8.507059e+37 }
 0x14c   : > { %v8291_v62 = vpop.eup %8290  ;;  %v1652_v0 = vunpack.c.l.b16 %v1535_v59  ;;  %v1112_v1 = vadd.f32 %v8287_v39, %v1111_v61  ;;  %v7677_v7 = vmul.f32 -1.442695, %v9242_v60 }
 0x14d   : > { %v9247_v3 = vadd.f32 1.0, %v8291_v62 }
 0x14e   : > { %v9251_v11 = vpack.c.b16 %v1652_v0, %v1651_v63  ;;  %v1116_v13 = vsel %vm1115_vm11, %v8287_v39, %v1112_v1  ;;  %v9281_v1 = vpop.permute.xlu0 %2378 }
 0x14f   : > { %8294 = vrcp.f32 %v9247_v3  ;;  %v8293_v12 = vpop.eup %8292  ;;  %v1121_v21 = vsel %vm1118_vm12, %v1120_v17, %v1116_v13  ;;  %vm1143_vm7 = vweird.f32 %v9247_v3  ;;  %v1147_v59 = vand.u32 2147483647, %v9247_v3 }
 0x150   : > { %13228 = vst [vmem:[#allocation11_spill] sm:$0xff] %v9251_v11  ;;  %8296 = vpow2.f32 %v7677_v7  ;;  %v1124_v16 = vmul.f32 %v8293_v12, %v817_v14  ;;  %v1752_v23 = vshrl.u32 %v9251_v11, 16  ;;  %vm1129_vm14 = vweird.f32 %v8293_v12 }
 0x151   : > { %v633_v4 = vpop.f32.mrf.mxu0  ;;  %v1755_v30 = vshll.u32 %v9251_v11, 16  ;;  %v1456_v2 = vmul.f32 %v1121_v21, %v9195_v34  ;;  %vm1130_vm1 = vmor %vm1128_vm15, %vm1129_vm14  ;;  %v1149_v14 = vand.u32 2147483648, %v9247_v3  ;;  %vm1148_vm9 = vcmp.eq.f32.partialorder %v1147_v59, 8.507059e+37  ;;  %v1846_v21 = vpop.permute.xlu2 %1845 }
 0x152   : > { %v9257_v19 = vadd.f32 %v9004_v54, %v633_v4  ;;  %v1125_v20 = vsub.f32 1.0, %v1124_v16  ;;  %v1754_v28 = vrot.slane %v1752_v23, 7 }
 0x153   : > { %v1536_v48 = vpack.c.bf16 %v1456_v2, %v1456_v2  ;;  %v1150_v0 = vor.u32 1.1754944e-38, %v1149_v14  ;;  %v9308_v2 = vsel %vm8959_vm3, %v1846_v21, 0 }
 0x154   : > { %v7678_v29 = vmul.f32 -1.442695, %v9257_v19  ;;  %v1126_v35 = vmul.f32 %v8293_v12, %v1125_v20  ;;  %1869 = vrot.lane.b32.xlu0 %v1754_v28, %s8811_s29  ;;  %v1757_v40 = vor.u32 %v1755_v30, %v1754_v28 }
 0x155   : > { %v8295_v37 = vpop.eup %8294  ;;  %v1653_v62 = vunpack.c.l.b16 %v1536_v48 }
 0x156   : > { %v8297_v33 = vpop.eup %8296  ;;  %v1139_v27 = vmul.f32 %v8295_v37, %v9247_v3  ;;  %8298 = vpow2.f32 %v7678_v29  ;;  %v1127_v38 = vadd.f32 %v8293_v12, %v1126_v35  ;;  %1867 = vrot.lane.b32.xlu1 %v1757_v40, %s8811_s29  ;;  %vm1144_vm6 = vweird.f32 %v8295_v37 }
 0x157   : > { %v9264_v39 = vadd.f32 1.0, %v8297_v33  ;;  %vm1145_vm8 = vmor %vm1143_vm7, %vm1144_vm6 }
 0x158   : > { %v1140_v58 = vsub.f32 1.0, %v1139_v27  ;;  %v1131_v44 = vsel %vm1130_vm1, %v8293_v12, %v1127_v38  ;;  %v9288_v12 = vld [vmem:[%s13173_s2] ss:$0 sm:$0xff] }
 0x159   : > { %8300 = vrcp.f32 %v9264_v39  ;;  %v635_v45 = vpop.f32.mrf.mxu0  ;;  %v1136_v47 = vsel %vm1133_vm2, %v1135_v41, %v1131_v44  ;;  %v1164_v16 = vand.u32 2147483648, %v9264_v39  ;;  %v1162_v23 = vand.u32 2147483647, %v9264_v39 }
 0x15a   : > { %v1141_v51 = vmul.f32 %v8295_v37, %v1140_v58  ;;  %v9270_v34 = vadd.f32 %v9004_v54, %v635_v45  ;;  %v1457_v42 = vmul.f32 %v1136_v47, %v9210_v6  ;;  %vm1158_vm12 = vweird.f32 %v9264_v39 }
 0x15b   : > { %v1165_v27 = vor.u32 1.1754944e-38, %v1164_v16  ;;  %vm1163_vm15 = vcmp.eq.f32.partialorder %v1162_v23, 8.507059e+37  ;;  %v2031_v16 = vshll.u32 %v9308_v2, 16 }
 0x15c   : > { %v8299_v52 = vpop.eup %8298  ;;  %v1142_v53 = vadd.f32 %v8295_v37, %v1141_v51  ;;  %v7679_v55 = vmul.f32 -1.442695, %v9270_v34  ;;  %v1537_v57 = vpack.c.bf16 %v1457_v42, %v1457_v42  ;;  %v2259_v42 = vrot.slane %v9308_v2, 1 }
 0x15d   : > { %v9277_v61 = vadd.f32 1.0, %v8299_v52 }
 0x15e   : > { %8302 = vpow2.f32 %v7679_v55  ;;  %v1654_v63 = vunpack.c.l.b16 %v1537_v57  ;;  %v1146_v6 = vsel %vm1145_vm8, %v8295_v37, %v1142_v53 }
 0x15f   : > { %v8301_v54 = vpop.eup %8300  ;;  %8304 = vrcp.f32 %v9277_v61  ;;  %v1151_v3 = vsel %vm1148_vm9, %v1150_v0, %v1146_v6  ;;  %vm1173_vm1 = vweird.f32 %v9277_v61  ;;  %v1179_v14 = vand.u32 2147483648, %v9277_v61 }
 0x160   : > { %v1154_v15 = vmul.f32 %v8301_v54, %v9264_v39  ;;  %v9283_v7 = vpack.c.b16 %v1654_v63, %v1653_v62  ;;  %vm1159_vm11 = vweird.f32 %v8301_v54  ;;  %v1458_v29 = vmul.f32 %v1151_v3, %v9227_v31 }
 0x161   : > { %v638_v10 = vpop.f32.mrf.mxu0  ;;  %vm1160_vm14 = vmor %vm1158_vm12, %vm1159_vm11 }
 0x162   : > { %13229 = vst [vmem:[#allocation12_spill] sm:$0xff] %v9283_v7  ;;  %v1155_v22 = vsub.f32 1.0, %v1154_v15  ;;  %v9291_v13 = vadd.f32 %v9288_v12, %v638_v10  ;;  %v1759_v4 = vshrl.u32 %v9283_v7, 16  ;;  %v1762_v33 = vshll.u32 %v9283_v7, 16  ;;  %v9335_v15 = vpop.permute.xlu1 %2342 }
 0x163   : > { %v1538_v40 = vpack.c.bf16 %v1458_v29, %v1458_v29  ;;  %v1177_v10 = vand.u32 2147483647, %v9277_v61 }
 0x164   : > { %v8303_v17 = vpop.eup %8302  ;;  %v1156_v20 = vmul.f32 %v8301_v54, %v1155_v22  ;;  %v7680_v26 = vmul.f32 -1.442695, %v9291_v13  ;;  %v1761_v35 = vrot.slane %v1759_v4, 7 }
 0x165   : > { %v9297_v25 = vpop.eup %8304  ;;  %v9301_v37 = vadd.f32 1.0, %v8303_v17  ;;  %v1655_v63 = vunpack.c.l.b16 %v1538_v40  ;;  %v1180_v17 = vor.u32 1.1754944e-38, %v1179_v14  ;;  %vm1178_vm8 = vcmp.eq.f32.partialorder %v1177_v10, 8.507059e+37 }
 0x166   : > { %v1157_v28 = vadd.f32 %v8301_v54, %v1156_v20  ;;  %v1169_v30 = vmul.f32 %v9297_v25, %v9277_v61  ;;  %8306 = vpow2.f32 %v7680_v26  ;;  %1873 = vrot.lane.b32.xlu2 %v1761_v35, %s8811_s29  ;;  %v1764_v39 = vor.u32 %v1762_v33, %v1761_v35 }
 0x167   : > { %8308 = vrcp.f32 %v9301_v37  ;;  %vm1174_vm2 = vweird.f32 %v9297_v25  ;;  %v1194_v21 = vand.u32 2147483648, %v9301_v37  ;;  %vm1188_vm9 = vweird.f32 %v9301_v37 }
 0x168   : > { %v1161_v31 = vsel %vm1160_vm14, %v8301_v54, %v1157_v28  ;;  %v1170_v38 = vsub.f32 1.0, %v1169_v30  ;;  %v1844_v58 = vpop.permute.xlu0 %1843  ;;  %1871 = vrot.lane.b32.xlu0 %v1764_v39, %s8811_s29  ;;  %vm9349_vm6 = vmor %vm1173_vm1, %vm1174_vm2  ;;  %v1192_v28 = vand.u32 2147483647, %v9301_v37 }
 0x169   : > { %v1166_v41 = vsel %vm1163_vm15, %v1165_v27, %v1161_v31  ;;  %v640_v44 = vpop.f32.mrf.mxu0  ;;  %v9317_v51 = vsel %vm8959_vm3, 0, %v1844_v58  ;;  %v1195_v31 = vor.u32 1.1754944e-38, %v1194_v21  ;;  %v2033_v58 = vrot.slane %v2031_v16, 1 }
 0x16a   : > { %v1459_v45 = vmul.f32 %v1166_v41, %v9242_v60  ;;  %v1171_v47 = vmul.f32 %v9297_v25, %v1170_v38  ;;  %v9320_v48 = vadd.f32 %v9288_v12, %v640_v44  ;;  %2414 = vrot.lane.b32.xlu1 %v9317_v51, %s8811_s29  ;;  %v2258_v52 = vrot.slane %v9317_v51, 1 }
 0x16b   : > { %v2026_v62 = vshll.u32 %v9317_v51, 16  ;;  %vm1193_vm12 = vcmp.eq.f32.partialorder %v1192_v28, 8.507059e+37 }
 0x16c   : > { %v8307_v53 = vpop.eup %8306  ;;  %v1539_v60 = vpack.c.bf16 %v1459_v45, %v1459_v45  ;;  %v1172_v57 = vadd.f32 %v9297_v25, %v1171_v47  ;;  %v7681_v59 = vmul.f32 -1.442695, %v9320_v48  ;;  %v2260_v54 = vsel %vm2251_vm4, %v2258_v52, %v2259_v42 }
 0x16d   : > { %v8309_v55 = vpop.eup %8308  ;;  %7768 = vmatmul.msk.bf16.vlgmr.msrb.gmra.mxu3 %vm2556_vm10, %v2260_v54  ;;  %v9338_v3 = vadd.f32 1.0, %v8307_v53  ;;  %v2028_v29 = vrot.slane %v2026_v62, 1 }
 0x16e   : > { %v1656_v6 = vunpack.c.l.b16 %v1539_v60  ;;  %v1184_v0 = vmul.f32 %v8309_v55, %v9301_v37  ;;  %2484 = vrot.lane.b32.xlu2 %v9317_v51, %s8813_s24  ;;  %v1176_v23 = vsel %vm9349_vm6, %v9297_v25, %v1172_v57  ;;  %8310 = vpow2.f32 %v7681_v59 }
 0x16f   : > { %vm1189_vm7 = vweird.f32 %v8309_v55  ;;  %8312 = vrcp.f32 %v9338_v3  ;;  %v2024_v25 = vshrl.u32 %v9317_v51, 16  ;;  %v1181_v33 = vsel %vm1178_vm8, %v1180_v17, %v1176_v23 }
 0x170   : > { %v9342_v22 = vpack.c.b16 %v1656_v6, %v1655_v63  ;;  %v1185_v20 = vsub.f32 1.0, %v1184_v0  ;;  %2450 = vrot.lane.b32.xlu0 %v2260_v54, %s8812_s23  ;;  %vm1190_vm11 = vmor %vm1188_vm9, %vm1189_vm7  ;;  %v1460_v44 = vmul.f32 %v1181_v33, %v9257_v19  ;;  %vm1203_vm14 = vweird.f32 %v9338_v3 }
 0x171   : > { %v643_v26 = vpop.f32.mrf.mxu0  ;;  %v2029_v39 = vor.u32 %v2028_v29, %v2024_v25 }
 0x172   : > { %13230 = vst [vmem:[#allocation13_spill] sm:$0xff] %v9342_v22  ;;  %v1186_v35 = vmul.f32 %v8309_v55, %v1185_v20  ;;  %v9360_v61 = vadd.f32 %v9288_v12, %v643_v26  ;;  %v1766_v30 = vshrl.u32 %v9342_v22, 16  ;;  %v1769_v59 = vshll.u32 %v9342_v22, 16 }
 0x173   : > { %v9380_v60 = vsel %vm1998_vm5, %v2029_v39, %v2033_v58 }
 0x174   : > { %v1187_v27 = vadd.f32 %v8309_v55, %v1186_v35  ;;  %v7682_v2 = vmul.f32 -1.442695, %v9360_v61  ;;  %v1768_v38 = vrot.slane %v1766_v30, 7  ;;  %v8311_v41 = vpop.eup %8310 }
 0x175   : > { %v9371_v42 = vadd.f32 1.0, %v8311_v41  ;;  %v9373_v52 = vpop.eup %8312 }
 0x176   : > { %v1191_v40 = vsel %vm1190_vm11, %v8309_v55, %v1187_v27  ;;  %8314 = vpow2.f32 %v7682_v2  ;;  %1877 = vrot.lane.b32.xlu1 %v1768_v38, %s8811_s29  ;;  %2380 = vrot.lane.b32.xlu2 %v2260_v54, %s8813_s24  ;;  %v1850_v47 = vpop.permute.xlu1 %1849  ;;  %v1199_v54 = vmul.f32 %v9373_v52, %v9338_v3  ;;  %v1771_v16 = vor.u32 %v1769_v59, %v1768_v38 }
 0x177   : > { %v1196_v45 = vsel %vm1193_vm12, %v1195_v31, %v1191_v40  ;;  %v9377_v53 = vsel %vm8959_vm3, %v1850_v47, 0  ;;  %8316 = vrcp.f32 %v9371_v42  ;;  %vm1204_vm15 = vweird.f32 %v9373_v52  ;;  %v1852_v40 = vpop.permute.xlu2 %1851 }
 0x178   : > { %v1461_v37 = vmul.f32 %v1196_v45, %v9270_v34  ;;  %v1848_v19 = vpop.permute.xlu0 %1847  ;;  %2520 = vrot.lane.b32.xlu0 %v9380_v60, %s8811_s29  ;;  %v1540_v34 = vpack.c.bf16 %v1460_v44, %v1460_v44  ;;  %v2262_v62 = vrot.slane %v9377_v53, 1  ;;  %v1200_v21 = vsub.f32 1.0, %v1199_v54  ;;  %vm9433_vm6 = vmor %vm1203_vm14, %vm1204_vm15 }
 0x179   : > { %v645_v14 = vpop.f32.mrf.mxu0  ;;  %v9387_v57 = vsel %vm8959_vm3, 0, %v1848_v19  ;;  %v1207_v2 = vand.u32 2147483647, %v9338_v3  ;;  %vm1218_vm1 = vweird.f32 %v9371_v42  ;;  %v1209_v44 = vand.u32 2147483648, %v9338_v3 }
 0x17a   : > { %v1541_v55 = vpack.c.bf16 %v1461_v37, %v1461_v37  ;;  %v9394_v63 = vadd.f32 %v9288_v12, %v645_v14  ;;  %v2261_v6 = vrot.slane %v9387_v57, 1  ;;  %v1657_v20 = vunpack.c.l.b16 %v1540_v34 }
 0x17b   : > { %v2038_v33 = vshll.u32 %v9387_v57, 16  ;;  %v1201_v27 = vmul.f32 %v9373_v52, %v1200_v21  ;;  %v1224_v47 = vand.u32 2147483648, %v9371_v42  ;;  %v2043_v34 = vshll.u32 %v9377_v53, 16 }
 0x17c   : > { %v8315_v0 = vpop.eup %8314  ;;  %v1658_v10 = vunpack.c.l.b16 %v1541_v55  ;;  %v7683_v4 = vmul.f32 -1.442695, %v9394_v63  ;;  %v2263_v17 = vsel %vm2251_vm4, %v2261_v6, %v2262_v62  ;;  %v1222_v55 = vand.u32 2147483647, %v9371_v42 }
 0x17d   : > { %v8317_v23 = vpop.eup %8316  ;;  %v9402_v26 = vadd.f32 1.0, %v8315_v0  ;;  %7769 = vmatmul.msk.bf16.gmra.mxu3 %vm2556_vm10, %v2263_v17  ;;  %v2040_v58 = vrot.slane %v2038_v33, 1  ;;  %v1202_v19 = vadd.f32 %v9373_v52, %v1201_v27  ;;  %v2036_v59 = vshrl.u32 %v9387_v57, 16 }
 0x17e   : > { %1875 = vrot.lane.b32.xlu2 %v1771_v16, %s8811_s29  ;;  %2486 = vrot.lane.b32.xlu1 %v9387_v57, %s8813_s24  ;;  %8318 = vpow2.f32 %v7683_v4  ;;  %v9405_v29 = vpack.c.b16 %v1658_v10, %v1657_v20  ;;  %v1214_v35 = vmul.f32 %v8317_v23, %v9371_v42  ;;  %vm1219_vm2 = vweird.f32 %v8317_v23 }
 0x17f   : > { %8320 = vrcp.f32 %v9402_v26  ;;  %vm9440_vm7 = vcmp.eq.f32.partialorder %v1207_v2, 8.507059e+37  ;;  %vm9447_vm8 = vmor %vm1218_vm1, %vm1219_vm2  ;;  %v9453_v3 = vsel %vm8959_vm3, 0, %v1852_v40  ;;  %v2041_v4 = vor.u32 %v2040_v58, %v2036_v59 }
 0x180   : > { %13233 = vst [vmem:[#allocation14_spill] sm:$0xff] %v9405_v29  ;;  %2344 = vrot.lane.b32.xlu0 %v9380_v60, %s8812_s23  ;;  %v1215_v25 = vsub.f32 1.0, %v1214_v35  ;;  %v1773_v38 = vshrl.u32 %v9405_v29, 16  ;;  %v1225_v20 = vor.u32 1.1754944e-38, %v1224_v47  ;;  %v1776_v35 = vshll.u32 %v9405_v29, 16 }
 0x181   : > { %v648_v28 = vpop.f32.mrf.mxu0  ;;  %vm1223_vm9 = vcmp.eq.f32.partialorder %v1222_v55, 8.507059e+37  ;;  %v2050_v14 = vshll.u32 %v9453_v3, 16  ;;  %vm1233_vm11 = vweird.f32 %v9402_v26 }
 0x182   : > { %v9411_v30 = vadd.f32 %v9288_v12, %v648_v28  ;;  %v1216_v31 = vmul.f32 %v8317_v23, %v1215_v25  ;;  %v1775_v0 = vrot.slane %v1773_v38, 7  ;;  %v1206_v28 = vsel %vm9433_vm6, %v9373_v52, %v1202_v19 }
 0x184   : > { %v8319_v39 = vpop.eup %8318  ;;  %v7684_v41 = vmul.f32 -1.442695, %v9411_v30  ;;  %v1217_v45 = vadd.f32 %v8317_v23, %v1216_v31  ;;  %v1778_v2 = vor.u32 %v1776_v35, %v1775_v0  ;;  %v2264_v31 = vrot.slane %v9453_v3, 1 }
 0x185   : > { %v9424_v37 = vadd.f32 1.0, %v8319_v39  ;;  %v9456_v10 = vpop.eup %8320 }
 0x186   : > { %2382 = vrot.lane.b32.xlu1 %v2263_v17, %s8813_s24  ;;  %2452 = vrot.lane.b32.xlu2 %v2263_v17, %s8812_s23  ;;  %v1221_v16 = vsel %vm9447_vm8, %v8317_v23, %v1217_v45  ;;  %v1210_v17 = vor.u32 1.1754944e-38, %v1209_v44  ;;  %v2045_v23 = vrot.slane %v2043_v34, 1  ;;  %v1229_v27 = vmul.f32 %v9456_v10, %v9402_v26 }
 0x187   : > { %8322 = vrcp.f32 %v9424_v37  ;;  %v1226_v33 = vsel %vm1223_vm9, %v1225_v20, %v1221_v16  ;;  %vm1234_vm12 = vweird.f32 %v9456_v10  ;;  %v1239_v16 = vand.u32 2147483648, %v9402_v26 }
 0x188   : > { %v1854_v53 = vpop.permute.xlu0 %1853  ;;  %8324 = vpow2.f32 %v7684_v41  ;;  %2416 = vrot.lane.b32.xlu0 %v9387_v57, %s8811_s29  ;;  %v9479_v39 = vsel %vm1998_vm5, %v2041_v4, %v2045_v23  ;;  %v1211_v52 = vsel %vm9440_vm7, %v1210_v17, %v1206_v28  ;;  %v1463_v44 = vmul.f32 %v1226_v33, %v9320_v48  ;;  %vm9523_vm1 = vmor %vm1233_vm11, %vm1234_vm12 }
 0x189   : > { %v650_v6 = vpop.f32.mrf.mxu0  ;;  %v9464_v42 = vsel %vm8959_vm3, %v1854_v53, 0  ;;  %v1230_v47 = vsub.f32 1.0, %v1229_v27  ;;  %v1462_v55 = vmul.f32 %v1211_v52, %v9291_v13  ;;  %v2052_v53 = vrot.slane %v2050_v14, 1 }
 0x18a   : > { %v2265_v21 = vrot.slane %v9464_v42, 1  ;;  %v9472_v25 = vadd.f32 %v9288_v12, %v650_v6  ;;  %v1543_v54 = vpack.c.bf16 %v1463_v44, %v1463_v44  ;;  %v2055_v13 = vshll.u32 %v9464_v42, 16 }
 0x18b   : > { %v1231_v62 = vmul.f32 %v9456_v10, %v1230_v47  ;;  %v1542_v6 = vpack.c.bf16 %v1462_v55, %v1462_v55  ;;  %vm1248_vm14 = vweird.f32 %v9424_v37  ;;  %v1254_v42 = vand.u32 2147483648, %v9424_v37 }
 0x18c   : > { %v7685_v38 = vmul.f32 -1.442695, %v9472_v25  ;;  %v9489_v41 = vsel %vm2251_vm4, %v2264_v31, %v2265_v21  ;;  %v1660_v21 = vunpack.c.l.b16 %v1543_v54  ;;  %v1237_v33 = vand.u32 2147483647, %v9402_v26 }
 0x18d   : > { %v9481_v40 = vpop.eup %8322  ;;  %7770 = vmatmul.msk.bf16.gmra.mxu3 %vm2556_vm10, %v9489_v41  ;;  %v1232_v28 = vadd.f32 %v9456_v10, %v1231_v62  ;;  %v1252_v27 = vand.u32 2147483647, %v9424_v37  ;;  %v1659_v52 = vunpack.c.l.b16 %v1542_v6  ;;  %v2057_v44 = vrot.slane %v2055_v13, 1 }
 0x18e   : > { %1879 = vrot.lane.b32.xlu1 %v1778_v2, %s8811_s29  ;;  %2522 = vrot.lane.b32.xlu2 %v9479_v39, %s8811_s29  ;;  %v8325_v58 = vpop.eup %8324  ;;  %v1244_v45 = vmul.f32 %v9481_v40, %v9424_v37  ;;  %8326 = vpow2.f32 %v7685_v38  ;;  %vm1249_vm15 = vweird.f32 %v9481_v40  ;;  %v2048_v38 = vshrl.u32 %v9453_v3, 16 }
 0x18f   : > { %v9499_v59 = vadd.f32 1.0, %v8325_v58  ;;  %vm9534_vm2 = vmor %vm1248_vm14, %vm1249_vm15  ;;  %v9552_v55 = vpack.c.b16 %v1660_v21, %v1659_v52  ;;  %v1236_v6 = vsel %vm9523_vm1, %v9456_v10, %v1232_v28  ;;  %vm1238_vm6 = vcmp.eq.f32.partialorder %v1237_v33, 8.507059e+37 }
 0x190   : > { %v1245_v34 = vsub.f32 1.0, %v1244_v45  ;;  %1881 = vrot.lane.b32.xlu0 %v1775_v0, %s8811_s29  ;;  %v1240_v45 = vor.u32 1.1754944e-38, %v1239_v16  ;;  %v2053_v14 = vor.u32 %v2052_v53, %v2048_v38  ;;  %vm1253_vm7 = vcmp.eq.f32.partialorder %v1252_v27, 8.507059e+37 }
 0x191   : > { %v653_v19 = vpop.f32.mrf.mxu0  ;;  %8328 = vrcp.f32 %v9499_v59  ;;  %13244 = vst [vmem:[#allocation15_spill] sm:$0xff] %v9552_v55  ;;  %v1780_v21 = vshrl.u32 %v9552_v55, 16  ;;  %v1783_v58 = vshll.u32 %v9552_v55, 16  ;;  %vm1263_vm11 = vweird.f32 %v9499_v59 }
 0x192   : > { %v1246_v48 = vmul.f32 %v9481_v40, %v1245_v34  ;;  %v1255_v34 = vor.u32 1.1754944e-38, %v1254_v42  ;;  %v9565_v53 = vadd.f32 %v9288_v12, %v653_v19 }
 0x193   : > { %v1782_v38 = vrot.slane %v1780_v21, 7  ;;  %v1269_v21 = vand.u32 2147483648, %v9499_v59 }
 0x194   : > { %v8327_v17 = vpop.eup %8326  ;;  %v1247_v0 = vadd.f32 %v9481_v40, %v1246_v48  ;;  %v7686_v33 = vmul.f32 -1.442695, %v9565_v53 }
 0x195   : > { %v3002_v4 = vpop.f32.mrf.mxu1  ;;  %v9516_v35 = vadd.f32 1.0, %v8327_v17 }
 0x196   : > { %2346 = vrot.lane.b32.xlu2 %v9479_v39, %s8812_s23  ;;  %2454 = vrot.lane.b32.xlu1 %v9489_v41, %s8812_s23  ;;  %v1858_v20 = vpop.permute.xlu0 %1857  ;;  %v1251_v47 = vsel %vm9534_vm2, %v9481_v40, %v1247_v0  ;;  %v9568_v4 = vsel %vm1998_vm5, %v2053_v14, %v2057_v44  ;;  %v1241_v0 = vsel %vm1238_vm6, %v1240_v45, %v1236_v6  ;;  %v1862_v45 = vpop.permute.xlu2 %1861 }
 0x197   : > { %8330 = vrcp.f32 %v9516_v35  ;;  %v9543_v26 = vsel %vm8959_vm3, %v1858_v20, 0  ;;  %v9558_v62 = vpop.eup %8328  ;;  %v1256_v16 = vsel %vm1253_vm7, %v1255_v34, %v1251_v47  ;;  %v1464_v27 = vmul.f32 %v1241_v0, %v9360_v61 }
 0x198   : > { %v1856_v2 = vpop.permute.xlu1 %1855  ;;  %2488 = vrot.lane.b32.xlu0 %v9453_v3, %s8813_s24  ;;  %v2268_v40 = vrot.slane %v9543_v26, 1  ;;  %v1259_v19 = vmul.f32 %v9558_v62, %v9499_v59  ;;  %v1465_v42 = vmul.f32 %v1256_v16, %v9394_v63  ;;  %v1785_v61 = vor.u32 %v1783_v58, %v1782_v38 }
 0x199   : > { %v655_v31 = vpop.f32.mrf.mxu0  ;;  %v9550_v37 = vsel %vm8959_vm3, 0, %v1856_v2  ;;  %v1544_v63 = vpack.c.bf16 %v1464_v27, %v1464_v27  ;;  %vm1278_vm8 = vweird.f32 %v9516_v35  ;;  %vm1264_vm12 = vweird.f32 %v9558_v62 }
 0x19a   : > { %v9555_v54 = vadd.f32 %v9288_v12, %v655_v31  ;;  %v2267_v48 = vrot.slane %v9550_v37, 1  ;;  %v1260_v31 = vsub.f32 1.0, %v1259_v19  ;;  %v1545_v52 = vpack.c.bf16 %v1465_v42, %v1465_v42  ;;  %vm9628_vm15 = vmor %vm1263_vm11, %vm1264_vm12 }
 0x19b   : > { %v1284_v34 = vand.u32 2147483648, %v9516_v35  ;;  %v1661_v6 = vunpack.c.l.b16 %v1544_v63  ;;  %v1282_v16 = vand.u32 2147483647, %v9516_v35 }
 0x19c   : > { %v9575_v10 = vsel %vm2251_vm4, %v2267_v48, %v2268_v40  ;;  %v7687_v20 = vmul.f32 -1.442695, %v9555_v54  ;;  %v1662_v47 = vunpack.c.l.b16 %v1545_v52 }
 0x19d   : > { %v3004_v13 = vpop.f32.mrf.mxu1  ;;  %v9577_v17 = vpop.eup %8330  ;;  %7771 = vmatmul.msk.bf16.gmra.mxu3 %vm2556_vm10, %v9575_v10  ;;  %v1285_v52 = vor.u32 1.1754944e-38, %v1284_v34  ;;  %vm1283_vm1 = vcmp.eq.f32.partialorder %v1282_v16, 8.507059e+37 }
 0x19e   : > { %2418 = vrot.lane.b32.xlu2 %v9453_v3, %s8811_s29  ;;  %2524 = vrot.lane.b32.xlu1 %v9568_v4, %s8811_s29  ;;  %v1274_v28 = vmul.f32 %v9577_v17, %v9516_v35  ;;  %8332 = vpow2.f32 %v7687_v20  ;;  %vm1279_vm9 = vweird.f32 %v9577_v17  ;;  %v9608_v13 = vsel %vm8959_vm3, %v1862_v45, 0 }
 0x19f   : > { %8334 = vpow2.f32 %v7686_v33  ;;  %v1267_v20 = vand.u32 2147483647, %v9499_v59  ;;  %vm9617_vm14 = vmor %vm1278_vm8, %vm1279_vm9  ;;  %v2062_v33 = vshll.u32 %v9550_v37, 16  ;;  %v9622_v27 = vpack.c.b16 %v1662_v47, %v1661_v6 }
 0x1a0   : > { %2384 = vrot.lane.b32.xlu0 %v9489_v41, %s8813_s24  ;;  %v1275_v2 = vsub.f32 1.0, %v1274_v28  ;;  %v1261_v41 = vmul.f32 %v9558_v62, %v1260_v31  ;;  %v2271_v58 = vrot.slane %v9608_v13, 1  ;;  %v1270_v45 = vor.u32 1.1754944e-38, %v1269_v21  ;;  %v8050_v21 = vld [vmem:[%s13174_s3 + $0x78] sm:$0xff] }
 0x1a1   : > { %v658_v23 = vpop.f32.mrf.mxu0  ;;  %13247 = vst [vmem:[#allocation16_spill] sm:$0xff] %v9622_v27  ;;  %vm1268_vm2 = vcmp.eq.f32.partialorder %v1267_v20, 8.507059e+37  ;;  %v1787_v47 = vshrl.u32 %v9622_v27, 16  ;;  %v2060_v6 = vshrl.u32 %v9550_v37, 16  ;;  %3092 = vmatpush.bf16.msra.mxu2 %v8050_v21 }
 0x1a2   : > { %v1276_v44 = vmul.f32 %v9577_v17, %v1275_v2  ;;  %v1262_v19 = vadd.f32 %v9558_v62, %v1261_v41  ;;  %v9643_v63 = vadd.f32 %v9288_v12, %v658_v23 }
 0x1a4   : > { %v8333_v14 = vpop.eup %8332  ;;  %v1277_v40 = vadd.f32 %v9577_v17, %v1276_v44  ;;  %v1266_v23 = vsel %vm9628_vm15, %v9558_v62, %v1262_v19  ;;  %v2067_v62 = vshll.u32 %v9543_v26, 16  ;;  %v1789_v19 = vrot.slane %v1787_v47, 7  ;;  %v1864_v26 = vpop.permute.xlu2 %1863 }
 0x1a5   : > { %v8335_v0 = vpop.eup %8334  ;;  %v9632_v31 = vadd.f32 1.0, %v8333_v14  ;;  %v2064_v14 = vrot.slane %v2062_v33, 1 }
 0x1a6   : > { %1885 = vrot.lane.b32.xlu2 %v1782_v38, %s8811_s29  ;;  %2348 = vrot.lane.b32.xlu1 %v9568_v4, %s8812_s23  ;;  %v1281_v44 = vsel %vm9617_vm14, %v9577_v17, %v1277_v40  ;;  %v9649_v41 = vadd.f32 1.0, %v8335_v0  ;;  %v1271_v40 = vsel %vm1268_vm2, %v1270_v45, %v1266_v23  ;;  %v2069_v33 = vrot.slane %v2067_v62, 1 }
 0x1a7   : > { %8336 = vrcp.f32 %v9632_v31  ;;  %v1286_v34 = vsel %vm1283_vm1, %v1285_v52, %v1281_v44  ;;  %v2065_v20 = vor.u32 %v2064_v14, %v2060_v6  ;;  %v9700_v45 = vsel %vm8959_vm3, 0, %v1864_v26  ;;  %v8048_v6 = vld [vmem:[%s13174_s3 + $0x68] sm:$0xff] }
 0x1a8   : > { %1883 = vrot.lane.b32.xlu0 %v1785_v61, %s8811_s29  ;;  %8338 = vrcp.f32 %v9649_v41  ;;  %v1467_v0 = vmul.f32 %v1286_v34, %v9472_v25  ;;  %v2273_v21 = vrot.slane %v9700_v45, 1  ;;  %vm1308_vm6 = vweird.f32 %v9632_v31 }
 0x1a9   : > { %v660_v48 = vpop.f32.mrf.mxu0  ;;  %vm1293_vm8 = vweird.f32 %v9649_v41 }
 0x1aa   : > { %v1860_v28 = vpop.permute.xlu0 %1859  ;;  %v9639_v38 = vadd.f32 %v9288_v12, %v660_v48  ;;  %v7688_v48 = vmul.f32 -1.442695, %v9643_v63  ;;  %v1547_v2 = vpack.c.bf16 %v1467_v0, %v1467_v0 }
 0x1ab   : > { %v9636_v35 = vsel %vm8959_vm3, 0, %v1860_v28  ;;  %v1466_v28 = vmul.f32 %v1271_v40, %v9411_v30 }
 0x1ac   : > { %v2270_v59 = vrot.slane %v9636_v35, 1  ;;  %v7689_v17 = vmul.f32 -1.442695, %v9639_v38 }
 0x1ad   : > { %v9676_v42 = vpop.eup %8336  ;;  %v1546_v23 = vpack.c.bf16 %v1466_v28, %v1466_v28 }
 0x1ae   : > { %2490 = vrot.lane.b32.xlu2 %v9550_v37, %s8813_s24  ;;  %2420 = vrot.lane.b32.xlu1 %v9550_v37, %s8811_s29  ;;  %v9659_v61 = vsel %vm2251_vm4, %v2270_v59, %v2271_v58  ;;  %8340 = vpow2.f32 %v7689_v17  ;;  %v9682_v25 = vpop.eup %8338  ;;  %v9685_v58 = vsel %vm1998_vm5, %v2065_v20, %v2069_v33  ;;  %v8049_v59 = vld [vmem:[%s13174_s3 + $0x70] sm:$0xff]  ;;  %v1304_v30 = vmul.f32 %v9676_v42, %v9632_v31 }
 0x1af   : > { %7772 = vmatmul.msk.bf16.gmra.mxu3 %vm2556_vm10, %v9659_v61  ;;  %8342 = vpow2.f32 %v7688_v48  ;;  %v1790_v17 = vshll.u32 %v9622_v27, 16  ;;  %v1289_v14 = vmul.f32 %v9682_v25, %v9649_v41  ;;  %3093 = vmatpush.bf16.msra.mxu2 %v8049_v59  ;;  %v1664_v48 = vunpack.c.l.b16 %v1547_v2 }
 0x1b0   : > { %2456 = vrot.lane.b32.xlu0 %v9575_v10, %s8812_s23  ;;  %v1305_v40 = vsub.f32 1.0, %v1304_v30  ;;  %v1663_v28 = vunpack.c.l.b16 %v1546_v23  ;;  %v2074_v23 = vshll.u32 %v9636_v35, 16  ;;  %vm1309_vm7 = vweird.f32 %v9676_v42 }
 0x1b1   : > { %v663_v16 = vpop.f32.mrf.mxu0  ;;  %v1792_v62 = vor.u32 %v1790_v17, %v1789_v19  ;;  %v1290_v26 = vsub.f32 1.0, %v1289_v14  ;;  %vm1294_vm9 = vweird.f32 %v9682_v25  ;;  %vm9761_vm11 = vmor %vm1308_vm6, %vm1309_vm7 }
 0x1b2   : > { %v9726_v59 = vpack.c.b16 %v1664_v48, %v1663_v28  ;;  %v673_v14 = vpop.f32.mrf.mxu3  ;;  %v1299_v28 = vand.u32 2147483648, %v9649_v41  ;;  %vm9783_vm12 = vmor %vm1293_vm8, %vm1294_vm9 }
 0x1b3   : > { %3094 = vmatpush.bf16.msra.mxu2 %v8048_v6  ;;  %v1291_v17 = vmul.f32 %v9682_v25, %v1290_v26 }
 0x1b4   : > { %13250 = vst [vmem:[#allocation17_spill] sm:$0xff] %v9726_v59  ;;  %v1300_v22 = vor.u32 1.1754944e-38, %v1299_v28 }
 0x1b6   : > { %1889 = vrot.lane.b32.xlu1 %v1789_v19, %s8811_s29  ;;  %2386 = vrot.lane.b32.xlu2 %v9575_v10, %s8813_s24  ;;  %v8341_v10 = vpop.eup %8340  ;;  %v9718_v19 = vadd.f32 %v9288_v12, %v663_v16  ;;  %v1306_v16 = vmul.f32 %v9676_v42, %v1305_v40  ;;  %v1312_v40 = vand.u32 2147483647, %v9632_v31 }
 0x1b7   : > { %v8343_v47 = vpop.eup %8342  ;;  %v9709_v0 = vadd.f32 1.0, %v8341_v10 }
 0x1b8   : > { %v1866_v52 = vpop.permute.xlu1 %1865  ;;  %2526 = vrot.lane.b32.xlu0 %v9685_v58, %s8811_s29  ;;  %v9712_v33 = vadd.f32 1.0, %v8343_v47  ;;  %v8046_v47 = vld [vmem:[%s13174_s3 + $0x58] sm:$0xff]  ;;  %v1307_v6 = vadd.f32 %v9676_v42, %v1306_v16  ;;  %v1297_v16 = vand.u32 2147483647, %v9649_v41  ;;  %vm9792_vm14 = vcmp.eq.f32.partialorder %v1312_v40, 8.507059e+37 }
 0x1b9   : > { %v9694_v44 = vsel %vm8959_vm3, %v1866_v52, 0  ;;  %v665_v20 = vpop.f32.mrf.mxu0  ;;  %v8047_v52 = vld [vmem:[%s13174_s3 + $0x60] sm:$0xff]  ;;  %8344 = vrcp.f32 %v9709_v0  ;;  %vm1338_vm2 = vweird.f32 %v9709_v0 }
 0x1ba   : > { %v2274_v34 = vrot.slane %v9694_v44, 1  ;;  %v9729_v30 = vadd.f32 %v9288_v12, %v665_v20  ;;  %8346 = vrcp.f32 %v9712_v33  ;;  %v7690_v12 = vmul.f32 -1.442695, %v9718_v19  ;;  %3095 = vmatpush.bf16.msra.mxu2 %v8047_v52 }
 0x1bb   : > { %v2076_v20 = vrot.slane %v2074_v23, 1  ;;  %v2072_v23 = vshrl.u32 %v9636_v35, 16  ;;  %v1311_v55 = vsel %vm9761_vm11, %v9676_v42, %v1307_v6  ;;  %v1797_v42 = vshll.u32 %v9726_v59, 16 }
 0x1bc   : > { %v9721_v2 = vsel %vm2251_vm4, %v2273_v21, %v2274_v34  ;;  %v1314_v34 = vand.u32 2147483648, %v9632_v31  ;;  %v7691_v48 = vmul.f32 -1.442695, %v9729_v30  ;;  %v2079_v21 = vshll.u32 %v9608_v13, 16  ;;  %v8045_v31 = vld [vmem:[%s13174_s3 + $0x50] sm:$0xff] }
 0x1bd   : > { %v1292_v13 = vadd.f32 %v9682_v25, %v1291_v17  ;;  %8348 = vpow2.f32 %v7690_v12  ;;  %vm1298_vm15 = vcmp.eq.f32.partialorder %v1297_v16, 8.507059e+37  ;;  %vm1323_vm1 = vweird.f32 %v9712_v33 }
 0x1be   : > { %1887 = vrot.lane.b32.xlu2 %v1792_v62, %s8811_s29  ;;  %2492 = vrot.lane.b32.xlu1 %v9636_v35, %s8813_s24  ;;  %v1794_v62 = vshrl.u32 %v9726_v59, 16  ;;  %v1315_v17 = vor.u32 1.1754944e-38, %v1314_v34  ;;  %8350 = vpow2.f32 %v7691_v48  ;;  %v2077_v34 = vor.u32 %v2076_v20, %v2072_v23  ;;  %v8044_v20 = vld [vmem:[%s13174_s3 + $0x48] sm:$0xff] }
 0x1bf   : > { %7773 = vmatmul.msk.bf16.gmra.mxu3 %vm2556_vm10, %v9721_v2  ;;  %v9769_v52 = vpop.eup %8344  ;;  %3096 = vmatpush.bf16.msra.mxu2 %v8046_v47  ;;  %v2081_v48 = vrot.slane %v2079_v21, 1  ;;  %v1296_v6 = vsel %vm9783_vm12, %v9682_v25, %v1292_v13  ;;  %v675_v21 = vpop.f32.mrf.mxu3 }
 0x1c0   : > { %v9733_v10 = vpop.permute.xlu2 %1873  ;;  %2350 = vrot.lane.b32.xlu0 %v9685_v58, %s8812_s23  ;;  %v9777_v14 = vpop.eup %8346  ;;  %v1796_v47 = vrot.slane %v1794_v62, 7  ;;  %v1334_v62 = vmul.f32 %v9769_v52, %v9709_v0  ;;  %v1316_v28 = vsel %vm9792_vm14, %v1315_v17, %v1311_v55  ;;  %vm1339_vm6 = vweird.f32 %v9769_v52 }
 0x1c1   : > { %v1319_v40 = vmul.f32 %v9777_v14, %v9712_v33  ;;  %v9822_v23 = vsel %vm1998_vm5, %v2077_v34, %v2081_v48  ;;  %v1469_v55 = vmul.f32 %v1316_v28, %v9555_v54  ;;  %v8043_v34 = vld [vmem:[%s13174_s3 + $0x40] sm:$0xff]  ;;  %vm1324_vm7 = vweird.f32 %v9777_v14  ;;  %vm9868_vm8 = vmor %vm1338_vm2, %vm1339_vm6 }
 0x1c2   : > { %v1799_v25 = vor.u32 %v1797_v42, %v1796_v47  ;;  %v2086_v42 = vshll.u32 %v9700_v45, 16  ;;  %vm9875_vm9 = vmor %vm1323_vm1, %vm1324_vm7 }
 0x1c3   : > { %3097 = vmatpush.bf16.msra.mxu2 %v8045_v31  ;;  %v8349_v16 = vpop.eup %8348  ;;  %v1335_v31 = vsub.f32 1.0, %v1334_v62  ;;  %v1320_v17 = vsub.f32 1.0, %v1319_v40  ;;  %v1549_v40 = vpack.c.bf16 %v1469_v55, %v1469_v55 }
 0x1c4   : > { %v2088_v21 = vrot.slane %v2086_v42, 1 }
 0x1c5   : > { %v1336_v54 = vmul.f32 %v9769_v52, %v1335_v31  ;;  %v2084_v31 = vshrl.u32 %v9700_v45, 16 }
 0x1c6   : > { %2388 = vrot.lane.b32.xlu1 %v9659_v61, %s8813_s24  ;;  %2458 = vrot.lane.b32.xlu2 %v9659_v61, %s8812_s23  ;;  %v1870_v27 = vpop.permute.xlu0 %1869  ;;  %v1301_v61 = vsel %vm1298_vm15, %v1300_v22, %v1296_v6  ;;  %v9835_v22 = vadd.f32 1.0, %v8349_v16 }
 0x1c7   : > { %v9800_v41 = vsel %vm8959_vm3, %v1870_v27, 0  ;;  %3098 = vmatpush.bf16.msra.mxu2 %v8044_v20  ;;  %v1468_v62 = vmul.f32 %v1301_v61, %v9565_v53  ;;  %v1321_v20 = vmul.f32 %v9777_v14, %v1320_v17  ;;  %v2091_v53 = vshll.u32 %v9694_v44, 16 }
 0x1c8   : > { %v9787_v12 = vpop.permute.xlu2 %2484  ;;  %2422 = vrot.lane.b32.xlu0 %v9636_v35, %s8811_s29  ;;  %v1868_v7 = vpop.permute.xlu1 %1867  ;;  %v2277_v26 = vrot.slane %v9800_v41, 1  ;;  %8352 = vrcp.f32 %v9835_v22  ;;  %v1666_v44 = vunpack.c.l.b16 %v1549_v40  ;;  %vm1353_vm14 = vweird.f32 %v9835_v22 }
 0x1c9   : > { %v9812_v27 = vsel %vm8959_vm3, 0, %v1868_v7  ;;  %v8351_v7 = vpop.eup %8350  ;;  %v1548_v28 = vpack.c.bf16 %v1468_v62, %v1468_v62  ;;  %v1322_v16 = vadd.f32 %v9777_v14, %v1321_v20  ;;  %v2093_v17 = vrot.slane %v2091_v53, 1 }
 0x1ca   : > { %v2276_v13 = vrot.slane %v9812_v27, 1  ;;  %v9842_v6 = vadd.f32 1.0, %v8351_v7  ;;  %v1327_v7 = vand.u32 2147483647, %v9712_v33  ;;  %v9894_v53 = vsel %vm8959_vm3, %v9733_v10, 0 }
 0x1cb   : > { %3099 = vmatpush.bf16.msra.mxu2 %v8043_v34  ;;  %v2560_v34 = vsel %vm2556_vm10, %v8977_v32, %v9335_v15 }
 0x1cc   : > { %v9828_v29 = vsel %vm2251_vm4, %v2276_v13, %v2277_v26  ;;  %8354 = vrcp.f32 %v9842_v6  ;;  %v1329_v26 = vand.u32 2147483648, %v9712_v33  ;;  %v1342_v13 = vand.u32 2147483647, %v9709_v0 }
 0x1cd   : > { %vm1328_vm12 = vcmp.eq.f32.partialorder %v1327_v7, 8.507059e+37  ;;  %vm1368_vm1 = vweird.f32 %v9842_v6 }
 0x1ce   : > { %1891 = vrot.lane.b32.xlu1 %v1799_v25, %s8811_s29  ;;  %2528 = vrot.lane.b32.xlu2 %v9822_v23, %s8811_s29  ;;  %v1337_v25 = vadd.f32 %v9769_v52, %v1336_v54  ;;  %v2089_v54 = vor.u32 %v2088_v21, %v2084_v31  ;;  %v9886_v40 = vpop.eup %8352  ;;  %v1330_v33 = vor.u32 1.1754944e-38, %v1329_v26  ;;  %vm1343_vm11 = vcmp.eq.f32.partialorder %v1342_v13, 8.507059e+37 }
 0x1cf   : > { %7774 = vmatmul.msk.bf16.gmra.mxu3 %vm2556_vm10, %v9828_v29  ;;  %v1326_v21 = vsel %vm9875_vm9, %v9777_v14, %v1322_v16  ;;  %v2280_v13 = vrot.slane %v9894_v53, 1  ;;  %v1349_v7 = vmul.f32 %v9886_v40, %v9835_v22  ;;  %vm1354_vm15 = vweird.f32 %v9886_v40 }
 0x1d0   : > { %v9839_v48 = vpop.permute.xlu2 %2380  ;;  %1893 = vrot.lane.b32.xlu0 %v1796_v47, %s8811_s29  ;;  %v1344_v47 = vand.u32 2147483648, %v9709_v0  ;;  %v1665_v0 = vunpack.c.l.b16 %v1548_v28  ;;  %v1341_v20 = vsel %vm9868_vm8, %v9769_v52, %v1337_v25  ;;  %v9910_v10 = vsel %vm1998_vm5, %v2089_v54, %v2093_v17  ;;  %vm9963_vm6 = vmor %vm1353_vm14, %vm1354_vm15 }
 0x1d1   : > { %v1331_v16 = vsel %vm1328_vm12, %v1330_v33, %v1326_v21 }
 0x1d2   : > { %v1345_v62 = vor.u32 1.1754944e-38, %v1344_v47  ;;  %v9896_v32 = vpop.eup %8354  ;;  %v9898_v15 = vpack.c.b16 %v1666_v44, %v1665_v0  ;;  %v2596_v47 = vsel %vm508_vm0, %v2560_v34, %v9281_v1  ;;  %v1470_v34 = vmul.f32 %v1331_v16, %v9643_v63 }
 0x1d3   : > { %v1364_v1 = vmul.f32 %v9896_v32, %v9842_v6  ;;  %v1350_v0 = vsub.f32 1.0, %v1349_v7  ;;  %v2686_v63 = vsel %vm2556_vm10, %v8995_v49, %v9129_v43  ;;  %vm1369_vm2 = vweird.f32 %v9896_v32 }
 0x1d4   : > { %13261 = vst [vmem:[#allocation18_spill] sm:$0xff] %v9898_v15  ;;  %v1346_v25 = vsel %vm1343_vm11, %v1345_v62, %v1341_v20  ;;  %v1801_v31 = vshrl.u32 %v9898_v15, 16  ;;  %v1550_v21 = vpack.c.bf16 %v1470_v34, %v1470_v34  ;;  %v1359_v16 = vand.u32 2147483648, %v9835_v22  ;;  %vm9974_vm7 = vmor %vm1368_vm1, %vm1369_vm2 }
 0x1d5   : > { %v1471_v55 = vmul.f32 %v1346_v25, %v9639_v38  ;;  %v1365_v62 = vsub.f32 1.0, %v1364_v1  ;;  %v1351_v38 = vmul.f32 %v9886_v40, %v1350_v0  ;;  %v1357_v25 = vand.u32 2147483647, %v9835_v22 }
 0x1d6   : > { %2460 = vrot.lane.b32.xlu1 %v9721_v2, %s8812_s23  ;;  %2352 = vrot.lane.b32.xlu2 %v9822_v23, %s8812_s23  ;;  %v1803_v33 = vrot.slane %v1801_v31, 7  ;;  %v1374_v49 = vand.u32 2147483648, %v9842_v6  ;;  %v2739_v22 = vsel %vm508_vm0, %v2686_v63, %v9787_v12 }
 0x1d7   : > { %v1551_v20 = vpack.c.bf16 %v1471_v55, %v1471_v55  ;;  %v1352_v7 = vadd.f32 %v9886_v40, %v1351_v38  ;;  %v1372_v55 = vand.u32 2147483647, %v9842_v6  ;;  %vm1358_vm8 = vcmp.eq.f32.partialorder %v1357_v25, 8.507059e+37 }
 0x1d8   : > { %v9879_v42 = vpop.permute.xlu2 %1875  ;;  %2494 = vrot.lane.b32.xlu0 %v9700_v45, %s8813_s24  ;;  %v1375_v38 = vor.u32 1.1754944e-38, %v1374_v49  ;;  %v2096_v49 = vshrl.u32 %v9812_v27, 16 }
 0x1d9   : > { %v9972_v34 = vsel %vm8959_vm3, 0, %v9879_v42  ;;  %vm1373_vm9 = vcmp.eq.f32.partialorder %v1372_v55, 8.507059e+37 }
 0x1da   : > { %v1872_v28 = vpop.permute.xlu0 %1871  ;;  %v2282_v42 = vrot.slane %v9972_v34, 1 }
 0x1db   : > { %v9907_v52 = vsel %vm8959_vm3, 0, %v1872_v28  ;;  %v1804_v28 = vshll.u32 %v9898_v15, 16 }
 0x1dc   : > { %v2415_v26 = vpop.permute.xlu1 %2414  ;;  %v2279_v44 = vrot.slane %v9907_v52, 1 }
 0x1dd   : > { %v2634_v14 = vsel %vm2629_vm13, %v2596_v47, %v2415_v26  ;;  %v1366_v47 = vmul.f32 %v9896_v32, %v1365_v62  ;;  %v1668_v26 = vunpack.c.l.b16 %v1551_v20  ;;  %v2098_v20 = vshll.u32 %v9812_v27, 16 }
 0x1de   : > { %2530 = vrot.lane.b32.xlu1 %v9910_v10, %s8811_s29  ;;  %2424 = vrot.lane.b32.xlu2 %v9700_v45, %s8811_s29  ;;  %v9924_v61 = vsel %vm2251_vm4, %v2279_v44, %v2280_v13 }
 0x1df   : > { %3006 = vmatmul.bf16.gmra.mxu1 %v2634_v14  ;;  %7775 = vmatmul.msk.bf16.gmra.mxu3 %vm2556_vm10, %v9924_v61  ;;  %v1667_v14 = vunpack.c.l.b16 %v1550_v21  ;;  %v1367_v31 = vadd.f32 %v9896_v32, %v1366_v47  ;;  %v1356_v47 = vsel %vm9963_vm6, %v9886_v40, %v1352_v7 }
 0x1e0   : > { %v9930_v17 = vpop.permute.xlu2 %2452  ;;  %2390 = vrot.lane.b32.xlu0 %v9721_v2, %s8813_s24  ;;  %v1806_v2 = vor.u32 %v1804_v28, %v1803_v33  ;;  %v1360_v28 = vor.u32 1.1754944e-38, %v1359_v16 }
 0x1e1   : > { %v9982_v21 = vpack.c.b16 %v1668_v26, %v1667_v14  ;;  %v1371_v12 = vsel %vm9974_vm7, %v9896_v32, %v1367_v31  ;;  %v2103_v14 = vshll.u32 %v9800_v41, 16 }
 0x1e2   : > { %v9935_v54 = vpop.permute.xlu0 %2450  ;;  %v1376_v32 = vsel %vm1373_vm9, %v1375_v38, %v1371_v12 }
 0x1e3   : > { %13266 = vst [vmem:[#allocation19_spill] sm:$0xff] %v9982_v21  ;;  %v1808_v25 = vshrl.u32 %v9982_v21, 16  ;;  %v1473_v55 = vmul.f32 %v1376_v32, %v9729_v30  ;;  %v1811_v38 = vshll.u32 %v9982_v21, 16 }
 0x1e5   : > { %v1810_v0 = vrot.slane %v1808_v25, 7 }
 0x1e6   : > { %2354 = vrot.lane.b32.xlu1 %v9910_v10, %s8812_s23  ;;  %1897 = vrot.lane.b32.xlu2 %v1803_v33, %s8811_s29 }
 0x1e7   : > { %v1813_v12 = vor.u32 %v1811_v38, %v1810_v0 }
 0x1e8   : > { %v1878_v13 = vpop.permute.xlu1 %1877  ;;  %v9951_v44 = vpop.permute.xlu2 %2522  ;;  %1895 = vrot.lane.b32.xlu0 %v1806_v2, %s8811_s29  ;;  %v2100_v2 = vrot.slane %v2098_v20, 1  ;;  %v2689_v20 = vsel %vm2556_vm10, %v9380_v60, %v9935_v54 }
 0x1e9   : > { %v9957_v43 = vsel %vm8959_vm3, %v1878_v13, 0  ;;  %v1361_v13 = vsel %vm1358_vm8, %v1360_v28, %v1356_v47 }
 0x1ea   : > { %v2283_v62 = vrot.slane %v9957_v43, 1  ;;  %v2521_v33 = vpop.permute.xlu0 %2520  ;;  %v2101_v1 = vor.u32 %v2100_v2, %v2096_v49  ;;  %v1472_v31 = vmul.f32 %v1361_v13, %v9718_v19 }
 0x1eb   : > { %v2775_v6 = vsel %vm2629_vm13, %v2739_v22, %v2521_v33  ;;  %v2105_v22 = vrot.slane %v2103_v14, 1  ;;  %v1553_v33 = vpack.c.bf16 %v1473_v55, %v1473_v55 }
 0x1ec   : > { %3100 = vmatmul.bf16.vlgmr.msra.gmra.mxu2 %v2775_v6  ;;  %v9997_v63 = vsel %vm2251_vm4, %v2282_v42, %v2283_v62  ;;  %v1552_v62 = vpack.c.bf16 %v1472_v31, %v1472_v31  ;;  %v2115_v31 = vshll.u32 %v9894_v53, 16 }
 0x1ed   : > { %v10012_v41 = vsel %vm1998_vm5, %v2101_v1, %v2105_v22  ;;  %v1670_v60 = vunpack.c.l.b16 %v1553_v33 }
 0x1ee   : > { %2426 = vrot.lane.b32.xlu1 %v9812_v27, %s8811_s29  ;;  %2496 = vrot.lane.b32.xlu2 %v9812_v27, %s8813_s24  ;;  %v1669_v2 = vunpack.c.l.b16 %v1552_v62 }
 0x1ef   : > { %7776 = vmatmul.msk.bf16.gmra.mxu3 %vm2556_vm10, %v9997_v63 }
 0x1f0   : > { %v2487_v40 = vpop.permute.xlu1 %2486  ;;  %v2347_v26 = vpop.permute.xlu2 %2346  ;;  %2462 = vrot.lane.b32.xlu0 %v9828_v29, %s8812_s23 }
 0x1f1   : > { %v3200_v16 = vpop.f32.mrf.mxu3  ;;  %v2741_v28 = vsel %vm508_vm0, %v2689_v20, %v2487_v40  ;;  %v10031_v40 = vpack.c.b16 %v1670_v60, %v1669_v2  ;;  %v2564_v22 = vsel %vm2556_vm10, %v9387_v57, %v2347_v26  ;;  %v2122_v60 = vshll.u32 %v9972_v34, 16 }
 0x1f2   : > { %v2345_v7 = vpop.permute.xlu0 %2344 }
 0x1f3   : > { %v2562_v19 = vsel %vm2556_vm10, %v9317_v51, %v2345_v7  ;;  %v2778_v51 = vsel %vm2629_vm13, %v2741_v28, %v9951_v44  ;;  %13267 = vst [vmem:[#allocation20_spill] sm:$0xff] %v10031_v40  ;;  %v1815_v16 = vshrl.u32 %v10031_v40, 16  ;;  %v2117_v28 = vrot.slane %v2115_v31, 1 }
 0x1f4   : > { %v2598_v47 = vsel %vm508_vm0, %v2562_v19, %v9839_v48  ;;  %v2110_v48 = vshll.u32 %v9907_v52, 16  ;;  %v1818_v19 = vshll.u32 %v10031_v40, 16 }
 0x1f5   : > { %v1817_v20 = vrot.slane %v1815_v16, 7 }
 0x1f6   : > { %1901 = vrot.lane.b32.xlu1 %v1810_v0, %s8811_s29  ;;  %2392 = vrot.lane.b32.xlu2 %v9828_v29, %s8813_s24  ;;  %v2112_v1 = vrot.slane %v2110_v48, 1  ;;  %v2108_v0 = vshrl.u32 %v9907_v52, 16  ;;  %v2120_v48 = vshrl.u32 %v9972_v34, 16 }
 0x1f7   : > { %v1820_v57 = vor.u32 %v1818_v19, %v1817_v20 }
 0x1f8   : > { %v2383_v30 = vpop.permute.xlu1 %2382  ;;  %v2419_v6 = vpop.permute.xlu2 %2418  ;;  %2532 = vrot.lane.b32.xlu0 %v10012_v41, %s8811_s29  ;;  %v2113_v53 = vor.u32 %v2112_v1, %v2108_v0 }
 0x1f9   : > { %v3202_v29 = vpop.f32.mrf.mxu3 }
 0x1fa   : > { %v2417_v42 = vpop.permute.xlu0 %2416  ;;  %v10068_v26 = vsel %vm1998_vm5, %v2113_v53, %v2117_v28 }
 0x1fb   : > { %v2637_v54 = vsel %vm2629_vm13, %v2598_v47, %v2417_v42 }
 0x1fc   : > { %3011 = vmatmul.bf16.gmra.mxu1 %v2637_v54  ;;  %3105 = vmatmul.bf16.gmra.mxu2 %v2778_v51  ;;  %v2127_v54 = vshll.u32 %v9957_v43, 16 }
 0x1fe   : > { %1899 = vrot.lane.b32.xlu2 %v1813_v12, %s8811_s29  ;;  %2498 = vrot.lane.b32.xlu1 %v9907_v52, %s8813_s24 }
 0x200   : > { %v1880_v25 = vpop.permute.xlu1 %1879  ;;  %v1886_v13 = vpop.permute.xlu2 %1885  ;;  %2356 = vrot.lane.b32.xlu0 %v10012_v41, %s8812_s23 }
 0x201   : > { %v10038_v32 = vsel %vm8959_vm3, 0, %v1880_v25  ;;  %v2129_v25 = vrot.slane %v2127_v54, 1 }
 0x202   : > { %v1882_v44 = vpop.permute.xlu0 %1881  ;;  %v2285_v7 = vrot.slane %v10038_v32, 1  ;;  %v2134_v53 = vshll.u32 %v10038_v32, 16 }
 0x203   : > { %v10042_v14 = vsel %vm8959_vm3, %v1882_v44, 0  ;;  %v10092_v44 = vsel %vm8959_vm3, %v1886_v13, 0 }
 0x204   : > { %v2286_v49 = vrot.slane %v10042_v14, 1  ;;  %v2139_v28 = vshll.u32 %v10042_v14, 16 }
 0x206   : > { %2394 = vrot.lane.b32.xlu1 %v9924_v61, %s8813_s24  ;;  %2464 = vrot.lane.b32.xlu2 %v9924_v61, %s8812_s23  ;;  %v10053_v55 = vsel %vm2251_vm4, %v2285_v7, %v2286_v49  ;;  %v2600_v61 = vsel %vm508_vm0, %v2564_v22, %v2383_v30  ;;  %v2692_v30 = vsel %vm2556_vm10, %v9479_v39, %v9930_v17  ;;  %v2124_v39 = vrot.slane %v2122_v60, 1 }
 0x207   : > { %7777 = vmatmul.msk.bf16.gmra.mxu3 %vm2556_vm10, %v10053_v55  ;;  %v2640_v38 = vsel %vm2629_vm13, %v2600_v61, %v2419_v6  ;;  %v2289_v7 = vrot.slane %v10092_v44, 1 }
 0x208   : > { %v10060_v62 = vpop.permute.xlu2 %2490  ;;  %v2455_v33 = vpop.permute.xlu1 %2454  ;;  %2428 = vrot.lane.b32.xlu0 %v9907_v52, %s8811_s29  ;;  %v2125_v16 = vor.u32 %v2124_v39, %v2120_v48 }
 0x20a   : > { %v2489_v29 = vpop.permute.xlu0 %2488  ;;  %v10102_v31 = vsel %vm1998_vm5, %v2125_v16, %v2129_v25  ;;  %v8070_v16 = vld [vmem:[%s13176_s5 + $0x88] sm:$0xff] }
 0x20b   : > { %v2743_v42 = vsel %vm508_vm0, %v2692_v30, %v2489_v29  ;;  %v2695_v29 = vsel %vm2556_vm10, %v9568_v4, %v2455_v33  ;;  %v2141_v33 = vrot.slane %v2139_v28, 1  ;;  %5488 = vmatpush.bf16.msrb.mxu2 %v8070_v16 }
 0x20c   : > { %3016 = vmatmul.bf16.gmra.mxu1 %v2640_v38  ;;  %v2745_v4 = vsel %vm508_vm0, %v2695_v29, %v10060_v62 }
 0x20e   : > { %1903 = vrot.lane.b32.xlu1 %v1820_v57, %s8811_s29  ;;  %2534 = vrot.lane.b32.xlu2 %v10068_v26, %s8811_s29 }
 0x210   : > { %v2525_v47 = vpop.permute.xlu1 %2524  ;;  %v10077_v12 = vpop.permute.xlu2 %2386  ;;  %1905 = vrot.lane.b32.xlu0 %v1817_v20, %s8811_s29 }
 0x211   : > { %v2781_v6 = vsel %vm2629_vm13, %v2743_v42, %v2525_v47  ;;  %v2132_v47 = vshrl.u32 %v10038_v32, 16 }
 0x212   : > { %3110 = vmatmul.bf16.gmra.mxu2 %v2781_v6  ;;  %v2385_v2 = vpop.permute.xlu0 %2384 }
 0x216   : > { %2466 = vrot.lane.b32.xlu1 %v9997_v63, %s8812_s23  ;;  %2358 = vrot.lane.b32.xlu2 %v10068_v26, %s8812_s23 }
 0x218   : > { %v2349_v17 = vpop.permute.xlu1 %2348  ;;  %v1888_v51 = vpop.permute.xlu2 %1887  ;;  %2500 = vrot.lane.b32.xlu0 %v9972_v34, %s8813_s24 }
 0x219   : > { %v2566_v1 = vsel %vm2556_vm10, %v9453_v3, %v2349_v17  ;;  %v10136_v42 = vsel %vm8959_vm3, 0, %v1888_v51 }
 0x21a   : > { %v1884_v43 = vpop.permute.xlu0 %1883  ;;  %v2602_v3 = vsel %vm508_vm0, %v2566_v1, %v2385_v2  ;;  %v2291_v54 = vrot.slane %v10136_v42, 1  ;;  %v10170_v1 = vpop.f32.mrf.mxu3 }
 0x21b   : > { %v10096_v49 = vsel %vm8959_vm3, 0, %v1884_v43 }
 0x21c   : > { %v2288_v0 = vrot.slane %v10096_v49, 1  ;;  %v2146_v25 = vshll.u32 %v10096_v49, 16 }
 0x21e   : > { %2536 = vrot.lane.b32.xlu1 %v10102_v31, %s8811_s29  ;;  %2430 = vrot.lane.b32.xlu2 %v9972_v34, %s8811_s29  ;;  %v10110_v13 = vsel %vm2251_vm4, %v2288_v0, %v2289_v7  ;;  %v2148_v43 = vrot.slane %v2146_v25, 1  ;;  %v2151_v7 = vshll.u32 %v10092_v44, 16  ;;  %v2144_v0 = vshrl.u32 %v10096_v49, 16 }
 0x21f   : > { %7778 = vmatmul.msk.bf16.gmra.mxu3 %vm2556_vm10, %v10110_v13 }
 0x220   : > { %v2421_v22 = vpop.permute.xlu1 %2420  ;;  %v10114_v20 = vpop.permute.xlu2 %2458  ;;  %2396 = vrot.lane.b32.xlu0 %v9997_v63, %s8813_s24  ;;  %v2136_v63 = vrot.slane %v2134_v53, 1  ;;  %v2149_v29 = vor.u32 %v2148_v43, %v2144_v0  ;;  %v2153_v44 = vrot.slane %v2151_v7, 1  ;;  %v2156_v7 = vshrl.u32 %v10136_v42, 16 }
 0x221   : > { %v2643_v19 = vsel %vm2629_vm13, %v2602_v3, %v2421_v22 }
 0x222   : > { %3021 = vmatmul.bf16.gmra.mxu1 %v2643_v19  ;;  %v2457_v61 = vpop.permute.xlu0 %2456  ;;  %v2137_v60 = vor.u32 %v2136_v63, %v2132_v47 }
 0x223   : > { %v2698_v22 = vsel %vm2556_vm10, %v9685_v58, %v2457_v61  ;;  %v10188_v61 = vsel %vm1998_vm5, %v2149_v29, %v2153_v44 }
 0x224   : > { %v10154_v51 = vsel %vm1998_vm5, %v2137_v60, %v2141_v33  ;;  %v2158_v33 = vshll.u32 %v10136_v42, 16 }
 0x226   : > { %2360 = vrot.lane.b32.xlu1 %v10102_v31, %s8812_s23  ;;  %2502 = vrot.lane.b32.xlu2 %v10038_v32, %s8813_s24  ;;  %v2160_v25 = vrot.slane %v2158_v33, 1 }
 0x228   : > { %v1890_v38 = vpop.permute.xlu1 %1889  ;;  %v2529_v57 = vpop.permute.xlu2 %2528  ;;  %2468 = vrot.lane.b32.xlu0 %v10053_v55, %s8812_s23 }
 0x229   : > { %v10130_v30 = vsel %vm8959_vm3, %v1890_v38, 0 }
 0x22a   : > { %v2292_v14 = vrot.slane %v10130_v30, 1  ;;  %v2527_v6 = vpop.permute.xlu0 %2526 }
 0x22b   : > { %v2784_v2 = vsel %vm2629_vm13, %v2745_v4, %v2527_v6  ;;  %v10194_v6 = vpop.f32.mrf.mxu3 }
 0x22c   : > { %3115 = vmatmul.bf16.gmra.mxu2 %v2784_v2  ;;  %v10149_v39 = vsel %vm2251_vm4, %v2291_v54, %v2292_v14  ;;  %v2163_v2 = vshll.u32 %v10130_v30, 16 }
 0x22e   : > { %2432 = vrot.lane.b32.xlu1 %v10038_v32, %s8811_s29  ;;  %2398 = vrot.lane.b32.xlu2 %v10053_v55, %s8813_s24  ;;  %v8060_v55 = vld [vmem:[%s13176_s5 + $0x38] sm:$0xff]  ;;  %v2165_v43 = vrot.slane %v2163_v2, 1 }
 0x22f   : > { %7779 = vmatmul.msk.bf16.gmra.mxu3 %vm2556_vm10, %v10149_v39 }
 0x230   : > { %v2493_v62 = vpop.permute.xlu1 %2492  ;;  %v2353_v17 = vpop.permute.xlu2 %2352  ;;  %2538 = vrot.lane.b32.xlu0 %v10154_v51, %s8811_s29  ;;  %5304 = vmatpush.bf16.msra.mxu3 %v8060_v55 }
 0x231   : > { %v2747_v28 = vsel %vm508_vm0, %v2698_v22, %v2493_v62 }
 0x232   : > { %v2351_v48 = vpop.permute.xlu0 %2350  ;;  %v2787_v58 = vsel %vm2629_vm13, %v2747_v28, %v2529_v57 }
 0x233   : > { %v2568_v3 = vsel %vm2556_vm10, %v9550_v37, %v2351_v48  ;;  %v8068_v37 = vld [vmem:[%s13176_s5 + $0x78] sm:$0xff]  ;;  %v2570_v48 = vsel %vm2556_vm10, %v9636_v35, %v2353_v17  ;;  %v10224_v0 = vpop.f32.mrf.mxu3 }
 0x234   : > { %v2604_v63 = vsel %vm508_vm0, %v2568_v3, %v10077_v12  ;;  %5393 = vmatpush.bf16.msrb.mxu1 %v8068_v37  ;;  %v2161_v3 = vor.u32 %v2160_v25, %v2156_v7 }
 0x236   : > { %2504 = vrot.lane.b32.xlu1 %v10096_v49, %s8813_s24  ;;  %2470 = vrot.lane.b32.xlu2 %v10110_v13, %s8812_s23  ;;  %v10228_v17 = vsel %vm1998_vm5, %v2161_v3, %v2165_v43 }
 0x238   : > { %v2389_v19 = vpop.permute.xlu1 %2388  ;;  %v2425_v53 = vpop.permute.xlu2 %2424  ;;  %1907 = vrot.lane.b32.xlu0 %v8929_v9, %s8811_s29 }
 0x239   : > { %v2606_v16 = vsel %vm508_vm0, %v2570_v48, %v2389_v19  ;;  %v2701_v19 = vsel %vm2556_vm10, %v9822_v23, %v10114_v20 }
 0x23a   : > { %v2423_v38 = vpop.permute.xlu0 %2422  ;;  %v2649_v35 = vsel %vm2629_vm13, %v2606_v16, %v2425_v53 }
 0x23b   : > { %v2646_v47 = vsel %vm2629_vm13, %v2604_v63, %v2423_v38 }
 0x23c   : > { %3026 = vmatmul.bf16.gmra.mxu1 %v2646_v47  ;;  %3120 = vmatmul.bf16.gmra.mxu2 %v2787_v58  ;;  %v10244_v47 = vpop.f32.mrf.mxu3 }
 0x23e   : > { %2400 = vrot.lane.b32.xlu1 %v10110_v13, %s8813_s24  ;;  %2540 = vrot.lane.b32.xlu2 %v10188_v61, %s8811_s29 }
 0x240   : > { %v1892_v12 = vpop.permute.xlu1 %1891  ;;  %v1898_v14 = vpop.permute.xlu2 %1897  ;;  %2362 = vrot.lane.b32.xlu0 %v10154_v51, %s8812_s23 }
 0x241   : > { %v10200_v57 = vsel %vm8959_vm3, 0, %v1892_v12  ;;  %v8059_v12 = vld [vmem:[%s13176_s5 + $0x30] sm:$0xff] }
 0x242   : > { %v1894_v4 = vpop.permute.xlu0 %1893  ;;  %v2294_v54 = vrot.slane %v10200_v57, 1  ;;  %v2170_v63 = vshll.u32 %v10200_v57, 16  ;;  %v2168_v33 = vshrl.u32 %v10200_v57, 16  ;;  %5305 = vmatpush.bf16.msra.mxu3 %v8059_v12 }
 0x243   : > { %v1992_v13 = vsel %vm8959_vm3, %v1894_v4, 0  ;;  %v1993_v4 = vsel %vm8959_vm3, %v1898_v14, 0 }
 0x244   : > { %v2295_v60 = vrot.slane %v1992_v13, 1  ;;  %v2175_v23 = vshll.u32 %v1992_v13, 16  ;;  %v2172_v37 = vrot.slane %v2170_v63, 1  ;;  %v2298_v25 = vrot.slane %v1993_v4, 1  ;;  %v10269_v14 = vpop.f32.mrf.mxu3 }
 0x246   : > { %2472 = vrot.lane.b32.xlu1 %v10149_v39, %s8812_s23  ;;  %1909 = vrot.lane.b32.xlu2 %v8924_v8, %s8811_s29  ;;  %v10212_v62 = vsel %vm2251_vm4, %v2294_v54, %v2295_v60  ;;  %v2177_v60 = vrot.slane %v2175_v23, 1  ;;  %v2173_v54 = vor.u32 %v2172_v37, %v2168_v33 }
 0x247   : > { %7780 = vmatmul.msk.bf16.gmra.mxu3 %vm2556_vm10, %v10212_v62 }
 0x248   : > { %v2461_v30 = vpop.permute.xlu1 %2460  ;;  %v10218_v55 = vpop.permute.xlu2 %2496  ;;  %2434 = vrot.lane.b32.xlu0 %v10096_v49, %s8811_s29 }
 0x24a   : > { %v2495_v22 = vpop.permute.xlu0 %2494 }
 0x24b   : > { %v2749_v28 = vsel %vm508_vm0, %v2701_v19, %v2495_v22 }
 0x24c   : > { %3031 = vmatmul.bf16.gmra.mxu1 %v2649_v35  ;;  %v10293_v37 = vpop.f32.mrf.mxu3 }
 0x24e   : > { %2542 = vrot.lane.b32.xlu1 %v10228_v17, %s8811_s29  ;;  %2364 = vrot.lane.b32.xlu2 %v10188_v61, %s8812_s23 }
 0x250   : > { %v2531_v29 = vpop.permute.xlu1 %2530  ;;  %v10238_v44 = vpop.permute.xlu2 %2392  ;;  %2506 = vrot.lane.b32.xlu0 %v10136_v42, %s8813_s24 }
 0x251   : > { %v2790_v53 = vsel %vm2629_vm13, %v2749_v28, %v2531_v29 }
 0x252   : > { %3125 = vmatmul.bf16.gmra.mxu2 %v2790_v53  ;;  %v2391_v38 = vpop.permute.xlu0 %2390  ;;  %v2187_v53 = vshll.u32 %v1993_v4, 16 }
 0x254   : > { %v2189_v4 = vrot.slane %v2187_v53, 1 }
 0x256   : > { %2366 = vrot.lane.b32.xlu1 %v10228_v17, %s8812_s23  ;;  %2436 = vrot.lane.b32.xlu2 %v10136_v42, %s8811_s29 }
 0x258   : > { %v2355_v20 = vpop.permute.xlu1 %2354  ;;  %v1900_v58 = vpop.permute.xlu2 %1899  ;;  %2474 = vrot.lane.b32.xlu0 %v10212_v62, %s8812_s23 }
 0x259   : > { %v2572_v48 = vsel %vm2556_vm10, %v9700_v45, %v2355_v20  ;;  %v10279_v45 = vsel %vm1998_vm5, %v2173_v54, %v2177_v60 }
 0x25a   : > { %v1896_v2 = vpop.permute.xlu0 %1895  ;;  %v2608_v3 = vsel %vm508_vm0, %v2572_v48, %v2391_v38  ;;  %v2704_v38 = vsel %vm2556_vm10, %v9910_v10, %v2461_v30 }
 0x25b   : > { %v10260_v13 = vsel %vm8959_vm3, 0, %v1896_v2  ;;  %v10301_v2 = vsel %vm8959_vm3, 0, %v1900_v58  ;;  %v2751_v60 = vsel %vm508_vm0, %v2704_v38, %v10218_v55 }
 0x25c   : > { %v2297_v43 = vrot.slane %v10260_v13, 1  ;;  %v2182_v19 = vshll.u32 %v10260_v13, 16  ;;  %v2180_v63 = vshrl.u32 %v10260_v13, 16  ;;  %13268 = vst [vmem:[#allocation21_spill] sm:$0xff] %v10301_v2  ;;  %v2300_v48 = vrot.slane %v10301_v2, 1 }
 0x25e   : > { %2438 = vrot.lane.b32.xlu1 %v10200_v57, %s8811_s29  ;;  %2508 = vrot.lane.b32.xlu2 %v10200_v57, %s8813_s24  ;;  %v10272_v16 = vsel %vm2251_vm4, %v2297_v43, %v2298_v25  ;;  %v2184_v29 = vrot.slane %v2182_v19, 1 }
 0x25f   : > { %7781 = vmatmul.msk.bf16.gmra.mxu3 %vm2556_vm10, %v10272_v16 }
 0x260   : > { %v2427_v7 = vpop.permute.xlu1 %2426  ;;  %v10276_v22 = vpop.permute.xlu2 %2464  ;;  %2544 = vrot.lane.b32.xlu0 %v10279_v45, %s8811_s29  ;;  %v2185_v33 = vor.u32 %v2184_v29, %v2180_v63 }
 0x261   : > { %v2652_v35 = vsel %vm2629_vm13, %v2608_v3, %v2427_v7  ;;  %v10321_v7 = vpop.f32.mrf.mxu3 }
 0x262   : > { %3036 = vmatmul.bf16.gmra.mxu1 %v2652_v35  ;;  %v2463_v28 = vpop.permute.xlu0 %2462  ;;  %v10307_v25 = vsel %vm1998_vm5, %v2185_v33, %v2189_v4  ;;  %v2194_v35 = vshll.u32 %v10301_v2, 16 }
 0x263   : > { %v2707_v53 = vsel %vm2556_vm10, %v10012_v41, %v2463_v28 }
 0x264   : > { %v2196_v29 = vrot.slane %v2194_v35, 1 }
 0x266   : > { %2510 = vrot.lane.b32.xlu1 %v10260_v13, %s8813_s24  ;;  %2476 = vrot.lane.b32.xlu2 %v10272_v16, %s8812_s23 }
 0x268   : > { %v1902_v23 = vpop.permute.xlu1 %1901  ;;  %v2535_v20 = vpop.permute.xlu2 %2534  ;;  %2402 = vrot.lane.b32.xlu0 %v10149_v39, %s8813_s24 }
 0x269   : > { %v1994_v12 = vsel %vm8959_vm3, %v1902_v23, 0 }
 0x26a   : > { %v2301_v10 = vrot.slane %v1994_v12, 1  ;;  %v2533_v30 = vpop.permute.xlu0 %2532  ;;  %v2199_v19 = vshll.u32 %v1994_v12, 16  ;;  %v2192_v12 = vshrl.u32 %v10301_v2, 16 }
 0x26b   : > { %v2793_v54 = vsel %vm2629_vm13, %v2751_v60, %v2533_v30  ;;  %v10339_v30 = vld [vmem:[%s13175_s4] ss:$0 sm:$0xff] }
 0x26c   : > { %3130 = vmatmul.bf16.gmra.mxu2 %v2793_v54  ;;  %v10315_v39 = vsel %vm2251_vm4, %v2300_v48, %v2301_v10  ;;  %v2201_v33 = vrot.slane %v2199_v19, 1  ;;  %v3007_v10 = vpop.f32.mrf.mxu1  ;;  %v2197_v28 = vor.u32 %v2196_v29, %v2192_v12  ;;  %v8067_v12 = vld [vmem:[%s13176_s5 + $0x70] sm:$0xff] }
 0x26d   : > { %5394 = vmatpush.bf16.msrb.mxu1 %v8067_v12 }
 0x26e   : > { %1913 = vrot.lane.b32.xlu1 %v8924_v8, %s8811_s29  ;;  %2546 = vrot.lane.b32.xlu2 %v10307_v25, %s8811_s29 }
 0x26f   : > { %v3101_v55 = vpop.f32.mrf.mxu2  ;;  %7782 = vmatmul.msk.bf16.gmra.mxu3 %vm2556_vm10, %v10315_v39 }
 0x270   : > { %v2499_v58 = vpop.permute.xlu1 %2498  ;;  %v2359_v43 = vpop.permute.xlu2 %2358  ;;  %2368 = vrot.lane.b32.xlu0 %v10279_v45, %s8812_s23 }
 0x271   : > { %v2753_v4 = vsel %vm508_vm0, %v2707_v53, %v2499_v58  ;;  %v10345_v55 = vpop.f32.mrf.mxu3  ;;  %v10348_v58 = vsel %vm1998_vm5, %v2197_v28, %v2201_v33 }
 0x272   : > { %v2357_v3 = vpop.permute.xlu0 %2356  ;;  %v2796_v48 = vsel %vm2629_vm13, %v2753_v4, %v2535_v20 }
 0x273   : > { %v2574_v63 = vsel %vm2556_vm10, %v9812_v27, %v2357_v3 }
 0x274   : > { %v2610_v27 = vsel %vm508_vm0, %v2574_v63, %v10238_v44  ;;  %v3008_v44 = vadd.f32 %v10339_v30, %v3007_v10 }
 0x276   : > { %2478 = vrot.lane.b32.xlu1 %v10315_v39, %s8812_s23  ;;  %1911 = vrot.lane.b32.xlu2 %v8929_v9, %s8811_s29 }
 0x277   : > { %v3103_v38 = vpop.f32.mrf.mxu2 }
 0x278   : > { %v2395_v23 = vpop.permute.xlu1 %2394  ;;  %v2431_v60 = vpop.permute.xlu2 %2430  ;;  %2440 = vrot.lane.b32.xlu0 %v10260_v13, %s8811_s29 }
 0x279   : > { %v3009_v38 = vpop.f32.mrf.mxu1 }
 0x27a   : > { %v2429_v41 = vpop.permute.xlu0 %2428 }
 0x27b   : > { %v2655_v54 = vsel %vm2629_vm13, %v2610_v27, %v2429_v41  ;;  %v3010_v27 = vadd.f32 %v10339_v30, %v3009_v38 }
 0x27c   : > { %3041 = vmatmul.bf16.gmra.mxu1 %v2655_v54  ;;  %3135 = vmatmul.bf16.gmra.mxu2 %v2796_v48  ;;  %v2576_v54 = vsel %vm2556_vm10, %v9907_v52, %v2359_v43 }
 0x27e   : > { %2548 = vrot.lane.b32.xlu1 %v10348_v58, %s8811_s29  ;;  %2404 = vrot.lane.b32.xlu2 %v10212_v62, %s8813_s24 }
 0x27f   : > { %v3106_v3 = vpop.f32.mrf.mxu2 }
 0x280   : > { %v1904_v35 = vpop.permute.xlu1 %1903  ;;  %v3107_v19 = vadd.f32 %v3106_v3, %v3008_v44  ;;  %v10359_v29 = vpop.permute.xlu2 %2502  ;;  %2512 = vrot.lane.b32.xlu0 %v10301_v2, %s8813_s24 }
 0x281   : > { %v10357_v20 = vsel %vm8959_vm3, 0, %v1904_v35  ;;  %v2612_v35 = vsel %vm508_vm0, %v2576_v54, %v2395_v23 }
 0x282   : > { %v10364_v53 = vadd.f32 %v10170_v1, %v3107_v19  ;;  %v1906_v63 = vpop.permute.xlu0 %1905  ;;  %v2206_v33 = vshll.u32 %v10357_v20, 16  ;;  %v2303_v41 = vrot.slane %v10357_v20, 1  ;;  %v10378_v1 = vpop.f32.mrf.mxu3  ;;  %v2204_v38 = vshrl.u32 %v10357_v20, 16 }
 0x283   : > { %v1995_v62 = vsel %vm8959_vm3, %v1906_v63, 0 }
 0x284   : > { %v7788_v4 = vmul.f32 -1.442695, %v10364_v53  ;;  %v2304_v10 = vrot.slane %v1995_v62, 1  ;;  %v2211_v48 = vshll.u32 %v1995_v62, 16 }
 0x286   : > { %2370 = vrot.lane.b32.xlu1 %v10307_v25, %s8812_s23  ;;  %2406 = vrot.lane.b32.xlu2 %v10272_v16, %s8813_s24  ;;  %8356 = vpow2.f32 %v7788_v4  ;;  %v10382_v28 = vsel %vm2251_vm4, %v2303_v41, %v2304_v10  ;;  %v2208_v16 = vrot.slane %v2206_v33, 1  ;;  %v2213_v62 = vrot.slane %v2211_v48, 1  ;;  %v3012_v33 = vpop.f32.mrf.mxu1 }
 0x287   : > { %v3108_v44 = vpop.f32.mrf.mxu2  ;;  %7783 = vmatmul.msk.bf16.gmra.mxu3 %vm2556_vm10, %v10382_v28  ;;  %v2658_v4 = vsel %vm2629_vm13, %v2612_v35, %v2431_v60 }
 0x288   : > { %v10388_v3 = vpop.permute.xlu1 %2466  ;;  %v3109_v19 = vadd.f32 %v3108_v44, %v3010_v27  ;;  %v10391_v63 = vpop.permute.xlu2 %2398  ;;  %2442 = vrot.lane.b32.xlu0 %v10301_v2, %s8811_s29  ;;  %v2209_v12 = vor.u32 %v2208_v16, %v2204_v38 }
 0x28a   : > { %v10397_v52 = vadd.f32 %v10194_v6, %v3109_v19  ;;  %v2501_v43 = vpop.permute.xlu0 %2500  ;;  %v2710_v6 = vsel %vm2556_vm10, %v10068_v26, %v10276_v22  ;;  %v10413_v54 = vsel %vm1998_vm5, %v2209_v12, %v2213_v62  ;;  %v10415_v48 = vpop.f32.mrf.mxu3  ;;  %v3013_v22 = vadd.f32 %v10339_v30, %v3012_v33 }
 0x28b   : > { %v2755_v60 = vsel %vm508_vm0, %v2710_v6, %v2501_v43 }
 0x28c   : > { %v8357_v10 = vpop.eup %8356  ;;  %v7789_v23 = vmul.f32 -1.442695, %v10397_v52  ;;  %3046 = vmatmul.bf16.gmra.mxu1 %v2658_v4 }
 0x28d   : > { %v10401_v41 = vadd.f32 1.0, %v8357_v10 }
 0x28e   : > { %2514 = vrot.lane.b32.xlu2 %v10357_v20, %s8813_s24  ;;  %2480 = vrot.lane.b32.xlu1 %v10382_v28, %s8812_s23  ;;  %8358 = vpow2.f32 %v7789_v23  ;;  %v3014_v12 = vpop.f32.mrf.mxu1 }
 0x28f   : > { %8360 = vrcp.f32 %v10401_v41  ;;  %vm3469_vm12 = vweird.f32 %v10401_v41  ;;  %v3473_v15 = vand.u32 2147483647, %v10401_v41 }
 0x290   : > { %v2537_v27 = vpop.permute.xlu1 %2536  ;;  %v10417_v44 = vpop.permute.xlu2 %2470  ;;  %2550 = vrot.lane.b32.xlu0 %v10413_v54, %s8811_s29 }
 0x291   : > { %v2799_v16 = vsel %vm2629_vm13, %v2755_v60, %v2537_v27  ;;  %vm3474_vm15 = vcmp.eq.f32.partialorder %v3473_v15, 8.507059e+37  ;;  %v8066_v15 = vld [vmem:[%s13176_s5 + $0x68] sm:$0xff] }
 0x292   : > { %3140 = vmatmul.bf16.gmra.mxu2 %v2799_v16  ;;  %v2397_v26 = vpop.permute.xlu0 %2396  ;;  %v10434_v60 = vpop.f32.mrf.mxu3  ;;  %5395 = vmatpush.bf16.msrb.mxu1 %v8066_v15 }
 0x294   : > { %v8359_v35 = vpop.eup %8358 }
 0x295   : > { %v3111_v19 = vpop.f32.mrf.mxu2  ;;  %v8361_v38 = vpop.eup %8360  ;;  %v10423_v43 = vadd.f32 1.0, %v8359_v35  ;;  %v8058_v35 = vld [vmem:[%s13176_s5 + $0x28] sm:$0xff] }
 0x296   : > { %v3112_v62 = vadd.f32 %v3111_v19, %v3013_v22  ;;  %2372 = vrot.lane.b32.xlu1 %v10348_v58, %s8812_s23  ;;  %v3465_v4 = vmul.f32 %v8361_v38, %v10401_v41  ;;  %v3015_v19 = vadd.f32 %v10339_v30, %v3014_v12  ;;  %vm3470_vm11 = vweird.f32 %v8361_v38  ;;  %5306 = vmatpush.bf16.msra.mxu3 %v8058_v35 }
 0x297   : > { %8362 = vrcp.f32 %v10423_v43  ;;  %v2713_v12 = vsel %vm2556_vm10, %v10102_v31, %v10388_v3  ;;  %vm10452_vm14 = vmor %vm3469_vm12, %vm3470_vm11  ;;  %v3490_v31 = vand.u32 2147483648, %v10423_v43  ;;  %vm3484_vm2 = vweird.f32 %v10423_v43 }
 0x298   : > { %v2361_v10 = vpop.permute.xlu1 %2360  ;;  %v3466_v23 = vsub.f32 1.0, %v3465_v4  ;;  %v10430_v6 = vadd.f32 %v10224_v0, %v3112_v62  ;;  %v10432_v33 = vpop.permute.xlu2 %2540 }
 0x299   : > { %v2578_v0 = vsel %vm2556_vm10, %v9972_v34, %v2361_v10 }
 0x29a   : > { %v3467_v27 = vmul.f32 %v8361_v38, %v3466_v23  ;;  %v7790_v16 = vmul.f32 -1.442695, %v10430_v6  ;;  %v10437_v22 = vpop.permute.xlu0 %2468  ;;  %v3475_v23 = vand.u32 2147483648, %v10401_v41 }
 0x29c   : > { %v3468_v40 = vadd.f32 %v8361_v38, %v3467_v27  ;;  %8364 = vpow2.f32 %v7790_v16  ;;  %v2614_v16 = vsel %vm508_vm0, %v2578_v0, %v2397_v26  ;;  %v3476_v24 = vor.u32 1.1754944e-38, %v3475_v23  ;;  %v10471_v27 = vpop.f32.mrf.mxu3 }
 0x29d   : > { %v3113_v62 = vpop.f32.mrf.mxu2  ;;  %v8363_v4 = vpop.eup %8362 }
 0x29e   : > { %v3114_v21 = vadd.f32 %v3113_v62, %v3015_v19  ;;  %v3480_v59 = vmul.f32 %v8363_v4, %v10423_v43  ;;  %v3472_v35 = vsel %vm10452_vm14, %v8361_v38, %v3468_v40  ;;  %v3017_v19 = vpop.f32.mrf.mxu1  ;;  %vm3485_vm1 = vweird.f32 %v8363_v4 }
 0x29f   : > { %v3488_v40 = vand.u32 2147483647, %v10423_v43  ;;  %v3477_v38 = vsel %vm3474_vm15, %v3476_v24, %v3472_v35  ;;  %vm3486_vm6 = vmor %vm3484_vm2, %vm3485_vm1 }
 0x2a0   : > { %v10457_v34 = vadd.f32 %v10244_v47, %v3114_v21  ;;  %v2433_v10 = vpop.permute.xlu1 %2432  ;;  %v3481_v41 = vsub.f32 1.0, %v3480_v59  ;;  %v1910_v62 = vpop.permute.xlu2 %1909  ;;  %v2757_v21 = vsel %vm508_vm0, %v2713_v12, %v10359_v29  ;;  %v3976_v24 = vmul.f32 %v3477_v38, %v10364_v53 }
 0x2a1   : > { %v2661_v11 = vsel %vm2629_vm13, %v2614_v16, %v2433_v10  ;;  %vm3489_vm7 = vcmp.eq.f32.partialorder %v3488_v40, 8.507059e+37  ;;  %v10482_v12 = vsel %vm8959_vm3, 0, %v8929_v9  ;;  %v10495_v40 = vsel %vm8959_vm3, %v8924_v8, 0 }
 0x2a2   : > { %v7791_v3 = vmul.f32 -1.442695, %v10457_v34  ;;  %3051 = vmatmul.bf16.gmra.mxu1 %v2661_v11  ;;  %v8365_v47 = vpop.eup %8364  ;;  %v3482_v26 = vmul.f32 %v8363_v4, %v3481_v41  ;;  %v2539_v59 = vpop.permute.xlu0 %2538  ;;  %v3491_v11 = vor.u32 1.1754944e-38, %v3490_v31  ;;  %v4410_v53 = vshll.u32 %v10482_v12, 16 }
 0x2a3   : > { %v10468_v0 = vadd.f32 1.0, %v8365_v47  ;;  %v2802_v23 = vsel %vm2629_vm13, %v2757_v21, %v2539_v59  ;;  %v3018_v59 = vadd.f32 %v10339_v30, %v3017_v19  ;;  %v2716_v8 = vsel %vm2556_vm10, %v10154_v51, %v10437_v22 }
 0x2a4   : > { %8366 = vpow2.f32 %v7791_v3  ;;  %v3483_v10 = vadd.f32 %v8363_v4, %v3482_v26  ;;  %3145 = vmatmul.bf16.gmra.mxu2 %v2802_v23  ;;  %v1996_v3 = vsel %vm8959_vm3, %v1910_v62, 0  ;;  %v4408_v62 = vshrl.u32 %v10482_v12, 16 }
 0x2a5   : > { %8368 = vrcp.f32 %v10468_v0  ;;  %v2314_v19 = vshll.u32 %v1996_v3, 16  ;;  %v4412_v15 = vrot.slane %v4410_v53, 1  ;;  %v3503_v56 = vand.u32 2147483647, %v10468_v0 }
 0x2a6   : > { %v3487_v29 = vsel %vm3486_vm6, %v8363_v4, %v3483_v10  ;;  %v4048_v4 = vpack.c.bf16 %v3976_v24, %v3976_v24  ;;  %v3019_v47 = vpop.f32.mrf.mxu1  ;;  %v4415_v24 = vshll.u32 %v10495_v40, 16  ;;  %vm3499_vm9 = vweird.f32 %v10468_v0 }
 0x2a7   : > { %v3492_v16 = vsel %vm3489_vm7, %v3491_v11, %v3487_v29  ;;  %v2321_v11 = vrot.slane %v1996_v3, 1  ;;  %v10511_v29 = vpop.f32.mrf.mxu3  ;;  %v2316_v5 = vrot.slane %v2314_v19, 1  ;;  %vm3504_vm12 = vcmp.eq.f32.partialorder %v3503_v56, 8.507059e+37 }
 0x2a8   : > { %v2505_v43 = vpop.permute.xlu1 %2504  ;;  %v3977_v35 = vmul.f32 %v3492_v16, %v10397_v52  ;;  %v10485_v41 = vpop.permute.xlu2 %2364  ;;  %13271 = vst [vmem:[#allocation22_spill] sm:$0xff] %v10511_v29  ;;  %v4157_v16 = vunpack.c.l.b16 %v4048_v4 }
 0x2a9   : > { %v2759_v46 = vsel %vm508_vm0, %v2716_v8, %v2505_v43  ;;  %v4417_v8 = vrot.slane %v4415_v24, 1 }
 0x2aa   : > { %v8367_v31 = vpop.eup %8366  ;;  %v4049_v21 = vpack.c.bf16 %v3977_v35, %v3977_v35  ;;  %v1908_v9 = vpop.permute.xlu0 %1907 }
 0x2ab   : > { %v10490_v26 = vadd.f32 1.0, %v8367_v31  ;;  %v8369_v52 = vpop.eup %8368  ;;  %v10500_v38 = vsel %vm8959_vm3, 0, %v1908_v9  ;;  %v3505_v9 = vand.u32 2147483648, %v10468_v0 }
 0x2ac   : > { %v4158_v23 = vunpack.c.l.b16 %v4049_v21  ;;  %v3495_v10 = vmul.f32 %v8369_v52, %v10468_v0  ;;  %2516 = vrot.lane.b32.xlu2 %v10500_v38, %s8813_s24  ;;  %v2309_v31 = vshll.u32 %v10500_v38, 16  ;;  %v2320_v21 = vrot.slane %v10500_v38, 1 }
 0x2ad   : > { %8370 = vrcp.f32 %v10490_v26  ;;  %vm3500_vm8 = vweird.f32 %v8369_v52  ;;  %v2307_v36 = vshrl.u32 %v10500_v38, 16  ;;  %v3506_v24 = vor.u32 1.1754944e-38, %v3505_v9 }
 0x2ae   : > { %v3496_v35 = vsub.f32 1.0, %v3495_v10  ;;  %v2322_v50 = vsel %vm2251_vm4, %v2320_v21, %v2321_v11  ;;  %v10523_v10 = vpack.c.b16 %v4158_v23, %v4157_v16  ;;  %v2311_v43 = vrot.slane %v2309_v31, 1  ;;  %vm3501_vm11 = vmor %vm3499_vm9, %vm3500_vm8 }
 0x2af   : > { %v3116_v51 = vpop.f32.mrf.mxu2  ;;  %2482 = vrot.lane.b32.xlu1 %v2322_v50, %s8812_s23  ;;  %7784 = vmatmul.msk.bf16.gmra.mxu3 %vm2556_vm10, %v2322_v50  ;;  %v4413_v23 = vor.u32 %v4412_v15, %v4408_v62  ;;  %v2805_v50 = vsel %vm2629_vm13, %v2759_v46, %v10432_v33  ;;  %v3020_v0 = vadd.f32 %v10339_v30, %v3019_v47  ;;  %v3520_v46 = vand.u32 2147483648, %v10490_v26 }
 0x2b0   : > { %v10518_v22 = vpop.permute.xlu1 %2400  ;;  %v3497_v3 = vmul.f32 %v8369_v52, %v3496_v35  ;;  %v3117_v53 = vadd.f32 %v3116_v51, %v3018_v59  ;;  %v10521_v4 = vpop.permute.xlu2 %2436  ;;  %v2312_v16 = vor.u32 %v2311_v43, %v2307_v36  ;;  %vm3514_vm15 = vweird.f32 %v10490_v26 }
 0x2b1   : > { %v3022_v59 = vpop.f32.mrf.mxu1  ;;  %v10548_v33 = vsel %vm1998_vm5, %v4413_v23, %v4417_v8  ;;  %v3521_v8 = vor.u32 1.1754944e-38, %v3520_v46 }
 0x2b2   : > { %v3498_v29 = vadd.f32 %v8369_v52, %v3497_v3  ;;  %v10530_v11 = vadd.f32 %v10269_v14, %v3117_v53  ;;  %v2363_v35 = vpop.permute.xlu0 %2362  ;;  %v4217_v14 = vshrl.u32 %v10523_v10, 16  ;;  %v10542_v15 = vsel %vm1998_vm5, %v2312_v16, %v2316_v5  ;;  %13272 = vst [vmem:[#allocation23_spill] sm:$0xff] %v10548_v33 }
 0x2b3   : > { %v8371_v2 = vpop.eup %8370  ;;  %2552 = vrot.lane.b32.xlu0 %v10542_v15, %s8811_s29  ;;  %v2580_v56 = vsel %vm2556_vm10, %v10038_v32, %v2363_v35 }
 0x2b4   : > { %v3510_v19 = vmul.f32 %v8371_v2, %v10490_v26  ;;  %v3502_v31 = vsel %vm3501_vm11, %v8369_v52, %v3498_v29  ;;  %v7792_v21 = vmul.f32 -1.442695, %v10530_v11  ;;  %3150 = vmatmul.bf16.gmra.mxu2 %v2805_v50  ;;  %2408 = vrot.lane.b32.xlu2 %v10315_v39, %s8813_s24  ;;  %vm3515_vm14 = vweird.f32 %v8371_v2  ;;  %v10555_v29 = vpop.f32.mrf.mxu3 }
 0x2b5   : > { %v3507_v36 = vsel %vm3504_vm12, %v3506_v24, %v3502_v31  ;;  %v3518_v52 = vand.u32 2147483647, %v10490_v26  ;;  %v4219_v3 = vrot.slane %v4217_v14, 7  ;;  %vm3516_vm1 = vmor %vm3514_vm15, %vm3515_vm14  ;;  %v2616_v23 = vsel %vm508_vm0, %v2580_v56, %v10391_v63 }
 0x2b6   : > { %v3511_v62 = vsub.f32 1.0, %v3510_v19  ;;  %8372 = vpow2.f32 %v7792_v21  ;;  %v3978_v53 = vmul.f32 %v3507_v36, %v10430_v6  ;;  %v4220_v19 = vshll.u32 %v10523_v10, 16 }
 0x2b7   : > { %v3118_v47 = vpop.f32.mrf.mxu2  ;;  %4713 = vrot.lane.b32.xlu1 %v10548_v33, %s8812_s23  ;;  %vm3519_vm2 = vcmp.eq.f32.partialorder %v3518_v52, 8.507059e+37  ;;  %v3023_v63 = vadd.f32 %v10339_v30, %v3022_v59 }
 0x2b8   : > { %v3512_v39 = vmul.f32 %v8371_v2, %v3511_v62  ;;  %v10553_v5 = vpop.permute.xlu1 %2472  ;;  %v3119_v9 = vadd.f32 %v3118_v47, %v3020_v0  ;;  %v10557_v51 = vpop.permute.xlu2 %2508  ;;  %v4222_v21 = vor.u32 %v4220_v19, %v4219_v3  ;;  %v4050_v14 = vpack.c.bf16 %v3978_v53, %v3978_v53 }
 0x2b9   : > { %v3024_v31 = vpop.f32.mrf.mxu1  ;;  %v2719_v47 = vsel %vm2556_vm10, %v10188_v61, %v10417_v44  ;;  %v2582_v19 = vsel %vm2556_vm10, %v10096_v49, %v10485_v41  ;;  %v8057_v61 = vld [vmem:[%s13176_s5 + $0x20] sm:$0xff]  ;;  %v4390_v41 = vsel %vm8959_vm3, %v4219_v3, 0 }
 0x2ba   : > { %v3513_v43 = vadd.f32 %v8371_v2, %v3512_v39  ;;  %v10564_v32 = vadd.f32 %v10293_v37, %v3119_v9  ;;  %v2435_v35 = vpop.permute.xlu0 %2434  ;;  %v10582_v52 = vsel %vm8959_vm3, 0, %v4222_v21  ;;  %5307 = vmatpush.bf16.msra.mxu3 %v8057_v61 }
 0x2bb   : > { %v2664_v6 = vsel %vm2629_vm13, %v2616_v23, %v2435_v35  ;;  %2444 = vrot.lane.b32.xlu0 %v10357_v20, %s8811_s29  ;;  %v4422_v35 = vshll.u32 %v10582_v52, 16 }
 0x2bc   : > { %v3517_v16 = vsel %vm3516_vm1, %v8371_v2, %v3513_v43  ;;  %v8373_v50 = vpop.eup %8372  ;;  %v7793_v24 = vmul.f32 -1.442695, %v10564_v32  ;;  %3056 = vmatmul.bf16.gmra.mxu1 %v2664_v6  ;;  %v10586_v59 = vpop.f32.mrf.mxu3 }
 0x2bd   : > { %v3522_v26 = vsel %vm3519_vm2, %v3521_v8, %v3517_v16  ;;  %v10572_v0 = vadd.f32 1.0, %v8373_v50  ;;  %v3025_v50 = vadd.f32 %v10339_v30, %v3024_v31  ;;  %v4424_v31 = vrot.slane %v4422_v35, 1 }
 0x2be   : > { %v3979_v37 = vmul.f32 %v3522_v26, %v10457_v34  ;;  %8374 = vpow2.f32 %v7793_v24  ;;  %v4159_v34 = vunpack.c.l.b16 %v4050_v14  ;;  %v2618_v26 = vsel %vm508_vm0, %v2582_v19, %v10518_v22 }
 0x2bf   : > { %8376 = vrcp.f32 %v10572_v0  ;;  %v3121_v62 = vpop.f32.mrf.mxu2  ;;  %2374 = vrot.lane.b32.xlu1 %v10413_v54, %s8812_s23  ;;  %v2722_v22 = vsel %vm2556_vm10, %v10228_v17, %v10553_v5  ;;  %v3535_v3 = vand.u32 2147483648, %v10572_v0  ;;  %v4634_v35 = vrot.slane %v10582_v52, 1 }
 0x2c0   : > { %v4051_v2 = vpack.c.bf16 %v3979_v37, %v3979_v37  ;;  %v2543_v36 = vpop.permute.xlu1 %2542  ;;  %v3122_v46 = vadd.f32 %v3121_v62, %v3023_v63  ;;  %v10578_v39 = vpop.permute.xlu2 %2476  ;;  %vm3529_vm7 = vweird.f32 %v10572_v0 }
 0x2c1   : > { %v3027_v16 = vpop.f32.mrf.mxu1 }
 0x2c2   : > { %v4160_v56 = vunpack.c.l.b16 %v4051_v2  ;;  %v10592_v9 = vadd.f32 %v10321_v7, %v3122_v46  ;;  %v2507_v53 = vpop.permute.xlu0 %2506  ;;  %v4635_v46 = vrot.slane %v4390_v41, 1 }
 0x2c3   : > { %v2761_v8 = vsel %vm508_vm0, %v2719_v47, %v2507_v53 }
 0x2c4   : > { %v10594_v43 = vpack.c.b16 %v4160_v56, %v4159_v34  ;;  %v8375_v23 = vpop.eup %8374  ;;  %v7794_v6 = vmul.f32 -1.442695, %v10592_v9  ;;  %v2808_v7 = vsel %vm2629_vm13, %v2761_v8, %v2543_v36  ;;  %v2667_v36 = vsel %vm2629_vm13, %v2618_v26, %v10521_v4  ;;  %v10636_v19 = vpop.f32.mrf.mxu3 }
 0x2c5   : > { %v8377_v44 = vpop.eup %8376  ;;  %v10609_v24 = vadd.f32 1.0, %v8375_v23  ;;  %3155 = vmatmul.bf16.gmra.mxu2 %v2808_v7  ;;  %v4420_v34 = vshrl.u32 %v10582_v52, 16  ;;  %v4427_v56 = vshll.u32 %v4390_v41, 16  ;;  %v3533_v8 = vand.u32 2147483647, %v10572_v0 }
 0x2c6   : > { %13273 = vst [vmem:[#allocation24_spill] sm:$0xff] %v10594_v43  ;;  %v3525_v49 = vmul.f32 %v8377_v44, %v10572_v0  ;;  %8378 = vpow2.f32 %v7794_v6  ;;  %v4224_v21 = vshrl.u32 %v10594_v43, 16  ;;  %vm3530_vm6 = vweird.f32 %v8377_v44 }
 0x2c7   : > { %8380 = vrcp.f32 %v10609_v24  ;;  %v3123_v14 = vpop.f32.mrf.mxu2  ;;  %6355 = vrot.lane.b32.xlu1 %v10523_v10, %s8813_s24  ;;  %v2763_v4 = vsel %vm508_vm0, %v2722_v22, %v10557_v51  ;;  %v4425_v23 = vor.u32 %v4424_v31, %v4420_v34  ;;  %v4227_v6 = vshll.u32 %v10594_v43, 16  ;;  %vm10642_vm8 = vmor %vm3529_vm7, %vm3530_vm6  ;;  %v8065_v34 = vld [vmem:[%s13176_s5 + $0x60] sm:$0xff] }
 0x2c8   : > { %v10616_v37 = vpop.permute.xlu1 %2366  ;;  %v3526_v63 = vsub.f32 1.0, %v3525_v49  ;;  %v3124_v2 = vadd.f32 %v3123_v14, %v3025_v50  ;;  %v10621_v62 = vpop.permute.xlu2 %2546  ;;  %v4226_v5 = vrot.slane %v4224_v21, 7  ;;  %v3536_v51 = vor.u32 1.1754944e-38, %v3535_v3  ;;  %5396 = vmatpush.bf16.msrb.mxu1 %v8065_v34 }
 0x2c9   : > { %v3028_v26 = vadd.f32 %v10339_v30, %v3027_v16  ;;  %v4429_v41 = vrot.slane %v4427_v56, 1  ;;  %v3029_v14 = vpop.f32.mrf.mxu1  ;;  %vm3534_vm9 = vcmp.eq.f32.partialorder %v3533_v8, 8.507059e+37  ;;  %v3550_v3 = vand.u32 2147483648, %v10609_v24 }
 0x2ca   : > { %v3527_v47 = vmul.f32 %v8377_v44, %v3526_v63  ;;  %v10630_v53 = vadd.f32 %v10345_v55, %v3124_v2  ;;  %v2475_v17 = vpop.permute.xlu0 %2474  ;;  %v4229_v31 = vor.u32 %v4227_v6, %v4226_v5  ;;  %v10654_v63 = vsel %vm2251_vm4, %v4634_v35, %v4635_v46 }
 0x2cb   : > { %v10659_v16 = vsel %vm1998_vm5, %v4425_v23, %v4429_v41  ;;  %vm3544_vm11 = vweird.f32 %v10609_v24  ;;  %v10668_v46 = vadd.f32 %v10339_v30, %v3029_v14  ;;  %v4631_v8 = vrot.slane %v10482_v12, 1 }
 0x2cc   : > { %v8379_v10 = vpop.eup %8378  ;;  %v3528_v61 = vadd.f32 %v8377_v44, %v3527_v47  ;;  %v7795_v55 = vmul.f32 -1.442695, %v10630_v53  ;;  %3061 = vmatmul.bf16.gmra.mxu1 %v2667_v36  ;;  %v4632_v6 = vrot.slane %v10495_v40, 1  ;;  %v3551_v40 = vor.u32 1.1754944e-38, %v3550_v3 }
 0x2cd   : > { %v8381_v7 = vpop.eup %8380  ;;  %v10647_v49 = vadd.f32 1.0, %v8379_v10  ;;  %v10681_v10 = vsel %vm8959_vm3, 0, %v4229_v31 }
 0x2ce   : > { %v3532_v21 = vsel %vm10642_vm8, %v8377_v44, %v3528_v61  ;;  %v3540_v0 = vmul.f32 %v8381_v7, %v10609_v24  ;;  %8382 = vpow2.f32 %v7795_v55  ;;  %v3548_v44 = vand.u32 2147483647, %v10609_v24 }
 0x2cf   : > { %8384 = vrcp.f32 %v10647_v49  ;;  %v3537_v2 = vsel %vm3534_vm9, %v3536_v51, %v3532_v21  ;;  %4809 = vrot.lane.b32.xlu1 %v10654_v63, %s8812_s23  ;;  %vm3545_vm12 = vweird.f32 %v8381_v7  ;;  %v2584_v55 = vsel %vm2556_vm10, %v10136_v42, %v10616_v37  ;;  %v10693_v21 = vpop.f32.mrf.mxu3 }
 0x2d0   : > { %v10656_v22 = vpop.permute.xlu1 %2438  ;;  %v3541_v36 = vsub.f32 1.0, %v3540_v0  ;;  %v1912_v56 = vpop.permute.xlu2 %1911  ;;  %v3980_v61 = vmul.f32 %v3537_v2, %v10530_v11  ;;  %v10691_v51 = vsel %vm8959_vm3, %v4226_v5, 0  ;;  %vm10695_vm14 = vcmp.eq.f32.partialorder %v3548_v44, 8.507059e+37  ;;  %vm3546_vm15 = vmor %vm3544_vm11, %vm3545_vm12 }
 0x2d1   : > { %v10674_v47 = vsel %vm8959_vm3, 0, %v1912_v56  ;;  %v10701_v11 = vsel %vm2556_vm10, %v10279_v45, %v2475_v17  ;;  %v3563_v5 = vand.u32 2147483647, %v10647_v49  ;;  %v4637_v2 = vrot.slane %v10681_v10, 1 }
 0x2d2   : > { %v3542_v35 = vmul.f32 %v8381_v7, %v3541_v36  ;;  %2518 = vrot.lane.b32.xlu2 %v10674_v47, %s8813_s24  ;;  %v2545_v23 = vpop.permute.xlu0 %2544  ;;  %v4638_v45 = vrot.slane %v10691_v51, 1  ;;  %v10713_v17 = vsel %vm2251_vm4, %v4631_v8, %v4632_v6  ;;  %v4052_v3 = vpack.c.bf16 %v3980_v61, %v3980_v61 }
 0x2d3   : > { %v2811_v50 = vsel %vm2629_vm13, %v2763_v4, %v2545_v23  ;;  %13278 = vst [vmem:[#allocation25_spill] sm:$0xff] %v10713_v17  ;;  %v4432_v23 = vshrl.u32 %v10681_v10, 16  ;;  %vm3559_vm1 = vweird.f32 %v10647_v49  ;;  %vm10725_vm2 = vcmp.eq.f32.partialorder %v3563_v5, 8.507059e+37 }
 0x2d4   : > { %v8383_v41 = vpop.eup %8382  ;;  %v3543_v0 = vadd.f32 %v8381_v7, %v3542_v35  ;;  %v3565_v6 = vand.u32 2147483648, %v10647_v49  ;;  %v10733_v61 = vsel %vm2251_vm4, %v4637_v2, %v4638_v45  ;;  %v2326_v14 = vshll.u32 %v10674_v47, 16 }
 0x2d5   : > { %v3126_v42 = vpop.f32.mrf.mxu2  ;;  %v8385_v37 = vpop.eup %8384  ;;  %v10707_v4 = vadd.f32 1.0, %v8383_v41  ;;  %3160 = vmatmul.bf16.gmra.mxu2 %v2811_v50 }
 0x2d6   : > { %v3127_v31 = vadd.f32 %v3126_v42, %v3028_v26  ;;  %v3547_v36 = vsel %vm3546_vm15, %v8381_v7, %v3543_v0  ;;  %v3555_v44 = vmul.f32 %v8385_v37, %v10647_v49  ;;  %v4434_v26 = vshll.u32 %v10681_v10, 16 }
 0x2d7   : > { %v3552_v24 = vsel %vm10695_vm14, %v3551_v40, %v3547_v36  ;;  %8386 = vrcp.f32 %v10707_v4  ;;  %4715 = vrot.lane.b32.xlu1 %v10659_v16, %s8812_s23  ;;  %vm3560_vm6 = vweird.f32 %v8385_v37  ;;  %v4161_v0 = vunpack.c.l.b16 %v4052_v3  ;;  %v10740_v36 = vpop.f32.mrf.mxu1 }
 0x2d8   : > { %v2511_v34 = vpop.permute.xlu1 %2510  ;;  %v3981_v56 = vmul.f32 %v3552_v24, %v10564_v32  ;;  %v3556_v35 = vsub.f32 1.0, %v3555_v44  ;;  %v10721_v7 = vadd.f32 %v10378_v1, %v3127_v31  ;;  %v4436_v42 = vrot.slane %v4434_v26, 1  ;;  %vm10747_vm7 = vmor %vm3559_vm1, %vm3560_vm6 }
 0x2d9   : > { %v3566_v3 = vor.u32 1.1754944e-38, %v3565_v6  ;;  %v4439_v26 = vshll.u32 %v10691_v51, 16  ;;  %v3578_v6 = vand.u32 2147483647, %v10707_v4  ;;  %vm3574_vm9 = vweird.f32 %v10707_v4 }
 0x2da   : > { %v4053_v32 = vpack.c.bf16 %v3981_v56, %v3981_v56  ;;  %v3557_v50 = vmul.f32 %v8385_v37, %v3556_v35  ;;  %v7796_v1 = vmul.f32 -1.442695, %v10721_v7  ;;  %2410 = vrot.lane.b32.xlu2 %v10382_v28, %s8813_s24  ;;  %v2403_v41 = vpop.permute.xlu0 %2402  ;;  %v10754_v56 = vpop.f32.mrf.mxu3 }
 0x2db   : > { %v2620_v40 = vsel %vm508_vm0, %v2584_v55, %v2403_v41  ;;  %v2324_v55 = vshrl.u32 %v10674_v47, 16  ;;  %vm10791_vm12 = vcmp.eq.f32.partialorder %v3578_v6, 8.507059e+37 }
 0x2dc   : > { %v4162_v5 = vunpack.c.l.b16 %v4053_v32  ;;  %v3558_v31 = vadd.f32 %v8385_v37, %v3557_v50  ;;  %8388 = vpow2.f32 %v7796_v1  ;;  %v2670_v2 = vsel %vm2629_vm13, %v2620_v40, %v10656_v22 }
 0x2dd   : > { %v3128_v44 = vpop.f32.mrf.mxu2  ;;  %v8387_v45 = vpop.eup %8386  ;;  %3066 = vmatmul.bf16.gmra.mxu1 %v2670_v2  ;;  %v2337_v32 = vrot.slane %v10674_v47, 1  ;;  %v3580_v50 = vand.u32 2147483648, %v10707_v4  ;;  %v2328_v1 = vrot.slane %v2326_v14, 1 }
 0x2de   : > { %v3129_v24 = vadd.f32 %v3128_v44, %v10668_v46  ;;  %v10756_v22 = vpack.c.b16 %v4162_v5, %v4161_v0  ;;  %v3562_v35 = vsel %vm10747_vm7, %v8385_v37, %v3558_v31  ;;  %v3570_v49 = vmul.f32 %v8387_v45, %v10707_v4 }
 0x2df   : > { %v3567_v41 = vsel %vm10725_vm2, %v3566_v3, %v3562_v35  ;;  %v2765_v37 = vsel %vm508_vm0, %v10701_v11, %v2511_v34  ;;  %vm3575_vm8 = vweird.f32 %v8387_v45  ;;  %4811 = vrot.lane.b32.xlu1 %v10733_v61, %s8812_s23  ;;  %v4437_v11 = vor.u32 %v4436_v42, %v4432_v23 }
 0x2e0   : > { %13283 = vst [vmem:[#allocation26_spill] sm:$0xff] %v10756_v22  ;;  %v10765_v46 = vadd.f32 %v10415_v48, %v3129_v24  ;;  %v1914_v51 = vpop.permute.xlu1 %1913  ;;  %v3571_v0 = vsub.f32 1.0, %v3570_v49  ;;  %v4231_v34 = vshrl.u32 %v10756_v22, 16  ;;  %v3982_v2 = vmul.f32 %v3567_v41, %v10592_v9  ;;  %vm10784_vm11 = vmor %vm3574_vm9, %vm3575_vm8  ;;  %v8056_v49 = vld [vmem:[%s13176_s5 + $0x18] sm:$0xff] }
 0x2e1   : > { %v1997_v40 = vsel %vm8959_vm3, %v1914_v51, 0  ;;  %v2814_v4 = vsel %vm2629_vm13, %v2765_v37, %v10621_v62  ;;  %v2329_v23 = vor.u32 %v2328_v1, %v2324_v55  ;;  %v3581_v9 = vor.u32 1.1754944e-38, %v3580_v50  ;;  %v8069_v62 = vld [vmem:[%s13176_s5 + $0x80] sm:$0xff]  ;;  %v8064_v55 = vld [vmem:[%s13176_s5 + $0x58] sm:$0xff]  ;;  %v10811_v51 = vpop.f32.mrf.mxu1  ;;  %5308 = vmatpush.bf16.msra.mxu3 %v8056_v49 }
 0x2e2   : > { %v7797_v47 = vmul.f32 -1.442695, %v10765_v46  ;;  %v2331_v14 = vshll.u32 %v1997_v40, 16  ;;  %v2338_v48 = vrot.slane %v1997_v40, 1  ;;  %v8389_v5 = vpop.eup %8388  ;;  %v3572_v31 = vmul.f32 %v8387_v45, %v3571_v0  ;;  %4745 = vrot.lane.b32.xlu2 %v10713_v17, %s8813_s24  ;;  %v2369_v8 = vpop.permute.xlu0 %2368  ;;  %5489 = vmatpush.bf16.msrb.mxu2 %v8069_v62 }
 0x2e3   : > { %v10781_v44 = vadd.f32 1.0, %v8389_v5  ;;  %v10806_v6 = vpop.f32.mrf.mxu3  ;;  %v4234_v50 = vshll.u32 %v10756_v22, 16  ;;  %v4233_v0 = vrot.slane %v4231_v34, 7  ;;  %v4054_v37 = vpack.c.bf16 %v3982_v2, %v3982_v2  ;;  %5397 = vmatpush.bf16.msrb.mxu1 %v8064_v55 }
 0x2e4   : > { %8390 = vpow2.f32 %v7797_v47  ;;  %v2333_v28 = vrot.slane %v2331_v14, 1  ;;  %v3573_v3 = vadd.f32 %v8387_v45, %v3572_v31  ;;  %v2339_v35 = vsel %vm2251_vm4, %v2337_v32, %v2338_v48  ;;  %v2405_v31 = vpop.permute.xlu2 %2404 }
 0x2e5   : > { %8392 = vrcp.f32 %v10781_v44  ;;  %3165 = vmatmul.bf16.gmra.mxu2 %v2814_v4  ;;  %7785 = vmatmul.msk.bf16.gmra.mxu3 %vm2556_vm10, %v2339_v35  ;;  %v4441_v32 = vrot.slane %v4439_v26, 1  ;;  %v2586_v40 = vsel %vm2556_vm10, %v10200_v57, %v2369_v8  ;;  %v4236_v48 = vor.u32 %v4234_v50, %v4233_v0 }
 0x2e6   : > { %v3577_v1 = vsel %vm10784_vm11, %v8387_v45, %v3573_v3  ;;  %v2334_v41 = vsel %vm1998_vm5, %v2329_v23, %v2333_v28  ;;  %v4163_v28 = vunpack.c.l.b16 %v4054_v37  ;;  %v4392_v24 = vsel %vm8959_vm3, %v4233_v0, 0 }
 0x2e7   : > { %v3582_v26 = vsel %vm10791_vm12, %v3581_v9, %v3577_v1  ;;  %v10822_v45 = vsel %vm1998_vm5, %v4437_v11, %v4441_v32  ;;  %2554 = vrot.lane.b32.xlu0 %v2334_v41, %s8811_s29  ;;  %v10834_v11 = vsel %vm8959_vm3, 0, %v4236_v48  ;;  %v3595_v42 = vand.u32 2147483648, %v10781_v44 }
 0x2e8   : > { %v10818_v47 = vpop.permute.xlu1 %2478  ;;  %v3983_v14 = vmul.f32 %v3582_v26, %v10630_v53  ;;  %4717 = vrot.lane.b32.xlu1 %v10822_v45, %s8812_s23  ;;  %v2622_v53 = vsel %vm508_vm0, %v2586_v40, %v2405_v31  ;;  %v4640_v4 = vrot.slane %v10834_v11, 1  ;;  %v3033_v49 = vadd.f32 %v10339_v30, %v10740_v36 }
 0x2e9   : > { %v10848_v32 = vpop.f32.mrf.mxu1  ;;  %v4641_v55 = vrot.slane %v4392_v24, 1  ;;  %v2728_v50 = vsel %vm2556_vm10, %v10307_v25, %v10578_v39  ;;  %vm3589_vm15 = vweird.f32 %v10781_v44  ;;  %v3593_v36 = vand.u32 2147483647, %v10781_v44 }
 0x2ea   : > { %v8391_v5 = vpop.eup %8390  ;;  %v4055_v34 = vpack.c.bf16 %v3983_v14, %v3983_v14  ;;  %4747 = vrot.lane.b32.xlu2 %v10654_v63, %s8813_s24  ;;  %v2441_v8 = vpop.permute.xlu0 %2440  ;;  %v4446_v63 = vshll.u32 %v10834_v11, 16  ;;  %v3596_v14 = vor.u32 1.1754944e-38, %v3595_v42  ;;  %v4444_v31 = vshrl.u32 %v10834_v11, 16 }
 0x2eb   : > { %v10827_v57 = vadd.f32 1.0, %v8391_v5  ;;  %v8393_v2 = vpop.eup %8392  ;;  %v2673_v3 = vsel %vm2629_vm13, %v2622_v53, %v2441_v8  ;;  %v10853_v0 = vpop.f32.mrf.mxu3  ;;  %v10856_v40 = vsel %vm2251_vm4, %v4640_v4, %v4641_v55  ;;  %vm3594_vm2 = vcmp.eq.f32.partialorder %v3593_v36, 8.507059e+37 }
 0x2ec   : > { %v4164_v35 = vunpack.c.l.b16 %v4055_v34  ;;  %v3585_v23 = vmul.f32 %v8393_v2, %v10781_v44  ;;  %vm3590_vm14 = vweird.f32 %v8393_v2  ;;  %v4448_v30 = vrot.slane %v4446_v63, 1 }
 0x2ed   : > { %8394 = vrcp.f32 %v10827_v57  ;;  %3071 = vmatmul.bf16.gmra.mxu1 %v2673_v3  ;;  %v4451_v34 = vshll.u32 %v4392_v24, 16  ;;  %vm10873_vm1 = vmor %vm3589_vm15, %vm3590_vm14  ;;  %vm3604_vm7 = vweird.f32 %v10827_v57 }
 0x2ee   : > { %v10844_v9 = vpack.c.b16 %v4164_v35, %v4163_v28  ;;  %v3586_v62 = vsub.f32 1.0, %v3585_v23  ;;  %v4449_v24 = vor.u32 %v4448_v30, %v4444_v31  ;;  %v10886_v23 = vld [vmem:[%s13175_s4] ss:$0 sm:$0xff] }
 0x2ef   : > { %v3131_v1 = vpop.f32.mrf.mxu2  ;;  %2446 = vrot.lane.b32.xlu0 %v10500_v38, %s8811_s29  ;;  %v3035_v63 = vadd.f32 %v10886_v23, %v10811_v51 }
 0x2f0   : > { %13288 = vst [vmem:[#allocation27_spill] sm:$0xff] %v10844_v9  ;;  %v2549_v41 = vpop.permute.xlu1 %2548  ;;  %v3587_v37 = vmul.f32 %v8393_v2, %v3586_v62  ;;  %v3132_v26 = vadd.f32 %v3131_v1, %v3033_v49  ;;  %4813 = vrot.lane.b32.xlu1 %v10856_v40, %s8812_s23  ;;  %v4238_v25 = vshrl.u32 %v10844_v9, 16  ;;  %v4241_v44 = vshll.u32 %v10844_v9, 16  ;;  %v2407_v49 = vpop.permute.xlu2 %2406 }
 0x2f2   : > { %v3588_v48 = vadd.f32 %v8393_v2, %v3587_v37  ;;  %v10866_v5 = vadd.f32 %v10434_v60, %v3132_v26  ;;  %4841 = vrot.lane.b32.xlu2 %v10681_v10, %s8813_s24  ;;  %v2513_v38 = vpop.permute.xlu0 %2512  ;;  %v4240_v60 = vrot.slane %v4238_v25, 7 }
 0x2f3   : > { %v8395_v39 = vpop.eup %8394  ;;  %v2767_v28 = vsel %vm508_vm0, %v2728_v50, %v2513_v38  ;;  %v4453_v50 = vrot.slane %v4451_v34, 1  ;;  %v10908_v31 = vpop.f32.mrf.mxu3 }
 0x2f4   : > { %v3600_v53 = vmul.f32 %v8395_v39, %v10827_v57  ;;  %v3592_v3 = vsel %vm10873_vm1, %v8393_v2, %v3588_v48  ;;  %v7798_v4 = vmul.f32 -1.442695, %v10866_v5  ;;  %v2817_v35 = vsel %vm2629_vm13, %v2767_v28, %v2549_v41  ;;  %v3039_v48 = vpop.f32.mrf.mxu1 }
 0x2f5   : > { %3170 = vmatmul.bf16.gmra.mxu2 %v2817_v35  ;;  %v4243_v62 = vor.u32 %v4241_v44, %v4240_v60  ;;  %v3597_v55 = vsel %vm3594_vm2, %v3596_v14, %v3592_v3  ;;  %v3610_v2 = vand.u32 2147483648, %v10827_v57  ;;  %vm3605_vm6 = vweird.f32 %v8395_v39 }
 0x2f6   : > { %v3601_v42 = vsub.f32 1.0, %v3600_v53  ;;  %8396 = vpow2.f32 %v7798_v4  ;;  %v3608_v41 = vand.u32 2147483647, %v10827_v57  ;;  %v10894_v51 = vsel %vm1998_vm5, %v4449_v24, %v4453_v50  ;;  %vm3606_vm8 = vmor %vm3604_vm7, %vm3605_vm6 }
 0x2f7   : > { %v3133_v37 = vpop.f32.mrf.mxu2  ;;  %4777 = vrot.lane.b32.xlu0 %v10582_v52, %s8811_s29  ;;  %v3984_v14 = vmul.f32 %v3597_v55, %v10721_v7  ;;  %v10906_v57 = vsel %vm8959_vm3, 0, %v4243_v62  ;;  %v3611_v34 = vor.u32 1.1754944e-38, %v3610_v2  ;;  %v4393_v53 = vsel %vm8959_vm3, %v4240_v60, 0 }
 0x2f8   : > { %v3602_v1 = vmul.f32 %v8395_v39, %v3601_v42  ;;  %v2371_v26 = vpop.permute.xlu1 %2370  ;;  %v3134_v30 = vadd.f32 %v3133_v37, %v3035_v63  ;;  %4719 = vrot.lane.b32.xlu1 %v10894_v51, %s8812_s23  ;;  %13291 = vst [vmem:[#allocation28_spill] sm:$0xff] %v10906_v57  ;;  %vm3609_vm9 = vcmp.eq.f32.partialorder %v3608_v41, 8.507059e+37  ;;  %v4643_v35 = vrot.slane %v10906_v57, 1  ;;  %v2515_v55 = vpop.permute.xlu2 %2514 }
 0x2f9   : > { %v2588_v36 = vsel %vm2556_vm10, %v10260_v13, %v2371_v26  ;;  %v4056_v24 = vpack.c.bf16 %v3984_v14, %v3984_v14  ;;  %v2731_v62 = vsel %vm2556_vm10, %v10348_v58, %v10818_v47  ;;  %v13292_v47 = vld [vmem:[#allocation22_spill] sm:$0xff]  ;;  %v4463_v14 = vshll.u32 %v4393_v53, 16 }
 0x2fa   : > { %v3603_v25 = vadd.f32 %v8395_v39, %v3602_v1  ;;  %v2624_v38 = vsel %vm508_vm0, %v2588_v36, %v2407_v49  ;;  %v10912_v13 = vadd.f32 %v10471_v27, %v3134_v30  ;;  %4749 = vrot.lane.b32.xlu2 %v10733_v61, %s8813_s24  ;;  %v2443_v7 = vpop.permute.xlu0 %2442  ;;  %v4458_v27 = vshll.u32 %v10906_v57, 16 }
 0x2fb   : > { %v2676_v8 = vsel %vm2629_vm13, %v2624_v38, %v2443_v7  ;;  %v4644_v49 = vrot.slane %v4393_v53, 1  ;;  %v2769_v58 = vsel %vm508_vm0, %v2731_v62, %v2515_v55  ;;  %v4456_v36 = vshrl.u32 %v10906_v57, 16  ;;  %v10950_v7 = vpop.f32.mrf.mxu3 }
 0x2fc   : > { %v3607_v44 = vsel %vm3606_vm8, %v8395_v39, %v3603_v25  ;;  %v8397_v28 = vpop.eup %8396  ;;  %v7799_v4 = vmul.f32 -1.442695, %v10912_v13  ;;  %v3038_v39 = vadd.f32 %v10886_v23, %v10848_v32  ;;  %v4460_v1 = vrot.slane %v4458_v27, 1  ;;  %v10936_v37 = vpop.f32.mrf.mxu1 }
 0x2fd   : > { %v3612_v3 = vsel %vm3609_vm9, %v3611_v34, %v3607_v44  ;;  %v10923_v42 = vadd.f32 1.0, %v8397_v28  ;;  %3076 = vmatmul.bf16.gmra.mxu1 %v2676_v8  ;;  %v4165_v32 = vunpack.c.l.b16 %v4056_v24  ;;  %v4465_v27 = vrot.slane %v4463_v14, 1 }
 0x2fe   : > { %v3985_v63 = vmul.f32 %v3612_v3, %v10765_v46  ;;  %8398 = vpow2.f32 %v7799_v4  ;;  %v10932_v46 = vsel %vm2251_vm4, %v4643_v35, %v4644_v49  ;;  %v4461_v8 = vor.u32 %v4460_v1, %v4456_v36 }
 0x2ff   : > { %8400 = vrcp.f32 %v10923_v42  ;;  %v3136_v2 = vpop.f32.mrf.mxu2  ;;  %4779 = vrot.lane.b32.xlu0 %v10681_v10, %s8811_s29  ;;  %v3040_v35 = vadd.f32 %v10886_v23, %v3039_v48  ;;  %vm3619_vm12 = vweird.f32 %v10923_v42 }
 0x300   : > { %v4057_v60 = vpack.c.bf16 %v3985_v63, %v3985_v63  ;;  %v3137_v50 = vadd.f32 %v3136_v2, %v3038_v39  ;;  %4815 = vrot.lane.b32.xlu1 %v10932_v46, %s8812_s23  ;;  %v10960_v49 = vsel %vm1998_vm5, %v4461_v8, %v4465_v27  ;;  %v3625_v2 = vand.u32 2147483648, %v10923_v42 }
 0x301   : > { %13294 = vst [vmem:[#allocation29_spill] sm:$0xff] %v10960_v49 }
 0x302   : > { %v4166_v41 = vunpack.c.l.b16 %v4057_v60  ;;  %v10942_v26 = vadd.f32 %v13292_v47, %v3137_v50  ;;  %4843 = vrot.lane.b32.xlu2 %v10834_v11, %s8813_s24  ;;  %v2551_v30 = vpop.permute.xlu0 %2550  ;;  %v3623_v47 = vand.u32 2147483647, %v10923_v42  ;;  %v3626_v8 = vor.u32 1.1754944e-38, %v3625_v2 }
 0x303   : > { %v2820_v38 = vsel %vm2629_vm13, %v2769_v58, %v2551_v30  ;;  %v3043_v2 = vadd.f32 %v10886_v23, %v10936_v37 }
 0x304   : > { %v10947_v25 = vpack.c.b16 %v4166_v41, %v4165_v32  ;;  %v8399_v34 = vpop.eup %8398  ;;  %v7800_v44 = vmul.f32 -1.442695, %v10942_v26  ;;  %v10973_v50 = vpop.f32.mrf.mxu1  ;;  %vm3624_vm15 = vcmp.eq.f32.partialorder %v3623_v47, 8.507059e+37 }
 0x305   : > { %v8401_v28 = vpop.eup %8400  ;;  %v10953_v3 = vadd.f32 1.0, %v8399_v34  ;;  %3175 = vmatmul.bf16.gmra.mxu2 %v2820_v38  ;;  %v10975_v41 = vpop.f32.mrf.mxu3 }
 0x306   : > { %13293 = vst [vmem:[#allocation22_spill] sm:$0xff] %v10947_v25  ;;  %v4245_v4 = vshrl.u32 %v10947_v25, 16  ;;  %v3615_v53 = vmul.f32 %v8401_v28, %v10923_v42  ;;  %8402 = vpow2.f32 %v7800_v44  ;;  %v4248_v60 = vshll.u32 %v10947_v25, 16 }
 0x307   : > { %8404 = vrcp.f32 %v10953_v3  ;;  %v3138_v24 = vpop.f32.mrf.mxu2  ;;  %4873 = vrot.lane.b32.xlu0 %v10822_v45, %s8811_s29  ;;  %vm3620_vm11 = vweird.f32 %v8401_v28  ;;  %vm3634_vm2 = vweird.f32 %v10953_v3 }
 0x308   : > { %v3616_v63 = vsub.f32 1.0, %v3615_v53  ;;  %v3139_v39 = vadd.f32 %v3138_v24, %v3040_v35  ;;  %4721 = vrot.lane.b32.xlu1 %v10960_v49, %s8812_s23  ;;  %v4247_v48 = vrot.slane %v4245_v4, 7  ;;  %vm10980_vm14 = vmor %vm3619_vm12, %vm3620_vm11  ;;  %v3640_v35 = vand.u32 2147483648, %v10953_v3  ;;  %v8055_v53 = vld [vmem:[%s13176_s5 + $0x10] sm:$0xff]  ;;  %v11005_v24 = vpop.permute.xlu1 %2480 }
 0x309   : > { %5309 = vmatpush.bf16.msra.mxu3 %v8055_v53 }
 0x30a   : > { %v3617_v62 = vmul.f32 %v8401_v28, %v3616_v63  ;;  %v10968_v55 = vadd.f32 %v10555_v29, %v3139_v39  ;;  %4751 = vrot.lane.b32.xlu2 %v10856_v40, %s8813_s24  ;;  %v4250_v1 = vor.u32 %v4248_v60, %v4247_v48  ;;  %v4394_v38 = vsel %vm8959_vm3, %v4247_v48, 0 }
 0x30b   : > { %v4647_v39 = vrot.slane %v4394_v38, 1  ;;  %v3641_v36 = vor.u32 1.1754944e-38, %v3640_v35 }
 0x30c   : > { %v8403_v32 = vpop.eup %8402  ;;  %v3618_v58 = vadd.f32 %v8401_v28, %v3617_v62  ;;  %v7801_v30 = vmul.f32 -1.442695, %v10968_v55  ;;  %v10993_v42 = vsel %vm8959_vm3, 0, %v4250_v1  ;;  %v3638_v62 = vand.u32 2147483647, %v10953_v3 }
 0x30d   : > { %v8405_v29 = vpop.eup %8404  ;;  %v10984_v14 = vadd.f32 1.0, %v8403_v32  ;;  %13297 = vst [vmem:[#allocation30_spill] sm:$0xff] %v10993_v42  ;;  %v4646_v63 = vrot.slane %v10993_v42, 1  ;;  %v4470_v60 = vshll.u32 %v10993_v42, 16  ;;  %v4468_v53 = vshrl.u32 %v10993_v42, 16 }
 0x30e   : > { %v3622_v34 = vsel %vm10980_vm14, %v8401_v28, %v3618_v58  ;;  %v3630_v44 = vmul.f32 %v8405_v29, %v10953_v3  ;;  %8406 = vpow2.f32 %v7801_v30  ;;  %v8063_v28 = vld [vmem:[%s13176_s5 + $0x50] sm:$0xff]  ;;  %vm3635_vm1 = vweird.f32 %v8405_v29 }
 0x30f   : > { %8408 = vrcp.f32 %v10984_v14  ;;  %4781 = vrot.lane.b32.xlu0 %v10834_v11, %s8811_s29  ;;  %v3627_v27 = vsel %vm3624_vm15, %v3626_v8, %v3622_v34  ;;  %5398 = vmatpush.bf16.msrb.mxu1 %v8063_v28  ;;  %v11013_v1 = vsel %vm2251_vm4, %v4646_v63, %v4647_v39  ;;  %v4472_v32 = vrot.slane %v4470_v60, 1  ;;  %vm3636_vm6 = vmor %vm3634_vm2, %vm3635_vm1  ;;  %v11024_v8 = vpop.f32.mrf.mxu1 }
 0x310   : > { %v3631_v4 = vsub.f32 1.0, %v3630_v44  ;;  %v3986_v47 = vmul.f32 %v3627_v27, %v10866_v5  ;;  %4817 = vrot.lane.b32.xlu1 %v11013_v1, %s8812_s23  ;;  %v4475_v28 = vshll.u32 %v4394_v38, 16  ;;  %v11027_v5 = vpop.f32.mrf.mxu3  ;;  %vm3639_vm7 = vcmp.eq.f32.partialorder %v3638_v62, 8.507059e+37 }
 0x311   : > { %v4473_v63 = vor.u32 %v4472_v32, %v4468_v53  ;;  %v3655_v38 = vand.u32 2147483648, %v10984_v14  ;;  %vm3649_vm9 = vweird.f32 %v10984_v14  ;;  %v11043_v32 = vpop.permute.xlu1 %2372 }
 0x312   : > { %v3632_v48 = vmul.f32 %v8405_v29, %v3631_v4  ;;  %4845 = vrot.lane.b32.xlu2 %v10906_v57, %s8813_s24  ;;  %v4058_v39 = vpack.c.bf16 %v3986_v47, %v3986_v47 }
 0x314   : > { %v8407_v58 = vpop.eup %8406  ;;  %v3633_v30 = vadd.f32 %v8405_v29, %v3632_v48 }
 0x315   : > { %v3141_v34 = vpop.f32.mrf.mxu2  ;;  %v8409_v44 = vpop.eup %8408  ;;  %v11022_v37 = vadd.f32 1.0, %v8407_v58 }
 0x316   : > { %v3142_v4 = vadd.f32 %v3141_v34, %v3043_v2  ;;  %v3637_v27 = vsel %vm3636_vm6, %v8405_v29, %v3633_v30  ;;  %v3645_v3 = vmul.f32 %v8409_v44, %v10984_v14  ;;  %v4477_v29 = vrot.slane %v4475_v28, 1  ;;  %v2517_v30 = vpop.permute.xlu2 %2516 }
 0x317   : > { %v3642_v35 = vsel %vm3639_vm7, %v3641_v36, %v3637_v27  ;;  %8410 = vrcp.f32 %v11022_v37  ;;  %4875 = vrot.lane.b32.xlu0 %v10894_v51, %s8811_s29  ;;  %vm3650_vm8 = vweird.f32 %v8409_v44  ;;  %v4167_v34 = vunpack.c.l.b16 %v4058_v39  ;;  %v11058_v39 = vpop.f32.mrf.mxu1 }
 0x318   : > { %v3987_v60 = vmul.f32 %v3642_v35, %v10912_v13  ;;  %v3646_v48 = vsub.f32 1.0, %v3645_v3  ;;  %v11033_v58 = vadd.f32 %v10586_v59, %v3142_v4  ;;  %v3653_v13 = vand.u32 2147483647, %v10984_v14  ;;  %vm3651_vm11 = vmor %vm3649_vm9, %vm3650_vm8  ;;  %v11053_v27 = vpop.f32.mrf.mxu3 }
 0x319   : > { %v3045_v59 = vadd.f32 %v10886_v23, %v10973_v50  ;;  %v11046_v47 = vsel %vm1998_vm5, %v4473_v63, %v4477_v29  ;;  %v3656_v63 = vor.u32 1.1754944e-38, %v3655_v38  ;;  %vm3664_vm15 = vweird.f32 %v11022_v37 }
 0x31a   : > { %v4059_v62 = vpack.c.bf16 %v3987_v60, %v3987_v60  ;;  %v3647_v2 = vmul.f32 %v8409_v44, %v3646_v48  ;;  %v7802_v36 = vmul.f32 -1.442695, %v11033_v58  ;;  %13298 = vst [vmem:[#allocation31_spill] sm:$0xff] %v11046_v47  ;;  %4753 = vrot.lane.b32.xlu2 %v10932_v46, %s8813_s24  ;;  %4723 = vrot.lane.b32.xlu1 %v11046_v47, %s8812_s23  ;;  %vm3654_vm12 = vcmp.eq.f32.partialorder %v3653_v13, 8.507059e+37 }
 0x31c   : > { %v4168_v4 = vunpack.c.l.b16 %v4059_v62  ;;  %v3648_v53 = vadd.f32 %v8409_v44, %v3647_v2  ;;  %8412 = vpow2.f32 %v7802_v36  ;;  %v3668_v36 = vand.u32 2147483647, %v11022_v37 }
 0x31d   : > { %v3143_v28 = vpop.f32.mrf.mxu2  ;;  %v8411_v14 = vpop.eup %8410 }
 0x31e   : > { %v3144_v50 = vadd.f32 %v3143_v28, %v3045_v59  ;;  %v11055_v3 = vpack.c.b16 %v4168_v4, %v4167_v34  ;;  %v3652_v35 = vsel %vm3651_vm11, %v8409_v44, %v3648_v53  ;;  %v3660_v60 = vmul.f32 %v8411_v14, %v11022_v37 }
 0x31f   : > { %v3657_v29 = vsel %vm3654_vm12, %v3656_v63, %v3652_v35  ;;  %4783 = vrot.lane.b32.xlu0 %v10906_v57, %s8811_s29  ;;  %v3670_v44 = vand.u32 2147483648, %v11022_v37  ;;  %vm3665_vm14 = vweird.f32 %v8411_v14  ;;  %v2409_v35 = vpop.permute.xlu2 %2408  ;;  %vm3669_vm2 = vcmp.eq.f32.partialorder %v3668_v36, 8.507059e+37 }
 0x320   : > { %13299 = vst [vmem:[#allocation32_spill] sm:$0xff] %v11055_v3  ;;  %v11061_v48 = vadd.f32 %v10636_v19, %v3144_v50  ;;  %v3661_v62 = vsub.f32 1.0, %v3660_v60  ;;  %v4252_v2 = vshrl.u32 %v11055_v3, 16  ;;  %v4255_v13 = vshll.u32 %v11055_v3, 16  ;;  %vm3666_vm1 = vmor %vm3664_vm15, %vm3665_vm14 }
 0x321   : > { %v3988_v4 = vmul.f32 %v3657_v29, %v10942_v26  ;;  %v11073_v28 = vpop.permute.xlu1 %2482  ;;  %v2734_v60 = vsel %vm2556_vm10, %v10413_v54, %v11005_v24  ;;  %v3048_v26 = vadd.f32 %v10886_v23, %v11024_v8  ;;  %v11091_v24 = vpop.f32.mrf.mxu1 }
 0x322   : > { %v7803_v38 = vmul.f32 -1.442695, %v11061_v48  ;;  %v8413_v59 = vpop.eup %8412  ;;  %v3662_v34 = vmul.f32 %v8411_v14, %v3661_v62  ;;  %v4254_v19 = vrot.slane %v4252_v2, 7  ;;  %4847 = vrot.lane.b32.xlu2 %v10993_v42, %s8813_s24  ;;  %v3671_v62 = vor.u32 1.1754944e-38, %v3670_v44 }
 0x323   : > { %v11071_v53 = vadd.f32 1.0, %v8413_v59  ;;  %v2771_v59 = vsel %vm508_vm0, %v2734_v60, %v2517_v30 }
 0x324   : > { %8414 = vpow2.f32 %v7803_v38  ;;  %v3663_v50 = vadd.f32 %v8411_v14, %v3662_v34  ;;  %v4257_v63 = vor.u32 %v4255_v13, %v4254_v19  ;;  %v4395_v37 = vsel %vm8959_vm3, %v4254_v19, 0  ;;  %v11093_v13 = vpop.f32.mrf.mxu3 }
 0x325   : > { %8416 = vrcp.f32 %v11071_v53  ;;  %v4060_v38 = vpack.c.bf16 %v3988_v4, %v3988_v4  ;;  %vm3679_vm7 = vweird.f32 %v11071_v53 }
 0x326   : > { %v3667_v29 = vsel %vm3666_vm1, %v8411_v14, %v3663_v50  ;;  %v11086_v2 = vsel %vm8959_vm3, 0, %v4257_v63  ;;  %v2553_v14 = vpop.permute.xlu0 %2552  ;;  %v4650_v50 = vrot.slane %v4395_v37, 1 }
 0x327   : > { %13300 = vst [vmem:[#allocation33_spill] sm:$0xff] %v11086_v2  ;;  %v3672_v54 = vsel %vm3669_vm2, %v3671_v62, %v3667_v29  ;;  %v3146_v44 = vpop.f32.mrf.mxu2  ;;  %4877 = vrot.lane.b32.xlu0 %v10960_v49, %s8811_s29  ;;  %v4649_v34 = vrot.slane %v11086_v2, 1  ;;  %v2823_v4 = vsel %vm2629_vm13, %v2771_v59, %v2553_v14  ;;  %v4482_v30 = vshll.u32 %v11086_v2, 16  ;;  %v13302_v29 = vld [vmem:[#allocation21_spill] sm:$0xff] }
 0x328   : > { %v3989_v8 = vmul.f32 %v3672_v54, %v10968_v55  ;;  %v3147_v36 = vadd.f32 %v3146_v44, %v3048_v26  ;;  %3180 = vmatmul.bf16.gmra.mxu2 %v2823_v4  ;;  %v2590_v54 = vsel %vm2556_vm10, %v13302_v29, %v11043_v32  ;;  %v4480_v4 = vshrl.u32 %v11086_v2, 16 }
 0x329   : > { %v11107_v55 = vsel %vm2251_vm4, %v4649_v34, %v4650_v50  ;;  %v11112_v44 = vpop.permute.xlu1 %4713  ;;  %v4484_v59 = vrot.slane %v4482_v30, 1  ;;  %v2626_v32 = vsel %vm508_vm0, %v2590_v54, %v2409_v35  ;;  %v3685_v29 = vand.u32 2147483648, %v11071_v53 }
 0x32a   : > { %v8415_v19 = vpop.eup %8414  ;;  %v4061_v63 = vpack.c.bf16 %v3989_v8, %v3989_v8  ;;  %v11104_v62 = vadd.f32 %v10693_v21, %v3147_v36  ;;  %13301 = vst [vmem:[#allocation34_spill] sm:$0xff] %v11107_v55  ;;  %4755 = vrot.lane.b32.xlu2 %v11013_v1, %s8813_s24  ;;  %4819 = vrot.lane.b32.xlu1 %v11107_v55, %s8812_s23  ;;  %v4487_v21 = vshll.u32 %v4395_v37, 16  ;;  %v4169_v8 = vunpack.c.l.b16 %v4060_v38 }
 0x32b   : > { %v11101_v60 = vadd.f32 1.0, %v8415_v19  ;;  %v8417_v26 = vpop.eup %8416  ;;  %v8054_v19 = vld [vmem:[%s13176_s5 + $0x8] sm:$0xff]  ;;  %v3050_v37 = vadd.f32 %v10886_v23, %v11058_v39  ;;  %v4485_v54 = vor.u32 %v4484_v59, %v4480_v4 }
 0x32c   : > { %v4170_v14 = vunpack.c.l.b16 %v4061_v63  ;;  %v3675_v36 = vmul.f32 %v8417_v26, %v11071_v53  ;;  %v11120_v34 = vpop.permute.xlu2 %2518  ;;  %v7804_v50 = vmul.f32 -1.442695, %v11104_v62  ;;  %v3683_v63 = vand.u32 2147483647, %v11071_v53  ;;  %5310 = vmatpush.bf16.msra.mxu3 %v8054_v19  ;;  %v11142_v59 = vpop.f32.mrf.mxu3 }
 0x32d   : > { %8418 = vrcp.f32 %v11101_v60  ;;  %v4489_v3 = vrot.slane %v4487_v21, 1  ;;  %vm3680_vm6 = vweird.f32 %v8417_v26  ;;  %vm3694_vm12 = vweird.f32 %v11101_v60 }
 0x32e   : > { %v11128_v30 = vpack.c.b16 %v4170_v14, %v4169_v8  ;;  %v3676_v38 = vsub.f32 1.0, %v3675_v36  ;;  %8420 = vpow2.f32 %v7804_v50  ;;  %v2445_v25 = vpop.permute.xlu0 %2444  ;;  %v11139_v14 = vpop.f32.mrf.mxu1  ;;  %vm11151_vm8 = vmor %vm3679_vm7, %vm3680_vm6  ;;  %vm11155_vm9 = vcmp.eq.f32.partialorder %v3683_v63, 8.507059e+37 }
 0x32f   : > { %v3148_v35 = vpop.f32.mrf.mxu2  ;;  %4785 = vrot.lane.b32.xlu0 %v10993_v42, %s8811_s29  ;;  %v2679_v36 = vsel %vm2629_vm13, %v2626_v32, %v2445_v25  ;;  %v11148_v4 = vsel %vm1998_vm5, %v4485_v54, %v4489_v3  ;;  %v3686_v3 = vor.u32 1.1754944e-38, %v3685_v29  ;;  %v3055_v33 = vadd.f32 %v10886_v23, %v11139_v14 }
 0x330   : > { %13303 = vst [vmem:[#allocation21_spill] sm:$0xff] %v11128_v30  ;;  %v3677_v17 = vmul.f32 %v8417_v26, %v3676_v38  ;;  %v3149_v22 = vadd.f32 %v3148_v35, %v3050_v37  ;;  %v4259_v8 = vshrl.u32 %v11128_v30, 16  ;;  %v4262_v39 = vshll.u32 %v11128_v30, 16  ;;  %3081 = vmatmul.bf16.gmra.mxu1 %v2679_v36 }
 0x331   : > { %13304 = vst [vmem:[#allocation35_spill] sm:$0xff] %v11148_v4  ;;  %v3700_v36 = vand.u32 2147483648, %v11101_v60 }
 0x332   : > { %v3678_v21 = vadd.f32 %v8417_v26, %v3677_v17  ;;  %v11145_v19 = vadd.f32 %v10754_v56, %v3149_v22  ;;  %v4261_v37 = vrot.slane %v4259_v8, 7  ;;  %v3053_v17 = vadd.f32 %v10886_v23, %v11091_v24  ;;  %v11162_v56 = vpop.permute.xlu1 %2374  ;;  %4849 = vrot.lane.b32.xlu2 %v11086_v2, %s8813_s24  ;;  %4725 = vrot.lane.b32.xlu1 %v11148_v4, %s8812_s23 }
 0x333   : > { %v8419_v50 = vpop.eup %8418  ;;  %v3698_v24 = vand.u32 2147483647, %v11101_v60 }
 0x334   : > { %v3690_v25 = vmul.f32 %v8419_v50, %v11101_v60  ;;  %v3682_v22 = vsel %vm11151_vm8, %v8417_v26, %v3678_v21  ;;  %v7805_v32 = vmul.f32 -1.442695, %v11145_v19  ;;  %v11171_v63 = vpop.permute.xlu2 %2410  ;;  %v4264_v35 = vor.u32 %v4262_v39, %v4261_v37  ;;  %v8421_v54 = vpop.eup %8420  ;;  %v8062_v26 = vld [vmem:[%s13176_s5 + $0x48] sm:$0xff] }
 0x335   : > { %v4396_v30 = vsel %vm8959_vm3, %v4261_v37, 0  ;;  %v3687_v43 = vsel %vm11155_vm9, %v3686_v3, %v3682_v22  ;;  %v11179_v38 = vadd.f32 1.0, %v8421_v54  ;;  %vm3695_vm11 = vweird.f32 %v8419_v50  ;;  %5399 = vmatpush.bf16.msrb.mxu1 %v8062_v26 }
 0x336   : > { %v3691_v8 = vsub.f32 1.0, %v3690_v25  ;;  %8422 = vpow2.f32 %v7805_v32  ;;  %v11186_v29 = vsel %vm8959_vm3, 0, %v4264_v35  ;;  %v4653_v37 = vrot.slane %v4396_v30, 1  ;;  %vm3696_vm14 = vmor %vm3694_vm12, %vm3695_vm11 }
 0x337   : > { %13309 = vst [vmem:[#allocation36_spill] sm:$0xff] %v11186_v29  ;;  %v3151_v21 = vpop.f32.mrf.mxu2  ;;  %v4652_v25 = vrot.slane %v11186_v29, 1  ;;  %8424 = vrcp.f32 %v11179_v38  ;;  %4879 = vrot.lane.b32.xlu0 %v11046_v47, %s8811_s29  ;;  %v3990_v53 = vmul.f32 %v3687_v43, %v11033_v58  ;;  %v3701_v54 = vor.u32 1.1754944e-38, %v3700_v36  ;;  %v11209_v58 = vpop.f32.mrf.mxu3 }
 0x338   : > { %v3692_v39 = vmul.f32 %v8419_v50, %v3691_v8  ;;  %v3152_v3 = vadd.f32 %v3151_v21, %v3053_v17  ;;  %v4494_v8 = vshll.u32 %v11186_v29, 16  ;;  %vm3699_vm15 = vcmp.eq.f32.partialorder %v3698_v24, 8.507059e+37 }
 0x339   : > { %v11194_v32 = vpop.f32.mrf.mxu1  ;;  %v11197_v35 = vsel %vm2251_vm4, %v4652_v25, %v4653_v37  ;;  %v3715_v14 = vand.u32 2147483648, %v11179_v38  ;;  %vm3709_vm2 = vweird.f32 %v11179_v38 }
 0x33a   : > { %v3693_v22 = vadd.f32 %v8419_v50, %v3692_v39  ;;  %13310 = vst [vmem:[#allocation37_spill] sm:$0xff] %v11197_v35  ;;  %v11201_v26 = vadd.f32 %v10806_v6, %v3152_v3  ;;  %v11203_v9 = vpop.permute.xlu1 %6355  ;;  %4757 = vrot.lane.b32.xlu2 %v11107_v55, %s8813_s24  ;;  %4821 = vrot.lane.b32.xlu1 %v11197_v35, %s8812_s23  ;;  %v4496_v24 = vrot.slane %v4494_v8, 1  ;;  %v4499_v39 = vshll.u32 %v4396_v30, 16 }
 0x33b   : > { %13311 = vst [vmem:[#allocation38_spill] sm:$0xff] %v11203_v9  ;;  %v4062_v6 = vpack.c.bf16 %v3990_v53, %v3990_v53 }
 0x33c   : > { %v3697_v60 = vsel %vm3696_vm14, %v8419_v50, %v3693_v22  ;;  %v8423_v43 = vpop.eup %8422  ;;  %v11211_v36 = vpop.permute.xlu2 %4745  ;;  %v4492_v50 = vshrl.u32 %v11186_v29, 16  ;;  %v7806_v37 = vmul.f32 -1.442695, %v11201_v26 }
 0x33d   : > { %v3702_v17 = vsel %vm3699_vm15, %v3701_v54, %v3697_v60  ;;  %v11215_v25 = vadd.f32 1.0, %v8423_v43  ;;  %v8425_v22 = vpop.eup %8424  ;;  %v4171_v30 = vunpack.c.l.b16 %v4062_v6 }
 0x33e   : > { %v3991_v21 = vmul.f32 %v3702_v17, %v11061_v48  ;;  %v4497_v3 = vor.u32 %v4496_v24, %v4492_v50  ;;  %v3705_v54 = vmul.f32 %v8425_v22, %v11179_v38  ;;  %v4501_v48 = vrot.slane %v4499_v39, 1 }
 0x33f   : > { %8426 = vrcp.f32 %v11215_v25  ;;  %v3153_v60 = vpop.f32.mrf.mxu2  ;;  %4787 = vrot.lane.b32.xlu0 %v11086_v2, %s8811_s29  ;;  %v3713_v50 = vand.u32 2147483647, %v11179_v38  ;;  %vm3710_vm1 = vweird.f32 %v8425_v22  ;;  %v3058_v38 = vadd.f32 %v10886_v23, %v11194_v32 }
 0x340   : > { %v4063_v9 = vpack.c.bf16 %v3991_v21, %v3991_v21  ;;  %8428 = vpow2.f32 %v7806_v37  ;;  %v3706_v8 = vsub.f32 1.0, %v3705_v54  ;;  %v3154_v43 = vadd.f32 %v3153_v60, %v3055_v33  ;;  %v11242_v33 = vpop.f32.mrf.mxu3  ;;  %vm3711_vm6 = vmor %vm3709_vm2, %vm3710_vm1 }
 0x341   : > { %v11224_v17 = vpop.f32.mrf.mxu1  ;;  %v11229_v24 = vsel %vm1998_vm5, %v4497_v3, %v4501_v48  ;;  %vm3714_vm7 = vcmp.eq.f32.partialorder %v3713_v50, 8.507059e+37  ;;  %v3716_v48 = vor.u32 1.1754944e-38, %v3715_v14  ;;  %v3728_v50 = vand.u32 2147483647, %v11215_v25 }
 0x342   : > { %v4172_v53 = vunpack.c.l.b16 %v4063_v9  ;;  %13312 = vst [vmem:[#allocation39_spill] sm:$0xff] %v11229_v24  ;;  %v3707_v37 = vmul.f32 %v8425_v22, %v3706_v8  ;;  %v11234_v2 = vadd.f32 %v10853_v0, %v3154_v43  ;;  %v11236_v39 = vpop.permute.xlu1 %4809  ;;  %4851 = vrot.lane.b32.xlu2 %v11186_v29, %s8813_s24  ;;  %4727 = vrot.lane.b32.xlu1 %v11229_v24, %s8812_s23  ;;  %v3730_v14 = vand.u32 2147483648, %v11215_v25 }
 0x343   : > { %vm3724_vm9 = vweird.f32 %v11215_v25  ;;  %vm3729_vm12 = vcmp.eq.f32.partialorder %v3728_v50, 8.507059e+37 }
 0x344   : > { %v11231_v21 = vpack.c.b16 %v4172_v53, %v4171_v30  ;;  %v11244_v9 = vpop.permute.xlu2 %4747  ;;  %v3708_v3 = vadd.f32 %v8425_v22, %v3707_v37  ;;  %v7807_v54 = vmul.f32 -1.442695, %v11234_v2 }
 0x345   : > { %v8427_v6 = vpop.eup %8426 }
 0x346   : > { %13313 = vst [vmem:[#allocation40_spill] sm:$0xff] %v11231_v21  ;;  %v4266_v0 = vshrl.u32 %v11231_v21, 16  ;;  %v8429_v60 = vpop.eup %8428  ;;  %v3720_v30 = vmul.f32 %v8427_v6, %v11215_v25  ;;  %v3712_v53 = vsel %vm3711_vm6, %v8425_v22, %v3708_v3  ;;  %8430 = vpow2.f32 %v7807_v54 }
 0x347   : > { %v11250_v8 = vadd.f32 1.0, %v8429_v60  ;;  %v3717_v42 = vsel %vm3714_vm7, %v3716_v48, %v3712_v53  ;;  %4881 = vrot.lane.b32.xlu0 %v11148_v4, %s8811_s29  ;;  %v4269_v55 = vshll.u32 %v11231_v21, 16  ;;  %vm3725_vm8 = vweird.f32 %v8427_v6 }
 0x348   : > { %v4268_v43 = vrot.slane %v4266_v0, 7  ;;  %v3721_v47 = vsub.f32 1.0, %v3720_v30  ;;  %v3156_v37 = vpop.f32.mrf.mxu2  ;;  %v3992_v0 = vmul.f32 %v3717_v42, %v11104_v62  ;;  %vm3726_vm11 = vmor %vm3724_vm9, %vm3725_vm8 }
 0x349   : > { %8432 = vrcp.f32 %v11250_v8  ;;  %v11260_v22 = vpop.f32.mrf.mxu1  ;;  %v3157_v54 = vadd.f32 %v3156_v37, %v3058_v38  ;;  %v8053_v37 = vld [vmem:[%s13176_s5] sm:$0xff]  ;;  %vm3739_vm15 = vweird.f32 %v11250_v8 }
 0x34a   : > { %v3722_v3 = vmul.f32 %v8427_v6, %v3721_v47  ;;  %v11263_v32 = vpop.permute.xlu1 %4715  ;;  %4759 = vrot.lane.b32.xlu2 %v11197_v35, %s8813_s24  ;;  %v4271_v60 = vor.u32 %v4269_v55, %v4268_v43  ;;  %v3731_v47 = vor.u32 1.1754944e-38, %v3730_v14  ;;  %v4397_v62 = vsel %vm8959_vm3, %v4268_v43, 0  ;;  %v11279_v55 = vpop.f32.mrf.mxu3  ;;  %5311 = vmatpush.bf16.msra.mxu3 %v8053_v37 }
 0x34b   : > { %v11269_v30 = vadd.f32 %v10908_v31, %v3157_v54  ;;  %v3060_v43 = vadd.f32 %v10886_v23, %v11224_v17  ;;  %v3745_v37 = vand.u32 2147483648, %v11250_v8 }
 0x34c   : > { %v3723_v48 = vadd.f32 %v8427_v6, %v3722_v3  ;;  %v11271_v53 = vpop.permute.xlu2 %4841  ;;  %v8431_v21 = vpop.eup %8430  ;;  %v11275_v42 = vsel %vm8959_vm3, 0, %v4271_v60  ;;  %v4064_v3 = vpack.c.bf16 %v3992_v0, %v3992_v0  ;;  %v2737_v0 = vsel %vm2556_vm10, %v10542_v15, %v11073_v28 }
 0x34d   : > { %v11281_v25 = vadd.f32 1.0, %v8431_v21  ;;  %v7808_v31 = vmul.f32 -1.442695, %v11269_v30  ;;  %v4655_v50 = vrot.slane %v11275_v42, 1  ;;  %v4506_v60 = vshll.u32 %v11275_v42, 16 }
 0x34e   : > { %v3727_v38 = vsel %vm3726_vm11, %v8427_v6, %v3723_v48  ;;  %v4656_v48 = vrot.slane %v4397_v62, 1  ;;  %v4173_v35 = vunpack.c.l.b16 %v4064_v3  ;;  %v4504_v15 = vshrl.u32 %v11275_v42, 16 }
 0x34f   : > { %v11288_v14 = vpop.eup %8432  ;;  %v3732_v54 = vsel %vm3729_vm12, %v3731_v47, %v3727_v38  ;;  %8434 = vrcp.f32 %v11281_v25  ;;  %4789 = vrot.lane.b32.xlu0 %v11186_v29, %s8811_s29  ;;  %v4508_v28 = vrot.slane %v4506_v60, 1  ;;  %v4511_v3 = vshll.u32 %v4397_v62, 16 }
 0x350   : > { %v3993_v21 = vmul.f32 %v3732_v54, %v11145_v19  ;;  %v3735_v6 = vmul.f32 %v11288_v14, %v11250_v8  ;;  %v3158_v4 = vpop.f32.mrf.mxu2  ;;  %8436 = vpow2.f32 %v7808_v31  ;;  %v11305_v38 = vsel %vm2251_vm4, %v4655_v50, %v4656_v48 }
 0x351   : > { %v11302_v17 = vpop.f32.mrf.mxu1  ;;  %v3159_v54 = vadd.f32 %v3158_v4, %v3060_v43  ;;  %4823 = vrot.lane.b32.xlu1 %v11305_v38, %s8812_s23  ;;  %v2773_v43 = vsel %vm508_vm0, %v2737_v0, %v11120_v34  ;;  %vm3740_vm14 = vweird.f32 %v11288_v14  ;;  %v3743_v62 = vand.u32 2147483647, %v11250_v8 }
 0x352   : > { %v4065_v47 = vpack.c.bf16 %v3993_v21, %v3993_v21  ;;  %v3736_v19 = vsub.f32 1.0, %v3735_v6  ;;  %v11310_v29 = vpop.permute.xlu1 %4811  ;;  %4853 = vrot.lane.b32.xlu2 %v11275_v42, %s8813_s24  ;;  %v11326_v57 = vpop.f32.mrf.mxu3  ;;  %v3063_v34 = vadd.f32 %v10886_v23, %v11260_v22  ;;  %vm11335_vm1 = vmor %vm3739_vm15, %vm3740_vm14  ;;  %v3746_v0 = vor.u32 1.1754944e-38, %v3745_v37 }
 0x353   : > { %v11317_v50 = vadd.f32 %v10950_v7, %v3159_v54  ;;  %13315 = vst [vmem:[#allocation42_spill] sm:$0xff] %v11326_v57  ;;  %v4513_v8 = vrot.slane %v4511_v3, 1  ;;  %v3758_v57 = vand.u32 2147483647, %v11281_v25  ;;  %vm3744_vm2 = vcmp.eq.f32.partialorder %v3743_v62, 8.507059e+37 }
 0x354   : > { %v4174_v31 = vunpack.c.l.b16 %v4065_v47  ;;  %v3737_v21 = vmul.f32 %v11288_v14, %v3736_v19  ;;  %v11319_v4 = vpop.permute.xlu2 %4749  ;;  %v4509_v19 = vor.u32 %v4508_v28, %v4504_v15  ;;  %v8061_v15 = vld [vmem:[%s13176_s5 + $0x40] sm:$0xff]  ;;  %v2592_v62 = vsel %vm2556_vm10, %v10357_v20, %v11162_v56 }
 0x355   : > { %v8435_v6 = vpop.eup %8434  ;;  %v7809_v47 = vmul.f32 -1.442695, %v11317_v50  ;;  %5400 = vmatpush.bf16.msrb.mxu1 %v8061_v15  ;;  %vm3754_vm7 = vweird.f32 %v11281_v25  ;;  %vm3759_vm9 = vcmp.eq.f32.partialorder %v3758_v57, 8.507059e+37  ;;  %v3065_v57 = vadd.f32 %v10886_v23, %v11302_v17 }
 0x356   : > { %v11324_v48 = vpack.c.b16 %v4174_v31, %v4173_v35  ;;  %v3738_v60 = vadd.f32 %v11288_v14, %v3737_v21  ;;  %v8437_v7 = vpop.eup %8436  ;;  %v3750_v54 = vmul.f32 %v8435_v6, %v11281_v25  ;;  %vm3755_vm6 = vweird.f32 %v8435_v6 }
 0x357   : > { %v11339_v31 = vadd.f32 1.0, %v8437_v7  ;;  %8438 = vpow2.f32 %v7809_v47  ;;  %4883 = vrot.lane.b32.xlu0 %v11229_v24, %s8811_s29  ;;  %v3760_v7 = vand.u32 2147483648, %v11281_v25  ;;  %v11353_v47 = vsel %vm1998_vm5, %v4509_v19, %v4513_v8  ;;  %vm3756_vm8 = vmor %vm3754_vm7, %vm3755_vm6 }
 0x358   : > { %13314 = vst [vmem:[#allocation41_spill] sm:$0xff] %v11324_v48  ;;  %v3161_v28 = vpop.f32.mrf.mxu2  ;;  %v3742_v22 = vsel %vm11335_vm1, %v11288_v14, %v3738_v60  ;;  %v3751_v21 = vsub.f32 1.0, %v3750_v54  ;;  %v4273_v3 = vshrl.u32 %v11324_v48, 16  ;;  %v4906_v60 = vsel %vm2556_vm10, %v10482_v12, %v11112_v44 }
 0x359   : > { %v3162_v37 = vadd.f32 %v3161_v28, %v3063_v34  ;;  %8440 = vrcp.f32 %v11339_v31  ;;  %v2555_v49 = vpop.permute.xlu0 %2554  ;;  %4729 = vrot.lane.b32.xlu1 %v11353_v47, %s8812_s23  ;;  %v3747_v19 = vsel %vm3744_vm2, %v3746_v0, %v3742_v22  ;;  %v3761_v44 = vor.u32 1.1754944e-38, %v3760_v7 }
 0x35a   : > { %v11355_v24 = vpop.f32.mrf.mxu1  ;;  %v3752_v35 = vmul.f32 %v8435_v6, %v3751_v21  ;;  %4761 = vrot.lane.b32.xlu2 %v11305_v38, %s8813_s24  ;;  %v2826_v54 = vsel %vm2629_vm13, %v2773_v43, %v2555_v49  ;;  %v11376_v8 = vpop.permute.xlu1 %4717  ;;  %v4275_v49 = vrot.slane %v4273_v3, 7  ;;  %v4276_v43 = vshll.u32 %v11324_v48, 16 }
 0x35b   : > { %v11361_v14 = vadd.f32 %v10975_v41, %v3162_v37  ;;  %3185 = vmatmul.bf16.gmra.mxu2 %v2826_v54  ;;  %v3994_v0 = vmul.f32 %v3747_v19, %v11201_v26  ;;  %v2628_v25 = vsel %vm508_vm0, %v2592_v62, %v11171_v63  ;;  %v11387_v21 = vpop.f32.mrf.mxu3  ;;  %v11402_v63 = vsel %vm2556_vm10, %v10659_v16, %v11236_v39 }
 0x35c   : > { %v11369_v34 = vpop.permute.xlu2 %4843  ;;  %v3753_v15 = vadd.f32 %v8435_v6, %v3752_v35  ;;  %v4278_v26 = vor.u32 %v4276_v43, %v4275_v49  ;;  %v11407_v23 = vsel %vm2556_vm10, %v10582_v52, %v11263_v32  ;;  %vm3769_vm11 = vweird.f32 %v11339_v31 }
 0x35d   : > { %v7810_v41 = vmul.f32 -1.442695, %v11361_v14  ;;  %v8439_v28 = vpop.eup %8438  ;;  %v3775_v52 = vand.u32 2147483648, %v11339_v31  ;;  %v3773_v43 = vand.u32 2147483647, %v11339_v31 }
 0x35e   : > { %v3757_v22 = vsel %vm3756_vm8, %v8435_v6, %v3753_v15  ;;  %v11381_v20 = vadd.f32 1.0, %v8439_v28  ;;  %v4938_v6 = vsel %vm508_vm0, %v4906_v60, %v11211_v36  ;;  %v4066_v36 = vpack.c.bf16 %v3994_v0, %v3994_v0 }
 0x35f   : > { %8442 = vpow2.f32 %v7810_v41  ;;  %v11383_v56 = vpop.eup %8440  ;;  %v3762_v37 = vsel %vm3759_vm9, %v3761_v44, %v3757_v22  ;;  %4791 = vrot.lane.b32.xlu0 %v11275_v42, %s8811_s29  ;;  %v11415_v62 = vsel %vm8959_vm3, 0, %v4278_v26  ;;  %vm3774_vm15 = vcmp.eq.f32.partialorder %v3773_v43, 8.507059e+37 }
 0x360   : > { %v3163_v7 = vpop.f32.mrf.mxu2  ;;  %v3995_v3 = vmul.f32 %v3762_v37, %v11234_v2  ;;  %v3765_v35 = vmul.f32 %v11383_v56, %v11339_v31  ;;  %8444 = vrcp.f32 %v11381_v20  ;;  %v11411_v2 = vsel %vm8959_vm3, %v4275_v49, 0 }
 0x361   : > { %v3164_v17 = vadd.f32 %v3163_v7, %v3065_v57  ;;  %v2447_v19 = vpop.permute.xlu0 %2446  ;;  %vm3770_vm12 = vweird.f32 %v11383_v56  ;;  %v4658_v44 = vrot.slane %v11415_v62, 1  ;;  %v4659_v49 = vrot.slane %v11411_v2, 1 }
 0x362   : > { %v4067_v60 = vpack.c.bf16 %v3995_v3, %v3995_v3  ;;  %v3766_v54 = vsub.f32 1.0, %v3765_v35  ;;  %4855 = vrot.lane.b32.xlu2 %v11415_v62, %s8813_s24  ;;  %v3069_v39 = vpop.f32.mrf.mxu1  ;;  %v2682_v22 = vsel %vm2629_vm13, %v2628_v25, %v2447_v19  ;;  %v4175_v57 = vunpack.c.l.b16 %v4066_v36  ;;  %v11438_v26 = vpop.permute.xlu1 %4813  ;;  %vm11448_vm14 = vmor %vm3769_vm11, %vm3770_vm12  ;;  %v11458_v36 = vld [vmem:[%s13175_s4] ss:$0 sm:$0xff] }
 0x363   : > { %v11421_v16 = vadd.f32 %v11027_v5, %v3164_v17  ;;  %v11441_v3 = vsel %vm2251_vm4, %v4658_v44, %v4659_v49  ;;  %3086 = vmatmul.bf16.gmra.mxu1 %v2682_v22  ;;  %v4518_v35 = vshll.u32 %v11415_v62, 16  ;;  %v3776_v25 = vor.u32 1.1754944e-38, %v3775_v52 }
 0x364   : > { %v11425_v32 = vpop.permute.xlu2 %4751  ;;  %v4176_v41 = vunpack.c.l.b16 %v4067_v60  ;;  %v3767_v28 = vmul.f32 %v11383_v56, %v3766_v54  ;;  %v3068_v60 = vadd.f32 %v11458_v36, %v11355_v24  ;;  %4825 = vrot.lane.b32.xlu1 %v11441_v3, %s8812_s23  ;;  %v3790_v24 = vand.u32 2147483648, %v11381_v20 }
 0x365   : > { %v8443_v15 = vpop.eup %8442  ;;  %v7811_v5 = vmul.f32 -1.442695, %v11421_v16  ;;  %v4520_v48 = vrot.slane %v4518_v35, 1  ;;  %vm3784_vm1 = vweird.f32 %v11381_v20 }
 0x366   : > { %v11431_v0 = vadd.f32 1.0, %v8443_v15  ;;  %v11435_v37 = vpop.eup %8444  ;;  %v3768_v7 = vadd.f32 %v11383_v56, %v3767_v28  ;;  %v11466_v52 = vpack.c.b16 %v4176_v41, %v4175_v57  ;;  %v3788_v28 = vand.u32 2147483647, %v11381_v20 }
 0x367   : > { %v3780_v19 = vmul.f32 %v11435_v37, %v11381_v20  ;;  %4885 = vrot.lane.b32.xlu0 %v11353_v47, %s8811_s29  ;;  %v4516_v41 = vshrl.u32 %v11415_v62, 16  ;;  %vm3785_vm2 = vweird.f32 %v11435_v37 }
 0x368   : > { %8446 = vrcp.f32 %v11431_v0  ;;  %v3166_v31 = vpop.f32.mrf.mxu2  ;;  %v3285_v54 = vpop.f32.mrf.mxu3  ;;  %v3772_v15 = vsel %vm11448_vm14, %v11383_v56, %v3768_v7  ;;  %vm11483_vm6 = vcmp.eq.f32.partialorder %v3788_v28, 8.507059e+37  ;;  %v4280_v35 = vshrl.u32 %v11466_v52, 16  ;;  %vm3786_vm7 = vmor %vm3784_vm1, %vm3785_vm2 }
 0x369   : > { %8448 = vpow2.f32 %v7811_v5  ;;  %v3781_v44 = vsub.f32 1.0, %v3780_v19  ;;  %v3167_v49 = vadd.f32 %v3166_v31, %v3068_v60  ;;  %v4778_v22 = vpop.permute.xlu0 %4777  ;;  %v3777_v57 = vsel %vm3774_vm15, %v3776_v25, %v3772_v15 }
 0x36a   : > { %v4970_v54 = vsel %vm2629_vm13, %v4938_v6, %v4778_v22  ;;  %4763 = vrot.lane.b32.xlu2 %v11441_v3, %s8813_s24  ;;  %v4521_v43 = vor.u32 %v4520_v48, %v4516_v41  ;;  %v4523_v6 = vshll.u32 %v11411_v2, 16  ;;  %v3791_v19 = vor.u32 1.1754944e-38, %v3790_v24  ;;  %v3072_v48 = vpop.f32.mrf.mxu1 }
 0x36b   : > { %v3782_v17 = vmul.f32 %v11435_v37, %v3781_v44  ;;  %v11479_v56 = vadd.f32 %v11053_v27, %v3167_v49  ;;  %5312 = vmatmul.bf16.vlgmr.msra.gmra.mxu3 %v4970_v54  ;;  %7894 = vmatmul.msk.bf16.vlgmr.msrb.gmra.mxu2 %vm2556_vm10, %v10733_v61  ;;  %v3070_v60 = vadd.f32 %v11458_v36, %v3069_v39  ;;  %v4283_v44 = vshll.u32 %v11466_v52, 16 }
 0x36c   : > { %v11490_v7 = vpop.permute.xlu2 %4845  ;;  %v3996_v2 = vmul.f32 %v3777_v57, %v11269_v30  ;;  %v4525_v28 = vrot.slane %v4523_v6, 1  ;;  %v4282_v22 = vrot.slane %v4280_v35, 7  ;;  %v5022_v6 = vsel %vm2556_vm10, %v10822_v45, %v11310_v29  ;;  %v11524_v35 = vpop.permute.xlu1 %4719 }
 0x36d   : > { %v3783_v25 = vadd.f32 %v11435_v37, %v3782_v17  ;;  %v7812_v31 = vmul.f32 -1.442695, %v11479_v56  ;;  %v11540_v29 = vsel %vm2556_vm10, %v10681_v10, %v11376_v8  ;;  %vm3799_vm9 = vweird.f32 %v11431_v0 }
 0x36e   : > { %v11493_v27 = vpop.eup %8446  ;;  %v11514_v41 = vsel %vm1998_vm5, %v4521_v43, %v4525_v28 }
 0x36f   : > { %v8449_v15 = vpop.eup %8448  ;;  %v3795_v61 = vmul.f32 %v11493_v27, %v11431_v0  ;;  %v3787_v24 = vsel %vm3786_vm7, %v11435_v37, %v3783_v25  ;;  %8450 = vpow2.f32 %v7812_v31  ;;  %4793 = vrot.lane.b32.xlu0 %v11415_v62, %s8811_s29  ;;  %v5066_v37 = vsel %vm508_vm0, %v11402_v63, %v11271_v53  ;;  %4731 = vrot.lane.b32.xlu1 %v11514_v41, %s8812_s23 }
 0x370   : > { %v11507_v39 = vadd.f32 1.0, %v8449_v15  ;;  %v3168_v30 = vpop.f32.mrf.mxu2  ;;  %v3287_v49 = vpop.f32.mrf.mxu3  ;;  %v3792_v20 = vsel %vm11483_vm6, %v3791_v19, %v3787_v24  ;;  %v4285_v53 = vor.u32 %v4283_v44, %v4282_v22  ;;  %v11544_v63 = vsel %vm508_vm0, %v5022_v6, %v11369_v34 }
 0x371   : > { %v3796_v54 = vsub.f32 1.0, %v3795_v61  ;;  %v3169_v57 = vadd.f32 %v3168_v30, %v3070_v60  ;;  %v3997_v17 = vmul.f32 %v3792_v20, %v11317_v50  ;;  %v11528_v5 = vpop.permute.xlu0 %4779  ;;  %v4940_v50 = vsel %vm508_vm0, %v11407_v23, %v11244_v9 }
 0x372   : > { %8452 = vrcp.f32 %v11507_v39  ;;  %v11548_v19 = vsel %vm8959_vm3, %v4282_v22, 0  ;;  %v3805_v60 = vand.u32 2147483648, %v11431_v0  ;;  %v11554_v9 = vsel %vm8959_vm3, 0, %v4285_v53  ;;  %v3074_v49 = vpop.f32.mrf.mxu1 }
 0x373   : > { %v3797_v43 = vmul.f32 %v11493_v27, %v3796_v54  ;;  %v11532_v25 = vadd.f32 %v11093_v13, %v3169_v57  ;;  %v4069_v45 = vpack.c.bf16 %v3997_v17, %v3997_v17  ;;  %v4068_v13 = vpack.c.bf16 %v3996_v2, %v3996_v2  ;;  %4857 = vrot.lane.b32.xlu2 %v11554_v9, %s8813_s24 }
 0x374   : > { %v11556_v23 = vpop.permute.xlu2 %4753  ;;  %vm3800_vm8 = vweird.f32 %v11493_v27  ;;  %v4661_v34 = vrot.slane %v11554_v9, 1  ;;  %v4662_v15 = vrot.slane %v11548_v19, 1  ;;  %v3803_v44 = vand.u32 2147483647, %v11431_v0 }
 0x375   : > { %v7813_v31 = vmul.f32 -1.442695, %v11532_v25  ;;  %v8451_v10 = vpop.eup %8450  ;;  %v3798_v8 = vadd.f32 %v11493_v27, %v3797_v43  ;;  %v4178_v2 = vunpack.c.l.b16 %v4069_v45  ;;  %v3073_v24 = vadd.f32 %v11458_v36, %v3072_v48  ;;  %vm11577_vm11 = vmor %vm3799_vm9, %vm3800_vm8 }
 0x376   : > { %v11565_v61 = vadd.f32 1.0, %v8451_v10  ;;  %v11570_v30 = vsel %vm2251_vm4, %v4661_v34, %v4662_v15  ;;  %v4530_v20 = vshll.u32 %v11554_v9, 16  ;;  %v4177_v54 = vunpack.c.l.b16 %v4068_v13  ;;  %v11594_v34 = vpop.permute.xlu1 %4815 }
 0x377   : > { %8454 = vpow2.f32 %v7813_v31  ;;  %4887 = vrot.lane.b32.xlu0 %v11514_v41, %s8811_s29  ;;  %v3806_v0 = vor.u32 1.1754944e-38, %v3805_v60  ;;  %v3802_v17 = vsel %vm11577_vm11, %v11493_v27, %v3798_v8  ;;  %v3818_v6 = vand.u32 2147483647, %v11507_v39  ;;  %4827 = vrot.lane.b32.xlu1 %v11570_v30, %s8812_s23 }
 0x378   : > { %v8453_v28 = vpop.eup %8452  ;;  %v3171_v22 = vpop.f32.mrf.mxu2  ;;  %8456 = vrcp.f32 %v11565_v61  ;;  %v3820_v43 = vand.u32 2147483648, %v11507_v39  ;;  %v11590_v13 = vpack.c.b16 %v4178_v2, %v4177_v54  ;;  %v4532_v10 = vrot.slane %v4530_v20, 1 }
 0x379   : > { %v3810_v48 = vmul.f32 %v8453_v28, %v11507_v39  ;;  %v3172_v53 = vadd.f32 %v3171_v22, %v3073_v24  ;;  %v4874_v45 = vpop.permute.xlu0 %4873  ;;  %vm3804_vm12 = vcmp.eq.f32.partialorder %v3803_v44, 8.507059e+37  ;;  %vm3814_vm14 = vweird.f32 %v11507_v39 }
 0x37a   : > { %v5098_v31 = vsel %vm2629_vm13, %v5066_v37, %v4874_v45  ;;  %v4528_v8 = vshrl.u32 %v11554_v9, 16  ;;  %v3807_v24 = vsel %vm3804_vm12, %v3806_v0, %v3802_v17  ;;  %vm3815_vm15 = vweird.f32 %v8453_v28 }
 0x37b   : > { %v3811_v60 = vsub.f32 1.0, %v3810_v48  ;;  %v11597_v27 = vadd.f32 %v11142_v59, %v3172_v53  ;;  %5401 = vmatmul.bf16.vlgmr.msrb.gmra.mxu1 %v5098_v31  ;;  %v4535_v2 = vshll.u32 %v11548_v19, 16  ;;  %7895 = vmatmul.msk.bf16.gmra.mxu2 %vm2556_vm10, %v10856_v40  ;;  %v4973_v54 = vsel %vm2629_vm13, %v4940_v50, %v11528_v5  ;;  %vm3816_vm2 = vmor %vm3814_vm14, %vm3815_vm15  ;;  %v3077_v31 = vpop.f32.mrf.mxu1 }
 0x37c   : > { %v11603_v37 = vpop.permute.xlu2 %4847  ;;  %4765 = vrot.lane.b32.xlu2 %v11570_v30, %s8813_s24  ;;  %v4533_v59 = vor.u32 %v4532_v10, %v4528_v8  ;;  %vm3819_vm1 = vcmp.eq.f32.partialorder %v3818_v6, 8.507059e+37  ;;  %v3821_v19 = vor.u32 1.1754944e-38, %v3820_v43  ;;  %5317 = vmatmul.bf16.gmra.mxu3 %v4973_v54  ;;  %v4287_v40 = vshrl.u32 %v11590_v13, 16 }
 0x37d   : > { %v8455_v15 = vpop.eup %8454  ;;  %v3812_v22 = vmul.f32 %v8453_v28, %v3811_v60  ;;  %v7814_v20 = vmul.f32 -1.442695, %v11597_v27  ;;  %v3075_v17 = vadd.f32 %v11458_v36, %v3074_v49  ;;  %v4537_v5 = vrot.slane %v4535_v2, 1 }
 0x37e   : > { %v11605_v44 = vadd.f32 1.0, %v8455_v15  ;;  %v11612_v57 = vpop.eup %8456  ;;  %v3998_v6 = vmul.f32 %v3807_v24, %v11361_v14  ;;  %v3833_v53 = vand.u32 2147483647, %v11565_v61  ;;  %v3835_v15 = vand.u32 2147483648, %v11565_v61 }
 0x37f   : > { %v3813_v0 = vadd.f32 %v8453_v28, %v3812_v22  ;;  %v3825_v48 = vmul.f32 %v11612_v57, %v11565_v61  ;;  %4795 = vrot.lane.b32.xlu0 %v11554_v9, %s8811_s29  ;;  %v11627_v60 = vsel %vm1998_vm5, %v4533_v59, %v4537_v5  ;;  %v4289_v14 = vrot.slane %v4287_v40, 7 }
 0x380   : > { %8458 = vrcp.f32 %v11605_v44  ;;  %v3173_v50 = vpop.f32.mrf.mxu2  ;;  %4733 = vrot.lane.b32.xlu1 %v11627_v60, %s8812_s23  ;;  %vm3829_vm6 = vweird.f32 %v11565_v61  ;;  %v4290_v2 = vshll.u32 %v11590_v13, 16  ;;  %vm3830_vm7 = vweird.f32 %v11612_v57 }
 0x381   : > { %v3817_v43 = vsel %vm3816_vm2, %v8453_v28, %v3813_v0  ;;  %8460 = vpow2.f32 %v7814_v20  ;;  %v3826_v45 = vsub.f32 1.0, %v3825_v48  ;;  %v3174_v10 = vadd.f32 %v3173_v50, %v3075_v17  ;;  %v11629_v8 = vpop.permute.xlu0 %4781  ;;  %v11652_v0 = vpop.permute.xlu1 %4721  ;;  %vm11674_vm9 = vmor %vm3829_vm6, %vm3830_vm7 }
 0x382   : > { %v3822_v39 = vsel %vm3819_vm1, %v3821_v19, %v3817_v43  ;;  %v4942_v28 = vsel %vm508_vm0, %v11540_v29, %v11319_v4  ;;  %vm11645_vm8 = vcmp.eq.f32.partialorder %v3833_v53, 8.507059e+37  ;;  %v4292_v19 = vor.u32 %v4290_v2, %v4289_v14 }
 0x383   : > { %v3999_v49 = vmul.f32 %v3822_v39, %v11421_v16  ;;  %v3827_v24 = vmul.f32 %v11612_v57, %v3826_v45  ;;  %v11641_v22 = vadd.f32 %v11209_v58, %v3174_v10  ;;  %v4070_v16 = vpack.c.bf16 %v3998_v6, %v3998_v6  ;;  %v3079_v10 = vpop.f32.mrf.mxu1 }
 0x384   : > { %v11649_v54 = vpop.permute.xlu2 %4755  ;;  %v11657_v40 = vsel %vm8959_vm3, %v4289_v14, 0  ;;  %v3836_v17 = vor.u32 1.1754944e-38, %v3835_v15  ;;  %v3848_v50 = vand.u32 2147483647, %v11605_v44  ;;  %v3850_v6 = vand.u32 2147483648, %v11605_v44 }
 0x385   : > { %v4071_v20 = vpack.c.bf16 %v3999_v49, %v3999_v49  ;;  %v3828_v29 = vadd.f32 %v11612_v57, %v3827_v24  ;;  %v7815_v58 = vmul.f32 -1.442695, %v11641_v22  ;;  %v11666_v39 = vsel %vm8959_vm3, 0, %v4292_v19 }
 0x386   : > { %v8459_v4 = vpop.eup %8458  ;;  %v3078_v15 = vadd.f32 %v11458_v36, %v3077_v31  ;;  %4859 = vrot.lane.b32.xlu2 %v11666_v39, %s8813_s24  ;;  %v4664_v14 = vrot.slane %v11666_v39, 1  ;;  %v4665_v24 = vrot.slane %v11657_v40, 1  ;;  %v4179_v2 = vunpack.c.l.b16 %v4070_v16 }
 0x387   : > { %v8461_v48 = vpop.eup %8460  ;;  %v3840_v5 = vmul.f32 %v8459_v4, %v11605_v44  ;;  %v4180_v43 = vunpack.c.l.b16 %v4071_v20  ;;  %8462 = vpow2.f32 %v7815_v58  ;;  %4889 = vrot.lane.b32.xlu0 %v11627_v60, %s8811_s29  ;;  %v3832_v20 = vsel %vm11674_vm9, %v11612_v57, %v3828_v29 }
 0x388   : > { %v11662_v53 = vadd.f32 1.0, %v8461_v48  ;;  %v3176_v45 = vpop.f32.mrf.mxu2  ;;  %vm3844_vm11 = vweird.f32 %v11605_v44  ;;  %vm3845_vm12 = vweird.f32 %v8459_v4  ;;  %v11689_v31 = vsel %vm2251_vm4, %v4664_v14, %v4665_v24 }
 0x389   : > { %v3841_v49 = vsub.f32 1.0, %v3840_v5  ;;  %v4876_v61 = vpop.permute.xlu0 %4875  ;;  %v3177_v19 = vadd.f32 %v3176_v45, %v3078_v15  ;;  %v11691_v48 = vpack.c.b16 %v4180_v43, %v4179_v2  ;;  %vm11693_vm14 = vcmp.eq.f32.partialorder %v3848_v50, 8.507059e+37  ;;  %4829 = vrot.lane.b32.xlu1 %v11689_v31, %s8812_s23  ;;  %vm3846_vm15 = vmor %vm3844_vm11, %vm3845_vm12 }
 0x38a   : > { %8464 = vrcp.f32 %v11662_v53  ;;  %v3851_v16 = vor.u32 1.1754944e-38, %v3850_v6  ;;  %v4542_v57 = vshll.u32 %v11666_v39, 16  ;;  %v3837_v29 = vsel %vm11645_vm8, %v3836_v17, %v3832_v20 }
 0x38b   : > { %v3842_v58 = vmul.f32 %v8459_v4, %v3841_v49  ;;  %v11703_v14 = vadd.f32 %v11242_v33, %v3177_v19  ;;  %v4547_v43 = vshll.u32 %v11657_v40, 16  ;;  %7896 = vmatmul.msk.bf16.gmra.mxu2 %vm2556_vm10, %v10932_v46  ;;  %v4540_v6 = vshrl.u32 %v11666_v39, 16 }
 0x38c   : > { %v4544_v45 = vrot.slane %v4542_v57, 1  ;;  %v4976_v59 = vsel %vm2629_vm13, %v4942_v28, %v11629_v8  ;;  %v5101_v33 = vsel %vm2629_vm13, %v11544_v63, %v4876_v61  ;;  %v3080_v40 = vadd.f32 %v11458_v36, %v3079_v10  ;;  %v11720_v44 = vpop.permute.xlu2 %4849  ;;  %v11725_v28 = vpop.permute.xlu1 %4817 }
 0x38d   : > { %v3843_v49 = vadd.f32 %v8459_v4, %v3842_v58  ;;  %v8463_v50 = vpop.eup %8462  ;;  %v7816_v46 = vmul.f32 -1.442695, %v11703_v14  ;;  %5322 = vmatmul.bf16.gmra.mxu3 %v4976_v59  ;;  %5406 = vmatmul.bf16.gmra.mxu1 %v5101_v33  ;;  %v4000_v2 = vmul.f32 %v3837_v29, %v11479_v56  ;;  %v4294_v20 = vshrl.u32 %v11691_v48, 16 }
 0x38e   : > { %v11716_v15 = vadd.f32 1.0, %v8463_v50  ;;  %v4545_v63 = vor.u32 %v4544_v45, %v4540_v6  ;;  %4767 = vrot.lane.b32.xlu2 %v11689_v31, %s8813_s24  ;;  %v4549_v56 = vrot.slane %v4547_v43, 1  ;;  %v5025_v19 = vsel %vm2556_vm10, %v10894_v51, %v11438_v26 }
 0x38f   : > { %v3847_v17 = vsel %vm3846_vm15, %v8459_v4, %v3843_v49  ;;  %4797 = vrot.lane.b32.xlu0 %v11666_v39, %s8811_s29  ;;  %v3863_v5 = vand.u32 2147483647, %v11662_v53  ;;  %v4072_v49 = vpack.c.bf16 %v4000_v2, %v4000_v2  ;;  %v3865_v50 = vand.u32 2147483648, %v11662_v53 }
 0x390   : > { %v8465_v24 = vpop.eup %8464  ;;  %v3852_v8 = vsel %vm11693_vm14, %v3851_v16, %v3847_v17  ;;  %v3178_v4 = vpop.f32.mrf.mxu2  ;;  %8466 = vrcp.f32 %v11716_v15  ;;  %v4296_v43 = vrot.slane %v4294_v20, 7  ;;  %v4297_v6 = vshll.u32 %v11691_v48, 16 }
 0x391   : > { %v4001_v61 = vmul.f32 %v3852_v8, %v11532_v25  ;;  %v3855_v58 = vmul.f32 %v8465_v24, %v11662_v53  ;;  %8468 = vpow2.f32 %v7816_v46  ;;  %v4784_v16 = vpop.permute.xlu0 %4783  ;;  %v11740_v25 = vsel %vm1998_vm5, %v4545_v63, %v4549_v56  ;;  %v8078_v56 = vld [vmem:[%s13178_s7 + $0x38] sm:$0xff] }
 0x392   : > { %v3179_v29 = vadd.f32 %v3178_v4, %v3080_v40  ;;  %4735 = vrot.lane.b32.xlu1 %v11740_v25, %s8812_s23  ;;  %v4912_v51 = vsel %vm2556_vm10, %v10834_v11, %v11524_v35  ;;  %vm3860_vm1 = vweird.f32 %v8465_v24  ;;  %v5070_v59 = vsel %vm508_vm0, %v5025_v19, %v11490_v7  ;;  %6663 = vmatpush.bf16.msrb.mxu0 %v8078_v56 }
 0x393   : > { %v4073_v10 = vpack.c.bf16 %v4001_v61, %v4001_v61  ;;  %v3856_v57 = vsub.f32 1.0, %v3855_v58  ;;  %vm3859_vm2 = vweird.f32 %v11662_v53  ;;  %vm11755_vm6 = vcmp.eq.f32.partialorder %v3863_v5, 8.507059e+37 }
 0x394   : > { %v11750_v45 = vadd.f32 %v11279_v55, %v3179_v29  ;;  %v4299_v17 = vor.u32 %v4297_v6, %v4296_v43  ;;  %v4401_v35 = vsel %vm8959_vm3, %v4296_v43, 0  ;;  %v4181_v8 = vunpack.c.l.b16 %v4072_v49  ;;  %vm3861_vm7 = vmor %vm3859_vm2, %vm3860_vm1  ;;  %v11774_v58 = vpop.permute.xlu2 %4757 }
 0x395   : > { %v3857_v26 = vmul.f32 %v8465_v24, %v3856_v57  ;;  %v4182_v46 = vunpack.c.l.b16 %v4073_v10  ;;  %v3866_v63 = vor.u32 1.1754944e-38, %v3865_v50  ;;  %v11781_v10 = vpop.permute.xlu1 %4723  ;;  %v3878_v50 = vand.u32 2147483647, %v11716_v15 }
 0x396   : > { %v8467_v40 = vpop.eup %8466  ;;  %v7817_v11 = vmul.f32 -1.442695, %v11750_v45  ;;  %v11765_v53 = vsel %vm8959_vm3, 0, %v4299_v17  ;;  %v3880_v43 = vand.u32 2147483648, %v11716_v15  ;;  %vm3874_vm9 = vweird.f32 %v11716_v15 }
 0x397   : > { %v3858_v2 = vadd.f32 %v8465_v24, %v3857_v26  ;;  %v8469_v55 = vpop.eup %8468  ;;  %v3870_v7 = vmul.f32 %v8467_v40, %v11716_v15  ;;  %4891 = vrot.lane.b32.xlu0 %v11740_v25, %s8811_s29  ;;  %4861 = vrot.lane.b32.xlu2 %v11765_v53, %s8813_s24  ;;  %v4667_v61 = vrot.slane %v11765_v53, 1  ;;  %v4554_v29 = vshll.u32 %v11765_v53, 16 }
 0x398   : > { %v11769_v20 = vadd.f32 1.0, %v8469_v55  ;;  %8470 = vpow2.f32 %v7817_v11  ;;  %v11784_v49 = vpack.c.b16 %v4182_v46, %v4181_v8  ;;  %vm3875_vm8 = vweird.f32 %v8467_v40 }
 0x399   : > { %v3862_v4 = vsel %vm3861_vm7, %v8465_v24, %v3858_v2  ;;  %v3871_v5 = vsub.f32 1.0, %v3870_v7  ;;  %v4668_v24 = vrot.slane %v4401_v35, 1  ;;  %v4878_v57 = vpop.permute.xlu0 %4877  ;;  %v4556_v33 = vrot.slane %v4554_v29, 1  ;;  %vm3876_vm11 = vmor %vm3874_vm9, %vm3875_vm8 }
 0x39a   : > { %v3867_v19 = vsel %vm11755_vm6, %v3866_v63, %v3862_v4  ;;  %8472 = vrcp.f32 %v11769_v20  ;;  %v4944_v46 = vsel %vm508_vm0, %v4912_v51, %v11425_v32  ;;  %v5104_v2 = vsel %vm2629_vm13, %v5070_v59, %v4878_v57 }
 0x39b   : > { %v3872_v6 = vmul.f32 %v8467_v40, %v3871_v5  ;;  %v11790_v26 = vsel %vm2251_vm4, %v4667_v61, %v4668_v24  ;;  %v4002_v17 = vmul.f32 %v3867_v19, %v11597_v27  ;;  %7897 = vmatmul.msk.bf16.gmra.mxu2 %vm2556_vm10, %v11013_v1  ;;  %v4552_v55 = vshrl.u32 %v11765_v53, 16 }
 0x39c   : > { %4831 = vrot.lane.b32.xlu1 %v11790_v26, %s8812_s23  ;;  %v4559_v8 = vshll.u32 %v4401_v35, 16  ;;  %v4979_v63 = vsel %vm2629_vm13, %v4944_v46, %v4784_v16  ;;  %v3881_v15 = vor.u32 1.1754944e-38, %v3880_v43  ;;  %v4301_v7 = vshrl.u32 %v11784_v49, 16  ;;  %v11816_v57 = vpop.permute.xlu2 %4851 }
 0x39d   : > { %v3873_v11 = vadd.f32 %v8467_v40, %v3872_v6  ;;  %5327 = vmatmul.bf16.gmra.mxu3 %v4979_v63  ;;  %5411 = vmatmul.bf16.gmra.mxu1 %v5104_v2  ;;  %vm3879_vm12 = vcmp.eq.f32.partialorder %v3878_v50, 8.507059e+37  ;;  %v4557_v51 = vor.u32 %v4556_v33, %v4552_v55  ;;  %v4074_v59 = vpack.c.bf16 %v4002_v17, %v4002_v17  ;;  %v11814_v5 = vpop.permute.xlu1 %4819 }
 0x39e   : > { %v8471_v27 = vpop.eup %8470  ;;  %v4303_v16 = vrot.slane %v4301_v7, 7  ;;  %v4304_v61 = vshll.u32 %v11784_v49, 16  ;;  %v4561_v19 = vrot.slane %v4559_v8, 1  ;;  %v3895_v17 = vand.u32 2147483648, %v11769_v20  ;;  %v13332_v8 = vld [vmem:[#allocation29_spill] sm:$0xff] }
 0x39f   : > { %v3877_v4 = vsel %vm3876_vm11, %v8467_v40, %v3873_v11  ;;  %v11804_v32 = vadd.f32 1.0, %v8471_v27  ;;  %4799 = vrot.lane.b32.xlu0 %v11765_v53, %s8811_s29  ;;  %4769 = vrot.lane.b32.xlu2 %v11790_v26, %s8813_s24  ;;  %v4183_v33 = vunpack.c.l.b16 %v4074_v59  ;;  %v5028_v63 = vsel %vm2556_vm10, %v13332_v8, %v11594_v34 }
 0x3a0   : > { %v8473_v1 = vpop.eup %8472  ;;  %v3882_v35 = vsel %vm3879_vm12, %v3881_v15, %v3877_v4  ;;  %v4306_v29 = vor.u32 %v4304_v61, %v4303_v16  ;;  %v11819_v6 = vsel %vm1998_vm5, %v4557_v51, %v4561_v19  ;;  %v4402_v46 = vsel %vm8959_vm3, %v4303_v16, 0 }
 0x3a1   : > { %v4003_v56 = vmul.f32 %v3882_v35, %v11641_v22  ;;  %v3885_v40 = vmul.f32 %v8473_v1, %v11769_v20  ;;  %8474 = vrcp.f32 %v11804_v32  ;;  %v4786_v24 = vpop.permute.xlu0 %4785  ;;  %vm3890_vm14 = vweird.f32 %v8473_v1  ;;  %v13333_v35 = vld [vmem:[#allocation28_spill] sm:$0xff] }
 0x3a2   : > { %v11826_v22 = vsel %vm8959_vm3, 0, %v4306_v29  ;;  %v3893_v27 = vand.u32 2147483647, %v11769_v20  ;;  %vm3889_vm15 = vweird.f32 %v11769_v20  ;;  %v4671_v59 = vrot.slane %v4402_v46, 1 }
 0x3a3   : > { %v4075_v50 = vpack.c.bf16 %v4003_v56, %v4003_v56  ;;  %v3886_v43 = vsub.f32 1.0, %v3885_v40  ;;  %v4670_v55 = vrot.slane %v11826_v22, 1  ;;  %v4566_v15 = vshll.u32 %v11826_v22, 16  ;;  %vm3891_vm1 = vmor %vm3889_vm15, %vm3890_vm14 }
 0x3a4   : > { %4737 = vrot.lane.b32.xlu1 %v11819_v6, %s8812_s23  ;;  %v4914_v16 = vsel %vm2556_vm10, %v13333_v35, %v11652_v0  ;;  %v5072_v34 = vsel %vm508_vm0, %v5028_v63, %v11603_v37  ;;  %v3896_v40 = vor.u32 1.1754944e-38, %v3895_v17  ;;  %vm3894_vm2 = vcmp.eq.f32.partialorder %v3893_v27, 8.507059e+37  ;;  %v11861_v8 = vpop.permute.xlu2 %4759  ;;  %v13334_v27 = vld [vmem:[#allocation34_spill] sm:$0xff] }
 0x3a5   : > { %v4184_v2 = vunpack.c.l.b16 %v4075_v50  ;;  %v3887_v11 = vmul.f32 %v8473_v1, %v3886_v43  ;;  %v11850_v20 = vsel %vm2251_vm4, %v4670_v55, %v4671_v59  ;;  %v3910_v0 = vand.u32 2147483648, %v11804_v32 }
 0x3a6   : > { %v4568_v43 = vrot.slane %v4566_v15, 1  ;;  %v3908_v55 = vand.u32 2147483647, %v11804_v32  ;;  %v4946_v63 = vsel %vm508_vm0, %v4914_v16, %v11556_v23  ;;  %v4564_v15 = vshrl.u32 %v11826_v22, 16 }
 0x3a7   : > { %v8475_v7 = vpop.eup %8474  ;;  %v11836_v4 = vpack.c.b16 %v4184_v2, %v4183_v33  ;;  %v3888_v51 = vadd.f32 %v8473_v1, %v3887_v11  ;;  %4893 = vrot.lane.b32.xlu0 %v11819_v6, %s8811_s29  ;;  %4863 = vrot.lane.b32.xlu2 %v11826_v22, %s8813_s24  ;;  %v11854_v33 = vpop.permute.xlu1 %4725  ;;  %v4982_v59 = vsel %vm2629_vm13, %v4946_v63, %v4786_v24  ;;  %vm3904_vm7 = vweird.f32 %v11804_v32 }
 0x3a8   : > { %v3900_v61 = vmul.f32 %v8475_v7, %v11804_v32  ;;  %vm3905_vm6 = vweird.f32 %v8475_v7  ;;  %v3911_v23 = vor.u32 1.1754944e-38, %v3910_v0  ;;  %v4569_v16 = vor.u32 %v4568_v43, %v4564_v15 }
 0x3a9   : > { %v3892_v56 = vsel %vm3891_vm1, %v8473_v1, %v3888_v51  ;;  %v4880_v19 = vpop.permute.xlu0 %4879  ;;  %v4308_v29 = vshrl.u32 %v11836_v4, 16  ;;  %v4311_v1 = vshll.u32 %v11836_v4, 16  ;;  %v4571_v51 = vshll.u32 %v4402_v46, 16  ;;  %vm3906_vm8 = vmor %vm3904_vm7, %vm3905_vm6 }
 0x3aa   : > { %v3901_v50 = vsub.f32 1.0, %v3900_v61  ;;  %v3897_v37 = vsel %vm3894_vm2, %v3896_v40, %v3892_v56  ;;  %v5107_v2 = vsel %vm2629_vm13, %v5072_v34, %v4880_v19  ;;  %vm3909_vm9 = vcmp.eq.f32.partialorder %v3908_v55, 8.507059e+37 }
 0x3ab   : > { %v4310_v11 = vrot.slane %v4308_v29, 7  ;;  %7898 = vmatmul.msk.bf16.gmra.mxu2 %vm2556_vm10, %v13334_v27  ;;  %v4004_v34 = vmul.f32 %v3897_v37, %v11703_v14  ;;  %v3181_v56 = vpop.f32.mrf.mxu2  ;;  %v4573_v46 = vrot.slane %v4571_v51, 1 }
 0x3ac   : > { %v3902_v17 = vmul.f32 %v8475_v7, %v3901_v50  ;;  %4833 = vrot.lane.b32.xlu1 %v11850_v20, %s8812_s23 }
 0x3ad   : > { %v4313_v35 = vor.u32 %v4311_v1, %v4310_v11  ;;  %5332 = vmatmul.bf16.gmra.mxu3 %v4982_v59  ;;  %5416 = vmatmul.bf16.gmra.mxu1 %v5107_v2  ;;  %v3082_v40 = vpop.f32.mrf.mxu1  ;;  %v4076_v0 = vpack.c.bf16 %v4004_v34, %v4004_v34  ;;  %v11883_v37 = vsel %vm1998_vm5, %v4569_v16, %v4573_v46  ;;  %v13335_v2 = vld [vmem:[#allocation42_spill] sm:$0xff]  ;;  %v4403_v55 = vsel %vm8959_vm3, %v4310_v11, 0  ;;  %v11897_v59 = vpop.permute.xlu2 %4853  ;;  %v13336_v11 = vld [vmem:[#allocation31_spill] sm:$0xff] }
 0x3ae   : > { %v3903_v61 = vadd.f32 %v8475_v7, %v3902_v17  ;;  %v3083_v19 = vadd.f32 %v11458_v36, %v3082_v40  ;;  %v4674_v34 = vrot.slane %v4403_v55, 1  ;;  %v5031_v40 = vsel %vm2556_vm10, %v13336_v11, %v11725_v28 }
 0x3af   : > { %4801 = vrot.lane.b32.xlu0 %v11826_v22, %s8811_s29  ;;  %4771 = vrot.lane.b32.xlu2 %v11850_v20, %s8813_s24  ;;  %v11879_v14 = vsel %vm8959_vm3, 0, %v4313_v35  ;;  %v11893_v63 = vpop.permute.xlu1 %4821  ;;  %v4185_v15 = vunpack.c.l.b16 %v4076_v0  ;;  %v4583_v0 = vshll.u32 %v4403_v55, 16  ;;  %v5074_v28 = vsel %vm508_vm0, %v5031_v40, %v11720_v44 }
 0x3b0   : > { %v3907_v24 = vsel %vm3906_vm8, %v8475_v7, %v3903_v61  ;;  %v3182_v29 = vadd.f32 %v3181_v56, %v3083_v19  ;;  %v4578_v1 = vshll.u32 %v11879_v14, 16 }
 0x3b1   : > { %v3912_v32 = vsel %vm3909_vm9, %v3911_v23, %v3907_v24  ;;  %v4788_v50 = vpop.permute.xlu0 %4787  ;;  %v13337_v23 = vld [vmem:[#allocation30_spill] sm:$0xff] }
 0x3b2   : > { %v4005_v43 = vmul.f32 %v3912_v32, %v11750_v45  ;;  %v11886_v7 = vadd.f32 %v13335_v2, %v3182_v29  ;;  %v4673_v45 = vrot.slane %v11879_v14, 1  ;;  %v4580_v56 = vrot.slane %v4578_v1, 1 }
 0x3b3   : > { %v4916_v16 = vsel %vm2556_vm10, %v13337_v23, %v11781_v10  ;;  %v3183_v24 = vpop.f32.mrf.mxu2  ;;  %v4576_v29 = vshrl.u32 %v11879_v14, 16 }
 0x3b4   : > { %v4077_v17 = vpack.c.bf16 %v4005_v43, %v4005_v43  ;;  %4739 = vrot.lane.b32.xlu1 %v11883_v37, %s8812_s23  ;;  %v7818_v27 = vmul.f32 -1.442695, %v11886_v7 }
 0x3b5   : > { %v3084_v35 = vpop.f32.mrf.mxu1  ;;  %v4581_v10 = vor.u32 %v4580_v56, %v4576_v29 }
 0x3b6   : > { %v4186_v51 = vunpack.c.l.b16 %v4077_v17  ;;  %8476 = vpow2.f32 %v7818_v27  ;;  %v3085_v61 = vadd.f32 %v11458_v36, %v3084_v35  ;;  %v11913_v36 = vsel %vm2251_vm4, %v4673_v45, %v4674_v34  ;;  %v13338_v27 = vld [vmem:[#allocation37_spill] sm:$0xff]  ;;  %v8077_v34 = vld [vmem:[%s13178_s7 + $0x30] sm:$0xff] }
 0x3b7   : > { %4895 = vrot.lane.b32.xlu0 %v11883_v37, %s8811_s29  ;;  %4865 = vrot.lane.b32.xlu2 %v11879_v14, %s8813_s24  ;;  %v4948_v17 = vsel %vm508_vm0, %v4916_v16, %v11649_v54  ;;  %v4585_v45 = vrot.slane %v4583_v0, 1 }
 0x3b8   : > { %v11908_v19 = vpack.c.b16 %v4186_v51, %v4185_v15  ;;  %v3184_v32 = vadd.f32 %v3183_v24, %v3085_v61  ;;  %v11931_v51 = vpop.permute.xlu1 %4727  ;;  %v11941_v61 = vpop.permute.xlu2 %4761  ;;  %6664 = vmatpush.bf16.msrb.mxu0 %v8077_v34  ;;  %v13339_v24 = vld [vmem:[#allocation35_spill] sm:$0xff] }
 0x3b9   : > { %v4882_v46 = vpop.permute.xlu0 %4881  ;;  %v11934_v35 = vsel %vm1998_vm5, %v4581_v10, %v4585_v45 }
 0x3ba   : > { %v11919_v43 = vadd.f32 %v11387_v21, %v3184_v32  ;;  %v5110_v2 = vsel %vm2629_vm13, %v5074_v28, %v4882_v46  ;;  %v4315_v1 = vshrl.u32 %v11908_v19, 16  ;;  %v4985_v21 = vsel %vm2629_vm13, %v4948_v17, %v4788_v50  ;;  %v13340_v28 = vld [vmem:[#allocation33_spill] sm:$0xff] }
 0x3bb   : > { %7899 = vmatmul.msk.bf16.gmra.mxu2 %vm2556_vm10, %v13338_v27  ;;  %v4318_v56 = vshll.u32 %v11908_v19, 16  ;;  %v5034_v32 = vsel %vm2556_vm10, %v13339_v24, %v11814_v5  ;;  %v4918_v10 = vsel %vm2556_vm10, %v13340_v28, %v11854_v33 }
 0x3bc   : > { %4835 = vrot.lane.b32.xlu1 %v11913_v36, %s8812_s23  ;;  %v8477_v55 = vpop.eup %8476  ;;  %v7819_v44 = vmul.f32 -1.442695, %v11919_v43  ;;  %v4317_v54 = vrot.slane %v4315_v1, 7  ;;  %v5076_v27 = vsel %vm508_vm0, %v5034_v32, %v11816_v57  ;;  %v4950_v33 = vsel %vm508_vm0, %v4918_v10, %v11774_v58 }
 0x3bd   : > { %v3430_v15 = vadd.f32 1.0, %v8477_v55  ;;  %5337 = vmatmul.bf16.gmra.mxu3 %v4985_v21  ;;  %5421 = vmatmul.bf16.gmra.mxu1 %v5110_v2 }
 0x3be   : > { %8478 = vpow2.f32 %v7819_v44  ;;  %v4320_v11 = vor.u32 %v4318_v56, %v4317_v54  ;;  %v4404_v1 = vsel %vm8959_vm3, %v4317_v54, 0 }
 0x3bf   : > { %4803 = vrot.lane.b32.xlu0 %v11879_v14, %s8811_s29  ;;  %8480 = vrcp.f32 %v3430_v15  ;;  %4741 = vrot.lane.b32.xlu2 %v11934_v35, %s8812_s23  ;;  %v3925_v34 = vand.u32 2147483648, %v3430_v15  ;;  %v4677_v54 = vrot.slane %v4404_v1, 1  ;;  %vm3919_vm12 = vweird.f32 %v3430_v15 }
 0x3c0   : > { %v11957_v0 = vsel %vm8959_vm3, 0, %v4320_v11  ;;  %v11969_v17 = vpop.permute.xlu2 %4855  ;;  %v3923_v11 = vand.u32 2147483647, %v3430_v15  ;;  %v4595_v10 = vshll.u32 %v4404_v1, 16 }
 0x3c1   : > { %v4790_v50 = vpop.permute.xlu0 %4789  ;;  %v4676_v55 = vrot.slane %v11957_v0, 1  ;;  %v4590_v44 = vshll.u32 %v11957_v0, 16  ;;  %v4588_v28 = vshrl.u32 %v11957_v0, 16 }
 0x3c2   : > { %v4988_v57 = vsel %vm2629_vm13, %v4950_v33, %v4790_v50  ;;  %vm3924_vm15 = vcmp.eq.f32.partialorder %v3923_v11, 8.507059e+37  ;;  %v4597_v33 = vrot.slane %v4595_v10, 1 }
 0x3c3   : > { %v11953_v29 = vpop.permute.xlu1 %4823  ;;  %v11986_v32 = vsel %vm2251_vm4, %v4676_v55, %v4677_v54  ;;  %v4592_v58 = vrot.slane %v4590_v44, 1 }
 0x3c4   : > { %4773 = vrot.lane.b32.xlu1 %v11913_v36, %s8813_s24  ;;  %v8479_v40 = vpop.eup %8478 }
 0x3c5   : > { %v8481_v23 = vpop.eup %8480  ;;  %v11948_v16 = vadd.f32 1.0, %v8479_v40  ;;  %v4593_v44 = vor.u32 %v4592_v58, %v4588_v28 }
 0x3c6   : > { %v3915_v46 = vmul.f32 %v8481_v23, %v3430_v15  ;;  %vm3920_vm11 = vweird.f32 %v8481_v23 }
 0x3c7   : > { %4897 = vrot.lane.b32.xlu0 %v11934_v35, %s8811_s29  ;;  %8482 = vrcp.f32 %v11948_v16  ;;  %4867 = vrot.lane.b32.xlu2 %v11957_v0, %s8813_s24  ;;  %vm11981_vm14 = vmor %vm3919_vm12, %vm3920_vm11  ;;  %vm3934_vm2 = vweird.f32 %v11948_v16  ;;  %v12006_v11 = vsel %vm1998_vm5, %v4593_v44, %v4597_v33 }
 0x3c8   : > { %v3916_v5 = vsub.f32 1.0, %v3915_v46  ;;  %v3926_v46 = vor.u32 1.1754944e-38, %v3925_v34  ;;  %v12001_v34 = vpop.permute.xlu2 %4763 }
 0x3c9   : > { %v4884_v2 = vpop.permute.xlu0 %4883 }
 0x3ca   : > { %v3917_v45 = vmul.f32 %v8481_v23, %v3916_v5  ;;  %v5113_v21 = vsel %vm2629_vm13, %v5076_v27, %v4884_v2 }
 0x3cb   : > { %7900 = vmatmul.msk.bf16.gmra.mxu2 %vm2556_vm10, %v11305_v38  ;;  %v8076_v38 = vld [vmem:[%s13178_s7 + $0x28] sm:$0xff]  ;;  %v4730_v2 = vpop.permute.xlu1 %4729 }
 0x3cc   : > { %v3918_v56 = vadd.f32 %v8481_v23, %v3917_v45  ;;  %6665 = vmatpush.bf16.msrb.mxu0 %v8076_v38 }
 0x3cd   : > { %v8483_v40 = vpop.eup %8482  ;;  %5342 = vmatmul.bf16.gmra.mxu3 %v4988_v57  ;;  %5426 = vmatmul.bf16.gmra.mxu1 %v5113_v21  ;;  %v3938_v21 = vand.u32 2147483647, %v11948_v16  ;;  %v13343_v57 = vld [vmem:[#allocation39_spill] sm:$0xff] }
 0x3ce   : > { %v3922_v15 = vsel %vm11981_vm14, %v8481_v23, %v3918_v56  ;;  %v3930_v50 = vmul.f32 %v8483_v40, %v11948_v16  ;;  %v3940_v23 = vand.u32 2147483648, %v11948_v16  ;;  %vm3935_vm1 = vweird.f32 %v8483_v40 }
 0x3cf   : > { %4837 = vrot.lane.b32.xlu0 %v11986_v32, %s8812_s23  ;;  %4805 = vrot.lane.b32.xlu2 %v11957_v0, %s8811_s29  ;;  %v3927_v55 = vsel %vm3924_vm15, %v3926_v46, %v3922_v15  ;;  %vm3936_vm6 = vmor %vm3934_vm2, %vm3935_vm1  ;;  %v5037_v24 = vsel %vm2556_vm10, %v13343_v57, %v11893_v63  ;;  %vm3939_vm7 = vcmp.eq.f32.partialorder %v3938_v21, 8.507059e+37 }
 0x3d0   : > { %v3931_v5 = vsub.f32 1.0, %v3930_v50  ;;  %v4006_v54 = vmul.f32 %v3927_v55, %v11886_v7  ;;  %v3941_v1 = vor.u32 1.1754944e-38, %v3940_v23  ;;  %v13344_v7 = vld [vmem:[#allocation36_spill] sm:$0xff]  ;;  %v5078_v10 = vsel %vm508_vm0, %v5037_v24, %v11897_v59  ;;  %v4858_v44 = vpop.permute.xlu2 %4857 }
 0x3d1   : > { %v4792_v27 = vpop.permute.xlu0 %4791  ;;  %v4920_v16 = vsel %vm2556_vm10, %v13344_v7, %v11931_v51 }
 0x3d2   : > { %v3932_v45 = vmul.f32 %v8483_v40, %v3931_v5  ;;  %v4078_v15 = vpack.c.bf16 %v4006_v54, %v4006_v54 }
 0x3d4   : > { %v3933_v56 = vadd.f32 %v8483_v40, %v3932_v45  ;;  %v4187_v55 = vunpack.c.l.b16 %v4078_v15 }
 0x3d6   : > { %v3937_v58 = vsel %vm3936_vm6, %v8483_v40, %v3933_v56  ;;  %v4826_v46 = vpop.permute.xlu1 %4825  ;;  %v4952_v40 = vsel %vm508_vm0, %v4920_v16, %v11861_v8 }
 0x3d7   : > { %4899 = vrot.lane.b32.xlu0 %v12006_v11, %s8811_s29  ;;  %v3942_v38 = vsel %vm3939_vm7, %v3941_v1, %v3937_v58  ;;  %v4991_v51 = vsel %vm2629_vm13, %v4952_v40, %v4792_v27  ;;  %v5040_v27 = vsel %vm2556_vm10, %v11353_v47, %v11953_v29 }
 0x3d8   : > { %v4007_v50 = vmul.f32 %v3942_v38, %v11919_v43  ;;  %v12036_v58 = vpop.permute.xlu2 %4765 }
 0x3d9   : > { %v4886_v28 = vpop.permute.xlu0 %4885 }
 0x3da   : > { %v4079_v5 = vpack.c.bf16 %v4007_v50, %v4007_v50  ;;  %v5116_v63 = vsel %vm2629_vm13, %v5078_v10, %v4886_v28  ;;  %v4922_v50 = vsel %vm2556_vm10, %v11275_v42, %v4730_v2  ;;  %v5080_v10 = vsel %vm508_vm0, %v5040_v27, %v11969_v17 }
 0x3db   : > { %7901 = vmatmul.msk.bf16.gmra.mxu2 %vm2556_vm10, %v11441_v3 }
 0x3dc   : > { %v4188_v23 = vunpack.c.l.b16 %v4079_v5 }
 0x3dd   : > { %5347 = vmatmul.bf16.gmra.mxu3 %v4991_v51  ;;  %5431 = vmatmul.bf16.gmra.mxu1 %v5116_v63 }
 0x3de   : > { %v12025_v43 = vpack.c.b16 %v4188_v23, %v4187_v55  ;;  %v3186_v45 = vpop.f32.mrf.mxu2  ;;  %v4954_v55 = vsel %vm508_vm0, %v4922_v50, %v11941_v61 }
 0x3e0   : > { %v4322_v21 = vshrl.u32 %v12025_v43, 16  ;;  %v3087_v54 = vpop.f32.mrf.mxu1  ;;  %v4325_v8 = vshll.u32 %v12025_v43, 16 }
 0x3e1   : > { %v4794_v59 = vpop.permute.xlu0 %4793  ;;  %v4732_v33 = vpop.permute.xlu1 %4731  ;;  %v5043_v54 = vsel %vm2556_vm10, %v11514_v41, %v4826_v46 }
 0x3e2   : > { %v4324_v56 = vrot.slane %v4322_v21, 7  ;;  %v4994_v23 = vsel %vm2629_vm13, %v4954_v55, %v4794_v59  ;;  %v4860_v21 = vpop.permute.xlu2 %4859  ;;  %v4924_v27 = vsel %vm2556_vm10, %v11415_v62, %v4732_v33 }
 0x3e3   : > { %v4956_v41 = vsel %vm508_vm0, %v4924_v27, %v12001_v34 }
 0x3e4   : > { %v4327_v1 = vor.u32 %v4325_v8, %v4324_v56  ;;  %v4405_v3 = vsel %vm8959_vm3, %v4324_v56, 0 }
 0x3e5   : > { %v4687_v15 = vshll.u32 %v4405_v3, 16  ;;  %v4694_v16 = vrot.slane %v4405_v3, 1 }
 0x3e6   : > { %v4387_v57 = vsel %vm8959_vm3, 0, %v4327_v1  ;;  %v3188_v24 = vpop.f32.mrf.mxu2 }
 0x3e7   : > { %4869 = vrot.lane.b32.xlu1 %v4387_v57, %s8813_s24  ;;  %v4682_v38 = vshll.u32 %v4387_v57, 16  ;;  %v4693_v7 = vrot.slane %v4387_v57, 1  ;;  %v4680_v47 = vshrl.u32 %v4387_v57, 16  ;;  %v4689_v2 = vrot.slane %v4687_v15, 1 }
 0x3e8   : > { %v3089_v5 = vpop.f32.mrf.mxu1  ;;  %v5082_v15 = vsel %vm508_vm0, %v5043_v54, %v4858_v44 }
 0x3e9   : > { %v4888_v28 = vpop.permute.xlu0 %4887  ;;  %v4684_v29 = vrot.slane %v4682_v38, 1  ;;  %v12044_v18 = vsel %vm2251_vm4, %v4693_v7, %v4694_v16  ;;  %v4828_v40 = vpop.permute.xlu1 %4827 }
 0x3ea   : > { %v5119_v63 = vsel %vm2629_vm13, %v5080_v10, %v4888_v28  ;;  %v12074_v50 = vpop.permute.xlu2 %4767  ;;  %v13345_v28 = vld [vmem:[#allocation23_spill] sm:$0xff] }
 0x3eb   : > { %7902 = vmatmul.msk.bf16.gmra.mxu2 %vm2556_vm10, %v11570_v30  ;;  %v4685_v42 = vor.u32 %v4684_v29, %v4680_v47  ;;  %v12062_v30 = vld [vmem:[%s13177_s6] ss:$0 sm:$0xff] }
 0x3ed   : > { %5352 = vmatmul.bf16.gmra.mxu3 %v4994_v23  ;;  %5436 = vmatmul.bf16.gmra.mxu1 %v5119_v63  ;;  %v12053_v17 = vsel %vm1998_vm5, %v4685_v42, %v4689_v2  ;;  %v5046_v2 = vsel %vm2556_vm10, %v11627_v60, %v4828_v40 }
 0x3ee   : > { %4901 = vrot.lane.b32.xlu2 %v12053_v17, %s8811_s29  ;;  %v5313_v51 = vpop.f32.mrf.mxu3  ;;  %v5491_v45 = vpop.f32.mrf.mxu2 }
 0x3ef   : > { %4743 = vrot.lane.b32.xlu1 %v12006_v11, %s8812_s23  ;;  %v5314_v56 = vadd.f32 %v12062_v30, %v5313_v51  ;;  %v13346_v51 = vld [vmem:[#allocation27_spill] sm:$0xff] }
 0x3f1   : > { %v4796_v61 = vpop.permute.xlu0 %4795 }
 0x3f2   : > { %v4734_v59 = vpop.permute.xlu1 %4733  ;;  %v4997_v62 = vsel %vm2629_vm13, %v4956_v41, %v4796_v61  ;;  %v4862_v55 = vpop.permute.xlu2 %4861 }
 0x3f6   : > { %v5315_v8 = vpop.f32.mrf.mxu3  ;;  %v5493_v1 = vpop.f32.mrf.mxu2 }
 0x3f7   : > { %4807 = vrot.lane.b32.xlu1 %v4387_v57, %s8811_s29  ;;  %v5316_v44 = vadd.f32 %v12062_v30, %v5315_v8 }
 0x3f8   : > { %v5402_v3 = vpop.f32.mrf.mxu1 }
 0x3f9   : > { %v5403_v24 = vadd.f32 %v5402_v3, %v5314_v56  ;;  %v4890_v38 = vpop.permute.xlu0 %4889 }
 0x3fa   : > { %v5122_v16 = vsel %vm2629_vm13, %v5082_v15, %v4890_v38  ;;  %v12106_v41 = vpop.permute.xlu2 %4769 }
 0x3fb   : > { %v12071_v7 = vadd.f32 %v5491_v45, %v5403_v24  ;;  %7903 = vmatmul.msk.bf16.gmra.mxu2 %vm2556_vm10, %v11689_v31  ;;  %v4830_v57 = vpop.permute.xlu1 %4829  ;;  %v4926_v45 = vsel %vm2556_vm10, %v11554_v9, %v4734_v59 }
 0x3fc   : > { %v4958_v40 = vsel %vm508_vm0, %v4926_v45, %v12036_v58 }
 0x3fd   : > { %v7910_v46 = vmul.f32 -1.442695, %v12071_v7  ;;  %5357 = vmatmul.bf16.gmra.mxu3 %v4997_v62  ;;  %5441 = vmatmul.bf16.gmra.mxu1 %v5122_v16 }
 0x3fe   : > { %v5496_v33 = vpop.f32.mrf.mxu2 }
 0x3ff   : > { %8484 = vpow2.f32 %v7910_v46  ;;  %4903 = vrot.lane.b32.xlu1 %v13345_v28, %s8811_s29  ;;  %v5318_v47 = vpop.f32.mrf.mxu3 }
 0x400   : > { %v5404_v10 = vpop.f32.mrf.mxu1  ;;  %v5319_v8 = vadd.f32 %v12062_v30, %v5318_v47 }
 0x401   : > { %v5405_v34 = vadd.f32 %v5404_v10, %v5316_v44  ;;  %v4798_v29 = vpop.permute.xlu0 %4797 }
 0x402   : > { %v5000_v9 = vsel %vm2629_vm13, %v4958_v40, %v4798_v29  ;;  %v5049_v29 = vsel %vm2556_vm10, %v11740_v25, %v4830_v57  ;;  %v8075_v57 = vld [vmem:[%s13178_s7 + $0x20] sm:$0xff] }
 0x403   : > { %v12085_v5 = vadd.f32 %v5493_v1, %v5405_v34  ;;  %v5084_v1 = vsel %vm508_vm0, %v5046_v2, %v4860_v21  ;;  %6666 = vmatpush.bf16.msrb.mxu0 %v8075_v57 }
 0x404   : > { %v4736_v56 = vpop.permute.xlu1 %4735 }
 0x405   : > { %v8485_v31 = vpop.eup %8484  ;;  %v7911_v63 = vmul.f32 -1.442695, %v12085_v5 }
 0x406   : > { %v5667_v42 = vadd.f32 1.0, %v8485_v31  ;;  %v5498_v23 = vpop.f32.mrf.mxu2 }
 0x407   : > { %8486 = vpow2.f32 %v7911_v63  ;;  %6361 = vrot.lane.b32.xlu1 %v13346_v51, %s8813_s24  ;;  %v5320_v61 = vpop.f32.mrf.mxu3 }
 0x408   : > { %8488 = vrcp.f32 %v5667_v42  ;;  %v5321_v44 = vadd.f32 %v12062_v30, %v5320_v61  ;;  %v5710_v10 = vand.u32 2147483648, %v5667_v42  ;;  %vm5704_vm4 = vweird.f32 %v5667_v42 }
 0x409   : > { %v4892_v54 = vpop.permute.xlu0 %4891  ;;  %v5708_v63 = vand.u32 2147483647, %v5667_v42 }
 0x40a   : > { %v5407_v3 = vpop.f32.mrf.mxu1  ;;  %v5125_v27 = vsel %vm2629_vm13, %v5084_v1, %v4892_v54  ;;  %v5711_v1 = vor.u32 1.1754944e-38, %v5710_v10 }
 0x40b   : > { %v5408_v60 = vadd.f32 %v5407_v3, %v5319_v8  ;;  %7904 = vmatmul.msk.bf16.gmra.mxu2 %vm2556_vm10, %v11790_v26  ;;  %vm5709_vm8 = vcmp.eq.f32.partialorder %v5708_v63, 8.507059e+37 }
 0x40d   : > { %v8487_v24 = vpop.eup %8486  ;;  %v12104_v15 = vadd.f32 %v5496_v33, %v5408_v60  ;;  %5362 = vmatmul.bf16.gmra.mxu3 %v5000_v9  ;;  %5446 = vmatmul.bf16.gmra.mxu1 %v5125_v27 }
 0x40e   : > { %v8489_v59 = vpop.eup %8488  ;;  %v12102_v38 = vadd.f32 1.0, %v8487_v24  ;;  %v5501_v16 = vpop.f32.mrf.mxu2 }
 0x40f   : > { %v5700_v21 = vmul.f32 %v8489_v59, %v5667_v42  ;;  %v7912_v46 = vmul.f32 -1.442695, %v12104_v15  ;;  %vm5705_vm3 = vweird.f32 %v8489_v59  ;;  %v12111_v47 = vpop.permute.xlu1 %4831  ;;  %v5086_v42 = vsel %vm508_vm0, %v5049_v29, %v4862_v55 }
 0x410   : > { %8490 = vrcp.f32 %v12102_v38  ;;  %v5323_v26 = vpop.f32.mrf.mxu3  ;;  %vm12115_vm5 = vmor %vm5704_vm4, %vm5705_vm3  ;;  %v5723_v60 = vand.u32 2147483647, %v12102_v38  ;;  %vm5719_vm11 = vweird.f32 %v12102_v38 }
 0x411   : > { %v5701_v58 = vsub.f32 1.0, %v5700_v21  ;;  %v4800_v62 = vpop.permute.xlu0 %4799  ;;  %8492 = vpow2.f32 %v7912_v46  ;;  %v5725_v21 = vand.u32 2147483648, %v12102_v38  ;;  %v5324_v46 = vadd.f32 %v12062_v30, %v5323_v26 }
 0x412   : > { %v5409_v33 = vpop.f32.mrf.mxu1  ;;  %vm5724_vm14 = vcmp.eq.f32.partialorder %v5723_v60, 8.507059e+37 }
 0x413   : > { %v5702_v28 = vmul.f32 %v8489_v59, %v5701_v58  ;;  %v5410_v34 = vadd.f32 %v5409_v33, %v5321_v44  ;;  %v5726_v26 = vor.u32 1.1754944e-38, %v5725_v21 }
 0x415   : > { %v5703_v31 = vadd.f32 %v8489_v59, %v5702_v28  ;;  %v12119_v45 = vadd.f32 %v5498_v23, %v5410_v34  ;;  %v4928_v23 = vsel %vm2556_vm10, %v11666_v39, %v4736_v56 }
 0x416   : > { %v8491_v2 = vpop.eup %8490  ;;  %v12124_v8 = vpop.f32.mrf.mxu2  ;;  %v4960_v56 = vsel %vm508_vm0, %v4928_v23, %v12074_v50 }
 0x417   : > { %v5707_v61 = vsel %vm12115_vm5, %v8489_v59, %v5703_v31  ;;  %v5715_v54 = vmul.f32 %v8491_v2, %v12102_v38  ;;  %v7913_v25 = vmul.f32 -1.442695, %v12119_v45  ;;  %v8493_v3 = vpop.eup %8492  ;;  %v12134_v59 = vpop.permute.xlu2 %4863  ;;  %vm5720_vm9 = vweird.f32 %v8491_v2 }
 0x418   : > { %v5325_v40 = vpop.f32.mrf.mxu3  ;;  %v5712_v9 = vsel %vm5709_vm8, %v5711_v1, %v5707_v61  ;;  %v12137_v58 = vadd.f32 1.0, %v8493_v3  ;;  %v5003_v34 = vsel %vm2629_vm13, %v4960_v56, %v4800_v62  ;;  %vm5721_vm12 = vmor %vm5719_vm11, %vm5720_vm9  ;;  %v4738_v29 = vpop.permute.xlu1 %4737 }
 0x419   : > { %v5716_v27 = vsub.f32 1.0, %v5715_v54  ;;  %v4894_v24 = vpop.permute.xlu0 %4893  ;;  %8494 = vpow2.f32 %v7913_v25  ;;  %v6179_v28 = vmul.f32 %v5712_v9, %v12071_v7 }
 0x41a   : > { %v5412_v44 = vpop.f32.mrf.mxu1  ;;  %v5128_v39 = vsel %vm2629_vm13, %v5086_v42, %v4894_v24  ;;  %8496 = vrcp.f32 %v12137_v58  ;;  %v5052_v24 = vsel %vm2556_vm10, %v11819_v6, %v12111_v47  ;;  %v5740_v9 = vand.u32 2147483648, %v12137_v58 }
 0x41b   : > { %v5717_v55 = vmul.f32 %v8491_v2, %v5716_v27  ;;  %7905 = vmatmul.msk.bf16.gmra.mxu2 %vm2556_vm10, %v11850_v20  ;;  %v5413_v10 = vadd.f32 %v5412_v44, %v5324_v46  ;;  %v6211_v61 = vpack.c.bf16 %v6179_v28, %v6179_v28  ;;  %v5738_v44 = vand.u32 2147483647, %v12137_v58 }
 0x41c   : > { %vm5734_vm1 = vweird.f32 %v12137_v58  ;;  %v4930_v6 = vsel %vm2556_vm10, %v11765_v53, %v4738_v29  ;;  %v5088_v53 = vsel %vm508_vm0, %v5052_v24, %v12134_v59 }
 0x41d   : > { %v5718_v33 = vadd.f32 %v8491_v2, %v5717_v55  ;;  %5367 = vmatmul.bf16.gmra.mxu3 %v5003_v34  ;;  %5451 = vmatmul.bf16.gmra.mxu1 %v5128_v39  ;;  %v12149_v31 = vadd.f32 %v5501_v16, %v5413_v10  ;;  %v5326_v16 = vadd.f32 %v12062_v30, %v5325_v40  ;;  %v6419_v23 = vunpack.c.l.b16 %v6211_v61 }
 0x41e   : > { %v5506_v63 = vpop.f32.mrf.mxu2  ;;  %vm5739_vm6 = vcmp.eq.f32.partialorder %v5738_v44, 8.507059e+37 }
 0x41f   : > { %v5722_v38 = vsel %vm5721_vm12, %v8491_v2, %v5718_v33  ;;  %v8495_v50 = vpop.eup %8494  ;;  %v7914_v54 = vmul.f32 -1.442695, %v12149_v31  ;;  %v12158_v3 = vpop.permute.xlu2 %4771 }
 0x420   : > { %v5727_v51 = vsel %vm5724_vm14, %v5726_v26, %v5722_v38  ;;  %v12152_v7 = vadd.f32 1.0, %v8495_v50  ;;  %v5328_v62 = vpop.f32.mrf.mxu3  ;;  %v8497_v25 = vpop.eup %8496  ;;  %v5741_v26 = vor.u32 1.1754944e-38, %v5740_v9  ;;  %v13351_v9 = vld [vmem:[#allocation24_spill] sm:$0xff] }
 0x421   : > { %v6180_v20 = vmul.f32 %v5727_v51, %v12085_v5  ;;  %v4802_v1 = vpop.permute.xlu0 %4801  ;;  %v5730_v42 = vmul.f32 %v8497_v25, %v12137_v58  ;;  %vm5735_vm15 = vweird.f32 %v8497_v25  ;;  %v12170_v39 = vpop.permute.xlu1 %4833  ;;  %v5329_v58 = vadd.f32 %v12062_v30, %v5328_v62 }
 0x422   : > { %8498 = vrcp.f32 %v12152_v7  ;;  %v5414_v2 = vpop.f32.mrf.mxu1  ;;  %vm12178_vm2 = vmor %vm5734_vm1, %vm5735_vm15  ;;  %v5755_v59 = vand.u32 2147483648, %v12152_v7  ;;  %vm5749_vm3 = vweird.f32 %v12152_v7 }
 0x423   : > { %v6212_v57 = vpack.c.bf16 %v6180_v20, %v6180_v20  ;;  %8500 = vpow2.f32 %v7914_v54  ;;  %v5731_v27 = vsub.f32 1.0, %v5730_v42  ;;  %v5415_v60 = vadd.f32 %v5414_v2, %v5326_v16 }
 0x424   : > { %v5753_v2 = vand.u32 2147483647, %v12152_v7 }
 0x425   : > { %v6420_v5 = vunpack.c.l.b16 %v6212_v57  ;;  %v5732_v21 = vmul.f32 %v8497_v25, %v5731_v27  ;;  %v12165_v55 = vadd.f32 %v12124_v8, %v5415_v60  ;;  %v4962_v57 = vsel %vm508_vm0, %v4930_v6, %v12106_v41 }
 0x426   : > { %v12167_v40 = vpop.f32.mrf.mxu2  ;;  %vm5754_vm5 = vcmp.eq.f32.partialorder %v5753_v2, 8.507059e+37 }
 0x427   : > { %v6451_v46 = vpack.c.b16 %v6420_v5, %v6419_v23  ;;  %v5733_v28 = vadd.f32 %v8497_v25, %v5732_v21  ;;  %v7915_v47 = vmul.f32 -1.442695, %v12165_v55  ;;  %v4866_v42 = vpop.permute.xlu2 %4865 }
 0x428   : > { %v8499_v56 = vpop.eup %8498  ;;  %v5330_v33 = vpop.f32.mrf.mxu3 }
 0x429   : > { %6467 = vrot.lane.b32.xlu0 %v6451_v46, %s8811_s29  ;;  %v4896_v8 = vpop.permute.xlu0 %4895  ;;  %v8501_v10 = vpop.eup %8500  ;;  %v5745_v38 = vmul.f32 %v8499_v56, %v12152_v7  ;;  %v5737_v29 = vsel %vm12178_vm2, %v8497_v25, %v5733_v28  ;;  %8502 = vpow2.f32 %v7915_v47  ;;  %v5006_v25 = vsel %vm2629_vm13, %v4962_v57, %v4802_v1 }
 0x42a   : > { %v12188_v50 = vadd.f32 1.0, %v8501_v10  ;;  %v5417_v51 = vpop.f32.mrf.mxu1  ;;  %v5131_v61 = vsel %vm2629_vm13, %v5088_v53, %v4896_v8  ;;  %v5742_v62 = vsel %vm5739_vm6, %v5741_v26, %v5737_v29  ;;  %vm5750_vm7 = vweird.f32 %v8499_v56  ;;  %v4740_v46 = vpop.permute.xlu1 %4739 }
 0x42b   : > { %v5746_v20 = vsub.f32 1.0, %v5745_v38  ;;  %v5418_v54 = vadd.f32 %v5417_v51, %v5329_v58  ;;  %7906 = vmatmul.msk.bf16.gmra.mxu2 %vm2556_vm10, %v11913_v36  ;;  %v6181_v36 = vmul.f32 %v5742_v62, %v12104_v15  ;;  %vm5751_vm4 = vmor %vm5749_vm3, %vm5750_vm7  ;;  %v5756_v1 = vor.u32 1.1754944e-38, %v5755_v59 }
 0x42c   : > { %8504 = vrcp.f32 %v12188_v50  ;;  %v5331_v7 = vadd.f32 %v12062_v30, %v5330_v33  ;;  %v5055_v38 = vsel %vm2556_vm10, %v11883_v37, %v12170_v39  ;;  %v5770_v58 = vand.u32 2147483648, %v12188_v50 }
 0x42d   : > { %v5747_v16 = vmul.f32 %v8499_v56, %v5746_v20  ;;  %v12199_v23 = vadd.f32 %v5506_v63, %v5418_v54  ;;  %5372 = vmatmul.bf16.gmra.mxu3 %v5006_v25  ;;  %5456 = vmatmul.bf16.gmra.mxu1 %v5131_v61  ;;  %v6213_v47 = vpack.c.bf16 %v6181_v36, %v6181_v36  ;;  %v5768_v54 = vand.u32 2147483647, %v12188_v50 }
 0x42e   : > { %v12201_v41 = vpop.f32.mrf.mxu2  ;;  %v4932_v57 = vsel %vm2556_vm10, %v11826_v22, %v4740_v46  ;;  %vm5764_vm9 = vweird.f32 %v12188_v50  ;;  %v5090_v2 = vsel %vm508_vm0, %v5055_v38, %v4866_v42 }
 0x42f   : > { %v5748_v5 = vadd.f32 %v8499_v56, %v5747_v16  ;;  %v7916_v27 = vmul.f32 -1.442695, %v12199_v23  ;;  %v8503_v60 = vpop.eup %8502  ;;  %v12223_v61 = vpop.permute.xlu2 %4741  ;;  %v4964_v42 = vsel %vm508_vm0, %v4932_v57, %v12158_v3  ;;  %vm5769_vm12 = vcmp.eq.f32.partialorder %v5768_v54, 8.507059e+37 }
 0x430   : > { %v5333_v24 = vpop.f32.mrf.mxu3  ;;  %v12208_v44 = vadd.f32 1.0, %v8503_v60 }
 0x431   : > { %6357 = vrot.lane.b32.xlu0 %v13351_v9, %s8813_s24  ;;  %v4804_v63 = vpop.permute.xlu0 %4803  ;;  %v5752_v21 = vsel %vm5751_vm4, %v8499_v56, %v5748_v5  ;;  %8506 = vpow2.f32 %v7916_v27  ;;  %v5334_v5 = vadd.f32 %v12062_v30, %v5333_v24 }
 0x432   : > { %v8505_v15 = vpop.eup %8504  ;;  %v5757_v28 = vsel %vm5754_vm5, %v5756_v1, %v5752_v21  ;;  %v5419_v6 = vpop.f32.mrf.mxu1  ;;  %8508 = vrcp.f32 %v12208_v44  ;;  %v5009_v46 = vsel %vm2629_vm13, %v4964_v42, %v4804_v63  ;;  %vm5779_vm15 = vweird.f32 %v12208_v44 }
 0x433   : > { %v6182_v8 = vmul.f32 %v5757_v28, %v12119_v45  ;;  %v5760_v10 = vmul.f32 %v8505_v15, %v12188_v50  ;;  %v5420_v34 = vadd.f32 %v5419_v6, %v5331_v7  ;;  %v6421_v45 = vunpack.c.l.b16 %v6213_v47  ;;  %v4836_v9 = vpop.permute.xlu1 %4835 }
 0x434   : > { %vm5765_vm8 = vweird.f32 %v8505_v15  ;;  %v5771_v50 = vor.u32 1.1754944e-38, %v5770_v58  ;;  %v5785_v7 = vand.u32 2147483648, %v12208_v44  ;;  %v5783_v6 = vand.u32 2147483647, %v12208_v44 }
 0x435   : > { %v6214_v26 = vpack.c.bf16 %v6182_v8, %v6182_v8  ;;  %v5761_v56 = vsub.f32 1.0, %v5760_v10  ;;  %v12219_v53 = vadd.f32 %v12167_v40, %v5420_v34  ;;  %vm12235_vm11 = vmor %vm5764_vm9, %vm5765_vm8  ;;  %v8074_v34 = vld [vmem:[%s13178_s7 + $0x18] sm:$0xff] }
 0x436   : > { %v12221_v33 = vpop.f32.mrf.mxu2  ;;  %vm5784_vm2 = vcmp.eq.f32.partialorder %v5783_v6, 8.507059e+37  ;;  %6667 = vmatpush.bf16.msrb.mxu0 %v8074_v34 }
 0x437   : > { %v8507_v29 = vpop.eup %8506  ;;  %v6422_v51 = vunpack.c.l.b16 %v6214_v26  ;;  %v5762_v20 = vmul.f32 %v8505_v15, %v5761_v56  ;;  %v7917_v39 = vmul.f32 -1.442695, %v12219_v53  ;;  %v4868_v38 = vpop.permute.xlu2 %4867 }
 0x438   : > { %v12228_v37 = vadd.f32 1.0, %v8507_v29  ;;  %v5335_v40 = vpop.f32.mrf.mxu3  ;;  %v8509_v59 = vpop.eup %8508 }
 0x439   : > { %4775 = vrot.lane.b32.xlu0 %v11986_v32, %s8813_s24  ;;  %v4898_v62 = vpop.permute.xlu0 %4897  ;;  %v5763_v25 = vadd.f32 %v8505_v15, %v5762_v20  ;;  %v6452_v16 = vpack.c.b16 %v6422_v51, %v6421_v45  ;;  %v5775_v22 = vmul.f32 %v8509_v59, %v12208_v44  ;;  %vm5780_vm14 = vweird.f32 %v8509_v59 }
 0x43a   : > { %8510 = vrcp.f32 %v12228_v37  ;;  %v5422_v27 = vpop.f32.mrf.mxu1  ;;  %v5134_v60 = vsel %vm2629_vm13, %v5090_v2, %v4898_v62  ;;  %vm5781_vm1 = vmor %vm5779_vm15, %vm5780_vm14  ;;  %v5336_v58 = vadd.f32 %v12062_v30, %v5335_v40  ;;  %v5058_v62 = vsel %vm2556_vm10, %v11934_v35, %v4836_v9 }
 0x43b   : > { %v5767_v1 = vsel %vm12235_vm11, %v8505_v15, %v5763_v25  ;;  %8512 = vpow2.f32 %v7917_v39  ;;  %6469 = vrot.lane.b32.xlu2 %v6452_v16, %s8811_s29  ;;  %7907 = vmatmul.msk.bf16.gmra.mxu2 %vm2556_vm10, %v11986_v32  ;;  %v5776_v21 = vsub.f32 1.0, %v5775_v22  ;;  %v5423_v24 = vadd.f32 %v5422_v27, %v5334_v5 }
 0x43c   : > { %v5772_v28 = vsel %vm5769_vm12, %v5771_v50, %v5767_v1  ;;  %v4934_v16 = vsel %vm2556_vm10, %v11879_v14, %v12223_v61  ;;  %v5092_v22 = vsel %vm508_vm0, %v5058_v62, %v4868_v38  ;;  %vm5794_vm7 = vweird.f32 %v12228_v37 }
 0x43d   : > { %5377 = vmatmul.bf16.gmra.mxu3 %v5009_v46  ;;  %5461 = vmatmul.bf16.gmra.mxu1 %v5134_v60  ;;  %v5777_v15 = vmul.f32 %v8509_v59, %v5776_v21  ;;  %v12254_v47 = vadd.f32 %v12201_v41, %v5423_v24  ;;  %v6183_v8 = vmul.f32 %v5772_v28, %v12149_v31  ;;  %v5786_v31 = vor.u32 1.1754944e-38, %v5785_v7 }
 0x43e   : > { %v12256_v3 = vpop.f32.mrf.mxu2  ;;  %v5798_v14 = vand.u32 2147483647, %v12228_v37 }
 0x43f   : > { %v5778_v10 = vadd.f32 %v8509_v59, %v5777_v15  ;;  %v7918_v63 = vmul.f32 -1.442695, %v12254_v47  ;;  %v6215_v57 = vpack.c.bf16 %v6183_v8, %v6183_v8  ;;  %v4806_v15 = vpop.permute.xlu2 %4805  ;;  %v13356_v8 = vld [vmem:[#allocation26_spill] sm:$0xff] }
 0x440   : > { %v12258_v32 = vpop.eup %8510  ;;  %v5338_v26 = vpop.f32.mrf.mxu3  ;;  %vm5799_vm4 = vcmp.eq.f32.partialorder %v5798_v14, 8.507059e+37 }
 0x441   : > { %4871 = vrot.lane.b32.xlu0 %v10482_v12, %s8813_s24  ;;  %v12268_v41 = vpop.permute.xlu0 %4837  ;;  %v8513_v56 = vpop.eup %8512  ;;  %v5790_v44 = vmul.f32 %v12258_v32, %v12228_v37  ;;  %v5782_v29 = vsel %vm5781_vm1, %v8509_v59, %v5778_v10  ;;  %8514 = vpow2.f32 %v7918_v63  ;;  %vm5795_vm6 = vweird.f32 %v12258_v32 }
 0x442   : > { %v12274_v45 = vadd.f32 1.0, %v8513_v56  ;;  %v5424_v51 = vpop.f32.mrf.mxu1  ;;  %v5787_v12 = vsel %vm5784_vm2, %v5786_v31, %v5782_v29  ;;  %v4774_v59 = vpop.permute.xlu1 %4773  ;;  %v6423_v27 = vunpack.c.l.b16 %v6215_v57  ;;  %vm12303_vm3 = vmor %vm5794_vm7, %vm5795_vm6  ;;  %v5339_v24 = vadd.f32 %v12062_v30, %v5338_v26 }
 0x443   : > { %v5791_v20 = vsub.f32 1.0, %v5790_v44  ;;  %v5425_v54 = vadd.f32 %v5424_v51, %v5336_v58  ;;  %4839 = vrot.lane.b32.xlu2 %v12044_v18, %s8812_s23  ;;  %v6184_v39 = vmul.f32 %v5787_v12, %v12165_v55  ;;  %v4966_v1 = vsel %vm508_vm0, %v4934_v16, %v4774_v59  ;;  %s7471_s23 = sshll.u32 %s7468_s16, 4  ;;  %s7472_s23 = int_to_ptr.hbm [resolvable:$true] %s7471_s23 }
 0x444   : > { %8516 = vrcp.f32 %v12274_v45  ;;  %v5012_v34 = vsel %vm2629_vm13, %v4966_v1, %v4806_v15  ;;  %v5815_v56 = vand.u32 2147483648, %v12274_v45  ;;  %v5813_v58 = vand.u32 2147483647, %v12274_v45 }
 0x445   : > { %v5792_v40 = vmul.f32 %v12258_v32, %v5791_v20  ;;  %v12284_v25 = vadd.f32 %v12221_v33, %v5425_v54  ;;  %v6216_v2 = vpack.c.bf16 %v6184_v39, %v6184_v39  ;;  %v5800_v33 = vand.u32 2147483648, %v12228_v37 }
 0x446   : > { %v12289_v36 = vpop.f32.mrf.mxu2  ;;  %vm5809_vm8 = vweird.f32 %v12274_v45  ;;  %vm5814_vm11 = vcmp.eq.f32.partialorder %v5813_v58, 8.507059e+37 }
 0x447   : > { %v5793_v55 = vadd.f32 %v12258_v32, %v5792_v40  ;;  %v7919_v35 = vmul.f32 -1.442695, %v12284_v25  ;;  %v8515_v5 = vpop.eup %8514  ;;  %v6424_v60 = vunpack.c.l.b16 %v6216_v2  ;;  %v5801_v10 = vor.u32 1.1754944e-38, %v5800_v33 }
 0x448   : > { %v5340_v50 = vpop.f32.mrf.mxu3  ;;  %v12299_v61 = vadd.f32 1.0, %v8515_v5 }
 0x449   : > { %8518 = vpow2.f32 %v7919_v35  ;;  %v4900_v9 = vpop.permute.xlu0 %4899  ;;  %v6453_v28 = vpack.c.b16 %v6424_v60, %v6423_v27  ;;  %v5797_v37 = vsel %vm12303_vm3, %v12258_v32, %v5793_v55  ;;  %v5341_v62 = vadd.f32 %v12062_v30, %v5340_v50  ;;  %v13357_v35 = vld [vmem:[#allocation22_spill] sm:$0xff] }
 0x44a   : > { %v8517_v42 = vpop.eup %8516  ;;  %v5427_v46 = vpop.f32.mrf.mxu1  ;;  %v5137_v7 = vsel %vm2629_vm13, %v5092_v22, %v4900_v9  ;;  %8520 = vrcp.f32 %v12299_v61  ;;  %v5802_v32 = vsel %vm5799_vm4, %v5801_v10, %v5797_v37  ;;  %v5830_v55 = vand.u32 2147483648, %v12299_v61 }
 0x44b   : > { %v5805_v6 = vmul.f32 %v8517_v42, %v12274_v45  ;;  %6359 = vrot.lane.b32.xlu2 %v13356_v8, %s8813_s24  ;;  %7908 = vmatmul.msk.bf16.gmra.mxu2 %vm2556_vm10, %v12044_v18  ;;  %v5428_v63 = vadd.f32 %v5427_v46, %v5339_v24  ;;  %vm5810_vm5 = vweird.f32 %v8517_v42  ;;  %v6185_v54 = vmul.f32 %v5802_v32, %v12199_v23 }
 0x44c   : > { %6471 = vrot.lane.b32.xlu0 %v6453_v28, %s8811_s29  ;;  %vm5811_vm9 = vmor %vm5809_vm8, %vm5810_vm5  ;;  %v5828_v1 = vand.u32 2147483647, %v12299_v61  ;;  %v5061_v50 = vsel %vm2556_vm10, %v12006_v11, %v12268_v41  ;;  %vm5824_vm14 = vweird.f32 %v12299_v61 }
 0x44d   : > { %v5806_v26 = vsub.f32 1.0, %v5805_v6  ;;  %5382 = vmatmul.bf16.gmra.mxu3 %v5012_v34  ;;  %5466 = vmatmul.bf16.gmra.mxu1 %v5137_v7  ;;  %v12322_v38 = vadd.f32 %v12256_v3, %v5428_v63  ;;  %v5816_v3 = vor.u32 1.1754944e-38, %v5815_v56  ;;  %v6217_v45 = vpack.c.bf16 %v6185_v54, %v6185_v54  ;;  %v13358_v63 = vld [vmem:[#allocation25_spill] sm:$0xff]  ;;  %v4902_v56 = vpop.permute.xlu2 %4901 }
 0x44e   : > { %v12324_v31 = vpop.f32.mrf.mxu2  ;;  %vm5829_vm1 = vcmp.eq.f32.partialorder %v5828_v1, 8.507059e+37 }
 0x44f   : > { %v8519_v44 = vpop.eup %8518  ;;  %v5807_v18 = vmul.f32 %v8517_v42, %v5806_v26  ;;  %v7920_v51 = vmul.f32 -1.442695, %v12322_v38 }
 0x450   : > { %v12327_v29 = vadd.f32 1.0, %v8519_v44  ;;  %v5343_v12 = vpop.f32.mrf.mxu3  ;;  %v8521_v20 = vpop.eup %8520 }
 0x451   : > { %v5808_v57 = vadd.f32 %v8517_v42, %v5807_v18  ;;  %v5820_v39 = vmul.f32 %v8521_v20, %v12299_v61  ;;  %vm5825_vm12 = vweird.f32 %v8521_v20  ;;  %v5344_v7 = vadd.f32 %v12062_v30, %v5343_v12 }
 0x452   : > { %8522 = vrcp.f32 %v12327_v29  ;;  %v5429_v40 = vpop.f32.mrf.mxu1  ;;  %vm5826_vm15 = vmor %vm5824_vm14, %vm5825_vm12  ;;  %v5843_v26 = vand.u32 2147483647, %v12327_v29  ;;  %v5845_v32 = vand.u32 2147483648, %v12327_v29  ;;  %vm5839_vm6 = vweird.f32 %v12327_v29 }
 0x453   : > { %v5812_v59 = vsel %vm5811_vm9, %v8517_v42, %v5808_v57  ;;  %8524 = vpow2.f32 %v7920_v51  ;;  %v5821_v2 = vsub.f32 1.0, %v5820_v39  ;;  %v5430_v23 = vadd.f32 %v5429_v40, %v5341_v62  ;;  %v8073_v57 = vld [vmem:[%s13178_s7 + $0x10] sm:$0xff] }
 0x454   : > { %v5817_v16 = vsel %vm5814_vm11, %v5816_v3, %v5812_v59  ;;  %6363 = vrot.lane.b32.xlu0 %v13357_v35, %s8813_s24  ;;  %v5831_v42 = vor.u32 1.1754944e-38, %v5830_v55  ;;  %vm5844_vm3 = vcmp.eq.f32.partialorder %v5843_v26, 8.507059e+37  ;;  %6668 = vmatpush.bf16.msrb.mxu0 %v8073_v57 }
 0x455   : > { %v6186_v22 = vmul.f32 %v5817_v16, %v12219_v53  ;;  %v5822_v5 = vmul.f32 %v8521_v20, %v5821_v2  ;;  %v12340_v27 = vadd.f32 %v12289_v36, %v5430_v23  ;;  %v6425_v36 = vunpack.c.l.b16 %v6217_v45 }
 0x456   : > { %v12342_v60 = vpop.f32.mrf.mxu2 }
 0x457   : > { %v6218_v33 = vpack.c.bf16 %v6186_v22, %v6186_v22  ;;  %v5823_v9 = vadd.f32 %v8521_v20, %v5822_v5  ;;  %v7921_v53 = vmul.f32 -1.442695, %v12340_v27  ;;  %v13359_v5 = vld [vmem:[#allocation32_spill] sm:$0xff] }
 0x458   : > { %v8523_v14 = vpop.eup %8522  ;;  %v5345_v21 = vpop.f32.mrf.mxu3 }
 0x459   : > { %v8525_v24 = vpop.eup %8524  ;;  %v6426_v46 = vunpack.c.l.b16 %v6218_v33  ;;  %v5835_v28 = vmul.f32 %v8523_v14, %v12327_v29  ;;  %v4870_v15 = vpop.permute.xlu1 %4869  ;;  %v5827_v37 = vsel %vm5826_vm15, %v8521_v20, %v5823_v9  ;;  %8526 = vpow2.f32 %v7921_v53 }
 0x45a   : > { %v12353_v11 = vadd.f32 1.0, %v8525_v24  ;;  %v5094_v41 = vsel %vm508_vm0, %v5061_v50, %v4870_v15  ;;  %v5432_v61 = vpop.f32.mrf.mxu1  ;;  %v5832_v34 = vsel %vm5829_vm1, %v5831_v42, %v5827_v37  ;;  %vm5840_vm2 = vweird.f32 %v8523_v14 }
 0x45b   : > { %v5836_v6 = vsub.f32 1.0, %v5835_v28  ;;  %v5433_v8 = vadd.f32 %v5432_v61, %v5344_v7  ;;  %v6454_v10 = vpack.c.b16 %v6426_v46, %v6425_v36  ;;  %7909 = vmatmul.msk.bf16.gmra.mxu2 %vm2556_vm10, %v13358_v63  ;;  %v5140_v58 = vsel %vm2629_vm13, %v5094_v41, %v4902_v56  ;;  %vm5841_vm7 = vmor %vm5839_vm6, %vm5840_vm2 }
 0x45c   : > { %8528 = vrcp.f32 %v12353_v11  ;;  %v6187_v12 = vmul.f32 %v5832_v34, %v12254_v47  ;;  %v5346_v29 = vadd.f32 %v12062_v30, %v5345_v21  ;;  %v5860_v33 = vand.u32 2147483648, %v12353_v11 }
 0x45d   : > { %v5837_v44 = vmul.f32 %v8523_v14, %v5836_v6  ;;  %v12362_v18 = vadd.f32 %v12324_v31, %v5433_v8  ;;  %6473 = vrot.lane.b32.xlu2 %v6454_v10, %s8811_s29  ;;  %5471 = vmatmul.bf16.gmra.mxu1 %v5140_v58  ;;  %v5846_v31 = vor.u32 1.1754944e-38, %v5845_v32  ;;  %v5858_v53 = vand.u32 2147483647, %v12353_v11 }
 0x45e   : > { %v5526_v51 = vpop.f32.mrf.mxu2  ;;  %v6219_v2 = vpack.c.bf16 %v6187_v12, %v6187_v12  ;;  %vm5854_vm5 = vweird.f32 %v12353_v11  ;;  %v5861_v61 = vor.u32 1.1754944e-38, %v5860_v33 }
 0x45f   : > { %v5838_v20 = vadd.f32 %v8523_v14, %v5837_v44  ;;  %v7922_v54 = vmul.f32 -1.442695, %v12362_v18  ;;  %v8527_v3 = vpop.eup %8526  ;;  %vm5859_vm9 = vcmp.eq.f32.partialorder %v5858_v53, 8.507059e+37 }
 0x460   : > { %v5348_v39 = vpop.f32.mrf.mxu3  ;;  %v12372_v40 = vadd.f32 1.0, %v8527_v3  ;;  %v6427_v9 = vunpack.c.l.b16 %v6219_v2 }
 0x461   : > { %v5842_v62 = vsel %vm5841_vm7, %v8523_v14, %v5838_v20  ;;  %8530 = vpow2.f32 %v7922_v54  ;;  %v5349_v15 = vadd.f32 %v12062_v30, %v5348_v39 }
 0x462   : > { %v8529_v47 = vpop.eup %8528  ;;  %v5847_v59 = vsel %vm5844_vm3, %v5846_v31, %v5842_v62  ;;  %v5434_v16 = vpop.f32.mrf.mxu1  ;;  %8532 = vrcp.f32 %v12372_v40  ;;  %v5873_v34 = vand.u32 2147483647, %v12372_v40  ;;  %vm5869_vm12 = vweird.f32 %v12372_v40 }
 0x463   : > { %v6188_v55 = vmul.f32 %v5847_v59, %v12284_v25  ;;  %v5850_v23 = vmul.f32 %v8529_v47, %v12353_v11  ;;  %v5435_v35 = vadd.f32 %v5434_v16, %v5346_v29  ;;  %vm5855_vm4 = vweird.f32 %v8529_v47 }
 0x464   : > { %vm5856_vm8 = vmor %vm5854_vm5, %vm5855_vm4  ;;  %v5875_v11 = vand.u32 2147483648, %v12372_v40  ;;  %vm5874_vm15 = vcmp.eq.f32.partialorder %v5873_v34, 8.507059e+37 }
 0x465   : > { %v6220_v45 = vpack.c.bf16 %v6188_v55, %v6188_v55  ;;  %v5851_v22 = vsub.f32 1.0, %v5850_v23  ;;  %6365 = vrot.lane.b32.xlu2 %v13359_v5, %s8813_s24  ;;  %v12382_v1 = vadd.f32 %v12342_v60, %v5435_v35 }
 0x466   : > { %v5528_v50 = vpop.f32.mrf.mxu2  ;;  %v5876_v57 = vor.u32 1.1754944e-38, %v5875_v11 }
 0x467   : > { %v8531_v14 = vpop.eup %8530  ;;  %v6428_v42 = vunpack.c.l.b16 %v6220_v45  ;;  %v5852_v25 = vmul.f32 %v8529_v47, %v5851_v22  ;;  %v7923_v24 = vmul.f32 -1.442695, %v12382_v1 }
 0x468   : > { %v12385_v21 = vadd.f32 1.0, %v8531_v14  ;;  %v5350_v36 = vpop.f32.mrf.mxu3  ;;  %v8533_v46 = vpop.eup %8532 }
 0x469   : > { %v5853_v28 = vadd.f32 %v8529_v47, %v5852_v25  ;;  %v6455_v7 = vpack.c.b16 %v6428_v42, %v6427_v9  ;;  %v5865_v60 = vmul.f32 %v8533_v46, %v12372_v40  ;;  %vm5870_vm11 = vweird.f32 %v8533_v46  ;;  %v13360_v40 = vld [vmem:[#allocation21_spill] sm:$0xff] }
 0x46a   : > { %8534 = vrcp.f32 %v12385_v21  ;;  %v5437_v37 = vpop.f32.mrf.mxu1  ;;  %vm5871_vm14 = vmor %vm5869_vm12, %vm5870_vm11  ;;  %v5351_v31 = vadd.f32 %v12062_v30, %v5350_v36  ;;  %v5890_v9 = vand.u32 2147483648, %v12385_v21  ;;  %vm5884_vm2 = vweird.f32 %v12385_v21 }
 0x46b   : > { %v5857_v41 = vsel %vm5856_vm8, %v8529_v47, %v5853_v28  ;;  %8536 = vpow2.f32 %v7923_v24  ;;  %6475 = vrot.lane.b32.xlu1 %v6455_v7, %s8811_s29  ;;  %v5866_v6 = vsub.f32 1.0, %v5865_v60  ;;  %v5438_v8 = vadd.f32 %v5437_v37, %v5349_v15 }
 0x46c   : > { %v5862_v10 = vsel %vm5859_vm9, %v5861_v61, %v5857_v41  ;;  %v5891_v7 = vor.u32 1.1754944e-38, %v5890_v9 }
 0x46d   : > { %v5867_v63 = vmul.f32 %v8533_v46, %v5866_v6  ;;  %v12395_v26 = vadd.f32 %v5526_v51, %v5438_v8  ;;  %v6189_v44 = vmul.f32 %v5862_v10, %v12322_v38 }
 0x46e   : > { %v5531_v32 = vpop.f32.mrf.mxu2 }
 0x46f   : > { %v5868_v58 = vadd.f32 %v8533_v46, %v5867_v63  ;;  %v7924_v12 = vmul.f32 -1.442695, %v12395_v26  ;;  %v6221_v29 = vpack.c.bf16 %v6189_v44, %v6189_v44 }
 0x470   : > { %v8535_v56 = vpop.eup %8534  ;;  %v5353_v20 = vpop.f32.mrf.mxu3 }
 0x471   : > { %v8537_v54 = vpop.eup %8536  ;;  %v5880_v3 = vmul.f32 %v8535_v56, %v12385_v21  ;;  %v5872_v39 = vsel %vm5871_vm14, %v8533_v46, %v5868_v58  ;;  %8538 = vpow2.f32 %v7924_v12  ;;  %vm5885_vm1 = vweird.f32 %v8535_v56  ;;  %v12436_v12 = vld [vmem:[%s13177_s6] ss:$0 sm:$0xff] }
 0x472   : > { %v12402_v51 = vadd.f32 1.0, %v8537_v54  ;;  %v5439_v62 = vpop.f32.mrf.mxu1  ;;  %v5877_v38 = vsel %vm5874_vm15, %v5876_v57, %v5872_v39  ;;  %v6429_v33 = vunpack.c.l.b16 %v6221_v29  ;;  %vm5886_vm6 = vmor %vm5884_vm2, %vm5885_vm1  ;;  %v5354_v53 = vadd.f32 %v12062_v30, %v5353_v20  ;;  %v13361_v39 = vld [vmem:[#allocation40_spill] sm:$0xff] }
 0x473   : > { %v5881_v47 = vsub.f32 1.0, %v5880_v3  ;;  %v5440_v59 = vadd.f32 %v5439_v62, %v5351_v31  ;;  %6367 = vrot.lane.b32.xlu1 %v13360_v40, %s8813_s24  ;;  %v6190_v16 = vmul.f32 %v5877_v38, %v12340_v27  ;;  %v5888_v27 = vand.u32 2147483647, %v12385_v21 }
 0x474   : > { %8540 = vrcp.f32 %v12402_v51  ;;  %v5905_v37 = vand.u32 2147483648, %v12402_v51  ;;  %v5903_v8 = vand.u32 2147483647, %v12402_v51  ;;  %vm5899_vm4 = vweird.f32 %v12402_v51 }
 0x475   : > { %v5882_v2 = vmul.f32 %v8535_v56, %v5881_v47  ;;  %v12408_v55 = vadd.f32 %v5528_v50, %v5440_v59  ;;  %v6222_v23 = vpack.c.bf16 %v6190_v16, %v6190_v16  ;;  %vm5889_vm7 = vcmp.eq.f32.partialorder %v5888_v27, 8.507059e+37 }
 0x476   : > { %v5533_v35 = vpop.f32.mrf.mxu2  ;;  %vm5904_vm8 = vcmp.eq.f32.partialorder %v5903_v8, 8.507059e+37 }
 0x477   : > { %v5883_v45 = vadd.f32 %v8535_v56, %v5882_v2  ;;  %v7925_v22 = vmul.f32 -1.442695, %v12408_v55  ;;  %v8539_v5 = vpop.eup %8538  ;;  %v6430_v14 = vunpack.c.l.b16 %v6222_v23 }
 0x478   : > { %v5355_v42 = vpop.f32.mrf.mxu3  ;;  %v12414_v25 = vadd.f32 1.0, %v8539_v5 }
 0x479   : > { %8542 = vpow2.f32 %v7925_v22  ;;  %v6456_v36 = vpack.c.b16 %v6430_v14, %v6429_v33  ;;  %v5887_v46 = vsel %vm5886_vm6, %v8535_v56, %v5883_v45  ;;  %v5356_v20 = vadd.f32 %v12436_v12, %v5355_v42 }
 0x47a   : > { %v8541_v50 = vpop.eup %8540  ;;  %v5442_v24 = vpop.f32.mrf.mxu1  ;;  %8544 = vrcp.f32 %v12414_v25  ;;  %v5892_v15 = vsel %vm5889_vm7, %v5891_v7, %v5887_v46  ;;  %v5920_v59 = vand.u32 2147483648, %v12414_v25  ;;  %v5918_v2 = vand.u32 2147483647, %v12414_v25 }
 0x47b   : > { %v5895_v28 = vmul.f32 %v8541_v50, %v12402_v51  ;;  %v5443_v60 = vadd.f32 %v5442_v24, %v5354_v53  ;;  %6477 = vrot.lane.b32.xlu0 %v6456_v36, %s8811_s29  ;;  %vm5900_vm3 = vweird.f32 %v8541_v50  ;;  %v6191_v56 = vmul.f32 %v5892_v15, %v12362_v18  ;;  %v8029_v51 = vld [vmem:[%s8939_s22 + $0x90] sm:$0xff]  ;;  %s12785_s22 = scalar_lea.vmem [#allocation2], %s7538_s25  ;;  %s8760_s25 = sshra.s32 %s7472_s23, 4  ;;  %s8761_s25 = int_to_ptr.hbm [resolvable:$true] %s8760_s25 }
 0x47c   : > { %vm5901_vm5 = vmor %vm5899_vm4, %vm5900_vm3  ;;  %7654 = vmatmul.msk.bf16.gmra.mxu0 %vm508_vm0, %v8029_v51  ;;  %vm5914_vm11 = vweird.f32 %v12414_v25  ;;  %vm5919_vm14 = vcmp.eq.f32.partialorder %v5918_v2, 8.507059e+37  ;;  %s7469_s13 = sshll.u32 %s12785_s22, 4  ;;  %p8767_p0 = scmp.lt.s32.totalorder %s8761_s25, %s13180_s9  ;;  %s7470_s13 = int_to_ptr.vmem [resolvable:$true] %s7469_s13 }
 0x47d   : > { %v5896_v21 = vsub.f32 1.0, %v5895_v28  ;;  %v12421_v41 = vadd.f32 %v5531_v32, %v5443_v60  ;;  %v5906_v32 = vor.u32 1.1754944e-38, %v5905_v37  ;;  %v6223_v62 = vpack.c.bf16 %v6191_v56, %v6191_v56 }
 0x47e   : > { %v12423_v61 = vpop.f32.mrf.mxu2 }
 0x47f   : > { %v8543_v30 = vpop.eup %8542  ;;  %v5897_v6 = vmul.f32 %v8541_v50, %v5896_v21  ;;  %v7926_v11 = vmul.f32 -1.442695, %v12421_v41 }
 0x480   : > { %v12426_v10 = vadd.f32 1.0, %v8543_v30  ;;  %v5358_v63 = vpop.f32.mrf.mxu3  ;;  %v8545_v34 = vpop.eup %8544 }
 0x481   : > { %v5898_v44 = vadd.f32 %v8541_v50, %v5897_v6  ;;  %v5910_v58 = vmul.f32 %v8545_v34, %v12414_v25  ;;  %vm5915_vm9 = vweird.f32 %v8545_v34  ;;  %v5359_v42 = vadd.f32 %v12436_v12, %v5358_v63 }
 0x482   : > { %8546 = vrcp.f32 %v12426_v10  ;;  %v5444_v54 = vpop.f32.mrf.mxu1  ;;  %vm5916_vm12 = vmor %vm5914_vm11, %vm5915_vm9  ;;  %v5935_v7 = vand.u32 2147483648, %v12426_v10  ;;  %v5933_v21 = vand.u32 2147483647, %v12426_v10  ;;  %vm5929_vm1 = vweird.f32 %v12426_v10 }
 0x483   : > { %v5902_v57 = vsel %vm5901_vm5, %v8541_v50, %v5898_v44  ;;  %8548 = vpow2.f32 %v7926_v11  ;;  %v5911_v3 = vsub.f32 1.0, %v5910_v58  ;;  %v5445_v31 = vadd.f32 %v5444_v54, %v5356_v20  ;;  %6369 = vrot.lane.b32.xlu0 %v13361_v39, %s8813_s24  ;;  %v13362_v39 = vld [vmem:[#allocation41_spill] sm:$0xff] }
 0x484   : > { %v5907_v18 = vsel %vm5904_vm8, %v5906_v32, %v5902_v57  ;;  %v5921_v50 = vor.u32 1.1754944e-38, %v5920_v59  ;;  %v5936_v63 = vor.u32 1.1754944e-38, %v5935_v7  ;;  %vm5934_vm6 = vcmp.eq.f32.partialorder %v5933_v21, 8.507059e+37 }
 0x485   : > { %v6192_v38 = vmul.f32 %v5907_v18, %v12382_v1  ;;  %v5912_v47 = vmul.f32 %v8545_v34, %v5911_v3  ;;  %v12444_v40 = vadd.f32 %v5533_v35, %v5445_v31  ;;  %v8072_v1 = vld [vmem:[%s13178_s7 + $0x8] sm:$0xff]  ;;  %v6431_v35 = vunpack.c.l.b16 %v6223_v62 }
 0x486   : > { %v5538_v29 = vpop.f32.mrf.mxu2  ;;  %6669 = vmatpush.bf16.msrb.mxu0 %v8072_v1 }
 0x487   : > { %v6224_v16 = vpack.c.bf16 %v6192_v38, %v6192_v38  ;;  %v5913_v45 = vadd.f32 %v8545_v34, %v5912_v47  ;;  %v7927_v22 = vmul.f32 -1.442695, %v12444_v40 }
 0x488   : > { %v8547_v23 = vpop.eup %8546  ;;  %v5360_v5 = vpop.f32.mrf.mxu3 }
 0x489   : > { %v8549_v33 = vpop.eup %8548  ;;  %v6432_v14 = vunpack.c.l.b16 %v6224_v16  ;;  %v5925_v9 = vmul.f32 %v8547_v23, %v12426_v10  ;;  %v5917_v27 = vsel %vm5916_vm12, %v8545_v34, %v5913_v45  ;;  %8550 = vpow2.f32 %v7927_v22 }
 0x48a   : > { %v12456_v53 = vadd.f32 1.0, %v8549_v33  ;;  %v5447_v25 = vpop.f32.mrf.mxu1  ;;  %v5922_v28 = vsel %vm5919_vm14, %v5921_v50, %v5917_v27  ;;  %vm5930_vm15 = vweird.f32 %v8547_v23  ;;  %v5361_v58 = vadd.f32 %v12436_v12, %v5360_v5  ;;  %v13365_v27 = vld [vmem:[#allocation38_spill] sm:$0xff]  ;;  %v13366_v50 = vld [vmem:[#allocation5_spill] sm:$0xff] }
 0x48b   : > { %v5926_v24 = vsub.f32 1.0, %v5925_v9  ;;  %v5448_v36 = vadd.f32 %v5447_v25, %v5359_v42  ;;  %v6457_v46 = vpack.c.b16 %v6432_v14, %v6431_v35  ;;  %v6193_v30 = vmul.f32 %v5922_v28, %v12395_v26  ;;  %vm5931_vm2 = vmor %vm5929_vm1, %vm5930_vm15  ;;  %v13367_v33 = vld [vmem:[#allocation6_spill] sm:$0xff] }
 0x48c   : > { %8552 = vrcp.f32 %v12456_v53  ;;  %v5950_v51 = vand.u32 2147483648, %v12456_v53  ;;  %v5948_v2 = vand.u32 2147483647, %v12456_v53  ;;  %vm5944_vm3 = vweird.f32 %v12456_v53 }
 0x48d   : > { %v5927_v60 = vmul.f32 %v8547_v23, %v5926_v24  ;;  %v12462_v15 = vadd.f32 %v12423_v61, %v5448_v36  ;;  %6479 = vrot.lane.b32.xlu2 %v6457_v46, %s8811_s29  ;;  %v8071_v61 = vld [vmem:[%s13178_s7] sm:$0xff]  ;;  %v6225_v20 = vpack.c.bf16 %v6193_v30, %v6193_v30  ;;  %v6501_v25 = vsel %vm508_vm0, %v13366_v50, %v13365_v27 }
 0x48e   : > { %v12465_v37 = vpop.f32.mrf.mxu2  ;;  %6670 = vmatpush.bf16.msrb.mxu0 %v8071_v61  ;;  %v5951_v24 = vor.u32 1.1754944e-38, %v5950_v51  ;;  %vm5949_vm5 = vcmp.eq.f32.partialorder %v5948_v2, 8.507059e+37 }
 0x48f   : > { %v5928_v6 = vadd.f32 %v8547_v23, %v5927_v60  ;;  %v7928_v8 = vmul.f32 -1.442695, %v12462_v15  ;;  %v8551_v11 = vpop.eup %8550  ;;  %v6433_v59 = vunpack.c.l.b16 %v6225_v20 }
 0x490   : > { %v5363_v34 = vpop.f32.mrf.mxu3  ;;  %v12470_v44 = vadd.f32 1.0, %v8551_v11 }
 0x491   : > { %v5932_v56 = vsel %vm5931_vm2, %v8547_v23, %v5928_v6  ;;  %8554 = vpow2.f32 %v7928_v8  ;;  %v5364_v14 = vadd.f32 %v12436_v12, %v5363_v34  ;;  %v4744_v8 = vpop.permute.xlu1 %4743 }
 0x492   : > { %v8553_v32 = vpop.eup %8552  ;;  %v5937_v26 = vsel %vm5934_vm6, %v5936_v63, %v5932_v56  ;;  %v5449_v10 = vpop.f32.mrf.mxu1  ;;  %8556 = vrcp.f32 %v12470_v44  ;;  %v5965_v60 = vand.u32 2147483648, %v12470_v44  ;;  %v5963_v30 = vand.u32 2147483647, %v12470_v44 }
 0x493   : > { %v6194_v54 = vmul.f32 %v5937_v26, %v12408_v55  ;;  %v5940_v57 = vmul.f32 %v8553_v32, %v12456_v53  ;;  %v5450_v18 = vadd.f32 %v5449_v10, %v5361_v58  ;;  %vm5945_vm7 = vweird.f32 %v8553_v32 }
 0x494   : > { %vm12491_vm4 = vmor %vm5944_vm3, %vm5945_vm7  ;;  %vm5959_vm9 = vweird.f32 %v12470_v44  ;;  %v5966_v58 = vor.u32 1.1754944e-38, %v5965_v60  ;;  %vm5964_vm12 = vcmp.eq.f32.partialorder %v5963_v30, 8.507059e+37 }
 0x495   : > { %v6226_v3 = vpack.c.bf16 %v6194_v54, %v6194_v54  ;;  %v5941_v31 = vsub.f32 1.0, %v5940_v57  ;;  %6371 = vrot.lane.b32.xlu2 %v13362_v39, %s8813_s24  ;;  %v12482_v62 = vadd.f32 %v5538_v29, %v5450_v18 }
 0x496   : > { %v12484_v38 = vpop.f32.mrf.mxu2 }
 0x497   : > { %v8555_v47 = vpop.eup %8554  ;;  %v6434_v55 = vunpack.c.l.b16 %v6226_v3  ;;  %v5942_v16 = vmul.f32 %v8553_v32, %v5941_v31  ;;  %v7929_v45 = vmul.f32 -1.442695, %v12482_v62 }
 0x498   : > { %v12487_v23 = vadd.f32 1.0, %v8555_v47  ;;  %v5365_v22 = vpop.f32.mrf.mxu3  ;;  %v8557_v1 = vpop.eup %8556 }
 0x499   : > { %v5943_v5 = vadd.f32 %v8553_v32, %v5942_v16  ;;  %v6458_v29 = vpack.c.b16 %v6434_v55, %v6433_v59  ;;  %v5955_v35 = vmul.f32 %v8557_v1, %v12470_v44  ;;  %vm5960_vm8 = vweird.f32 %v8557_v1  ;;  %v6470_v55 = vpop.permute.xlu2 %6469 }
 0x49a   : > { %8558 = vrcp.f32 %v12487_v23  ;;  %v5452_v9 = vpop.f32.mrf.mxu1  ;;  %vm5961_vm11 = vmor %vm5959_vm9, %vm5960_vm8  ;;  %v5366_v10 = vadd.f32 %v12436_v12, %v5365_v22  ;;  %vm5974_vm15 = vweird.f32 %v12487_v23 }
 0x49b   : > { %v6468_v42 = vpop.permute.xlu0 %6467  ;;  %v5947_v53 = vsel %vm12491_vm4, %v8553_v32, %v5943_v5  ;;  %8560 = vpow2.f32 %v7929_v45  ;;  %6481 = vrot.lane.b32.xlu1 %v6458_v29, %s8811_s29  ;;  %v5956_v36 = vsub.f32 1.0, %v5955_v35  ;;  %v5453_v46 = vadd.f32 %v5452_v9, %v5364_v14  ;;  %v4808_v5 = vpop.permute.xlu1 %4807 }
 0x49c   : > { %v6548_v28 = vsel %vm2629_vm13, %v6501_v25, %v6468_v42  ;;  %v5952_v7 = vsel %vm5949_vm5, %v5951_v24, %v5947_v53 }
 0x49d   : > { %6671 = vmatmul.bf16.vlgmr.msrb.gmra.mxu0 %v6548_v28  ;;  %v5957_v21 = vmul.f32 %v8557_v1, %v5956_v36  ;;  %v12508_v6 = vadd.f32 %v12465_v37, %v5453_v46  ;;  %v6195_v34 = vmul.f32 %v5952_v7, %v12421_v41  ;;  %v4936_v36 = vsel %vm2556_vm10, %v11957_v0, %v4744_v8 }
 0x49e   : > { %v12510_v11 = vpop.f32.mrf.mxu2 }
 0x49f   : > { %v5958_v56 = vadd.f32 %v8557_v1, %v5957_v21  ;;  %v7930_v61 = vmul.f32 -1.442695, %v12508_v6  ;;  %v6227_v31 = vpack.c.bf16 %v6195_v34, %v6195_v34 }
 0x4a0   : > { %v12512_v63 = vpop.eup %8558  ;;  %v5368_v32 = vpop.f32.mrf.mxu3 }
 0x4a1   : > { %v8561_v26 = vpop.eup %8560  ;;  %v5970_v37 = vmul.f32 %v12512_v63, %v12487_v23  ;;  %v5962_v20 = vsel %vm5961_vm11, %v8557_v1, %v5958_v56  ;;  %8562 = vpow2.f32 %v7930_v61  ;;  %vm5975_vm14 = vweird.f32 %v12512_v63 }
 0x4a2   : > { %v12520_v54 = vadd.f32 1.0, %v8561_v26  ;;  %v5454_v41 = vpop.f32.mrf.mxu1  ;;  %v5967_v18 = vsel %vm5964_vm12, %v5966_v58, %v5962_v20  ;;  %vm12542_vm1 = vmor %vm5974_vm15, %vm5975_vm14  ;;  %v5369_v27 = vadd.f32 %v12436_v12, %v5368_v32  ;;  %v4840_v32 = vpop.permute.xlu2 %4839 }
 0x4a3   : > { %v6358_v57 = vpop.permute.xlu0 %6357  ;;  %v5971_v44 = vsub.f32 1.0, %v5970_v37  ;;  %v5455_v3 = vadd.f32 %v5454_v41, %v5366_v10  ;;  %6373 = vrot.lane.b32.xlu1 %v11466_v52, %s8813_s24  ;;  %v6196_v39 = vmul.f32 %v5967_v18, %v12444_v40  ;;  %v6435_v52 = vunpack.c.l.b16 %v6227_v31 }
 0x4a4   : > { %8564 = vrcp.f32 %v12520_v54  ;;  %v5980_v40 = vand.u32 2147483648, %v12487_v23  ;;  %v6504_v35 = vsel %vm508_vm0, %v13367_v33, %v6358_v57  ;;  %v5993_v61 = vand.u32 2147483647, %v12520_v54 }
 0x4a5   : > { %v5972_v51 = vmul.f32 %v12512_v63, %v5971_v44  ;;  %v12528_v47 = vadd.f32 %v12484_v38, %v5455_v3  ;;  %v6228_v59 = vpack.c.bf16 %v6196_v39, %v6196_v39  ;;  %v5978_v38 = vand.u32 2147483647, %v12487_v23 }
 0x4a6   : > { %v5548_v14 = vpop.f32.mrf.mxu2  ;;  %v5981_v46 = vor.u32 1.1754944e-38, %v5980_v40  ;;  %v6551_v7 = vsel %vm2629_vm13, %v6504_v35, %v6470_v55  ;;  %vm5989_vm7 = vweird.f32 %v12520_v54  ;;  %vm5994_vm4 = vcmp.eq.f32.partialorder %v5993_v61, 8.507059e+37 }
 0x4a7   : > { %v5973_v16 = vadd.f32 %v12512_v63, %v5972_v51  ;;  %v7931_v2 = vmul.f32 -1.442695, %v12528_v47  ;;  %v8563_v45 = vpop.eup %8562  ;;  %v6436_v22 = vunpack.c.l.b16 %v6228_v59  ;;  %vm5979_vm2 = vcmp.eq.f32.partialorder %v5978_v38, 8.507059e+37  ;;  %v4904_v51 = vpop.permute.xlu1 %4903 }
 0x4a8   : > { %v5370_v1 = vpop.f32.mrf.mxu3  ;;  %v12536_v29 = vadd.f32 1.0, %v8563_v45  ;;  %v5064_v39 = vsel %vm2556_vm10, %v12053_v17, %v4840_v32 }
 0x4a9   : > { %8566 = vpow2.f32 %v7931_v2  ;;  %v6459_v25 = vpack.c.b16 %v6436_v22, %v6435_v52  ;;  %v5977_v23 = vsel %vm12542_vm1, %v12512_v63, %v5973_v16  ;;  %v5995_v63 = vand.u32 2147483648, %v12520_v54 }
 0x4aa   : > { %v8565_v9 = vpop.eup %8564  ;;  %v5457_v50 = vpop.f32.mrf.mxu1  ;;  %8568 = vrcp.f32 %v12536_v29  ;;  %v5982_v30 = vsel %vm5979_vm2, %v5981_v46, %v5977_v23  ;;  %v5371_v18 = vadd.f32 %v12436_v12, %v5370_v1  ;;  %v6010_v17 = vand.u32 2147483648, %v12536_v29 }
 0x4ab   : > { %v4776_v53 = vpop.permute.xlu0 %4775  ;;  %v5985_v24 = vmul.f32 %v8565_v9, %v12520_v54  ;;  %v5458_v28 = vadd.f32 %v5457_v50, %v5369_v27  ;;  %6483 = vrot.lane.b32.xlu0 %v6459_v25, %s8811_s29  ;;  %vm5990_vm6 = vweird.f32 %v8565_v9  ;;  %v6197_v20 = vmul.f32 %v5982_v30, %v12462_v15 }
 0x4ac   : > { %v4968_v21 = vsel %vm508_vm0, %v4936_v36, %v4776_v53  ;;  %vm5991_vm3 = vmor %vm5989_vm7, %vm5990_vm6  ;;  %vm6004_vm10 = vweird.f32 %v12536_v29  ;;  %v6011_v25 = vor.u32 1.1754944e-38, %v6010_v17 }
 0x4ad   : > { %v5986_v60 = vsub.f32 1.0, %v5985_v24  ;;  %6676 = vmatmul.bf16.gmra.mxu0 %v6551_v7  ;;  %v12559_v34 = vadd.f32 %v12510_v11, %v5458_v28  ;;  %v5015_v56 = vsel %vm2629_vm13, %v4968_v21, %v4808_v5  ;;  %v5996_v11 = vor.u32 1.1754944e-38, %v5995_v63 }
 0x4ae   : > { %5387 = vmatmul.bf16.gmra.mxu3 %v5015_v56  ;;  %v5551_v15 = vpop.f32.mrf.mxu2  ;;  %v6229_v2 = vpack.c.bf16 %v6197_v20, %v6197_v20  ;;  %v6008_v5 = vand.u32 2147483647, %v12536_v29  ;;  %v13370_v56 = vld [vmem:[#allocation7_spill] sm:$0xff] }
 0x4af   : > { %v8567_v0 = vpop.eup %8566  ;;  %v5987_v8 = vmul.f32 %v8565_v9, %v5986_v60  ;;  %v7932_v58 = vmul.f32 -1.442695, %v12559_v34 }
 0x4b0   : > { %v12563_v26 = vadd.f32 1.0, %v8567_v0  ;;  %v5373_v37 = vpop.f32.mrf.mxu3  ;;  %v8569_v10 = vpop.eup %8568  ;;  %vm6009_vm9 = vcmp.eq.f32.partialorder %v6008_v5, 8.507059e+37 }
 0x4b1   : > { %v5988_v41 = vadd.f32 %v8565_v9, %v5987_v8  ;;  %v6000_v57 = vmul.f32 %v8569_v10, %v12536_v29  ;;  %vm6005_vm5 = vweird.f32 %v8569_v10  ;;  %v6360_v29 = vpop.permute.xlu2 %6359 }
 0x4b2   : > { %8570 = vrcp.f32 %v12563_v26  ;;  %v5459_v44 = vpop.f32.mrf.mxu1  ;;  %vm6006_vm8 = vmor %vm6004_vm10, %vm6005_vm5  ;;  %v6025_v7 = vand.u32 2147483648, %v12563_v26  ;;  %v6023_v21 = vand.u32 2147483647, %v12563_v26  ;;  %vm6019_vm12 = vweird.f32 %v12563_v26 }
 0x4b3   : > { %v4872_v3 = vpop.permute.xlu0 %4871  ;;  %v5992_v31 = vsel %vm5991_vm3, %v8565_v9, %v5988_v41  ;;  %8572 = vpow2.f32 %v7932_v58  ;;  %v6001_v54 = vsub.f32 1.0, %v6000_v57  ;;  %v5460_v55 = vadd.f32 %v5459_v44, %v5371_v18  ;;  %6375 = vrot.lane.b32.xlu0 %v11590_v13, %s8813_s24 }
 0x4b4   : > { %v5997_v59 = vsel %vm5994_vm4, %v5996_v11, %v5992_v31  ;;  %v5096_v16 = vsel %vm508_vm0, %v5064_v39, %v4872_v3  ;;  %v6437_v9 = vunpack.c.l.b16 %v6229_v2  ;;  %v6507_v0 = vsel %vm508_vm0, %v13370_v56, %v6360_v29 }
 0x4b5   : > { %v6198_v45 = vmul.f32 %v5997_v59, %v12482_v62  ;;  %v5143_v52 = vsel %vm2629_vm13, %v5096_v16, %v4904_v51  ;;  %v6002_v22 = vmul.f32 %v8569_v10, %v6001_v54  ;;  %v12579_v40 = vadd.f32 %v5548_v14, %v5460_v55 }
 0x4b6   : > { %5476 = vmatmul.bf16.gmra.mxu1 %v5143_v52  ;;  %v5374_v14 = vadd.f32 %v12436_v12, %v5373_v37  ;;  %v5553_v30 = vpop.f32.mrf.mxu2  ;;  %v6026_v20 = vor.u32 1.1754944e-38, %v6025_v7  ;;  %vm6024_vm15 = vcmp.eq.f32.partialorder %v6023_v21, 8.507059e+37 }
 0x4b7   : > { %v6230_v1 = vpack.c.bf16 %v6198_v45, %v6198_v45  ;;  %v6003_v33 = vadd.f32 %v8569_v10, %v6002_v22  ;;  %v7933_v13 = vmul.f32 -1.442695, %v12579_v40 }
 0x4b8   : > { %v8571_v38 = vpop.eup %8570  ;;  %v5375_v35 = vpop.f32.mrf.mxu3 }
 0x4b9   : > { %v8573_v62 = vpop.eup %8572  ;;  %v6438_v42 = vunpack.c.l.b16 %v6230_v1  ;;  %v6015_v27 = vmul.f32 %v8571_v38, %v12563_v26  ;;  %v6007_v50 = vsel %vm6006_vm8, %v8569_v10, %v6003_v33  ;;  %8574 = vpow2.f32 %v7933_v13  ;;  %v6362_v33 = vpop.permute.xlu1 %6361 }
 0x4ba   : > { %v12586_v53 = vadd.f32 1.0, %v8573_v62  ;;  %v5462_v23 = vpop.f32.mrf.mxu1  ;;  %v6012_v28 = vsel %vm6009_vm9, %v6011_v25, %v6007_v50  ;;  %vm6020_vm11 = vweird.f32 %v8571_v38  ;;  %v5376_v44 = vadd.f32 %v12436_v12, %v5375_v35  ;;  %v6474_v25 = vpop.permute.xlu2 %6473 }
 0x4bb   : > { %v6016_v24 = vsub.f32 1.0, %v6015_v27  ;;  %v5463_v36 = vadd.f32 %v5462_v23, %v5374_v14  ;;  %v6460_v46 = vpack.c.b16 %v6438_v42, %v6437_v9  ;;  %v6199_v61 = vmul.f32 %v6012_v28, %v12508_v6  ;;  %vm6021_vm14 = vmor %vm6019_vm12, %vm6020_vm11  ;;  %v13373_v23 = vld [vmem:[#allocation8_spill] sm:$0xff] }
 0x4bc   : > { %8576 = vrcp.f32 %v12586_v53  ;;  %v6040_v54 = vand.u32 2147483648, %v12586_v53  ;;  %v6038_v22 = vand.u32 2147483647, %v12586_v53  ;;  %vm6034_vm2 = vweird.f32 %v12586_v53 }
 0x4bd   : > { %v6017_v60 = vmul.f32 %v8571_v38, %v6016_v24  ;;  %v12591_v63 = vadd.f32 %v5551_v15, %v5463_v36  ;;  %6485 = vrot.lane.b32.xlu2 %v6460_v46, %s8811_s29  ;;  %v6231_v3 = vpack.c.bf16 %v6199_v61, %v6199_v61  ;;  %v6510_v24 = vsel %vm508_vm0, %v13373_v23, %v6362_v33 }
 0x4be   : > { %v6472_v8 = vpop.permute.xlu0 %6471  ;;  %v6041_v27 = vor.u32 1.1754944e-38, %v6040_v54  ;;  %vm6039_vm7 = vcmp.eq.f32.partialorder %v6038_v22, 8.507059e+37 }
 0x4bf   : > { %v6018_v32 = vadd.f32 %v8571_v38, %v6017_v60  ;;  %v7934_v58 = vmul.f32 -1.442695, %v12591_v63  ;;  %v6554_v37 = vsel %vm2629_vm13, %v6507_v0, %v6472_v8  ;;  %v8575_v10 = vpop.eup %8574  ;;  %v6439_v2 = vunpack.c.l.b16 %v6231_v3 }
 0x4c0   : > { %6681 = vmatmul.bf16.gmra.mxu0 %v6554_v37  ;;  %v12600_v11 = vadd.f32 1.0, %v8575_v10  ;;  %v5378_v26 = vpop.f32.mrf.mxu3  ;;  %v6557_v60 = vsel %vm2629_vm13, %v6510_v24, %v6474_v25 }
 0x4c1   : > { %v6022_v41 = vsel %vm6021_vm14, %v8571_v38, %v6018_v32  ;;  %8578 = vpow2.f32 %v7934_v58  ;;  %v5379_v62 = vadd.f32 %v12436_v12, %v5378_v26 }
 0x4c2   : > { %v8577_v57 = vpop.eup %8576  ;;  %v6027_v18 = vsel %vm6024_vm15, %v6026_v20, %v6022_v41  ;;  %v5464_v6 = vpop.f32.mrf.mxu1  ;;  %8580 = vrcp.f32 %v12600_v11  ;;  %v6055_v36 = vand.u32 2147483648, %v12600_v11  ;;  %v6053_v28 = vand.u32 2147483647, %v12600_v11 }
 0x4c3   : > { %v6200_v31 = vmul.f32 %v6027_v18, %v12528_v47  ;;  %v6030_v39 = vmul.f32 %v8577_v57, %v12586_v53  ;;  %v5465_v15 = vadd.f32 %v5464_v6, %v5376_v44  ;;  %vm6035_vm1 = vweird.f32 %v8577_v57  ;;  %v5556_v47 = vpop.f32.mrf.mxu2 }
 0x4c4   : > { %vm12616_vm6 = vmor %vm6034_vm2, %vm6035_vm1  ;;  %vm6049_vm4 = vweird.f32 %v12600_v11  ;;  %v6056_v61 = vor.u32 1.1754944e-38, %v6055_v36  ;;  %vm6054_vm10 = vcmp.eq.f32.partialorder %v6053_v28, 8.507059e+37 }
 0x4c5   : > { %v6232_v51 = vpack.c.bf16 %v6200_v31, %v6200_v31  ;;  %v6031_v59 = vsub.f32 1.0, %v6030_v39  ;;  %6377 = vrot.lane.b32.xlu2 %v11691_v48, %s8813_s24  ;;  %v12609_v55 = vadd.f32 %v5553_v30, %v5465_v15 }
 0x4c7   : > { %v8579_v16 = vpop.eup %8578  ;;  %v6440_v45 = vunpack.c.l.b16 %v6232_v51  ;;  %v6032_v52 = vmul.f32 %v8577_v57, %v6031_v59  ;;  %v7935_v1 = vmul.f32 -1.442695, %v12609_v55 }
 0x4c8   : > { %v12612_v17 = vadd.f32 1.0, %v8579_v16  ;;  %v8581_v5 = vpop.eup %8580  ;;  %v5380_v14 = vpop.f32.mrf.mxu3 }
 0x4c9   : > { %v6033_v38 = vadd.f32 %v8577_v57, %v6032_v52  ;;  %v6461_v48 = vpack.c.b16 %v6440_v45, %v6439_v2  ;;  %v6045_v35 = vmul.f32 %v8581_v5, %v12600_v11  ;;  %vm6050_vm3 = vweird.f32 %v8581_v5  ;;  %v6364_v52 = vpop.permute.xlu0 %6363  ;;  %v13377_v45 = vld [vmem:[#allocation10_spill] sm:$0xff] }
 0x4ca   : > { %8582 = vrcp.f32 %v12612_v17  ;;  %v5467_v9 = vpop.f32.mrf.mxu1  ;;  %vm6051_vm5 = vmor %vm6049_vm4, %vm6050_vm3  ;;  %v5381_v58 = vadd.f32 %v12436_v12, %v5380_v14  ;;  %v6070_v16 = vand.u32 2147483648, %v12612_v17  ;;  %vm6064_vm9 = vweird.f32 %v12612_v17 }
 0x4cb   : > { %v6037_v42 = vsel %vm12616_vm6, %v8577_v57, %v6033_v38  ;;  %8584 = vpow2.f32 %v7935_v1  ;;  %6487 = vrot.lane.b32.xlu1 %v6461_v48, %s8811_s29  ;;  %v6046_v50 = vsub.f32 1.0, %v6045_v35  ;;  %v5468_v53 = vadd.f32 %v5467_v9, %v5379_v62  ;;  %v5558_v37 = vpop.f32.mrf.mxu2  ;;  %v13376_v35 = vld [vmem:[#allocation9_spill] sm:$0xff] }
 0x4cc   : > { %v6042_v29 = vsel %vm6039_vm7, %v6041_v27, %v6037_v42  ;;  %v6071_v48 = vor.u32 1.1754944e-38, %v6070_v16  ;;  %v6513_v62 = vsel %vm508_vm0, %v13376_v35, %v6364_v52 }
 0x4cd   : > { %v6047_v46 = vmul.f32 %v8581_v5, %v6046_v50  ;;  %v12630_v7 = vadd.f32 %v5556_v47, %v5468_v53  ;;  %v6201_v30 = vmul.f32 %v6042_v29, %v12559_v34 }
 0x4cf   : > { %v6048_v56 = vadd.f32 %v8581_v5, %v6047_v46  ;;  %v7936_v0 = vmul.f32 -1.442695, %v12630_v7  ;;  %v6233_v57 = vpack.c.bf16 %v6201_v30, %v6201_v30 }
 0x4d0   : > { %v8583_v21 = vpop.eup %8582  ;;  %6686 = vmatmul.bf16.gmra.mxu0 %v6557_v60  ;;  %v5383_v6 = vpop.f32.mrf.mxu3 }
 0x4d1   : > { %v8585_v8 = vpop.eup %8584  ;;  %v6060_v32 = vmul.f32 %v8583_v21, %v12612_v17  ;;  %v6052_v10 = vsel %vm6051_vm5, %v8581_v5, %v6048_v56  ;;  %8586 = vpow2.f32 %v7936_v0  ;;  %vm6065_vm8 = vweird.f32 %v8583_v21 }
 0x4d2   : > { %v12638_v20 = vadd.f32 1.0, %v8585_v8  ;;  %v5469_v34 = vpop.f32.mrf.mxu1  ;;  %v6057_v41 = vsel %vm6054_vm10, %v6056_v61, %v6052_v10  ;;  %v6441_v59 = vunpack.c.l.b16 %v6233_v57  ;;  %vm12652_vm11 = vmor %vm6064_vm9, %vm6065_vm8  ;;  %v5384_v47 = vadd.f32 %v12436_v12, %v5383_v6 }
 0x4d3   : > { %v6061_v26 = vsub.f32 1.0, %v6060_v32  ;;  %v5470_v11 = vadd.f32 %v5469_v34, %v5381_v58  ;;  %6379 = vrot.lane.b32.xlu1 %v11784_v49, %s8813_s24  ;;  %v6202_v18 = vmul.f32 %v6057_v41, %v12579_v40  ;;  %v6068_v49 = vand.u32 2147483647, %v12612_v17  ;;  %v5561_v17 = vpop.f32.mrf.mxu2 }
 0x4d4   : > { %8588 = vrcp.f32 %v12638_v20  ;;  %v6085_v27 = vand.u32 2147483648, %v12638_v20  ;;  %v6083_v23 = vand.u32 2147483647, %v12638_v20  ;;  %vm6079_vm15 = vweird.f32 %v12638_v20 }
 0x4d5   : > { %v6062_v44 = vmul.f32 %v8583_v21, %v6061_v26  ;;  %v12644_v3 = vadd.f32 %v5558_v37, %v5470_v11  ;;  %v6234_v31 = vpack.c.bf16 %v6202_v18, %v6202_v18  ;;  %vm6069_vm12 = vcmp.eq.f32.partialorder %v6068_v49, 8.507059e+37 }
 0x4d6   : > { %vm6084_vm2 = vcmp.eq.f32.partialorder %v6083_v23, 8.507059e+37 }
 0x4d7   : > { %v6063_v39 = vadd.f32 %v8583_v21, %v6062_v44  ;;  %v7937_v15 = vmul.f32 -1.442695, %v12644_v3  ;;  %v8587_v51 = vpop.eup %8586  ;;  %v6442_v54 = vunpack.c.l.b16 %v6234_v31 }
 0x4d8   : > { %v12650_v40 = vadd.f32 1.0, %v8587_v51  ;;  %v5385_v24 = vpop.f32.mrf.mxu3  ;;  %v6366_v51 = vpop.permute.xlu2 %6365 }
 0x4d9   : > { %8590 = vpow2.f32 %v7937_v15  ;;  %v6462_v22 = vpack.c.b16 %v6442_v54, %v6441_v59  ;;  %v6067_v1 = vsel %vm12652_vm11, %v8583_v21, %v6063_v39  ;;  %v6086_v21 = vor.u32 1.1754944e-38, %v6085_v27 }
 0x4da   : > { %v8589_v2 = vpop.eup %8588  ;;  %8592 = vrcp.f32 %v12650_v40  ;;  %v5472_v38 = vpop.f32.mrf.mxu1  ;;  %v6072_v42 = vsel %vm6069_vm12, %v6071_v48, %v6067_v1  ;;  %v5386_v56 = vadd.f32 %v12436_v12, %v5385_v24  ;;  %v6100_v34 = vand.u32 2147483648, %v12650_v40 }
 0x4db   : > { %v6075_v5 = vmul.f32 %v8589_v2, %v12638_v20  ;;  %v5473_v33 = vadd.f32 %v5472_v38, %v5384_v47  ;;  %6489 = vrot.lane.b32.xlu0 %v6462_v22, %s8811_s29  ;;  %vm6080_vm14 = vweird.f32 %v8589_v2  ;;  %v6203_v28 = vmul.f32 %v6072_v42, %v12591_v63  ;;  %v5563_v10 = vpop.f32.mrf.mxu2 }
 0x4dc   : > { %vm6081_vm1 = vmor %vm6079_vm15, %vm6080_vm14  ;;  %v6098_v26 = vand.u32 2147483647, %v12650_v40  ;;  %vm6094_vm7 = vweird.f32 %v12650_v40  ;;  %v6101_v39 = vor.u32 1.1754944e-38, %v6100_v34  ;;  %v6516_v52 = vsel %vm508_vm0, %v13377_v45, %v6366_v51 }
 0x4dd   : > { %v6076_v13 = vsub.f32 1.0, %v6075_v5  ;;  %v6476_v9 = vpop.permute.xlu1 %6475  ;;  %v12665_v14 = vadd.f32 %v5561_v17, %v5473_v33  ;;  %v6235_v63 = vpack.c.bf16 %v6203_v28, %v6203_v28 }
 0x4de   : > { %v6560_v50 = vsel %vm2629_vm13, %v6513_v62, %v6476_v9  ;;  %vm6099_vm4 = vcmp.eq.f32.partialorder %v6098_v26, 8.507059e+37 }
 0x4df   : > { %v8591_v25 = vpop.eup %8590  ;;  %v6077_v53 = vmul.f32 %v8589_v2, %v6076_v13  ;;  %v7938_v36 = vmul.f32 -1.442695, %v12665_v14  ;;  %v6443_v44 = vunpack.c.l.b16 %v6235_v63 }
 0x4e0   : > { %v12669_v29 = vadd.f32 1.0, %v8591_v25  ;;  %6691 = vmatmul.bf16.gmra.mxu0 %v6560_v50  ;;  %v8593_v46 = vpop.eup %8592 }
 0x4e1   : > { %v6078_v60 = vadd.f32 %v8589_v2, %v6077_v53  ;;  %v6090_v30 = vmul.f32 %v8593_v46, %v12650_v40  ;;  %vm6095_vm6 = vweird.f32 %v8593_v46 }
 0x4e2   : > { %8594 = vrcp.f32 %v12669_v29  ;;  %v5474_v8 = vpop.f32.mrf.mxu1  ;;  %vm6096_vm3 = vmor %vm6094_vm7, %vm6095_vm6  ;;  %v6115_v49 = vand.u32 2147483648, %v12669_v29  ;;  %vm6109_vm10 = vweird.f32 %v12669_v29 }
 0x4e3   : > { %v6082_v0 = vsel %vm6081_vm1, %v8589_v2, %v6078_v60  ;;  %8596 = vpow2.f32 %v7938_v36  ;;  %v6091_v32 = vsub.f32 1.0, %v6090_v30  ;;  %v5475_v58 = vadd.f32 %v5474_v8, %v5386_v56  ;;  %6381 = vrot.lane.b32.xlu0 %v11836_v4, %s8813_s24 }
 0x4e4   : > { %v6087_v61 = vsel %vm6084_vm2, %v6086_v21, %v6082_v0  ;;  %v6113_v2 = vand.u32 2147483647, %v12669_v29  ;;  %v6116_v38 = vor.u32 1.1754944e-38, %v6115_v49  ;;  %v13380_v49 = vld [vmem:[#allocation13_spill] sm:$0xff] }
 0x4e5   : > { %v6204_v37 = vmul.f32 %v6087_v61, %v12609_v55  ;;  %v6092_v20 = vmul.f32 %v8593_v46, %v6091_v32  ;;  %v12681_v41 = vadd.f32 %v5563_v10, %v5475_v58 }
 0x4e6   : > { %vm6114_vm9 = vcmp.eq.f32.partialorder %v6113_v2, 8.507059e+37 }
 0x4e7   : > { %v6236_v12 = vpack.c.bf16 %v6204_v37, %v6204_v37  ;;  %v6093_v57 = vadd.f32 %v8593_v46, %v6092_v20  ;;  %v7939_v18 = vmul.f32 -1.442695, %v12681_v41  ;;  %v6480_v0 = vpop.permute.xlu2 %6479 }
 0x4e8   : > { %v8595_v11 = vpop.eup %8594 }
 0x4e9   : > { %v8597_v4 = vpop.eup %8596  ;;  %v6444_v6 = vunpack.c.l.b16 %v6236_v12  ;;  %v6105_v55 = vmul.f32 %v8595_v11, %v12669_v29  ;;  %v6097_v31 = vsel %vm6096_vm3, %v8593_v46, %v6093_v57  ;;  %8598 = vpow2.f32 %v7939_v18  ;;  %v6368_v46 = vpop.permute.xlu1 %6367 }
 0x4ea   : > { %v5695_v15 = vadd.f32 1.0, %v8597_v4  ;;  %v6102_v16 = vsel %vm6099_vm4, %v6101_v39, %v6097_v31  ;;  %vm6110_vm5 = vweird.f32 %v8595_v11  ;;  %v13379_v31 = vld [vmem:[#allocation12_spill] sm:$0xff] }
 0x4eb   : > { %v6106_v59 = vsub.f32 1.0, %v6105_v55  ;;  %v6463_v54 = vpack.c.b16 %v6444_v6, %v6443_v44  ;;  %v6205_v22 = vmul.f32 %v6102_v16, %v12630_v7  ;;  %vm6111_vm8 = vmor %vm6109_vm10, %vm6110_vm5 }
 0x4ec   : > { %8600 = vrcp.f32 %v5695_v15  ;;  %v6130_v50 = vand.u32 2147483648, %v5695_v15  ;;  %v6128_v24 = vand.u32 2147483647, %v5695_v15  ;;  %vm6124_vm12 = vweird.f32 %v5695_v15 }
 0x4ed   : > { %v6107_v40 = vmul.f32 %v8595_v11, %v6106_v59  ;;  %6491 = vrot.lane.b32.xlu2 %v6463_v54, %s8811_s29  ;;  %v6478_v47 = vpop.permute.xlu0 %6477  ;;  %v6237_v62 = vpack.c.bf16 %v6205_v22, %v6205_v22 }
 0x4ee   : > { %v6563_v5 = vsel %vm2629_vm13, %v6516_v52, %v6478_v47  ;;  %v6131_v21 = vor.u32 1.1754944e-38, %v6130_v50  ;;  %vm6129_vm15 = vcmp.eq.f32.partialorder %v6128_v24, 8.507059e+37 }
 0x4ef   : > { %v6108_v1 = vadd.f32 %v8595_v11, %v6107_v40  ;;  %v8599_v17 = vpop.eup %8598  ;;  %v6445_v25 = vunpack.c.l.b16 %v6237_v62  ;;  %v6372_v59 = vpop.permute.xlu2 %6371 }
 0x4f0   : > { %6696 = vmatmul.bf16.gmra.mxu0 %v6563_v5  ;;  %v5696_v33 = vadd.f32 1.0, %v8599_v17  ;;  %v6525_v40 = vsel %vm508_vm0, %v13380_v49, %v6372_v59 }
 0x4f1   : > { %v6112_v48 = vsel %vm6111_vm8, %v8595_v11, %v6108_v1 }
 0x4f2   : > { %v8601_v13 = vpop.eup %8600  ;;  %v6117_v35 = vsel %vm6114_vm9, %v6116_v38, %v6112_v48  ;;  %8602 = vrcp.f32 %v5696_v33  ;;  %v6145_v61 = vand.u32 2147483648, %v5696_v33  ;;  %v6143_v58 = vand.u32 2147483647, %v5696_v33 }
 0x4f3   : > { %v6206_v9 = vmul.f32 %v6117_v35, %v12644_v3  ;;  %v6120_v42 = vmul.f32 %v8601_v13, %v5695_v15  ;;  %vm6125_vm11 = vweird.f32 %v8601_v13  ;;  %vm6139_vm2 = vweird.f32 %v5696_v33 }
 0x4f4   : > { %vm6126_vm14 = vmor %vm6124_vm12, %vm6125_vm11  ;;  %v6146_v20 = vor.u32 1.1754944e-38, %v6145_v61  ;;  %vm6144_vm7 = vcmp.eq.f32.partialorder %v6143_v58, 8.507059e+37 }
 0x4f5   : > { %v6238_v7 = vpack.c.bf16 %v6206_v9, %v6206_v9  ;;  %v6121_v27 = vsub.f32 1.0, %v6120_v42  ;;  %6383 = vrot.lane.b32.xlu2 %v11908_v19, %s8813_s24  ;;  %v13378_v19 = vld [vmem:[#allocation11_spill] sm:$0xff]  ;;  %v6370_v6 = vpop.permute.xlu0 %6369 }
 0x4f6   : > { %v6519_v56 = vsel %vm508_vm0, %v13378_v19, %v6368_v46  ;;  %v6522_v39 = vsel %vm508_vm0, %v13379_v31, %v6370_v6  ;;  %v13384_v6 = vld [vmem:[#allocation15_spill] sm:$0xff] }
 0x4f7   : > { %v6446_v53 = vunpack.c.l.b16 %v6238_v7  ;;  %v6122_v23 = vmul.f32 %v8601_v13, %v6121_v27  ;;  %v6566_v63 = vsel %vm2629_vm13, %v6519_v56, %v6480_v0 }
 0x4f8   : > { %v8603_v29 = vpop.eup %8602 }
 0x4f9   : > { %v6123_v36 = vadd.f32 %v8601_v13, %v6122_v23  ;;  %v6464_v28 = vpack.c.b16 %v6446_v53, %v6445_v25  ;;  %v6135_v3 = vmul.f32 %v8603_v29, %v5696_v33  ;;  %vm6140_vm1 = vweird.f32 %v8603_v29  ;;  %v668_v26 = vpop.f32.mrf.mxu0  ;;  %v13381_v33 = vld [vmem:[#allocation14_spill] sm:$0xff] }
 0x4fa   : > { %vm6141_vm6 = vmor %vm6139_vm2, %vm6140_vm1 }
 0x4fb   : > { %v6127_v60 = vsel %vm6126_vm14, %v8601_v13, %v6123_v36  ;;  %6493 = vrot.lane.b32.xlu1 %v6464_v28, %s8811_s29  ;;  %v6136_v30 = vsub.f32 1.0, %v6135_v3  ;;  %v5566_v3 = vpop.f32.mrf.mxu2 }
 0x4fc   : > { %v6132_v8 = vsel %vm6129_vm15, %v6131_v21, %v6127_v60 }
 0x4fd   : > { %v6137_v32 = vmul.f32 %v8603_v29, %v6136_v30  ;;  %v6207_v37 = vmul.f32 %v6132_v8, %v12665_v14 }
 0x4ff   : > { %v6138_v10 = vadd.f32 %v8603_v29, %v6137_v32  ;;  %v6239_v11 = vpack.c.bf16 %v6207_v37, %v6207_v37 }
 0x500   : > { %6701 = vmatmul.bf16.gmra.mxu0 %v6566_v63 }
 0x501   : > { %v6142_v34 = vsel %vm6141_vm6, %v8603_v29, %v6138_v10  ;;  %v6447_v4 = vunpack.c.l.b16 %v6239_v11  ;;  %v670_v55 = vpop.f32.mrf.mxu0  ;;  %v8744_v29 = vld [vmem:[%s13177_s6] ss:$0 sm:$0xff] }
 0x502   : > { %v6147_v12 = vsel %vm6144_vm7, %v6146_v20, %v6142_v34 }
 0x503   : > { %6385 = vrot.lane.b32.xlu1 %v12025_v43, %s8813_s24  ;;  %v6208_v57 = vmul.f32 %v6147_v12, %v12681_v41  ;;  %v12713_v43 = vld [vmem:[%s13179_s8] ss:$0 sm:$0xff] }
 0x505   : > { %v6240_v18 = vpack.c.bf16 %v6208_v57, %v6208_v57 }
 0x507   : > { %v6448_v44 = vunpack.c.l.b16 %v6240_v18 }
 0x509   : > { %v6465_v14 = vpack.c.b16 %v6448_v44, %v6447_v4 }
 0x50b   : > { %6495 = vrot.lane.b32.xlu0 %v6465_v14, %s8811_s29 }
 0x50d   : > { %v6482_v15 = vpop.permute.xlu1 %6481 }
 0x50e   : > { %v6569_v51 = vsel %vm2629_vm13, %v6522_v39, %v6482_v15 }
 0x510   : > { %6706 = vmatmul.bf16.gmra.mxu0 %v6569_v51 }
 0x515   : > { %v6374_v17 = vpop.permute.xlu1 %6373 }
 0x516   : > { %v6528_v13 = vsel %vm508_vm0, %v13381_v33, %v6374_v17 }
 0x517   : > { %v6486_v35 = vpop.permute.xlu2 %6485 }
 0x518   : > { %v6575_v50 = vsel %vm2629_vm13, %v6528_v13, %v6486_v35 }
 0x51a   : > { %v6672_v41 = vpop.f32.mrf.mxu0 }
 0x51b   : > { %v12716_v54 = vadd.f32 %v12713_v43, %v6672_v41 }
 0x51d   : > { %v7974_v16 = vmul.f32 -1.442695, %v12716_v54  ;;  %v6484_v2 = vpop.permute.xlu0 %6483 }
 0x51e   : > { %v6572_v45 = vsel %vm2629_vm13, %v6525_v40, %v6484_v2  ;;  %v5568_v40 = vpop.f32.mrf.mxu2 }
 0x51f   : > { %8604 = vpow2.f32 %v7974_v16 }
 0x520   : > { %6711 = vmatmul.bf16.gmra.mxu0 %v6572_v45 }
 0x522   : > { %v6674_v52 = vpop.f32.mrf.mxu0 }
 0x523   : > { %v12723_v47 = vadd.f32 %v12713_v43, %v6674_v52 }
 0x525   : > { %v8605_v22 = vpop.eup %8604  ;;  %v7975_v1 = vmul.f32 -1.442695, %v12723_v47  ;;  %v6376_v10 = vpop.permute.xlu0 %6375 }
 0x526   : > { %v6848_v5 = vadd.f32 1.0, %v8605_v22  ;;  %v6531_v14 = vsel %vm508_vm0, %v13384_v6, %v6376_v10  ;;  %v13387_v10 = vld [vmem:[#allocation16_spill] sm:$0xff] }
 0x527   : > { %8606 = vpow2.f32 %v7975_v1 }
 0x528   : > { %8608 = vrcp.f32 %v6848_v5  ;;  %vm6885_vm4 = vweird.f32 %v6848_v5  ;;  %v6889_v61 = vand.u32 2147483647, %v6848_v5  ;;  %v6891_v32 = vand.u32 2147483648, %v6848_v5 }
 0x52a   : > { %v6677_v38 = vpop.f32.mrf.mxu0  ;;  %vm6890_vm8 = vcmp.eq.f32.partialorder %v6889_v61, 8.507059e+37  ;;  %v6892_v44 = vor.u32 1.1754944e-38, %v6891_v32 }
 0x52b   : > { %v12727_v48 = vadd.f32 %v12713_v43, %v6677_v38 }
 0x52d   : > { %v8607_v62 = vpop.eup %8606  ;;  %v7976_v9 = vmul.f32 -1.442695, %v12727_v48 }
 0x52e   : > { %v8609_v42 = vpop.eup %8608  ;;  %v12732_v7 = vadd.f32 1.0, %v8607_v62 }
 0x52f   : > { %v6881_v27 = vmul.f32 %v8609_v42, %v6848_v5  ;;  %8610 = vpow2.f32 %v7976_v9  ;;  %vm6886_vm3 = vweird.f32 %v8609_v42 }
 0x530   : > { %8612 = vrcp.f32 %v12732_v7  ;;  %6716 = vmatmul.bf16.gmra.mxu0 %v6575_v50  ;;  %vm12747_vm5 = vmor %vm6885_vm4, %vm6886_vm3  ;;  %v6906_v37 = vand.u32 2147483648, %v12732_v7  ;;  %v6904_v12 = vand.u32 2147483647, %v12732_v7  ;;  %vm6900_vm9 = vweird.f32 %v12732_v7 }
 0x531   : > { %v6882_v25 = vsub.f32 1.0, %v6881_v27  ;;  %v5388_v53 = vpop.f32.mrf.mxu3 }
 0x532   : > { %v6679_v23 = vpop.f32.mrf.mxu0  ;;  %v5389_v36 = vadd.f32 %v8744_v29, %v5388_v53  ;;  %v6907_v39 = vor.u32 1.1754944e-38, %v6906_v37  ;;  %vm6905_vm12 = vcmp.eq.f32.partialorder %v6904_v12, 8.507059e+37 }
 0x533   : > { %v6883_v24 = vmul.f32 %v8609_v42, %v6882_v25  ;;  %v12740_v46 = vadd.f32 %v12713_v43, %v6679_v23  ;;  %v5477_v28 = vpop.f32.mrf.mxu1 }
 0x534   : > { %v5478_v30 = vadd.f32 %v5477_v28, %v5389_v36 }
 0x535   : > { %v8611_v60 = vpop.eup %8610  ;;  %v7977_v21 = vmul.f32 -1.442695, %v12740_v46  ;;  %v6884_v56 = vadd.f32 %v8609_v42, %v6883_v24 }
 0x536   : > { %v8613_v19 = vpop.eup %8612  ;;  %v12743_v0 = vadd.f32 1.0, %v8611_v60  ;;  %v12752_v20 = vadd.f32 %v5566_v3, %v5478_v30 }
 0x537   : > { %v6896_v8 = vmul.f32 %v8613_v19, %v12732_v7  ;;  %8614 = vpow2.f32 %v7977_v21  ;;  %v6888_v34 = vsel %vm12747_vm5, %v8609_v42, %v6884_v56  ;;  %vm6901_vm10 = vweird.f32 %v8613_v19  ;;  %v6378_v56 = vpop.permute.xlu2 %6377 }
 0x538   : > { %8616 = vrcp.f32 %v12743_v0  ;;  %v7940_v57 = vmul.f32 -1.442695, %v12752_v20  ;;  %v6893_v16 = vsel %vm6890_vm8, %v6892_v44, %v6888_v34  ;;  %vm6902_vm11 = vmor %vm6900_vm9, %vm6901_vm10  ;;  %vm6915_vm15 = vweird.f32 %v12743_v0 }
 0x539   : > { %v6897_v63 = vsub.f32 1.0, %v6896_v8  ;;  %v5390_v26 = vpop.f32.mrf.mxu3  ;;  %v7360_v17 = vmul.f32 %v6893_v16, %v12716_v54  ;;  %v6919_v53 = vand.u32 2147483647, %v12743_v0  ;;  %v6921_v23 = vand.u32 2147483648, %v12743_v0 }
 0x53a   : > { %v5391_v18 = vadd.f32 %v8744_v29, %v5390_v26  ;;  %8618 = vpow2.f32 %v7940_v57  ;;  %v6534_v34 = vsel %vm508_vm0, %v13387_v10, %v6378_v56 }
 0x53b   : > { %v6898_v11 = vmul.f32 %v8613_v19, %v6897_v63  ;;  %v5479_v4 = vpop.f32.mrf.mxu1  ;;  %vm6920_vm6 = vcmp.eq.f32.partialorder %v6919_v53, 8.507059e+37  ;;  %v6922_v32 = vor.u32 1.1754944e-38, %v6921_v23 }
 0x53c   : > { %v5480_v41 = vadd.f32 %v5479_v4, %v5391_v18 }
 0x53d   : > { %v8615_v55 = vpop.eup %8614  ;;  %v6899_v31 = vadd.f32 %v8613_v19, %v6898_v11  ;;  %v6682_v15 = vpop.f32.mrf.mxu0 }
 0x53e   : > { %v6488_v51 = vpop.permute.xlu1 %6487  ;;  %v12762_v59 = vpop.eup %8616  ;;  %v12765_v49 = vadd.f32 1.0, %v8615_v55  ;;  %v12768_v2 = vadd.f32 %v12713_v43, %v6682_v15  ;;  %v12775_v1 = vadd.f32 %v5568_v40, %v5480_v41 }
 0x53f   : > { %v6578_v45 = vsel %vm2629_vm13, %v6531_v14, %v6488_v51  ;;  %v6903_v52 = vsel %vm6902_vm11, %v8613_v19, %v6899_v31  ;;  %v6911_v22 = vmul.f32 %v12762_v59, %v12743_v0  ;;  %vm6916_vm14 = vweird.f32 %v12762_v59 }
 0x540   : > { %v6908_v5 = vsel %vm6905_vm12, %v6907_v39, %v6903_v52  ;;  %8620 = vrcp.f32 %v12765_v49  ;;  %6721 = vmatmul.bf16.gmra.mxu0 %v6578_v45  ;;  %v7978_v13 = vmul.f32 -1.442695, %v12768_v2  ;;  %v7941_v35 = vmul.f32 -1.442695, %v12775_v1  ;;  %v8619_v62 = vpop.eup %8618  ;;  %vm12798_vm1 = vmor %vm6915_vm15, %vm6916_vm14 }
 0x541   : > { %v7361_v38 = vmul.f32 %v6908_v5, %v12723_v47  ;;  %v6912_v33 = vsub.f32 1.0, %v6911_v22  ;;  %v12783_v7 = vadd.f32 1.0, %v8619_v62  ;;  %v6934_v21 = vand.u32 2147483647, %v12765_v49 }
 0x542   : > { %8622 = vpow2.f32 %v7978_v13  ;;  %v6936_v30 = vand.u32 2147483648, %v12765_v49  ;;  %vm6930_vm7 = vweird.f32 %v12765_v49  ;;  %v13388_v13 = vld [vmem:[#allocation17_spill] sm:$0xff] }
 0x543   : > { %v8083_v9 = vpack.c.bf16 %v7361_v38, %v7360_v17  ;;  %v6913_v42 = vmul.f32 %v12762_v59, %v6912_v33  ;;  %8624 = vpow2.f32 %v7941_v35  ;;  %vm6935_vm4 = vcmp.eq.f32.partialorder %v6934_v21, 8.507059e+37 }
 0x544   : > { %8626 = vrcp.f32 %v12783_v7  ;;  %v6937_v26 = vor.u32 1.1754944e-38, %v6936_v30  ;;  %v6158_v6 = vand.u32 2147483647, %v12783_v7  ;;  %v6160_v14 = vand.u32 2147483648, %v12783_v7 }
 0x545   : > { %8084 = vst [vmem:[%s12785_s22] sm:$0xff] %v8083_v9   ;;  %v6684_v54 = vpop.f32.mrf.mxu0  ;;  %v6914_v47 = vadd.f32 %v12762_v59, %v6913_v42  ;;  %vm6154_vm10 = vweird.f32 %v12783_v7 }
 0x546   : > { %v8621_v27 = vpop.eup %8620  ;;  %v12793_v25 = vadd.f32 %v12713_v43, %v6684_v54  ;;  %v6380_v52 = vpop.permute.xlu1 %6379  ;;  %vm6159_vm9 = vcmp.eq.f32.partialorder %v6158_v6, 8.507059e+37  ;;  %v6161_v5 = vor.u32 1.1754944e-38, %v6160_v14 }
 0x547   : > { %v6926_v50 = vmul.f32 %v8621_v27, %v12765_v49  ;;  %v6918_v60 = vsel %vm12798_vm1, %v12762_v59, %v6914_v47  ;;  %vm6931_vm2 = vweird.f32 %v8621_v27  ;;  %v6537_v35 = vsel %vm508_vm0, %v13388_v13, %v6380_v52  ;;  %v6492_v62 = vpop.permute.xlu2 %6491 }
 0x548   : > { %v8623_v24 = vpop.eup %8622  ;;  %v7979_v28 = vmul.f32 -1.442695, %v12793_v25  ;;  %v6923_v12 = vsel %vm6920_vm6, %v6922_v32, %v6918_v60  ;;  %vm6932_vm3 = vmor %vm6930_vm7, %vm6931_vm2  ;;  %v6584_v53 = vsel %vm2629_vm13, %v6537_v35, %v6492_v62 }
 0x549   : > { %v6927_v36 = vsub.f32 1.0, %v6926_v50  ;;  %v8625_v3 = vpop.eup %8624  ;;  %v12808_v19 = vadd.f32 1.0, %v8623_v24  ;;  %v7362_v39 = vmul.f32 %v6923_v12, %v12727_v48 }
 0x54a   : > { %v12810_v8 = vadd.f32 1.0, %v8625_v3  ;;  %8628 = vpow2.f32 %v7979_v28  ;;  %v8627_v61 = vpop.eup %8626 }
 0x54b   : > { %v6928_v0 = vmul.f32 %v8621_v27, %v6927_v36  ;;  %8630 = vrcp.f32 %v12808_v19  ;;  %v6150_v63 = vmul.f32 %v8627_v61, %v12783_v7  ;;  %vm6155_vm5 = vweird.f32 %v8627_v61 }
 0x54c   : > { %8632 = vrcp.f32 %v12810_v8  ;;  %vm6156_vm8 = vmor %vm6154_vm10, %vm6155_vm5  ;;  %v6175_v54 = vand.u32 2147483648, %v12810_v8  ;;  %v6173_v47 = vand.u32 2147483647, %v12810_v8  ;;  %vm6945_vm12 = vweird.f32 %v12808_v19 }
 0x54d   : > { %v6929_v58 = vadd.f32 %v8621_v27, %v6928_v0  ;;  %v6687_v37 = vpop.f32.mrf.mxu0  ;;  %v6490_v11 = vpop.permute.xlu0 %6489  ;;  %v6151_v18 = vsub.f32 1.0, %v6150_v63  ;;  %vm6169_vm14 = vweird.f32 %v12810_v8  ;;  %v6949_v21 = vand.u32 2147483647, %v12808_v19 }
 0x54e   : > { %v12819_v4 = vadd.f32 %v12713_v43, %v6687_v37  ;;  %v6581_v55 = vsel %vm2629_vm13, %v6534_v34, %v6490_v11  ;;  %v6176_v28 = vor.u32 1.1754944e-38, %v6175_v54  ;;  %v6951_v30 = vand.u32 2147483648, %v12808_v19 }
 0x54f   : > { %v6933_v57 = vsel %vm6932_vm3, %v8621_v27, %v6929_v58  ;;  %v6152_v51 = vmul.f32 %v8627_v61, %v6151_v18  ;;  %vm6174_vm2 = vcmp.eq.f32.partialorder %v6173_v47, 8.507059e+37  ;;  %vm6950_vm3 = vcmp.eq.f32.partialorder %v6949_v21, 8.507059e+37 }
 0x550   : > { %v6938_v44 = vsel %vm6935_vm4, %v6937_v26, %v6933_v57  ;;  %v8629_v31 = vpop.eup %8628  ;;  %6726 = vmatmul.bf16.gmra.mxu0 %v6581_v55  ;;  %v7980_v16 = vmul.f32 -1.442695, %v12819_v4  ;;  %v6952_v11 = vor.u32 1.1754944e-38, %v6951_v30 }
 0x551   : > { %v7363_v15 = vmul.f32 %v6938_v44, %v12740_v46  ;;  %v12826_v41 = vpop.eup %8630  ;;  %v12828_v59 = vadd.f32 1.0, %v8629_v31  ;;  %v6153_v45 = vadd.f32 %v8627_v61, %v6152_v51 }
 0x552   : > { %v8633_v49 = vpop.eup %8632  ;;  %v6941_v48 = vmul.f32 %v12826_v41, %v12808_v19  ;;  %vm6946_vm15 = vweird.f32 %v12826_v41 }
 0x553   : > { %v8088_v40 = vpack.c.bf16 %v7363_v15, %v7362_v39  ;;  %v6165_v46 = vmul.f32 %v8633_v49, %v12810_v8  ;;  %8634 = vrcp.f32 %v12828_v59  ;;  %v6157_v22 = vsel %vm6156_vm8, %v8627_v61, %v6153_v45  ;;  %vm12862_vm6 = vmor %vm6945_vm12, %vm6946_vm15 }
 0x554   : > { %v6942_v17 = vsub.f32 1.0, %v6941_v48  ;;  %8636 = vpow2.f32 %v7980_v16  ;;  %v6162_v42 = vsel %vm6159_vm9, %v6161_v5, %v6157_v22  ;;  %vm6170_vm11 = vweird.f32 %v8633_v49 }
 0x555   : > { %8160 = vst [vmem:[%s12785_s22 + $0x8] sm:$0xff] %v8088_v40   ;;  %v6689_v38 = vpop.f32.mrf.mxu0  ;;  %v6166_v33 = vsub.f32 1.0, %v6165_v46  ;;  %v6209_v24 = vmul.f32 %v6162_v42, %v12752_v20  ;;  %vm6171_vm1 = vmor %vm6169_vm14, %vm6170_vm11  ;;  %v6966_v8 = vand.u32 2147483648, %v12828_v59  ;;  %v6964_v10 = vand.u32 2147483647, %v12828_v59 }
 0x556   : > { %v12840_v9 = vadd.f32 %v12713_v43, %v6689_v38  ;;  %v6943_v7 = vmul.f32 %v12826_v41, %v6942_v17  ;;  %vm6960_vm4 = vweird.f32 %v12828_v59  ;;  %v6382_v38 = vpop.permute.xlu0 %6381 }
 0x557   : > { %v6167_v27 = vmul.f32 %v8633_v49, %v6166_v33  ;;  %v6241_v58 = vpack.c.bf16 %v6209_v24, %v6209_v24  ;;  %v6967_v44 = vor.u32 1.1754944e-38, %v6966_v8  ;;  %vm6965_vm10 = vcmp.eq.f32.partialorder %v6964_v10, 8.507059e+37 }
 0x558   : > { %v7981_v50 = vmul.f32 -1.442695, %v12840_v9  ;;  %v6944_v36 = vadd.f32 %v12826_v41, %v6943_v7 }
 0x559   : > { %v8635_v23 = vpop.eup %8634  ;;  %v6168_v29 = vadd.f32 %v8633_v49, %v6167_v27  ;;  %v6449_v14 = vunpack.c.l.b16 %v6241_v58  ;;  %v13393_v27 = vld [vmem:[#allocation18_spill] sm:$0xff] }
 0x55a   : > { %8638 = vpow2.f32 %v7981_v50  ;;  %v6956_v3 = vmul.f32 %v8635_v23, %v12828_v59  ;;  %v8637_v60 = vpop.eup %8636  ;;  %v6948_v12 = vsel %vm12862_vm6, %v12826_v41, %v6944_v36  ;;  %vm6961_vm7 = vweird.f32 %v8635_v23 }
 0x55b   : > { %v6172_v56 = vsel %vm6171_vm1, %v8633_v49, %v6168_v29  ;;  %v12856_v61 = vadd.f32 1.0, %v8637_v60  ;;  %v6953_v55 = vsel %vm6950_vm3, %v6952_v11, %v6948_v12  ;;  %vm6962_vm5 = vmor %vm6960_vm4, %vm6961_vm7  ;;  %v6540_v47 = vsel %vm508_vm0, %v13393_v27, %v6382_v38 }
 0x55c   : > { %v6177_v20 = vsel %vm6174_vm2, %v6176_v28, %v6172_v56  ;;  %v6957_v0 = vsub.f32 1.0, %v6956_v3  ;;  %v7364_v16 = vmul.f32 %v6953_v55, %v12768_v2 }
 0x55d   : > { %v6692_v32 = vpop.f32.mrf.mxu0  ;;  %v6210_v37 = vmul.f32 %v6177_v20, %v12775_v1  ;;  %8640 = vrcp.f32 %v12856_v61  ;;  %v6981_v33 = vand.u32 2147483648, %v12856_v61  ;;  %vm6975_vm9 = vweird.f32 %v12856_v61 }
 0x55e   : > { %v12869_v34 = vadd.f32 %v12713_v43, %v6692_v32  ;;  %v6958_v26 = vmul.f32 %v8635_v23, %v6957_v0  ;;  %v6979_v35 = vand.u32 2147483647, %v12856_v61 }
 0x55f   : > { %v6242_v57 = vpack.c.bf16 %v6210_v37, %v6210_v37  ;;  %v6982_v28 = vor.u32 1.1754944e-38, %v6981_v33 }
 0x560   : > { %v8639_v19 = vpop.eup %8638  ;;  %v7982_v18 = vmul.f32 -1.442695, %v12869_v34  ;;  %v6959_v1 = vadd.f32 %v8635_v23, %v6958_v26  ;;  %6731 = vmatmul.bf16.gmra.mxu0 %v6584_v53  ;;  %vm6980_vm14 = vcmp.eq.f32.partialorder %v6979_v35, 8.507059e+37 }
 0x561   : > { %v6855_v6 = vadd.f32 1.0, %v8639_v19  ;;  %v6450_v31 = vunpack.c.l.b16 %v6242_v57 }
 0x562   : > { %8642 = vpow2.f32 %v7982_v18  ;;  %v6963_v39 = vsel %vm6962_vm5, %v8635_v23, %v6959_v1 }
 0x563   : > { %8644 = vrcp.f32 %v6855_v6  ;;  %v6968_v15 = vsel %vm6965_vm10, %v6967_v44, %v6963_v39  ;;  %v6466_v51 = vpack.c.b16 %v6450_v31, %v6449_v14  ;;  %v8641_v41 = vpop.eup %8640  ;;  %v6994_v7 = vand.u32 2147483647, %v6855_v6  ;;  %v6384_v44 = vpop.permute.xlu2 %6383  ;;  %v13394_v31 = vld [vmem:[#allocation19_spill] sm:$0xff] }
 0x564   : > { %v7365_v59 = vmul.f32 %v6968_v15, %v12793_v25  ;;  %v6971_v40 = vmul.f32 %v8641_v41, %v12856_v61  ;;  %vm6976_vm8 = vweird.f32 %v8641_v41  ;;  %v6996_v54 = vand.u32 2147483648, %v6855_v6 }
 0x565   : > { %v6694_v49 = vpop.f32.mrf.mxu0  ;;  %6497 = vrot.lane.b32.xlu2 %v6466_v51, %s8811_s29  ;;  %vm12893_vm11 = vmor %vm6975_vm9, %vm6976_vm8  ;;  %vm6990_vm15 = vweird.f32 %v6855_v6  ;;  %vm6995_vm2 = vcmp.eq.f32.partialorder %v6994_v7, 8.507059e+37  ;;  %v6543_v39 = vsel %vm508_vm0, %v13394_v31, %v6384_v44  ;;  %s8762_s29 = scalar_lea.hbm %s8761_s25, 128 }
 0x566   : > { %v12882_v45 = vadd.f32 %v12713_v43, %v6694_v49  ;;  %v8093_v48 = vpack.c.bf16 %v7365_v59, %v7364_v16  ;;  %v6972_v46 = vsub.f32 1.0, %v6971_v40  ;;  %v6997_v20 = vor.u32 1.1754944e-38, %v6996_v54  ;;  %p8763_p11 = scmp.ne.s32.totalorder %s8761_s25, %s8762_s29  ;;  %p8768_p1 = scmp.lt.s32.totalorder %s8766_s28, %s8762_s29 }
 0x568   : > { %v8643_v52 = vpop.eup %8642  ;;  %v7983_v22 = vmul.f32 -1.442695, %v12882_v45  ;;  %8161 = vst [vmem:[%s12785_s22 + $0x10] sm:$0xff] %v8093_v48   ;;  %v6973_v2 = vmul.f32 %v8641_v41, %v6972_v46  ;;  %p8764_p12 = pnand %p8763_p11, %p8903_p5  ;;  %p8769_p2 = por %p8768_p1, %p8767_p0 }
 0x569   : > { %v8645_v5 = vpop.eup %8644  ;;  %v12887_v17 = vadd.f32 1.0, %v8643_v52 }
 0x56a   : > { %v6986_v25 = vmul.f32 %v8645_v5, %v6855_v6  ;;  %8646 = vpow2.f32 %v7983_v22  ;;  %v6974_v13 = vadd.f32 %v8641_v41, %v6973_v2  ;;  %vm6991_vm12 = vweird.f32 %v8645_v5  ;;  %p8765_p13 = pneg %p8764_p12 }
 0x56b   : > { %8648 = vrcp.f32 %v12887_v17  ;;  %vm6992_vm1 = vmor %vm6990_vm15, %vm6991_vm12  ;;  %vm7005_vm7 = vweird.f32 %v12887_v17  ;;  %v7009_v14 = vand.u32 2147483647, %v12887_v17 }
 0x56c   : > { %v6987_v62 = vsub.f32 1.0, %v6986_v25  ;;  %v6978_v23 = vsel %vm12893_vm11, %v8641_v41, %v6974_v13  ;;  %p8770_p3 = pnand %p8769_p2, %p8765_p13 }
 0x56d   : > { %v6697_v50 = vpop.f32.mrf.mxu0  ;;  %v6494_v53 = vpop.permute.xlu1 %6493  ;;  %v6983_v56 = vsel %vm6980_vm14, %v6982_v28, %v6978_v23  ;;  %vm7010_vm5 = vcmp.eq.f32.partialorder %v7009_v14, 8.507059e+37 }
 0x56e   : > { %v6988_v24 = vmul.f32 %v8645_v5, %v6987_v62  ;;  %v12902_v29 = vadd.f32 %v12713_v43, %v6697_v50  ;;  %v6587_v36 = vsel %vm2629_vm13, %v6540_v47, %v6494_v53  ;;  %v7366_v58 = vmul.f32 %v6983_v56, %v12819_v4 }
 0x570   : > { %v8647_v3 = vpop.eup %8646  ;;  %v6989_v60 = vadd.f32 %v8645_v5, %v6988_v24  ;;  %v7984_v21 = vmul.f32 -1.442695, %v12902_v29  ;;  %6736 = vmatmul.bf16.gmra.mxu0 %v6587_v36 }
 0x571   : > { %v8649_v30 = vpop.eup %8648  ;;  %v6857_v0 = vadd.f32 1.0, %v8647_v3 }
 0x572   : > { %v6993_v8 = vsel %vm6992_vm1, %v8645_v5, %v6989_v60  ;;  %v7001_v61 = vmul.f32 %v8649_v30, %v12887_v17  ;;  %8650 = vpow2.f32 %v7984_v21  ;;  %vm7006_vm6 = vweird.f32 %v8649_v30 }
 0x573   : > { %v6998_v32 = vsel %vm6995_vm2, %v6997_v20, %v6993_v8  ;;  %8652 = vrcp.f32 %v6857_v0  ;;  %vm12923_vm3 = vmor %vm7005_vm7, %vm7006_vm6  ;;  %v7024_v51 = vand.u32 2147483647, %v6857_v0  ;;  %v7026_v41 = vand.u32 2147483648, %v6857_v0 }
 0x574   : > { %v7367_v63 = vmul.f32 %v6998_v32, %v12840_v9  ;;  %v7002_v37 = vsub.f32 1.0, %v7001_v61  ;;  %v7011_v9 = vand.u32 2147483648, %v12887_v17  ;;  %vm7020_vm10 = vweird.f32 %v6857_v0 }
 0x575   : > { %v6699_v10 = vpop.f32.mrf.mxu0  ;;  %v7027_v38 = vor.u32 1.1754944e-38, %v7026_v41  ;;  %vm7025_vm9 = vcmp.eq.f32.partialorder %v7024_v51, 8.507059e+37 }
 0x576   : > { %v8098_v12 = vpack.c.bf16 %v7367_v63, %v7366_v58  ;;  %v7003_v26 = vmul.f32 %v8649_v30, %v7002_v37  ;;  %v12911_v19 = vadd.f32 %v12713_v43, %v6699_v10  ;;  %v7012_v52 = vor.u32 1.1754944e-38, %v7011_v9 }
 0x578   : > { %v8651_v11 = vpop.eup %8650  ;;  %8162 = vst [vmem:[%s12785_s22 + $0x18] sm:$0xff] %v8098_v12   ;;  %v7985_v57 = vmul.f32 -1.442695, %v12911_v19  ;;  %v7004_v6 = vadd.f32 %v8649_v30, %v7003_v26 }
 0x579   : > { %v8653_v18 = vpop.eup %8652  ;;  %v12915_v1 = vadd.f32 1.0, %v8651_v11 }
 0x57a   : > { %v7016_v4 = vmul.f32 %v8653_v18, %v6857_v0  ;;  %8654 = vpow2.f32 %v7985_v57  ;;  %v7008_v59 = vsel %vm12923_vm3, %v8649_v30, %v7004_v6  ;;  %vm7021_vm4 = vweird.f32 %v8653_v18 }
 0x57b   : > { %8656 = vrcp.f32 %v12915_v1  ;;  %v7013_v25 = vsel %vm7010_vm5, %v7012_v52, %v7008_v59  ;;  %vm7022_vm8 = vmor %vm7020_vm10, %vm7021_vm4  ;;  %vm7035_vm12 = vweird.f32 %v12915_v1 }
 0x57c   : > { %v7017_v55 = vsub.f32 1.0, %v7016_v4  ;;  %v7368_v42 = vmul.f32 %v7013_v25, %v12869_v34  ;;  %v7041_v34 = vand.u32 2147483648, %v12915_v1 }
 0x57d   : > { %v6702_v16 = vpop.f32.mrf.mxu0  ;;  %v6496_v48 = vpop.permute.xlu0 %6495 }
 0x57e   : > { %v7018_v49 = vmul.f32 %v8653_v18, %v7017_v55  ;;  %v12930_v40 = vadd.f32 %v12713_v43, %v6702_v16  ;;  %v6590_v46 = vsel %vm2629_vm13, %v6543_v39, %v6496_v48  ;;  %v7042_v58 = vor.u32 1.1754944e-38, %v7041_v34 }
 0x580   : > { %v8655_v22 = vpop.eup %8654  ;;  %v7019_v5 = vadd.f32 %v8653_v18, %v7018_v49  ;;  %v7986_v17 = vmul.f32 -1.442695, %v12930_v40  ;;  %6741 = vmatmul.bf16.gmra.mxu0 %v6590_v46 }
 0x581   : > { %v8657_v2 = vpop.eup %8656  ;;  %v6859_v33 = vadd.f32 1.0, %v8655_v22 }
 0x582   : > { %v7023_v13 = vsel %vm7022_vm8, %v8653_v18, %v7019_v5  ;;  %v7031_v35 = vmul.f32 %v8657_v2, %v12915_v1  ;;  %8658 = vpow2.f32 %v7986_v17  ;;  %vm7036_vm11 = vweird.f32 %v8657_v2 }
 0x583   : > { %v7028_v62 = vsel %vm7025_vm9, %v7027_v38, %v7023_v13  ;;  %8660 = vrcp.f32 %v6859_v33  ;;  %vm12948_vm14 = vmor %vm7035_vm12, %vm7036_vm11  ;;  %v7054_v56 = vand.u32 2147483647, %v6859_v33  ;;  %v7056_v20 = vand.u32 2147483648, %v6859_v33 }
 0x584   : > { %v7369_v7 = vmul.f32 %v7028_v62, %v12882_v45  ;;  %v7032_v54 = vsub.f32 1.0, %v7031_v35  ;;  %v7039_v45 = vand.u32 2147483647, %v12915_v1  ;;  %vm7050_vm2 = vweird.f32 %v6859_v33 }
 0x585   : > { %v6704_v27 = vpop.f32.mrf.mxu0  ;;  %v7057_v11 = vor.u32 1.1754944e-38, %v7056_v20  ;;  %vm7055_vm7 = vcmp.eq.f32.partialorder %v7054_v56, 8.507059e+37 }
 0x586   : > { %v8103_v47 = vpack.c.bf16 %v7369_v7, %v7368_v42  ;;  %v7033_v50 = vmul.f32 %v8657_v2, %v7032_v54  ;;  %v12938_v53 = vadd.f32 %v12713_v43, %v6704_v27  ;;  %vm7040_vm1 = vcmp.eq.f32.partialorder %v7039_v45, 8.507059e+37 }
 0x588   : > { %v8659_v23 = vpop.eup %8658  ;;  %8163 = vst [vmem:[%s12785_s22 + $0x20] sm:$0xff] %v8103_v47   ;;  %v7987_v24 = vmul.f32 -1.442695, %v12938_v53  ;;  %v7034_v3 = vadd.f32 %v8657_v2, %v7033_v50 }
 0x589   : > { %v8661_v36 = vpop.eup %8660  ;;  %v12942_v28 = vadd.f32 1.0, %v8659_v23 }
 0x58a   : > { %v7046_v60 = vmul.f32 %v8661_v36, %v6859_v33  ;;  %8662 = vpow2.f32 %v7987_v24  ;;  %v7038_v8 = vsel %vm12948_vm14, %v8657_v2, %v7034_v3  ;;  %vm7051_vm15 = vweird.f32 %v8661_v36 }
 0x58b   : > { %8664 = vrcp.f32 %v12942_v28  ;;  %v7043_v26 = vsel %vm7040_vm1, %v7042_v58, %v7038_v8  ;;  %vm7052_vm6 = vmor %vm7050_vm2, %vm7051_vm15  ;;  %vm7065_vm4 = vweird.f32 %v12942_v28 }
 0x58c   : > { %v7047_v21 = vsub.f32 1.0, %v7046_v60  ;;  %v7370_v6 = vmul.f32 %v7043_v26, %v12902_v29  ;;  %v7071_v29 = vand.u32 2147483648, %v12942_v28 }
 0x58d   : > { %v6707_v0 = vpop.f32.mrf.mxu0 }
 0x58e   : > { %v7048_v61 = vmul.f32 %v8661_v36, %v7047_v21  ;;  %v12955_v32 = vadd.f32 %v12713_v43, %v6707_v0  ;;  %v7072_v38 = vor.u32 1.1754944e-38, %v7071_v29 }
 0x590   : > { %v8663_v63 = vpop.eup %8662  ;;  %v7049_v37 = vadd.f32 %v8661_v36, %v7048_v61  ;;  %v7988_v10 = vmul.f32 -1.442695, %v12955_v32 }
 0x591   : > { %v8665_v12 = vpop.eup %8664  ;;  %v6861_v57 = vadd.f32 1.0, %v8663_v63 }
 0x592   : > { %v7053_v18 = vsel %vm7052_vm6, %v8661_v36, %v7049_v37  ;;  %v7061_v1 = vmul.f32 %v8665_v12, %v12942_v28  ;;  %8666 = vpow2.f32 %v7988_v10  ;;  %vm7066_vm3 = vweird.f32 %v8665_v12 }
 0x593   : > { %v7058_v44 = vsel %vm7055_vm7, %v7057_v11, %v7053_v18  ;;  %8668 = vrcp.f32 %v6861_v57  ;;  %vm12972_vm5 = vmor %vm7065_vm4, %vm7066_vm3  ;;  %v7084_v46 = vand.u32 2147483647, %v6861_v57  ;;  %v7086_v22 = vand.u32 2147483648, %v6861_v57 }
 0x594   : > { %v7371_v4 = vmul.f32 %v7058_v44, %v12911_v19  ;;  %v7062_v9 = vsub.f32 1.0, %v7061_v1  ;;  %v7069_v19 = vand.u32 2147483647, %v12942_v28  ;;  %vm7080_vm9 = vweird.f32 %v6861_v57 }
 0x595   : > { %v6709_v14 = vpop.f32.mrf.mxu0  ;;  %v7087_v7 = vor.u32 1.1754944e-38, %v7086_v22  ;;  %vm7085_vm12 = vcmp.eq.f32.partialorder %v7084_v46, 8.507059e+37 }
 0x596   : > { %v8108_v55 = vpack.c.bf16 %v7371_v4, %v7370_v6  ;;  %v7063_v31 = vmul.f32 %v8665_v12, %v7062_v9  ;;  %v12962_v39 = vadd.f32 %v12713_v43, %v6709_v14  ;;  %vm7070_vm8 = vcmp.eq.f32.partialorder %v7069_v19, 8.507059e+37 }
 0x598   : > { %v8667_v15 = vpop.eup %8666  ;;  %8164 = vst [vmem:[%s12785_s22 + $0x28] sm:$0xff] %v8108_v55   ;;  %v7989_v51 = vmul.f32 -1.442695, %v12962_v39  ;;  %v7064_v59 = vadd.f32 %v8665_v12, %v7063_v31 }
 0x599   : > { %v8669_v41 = vpop.eup %8668  ;;  %v12966_v16 = vadd.f32 1.0, %v8667_v15 }
 0x59a   : > { %v7076_v49 = vmul.f32 %v8669_v41, %v6861_v57  ;;  %8670 = vpow2.f32 %v7989_v51  ;;  %v7068_v17 = vsel %vm12972_vm5, %v8665_v12, %v7064_v59  ;;  %vm7081_vm10 = vweird.f32 %v8669_v41 }
 0x59b   : > { %8672 = vrcp.f32 %v12966_v16  ;;  %v7073_v42 = vsel %vm7070_vm8, %v7072_v38, %v7068_v17  ;;  %vm7082_vm11 = vmor %vm7080_vm9, %vm7081_vm10  ;;  %vm7095_vm15 = vweird.f32 %v12966_v16 }
 0x59c   : > { %v7077_v48 = vsub.f32 1.0, %v7076_v49  ;;  %v7372_v23 = vmul.f32 %v7073_v42, %v12930_v40  ;;  %v7101_v40 = vand.u32 2147483648, %v12966_v16 }
 0x59d   : > { %v6712_v5 = vpop.f32.mrf.mxu0 }
 0x59e   : > { %v7078_v2 = vmul.f32 %v8669_v41, %v7077_v48  ;;  %v12979_v25 = vadd.f32 %v12713_v43, %v6712_v5  ;;  %v7102_v11 = vor.u32 1.1754944e-38, %v7101_v40 }
 0x5a0   : > { %v8671_v33 = vpop.eup %8670  ;;  %v7079_v13 = vadd.f32 %v8669_v41, %v7078_v2  ;;  %v7990_v35 = vmul.f32 -1.442695, %v12979_v25 }
 0x5a1   : > { %v8673_v62 = vpop.eup %8672  ;;  %v6863_v54 = vadd.f32 1.0, %v8671_v33 }
 0x5a2   : > { %v7083_v27 = vsel %vm7082_vm11, %v8669_v41, %v7079_v13  ;;  %v7091_v47 = vmul.f32 %v8673_v62, %v12966_v16  ;;  %8674 = vpow2.f32 %v7990_v35  ;;  %vm7096_vm14 = vweird.f32 %v8673_v62 }
 0x5a3   : > { %v7088_v50 = vsel %vm7085_vm12, %v7087_v7, %v7083_v27  ;;  %8676 = vrcp.f32 %v6863_v54  ;;  %vm12996_vm1 = vmor %vm7095_vm15, %vm7096_vm14  ;;  %v7114_v58 = vand.u32 2147483647, %v6863_v54  ;;  %v7116_v63 = vand.u32 2147483648, %v6863_v54 }
 0x5a4   : > { %v7373_v24 = vmul.f32 %v7088_v50, %v12938_v53  ;;  %v7092_v36 = vsub.f32 1.0, %v7091_v47  ;;  %v7099_v53 = vand.u32 2147483647, %v12966_v16  ;;  %vm7110_vm7 = vweird.f32 %v6863_v54 }
 0x5a5   : > { %v6714_v28 = vpop.f32.mrf.mxu0  ;;  %v7117_v4 = vor.u32 1.1754944e-38, %v7116_v63  ;;  %vm7115_vm4 = vcmp.eq.f32.partialorder %v7114_v58, 8.507059e+37  ;;  %v13039_v58 = vld [vmem:[%s13179_s8] ss:$0 sm:$0xff] }
 0x5a6   : > { %v8113_v3 = vpack.c.bf16 %v7373_v24, %v7372_v23  ;;  %v7093_v60 = vmul.f32 %v8673_v62, %v7092_v36  ;;  %v12986_v34 = vadd.f32 %v12713_v43, %v6714_v28  ;;  %vm7100_vm6 = vcmp.eq.f32.partialorder %v7099_v53, 8.507059e+37 }
 0x5a8   : > { %v8675_v45 = vpop.eup %8674  ;;  %8165 = vst [vmem:[%s12785_s22 + $0x30] sm:$0xff] %v8113_v3   ;;  %v7991_v21 = vmul.f32 -1.442695, %v12986_v34  ;;  %v7094_v20 = vadd.f32 %v8673_v62, %v7093_v60 }
 0x5a9   : > { %v8677_v30 = vpop.eup %8676  ;;  %v12990_v56 = vadd.f32 1.0, %v8675_v45 }
 0x5aa   : > { %v7106_v0 = vmul.f32 %v8677_v30, %v6863_v54  ;;  %8678 = vpow2.f32 %v7991_v21  ;;  %v7098_v10 = vsel %vm12996_vm1, %v8673_v62, %v7094_v20  ;;  %vm7111_vm2 = vweird.f32 %v8677_v30  ;;  %v13405_v54 = vld [vmem:[#allocation20_spill] sm:$0xff] }
 0x5ab   : > { %8680 = vrcp.f32 %v12990_v56  ;;  %v7103_v6 = vsel %vm7100_vm6, %v7102_v11, %v7098_v10  ;;  %vm7112_vm3 = vmor %vm7110_vm7, %vm7111_vm2  ;;  %vm7125_vm10 = vweird.f32 %v12990_v56  ;;  %v7129_v17 = vand.u32 2147483647, %v12990_v56 }
 0x5ac   : > { %v7107_v8 = vsub.f32 1.0, %v7106_v0  ;;  %v7374_v15 = vmul.f32 %v7103_v6, %v12955_v32  ;;  %v7131_v32 = vand.u32 2147483648, %v12990_v56 }
 0x5ad   : > { %v6717_v37 = vpop.f32.mrf.mxu0  ;;  %vm7130_vm11 = vcmp.eq.f32.partialorder %v7129_v17, 8.507059e+37 }
 0x5ae   : > { %v7108_v12 = vmul.f32 %v8677_v30, %v7107_v8  ;;  %v13003_v26 = vadd.f32 %v12713_v43, %v6717_v37  ;;  %v7132_v47 = vor.u32 1.1754944e-38, %v7131_v32 }
 0x5b0   : > { %v8679_v57 = vpop.eup %8678  ;;  %v7109_v18 = vadd.f32 %v8677_v30, %v7108_v12  ;;  %v7992_v1 = vmul.f32 -1.442695, %v13003_v26 }
 0x5b1   : > { %v8681_v44 = vpop.eup %8680  ;;  %v6865_v9 = vadd.f32 1.0, %v8679_v57 }
 0x5b2   : > { %v7113_v14 = vsel %vm7112_vm3, %v8677_v30, %v7109_v18  ;;  %v7121_v55 = vmul.f32 %v8681_v44, %v12990_v56  ;;  %8682 = vpow2.f32 %v7992_v1  ;;  %vm7126_vm5 = vweird.f32 %v8681_v44 }
 0x5b3   : > { %v7118_v31 = vsel %vm7115_vm4, %v7117_v4, %v7113_v14  ;;  %8684 = vrcp.f32 %v6865_v9  ;;  %vm13020_vm8 = vmor %vm7125_vm10, %vm7126_vm5  ;;  %v7144_v33 = vand.u32 2147483647, %v6865_v9  ;;  %v7146_v13 = vand.u32 2147483648, %v6865_v9 }
 0x5b4   : > { %v7375_v51 = vmul.f32 %v7118_v31, %v12962_v39  ;;  %v7122_v41 = vsub.f32 1.0, %v7121_v55  ;;  %v6386_v39 = vpop.permute.xlu1 %6385  ;;  %vm7140_vm12 = vweird.f32 %v6865_v9 }
 0x5b5   : > { %v6719_v16 = vpop.f32.mrf.mxu0  ;;  %v6546_v27 = vsel %vm508_vm0, %v13405_v54, %v6386_v39  ;;  %v7147_v60 = vor.u32 1.1754944e-38, %v7146_v13  ;;  %vm7145_vm15 = vcmp.eq.f32.partialorder %v7144_v33, 8.507059e+37 }
 0x5b6   : > { %v8118_v59 = vpack.c.bf16 %v7375_v51, %v7374_v15  ;;  %v7123_v49 = vmul.f32 %v8681_v44, %v7122_v41  ;;  %v13010_v29 = vadd.f32 %v12713_v43, %v6719_v16 }
 0x5b8   : > { %v8683_v19 = vpop.eup %8682  ;;  %8166 = vst [vmem:[%s12785_s22 + $0x38] sm:$0xff] %v8118_v59   ;;  %v7993_v48 = vmul.f32 -1.442695, %v13010_v29  ;;  %v7124_v22 = vadd.f32 %v8681_v44, %v7123_v49 }
 0x5b9   : > { %v8685_v52 = vpop.eup %8684  ;;  %v13014_v46 = vadd.f32 1.0, %v8683_v19 }
 0x5ba   : > { %v7136_v5 = vmul.f32 %v8685_v52, %v6865_v9  ;;  %8686 = vpow2.f32 %v7993_v48  ;;  %v7128_v62 = vsel %vm13020_vm8, %v8681_v44, %v7124_v22  ;;  %vm7141_vm9 = vweird.f32 %v8685_v52 }
 0x5bb   : > { %8688 = vrcp.f32 %v13014_v46  ;;  %v7133_v3 = vsel %vm7130_vm11, %v7132_v47, %v7128_v62  ;;  %vm7142_vm14 = vmor %vm7140_vm12, %vm7141_vm9  ;;  %v7161_v57 = vand.u32 2147483648, %v13014_v46  ;;  %v7159_v18 = vand.u32 2147483647, %v13014_v46 }
 0x5bc   : > { %v7137_v2 = vsub.f32 1.0, %v7136_v5  ;;  %v7376_v20 = vmul.f32 %v7133_v3, %v12979_v25 }
 0x5bd   : > { %v6722_v35 = vpop.f32.mrf.mxu0  ;;  %v7162_v55 = vor.u32 1.1754944e-38, %v7161_v57  ;;  %vm7160_vm6 = vcmp.eq.f32.partialorder %v7159_v18, 8.507059e+37 }
 0x5be   : > { %v7138_v42 = vmul.f32 %v8685_v52, %v7137_v2  ;;  %v13027_v7 = vadd.f32 %v12713_v43, %v6722_v35 }
 0x5bf   : > { %v6498_v36 = vpop.permute.xlu2 %6497 }
 0x5c0   : > { %v8687_v50 = vpop.eup %8686  ;;  %v7139_v23 = vadd.f32 %v8685_v52, %v7138_v42  ;;  %v7994_v24 = vmul.f32 -1.442695, %v13027_v7  ;;  %v6593_v21 = vsel %vm2629_vm13, %v6546_v27, %v6498_v36  ;;  %vm7155_vm13 = vweird.f32 %v13014_v46 }
 0x5c1   : > { %v8689_v28 = vpop.eup %8688  ;;  %v6867_v45 = vadd.f32 1.0, %v8687_v50  ;;  %6746 = vmatmul.bf16.gmra.mxu0 %v6593_v21 }
 0x5c2   : > { %v7143_v43 = vsel %vm7142_vm14, %v8685_v52, %v7139_v23  ;;  %v7151_v30 = vmul.f32 %v8689_v28, %v13014_v46  ;;  %8690 = vpow2.f32 %v7994_v24  ;;  %vm7156_vm0 = vweird.f32 %v8689_v28 }
 0x5c3   : > { %v7148_v56 = vsel %vm7145_vm15, %v7147_v60, %v7143_v43  ;;  %8692 = vrcp.f32 %v6867_v45  ;;  %vm7157_vm1 = vmor %vm7155_vm13, %vm7156_vm0  ;;  %v7176_v44 = vand.u32 2147483648, %v6867_v45  ;;  %v7174_v9 = vand.u32 2147483647, %v6867_v45 }
 0x5c4   : > { %v7377_v0 = vmul.f32 %v7148_v56, %v12986_v34  ;;  %v7152_v40 = vsub.f32 1.0, %v7151_v30  ;;  %vm7170_vm7 = vweird.f32 %v6867_v45 }
 0x5c5   : > { %v6724_v53 = vpop.f32.mrf.mxu0  ;;  %v7177_v59 = vor.u32 1.1754944e-38, %v7176_v44  ;;  %vm7175_vm4 = vcmp.eq.f32.partialorder %v7174_v9, 8.507059e+37 }
 0x5c6   : > { %v8123_v8 = vpack.c.bf16 %v7377_v0, %v7376_v20  ;;  %v7153_v61 = vmul.f32 %v8689_v28, %v7152_v40  ;;  %v13042_v63 = vadd.f32 %v13039_v58, %v6724_v53 }
 0x5c8   : > { %v8691_v37 = vpop.eup %8690  ;;  %8167 = vst [vmem:[%s12785_s22 + $0x40] sm:$0xff] %v8123_v8   ;;  %v7995_v10 = vmul.f32 -1.442695, %v13042_v63  ;;  %v7154_v34 = vadd.f32 %v8689_v28, %v7153_v61 }
 0x5c9   : > { %v8693_v12 = vpop.eup %8692  ;;  %v13046_v25 = vadd.f32 1.0, %v8691_v37 }
 0x5ca   : > { %v7166_v11 = vmul.f32 %v8693_v12, %v6867_v45  ;;  %8694 = vpow2.f32 %v7995_v10  ;;  %v7158_v6 = vsel %vm7157_vm1, %v8689_v28, %v7154_v34  ;;  %vm7171_vm2 = vweird.f32 %v8693_v12 }
 0x5cb   : > { %8696 = vrcp.f32 %v13046_v25  ;;  %v7163_v16 = vsel %vm7160_vm6, %v7162_v55, %v7158_v6  ;;  %vm7172_vm3 = vmor %vm7170_vm7, %vm7171_vm2  ;;  %vm7185_vm10 = vweird.f32 %v13046_v25 }
 0x5cc   : > { %v7167_v1 = vsub.f32 1.0, %v7166_v11  ;;  %v7378_v22 = vmul.f32 %v7163_v16, %v13003_v26  ;;  %v7191_v26 = vand.u32 2147483648, %v13046_v25 }
 0x5cd   : > { %v6727_v14 = vpop.f32.mrf.mxu0 }
 0x5ce   : > { %v7168_v4 = vmul.f32 %v8693_v12, %v7167_v1  ;;  %v13053_v31 = vadd.f32 %v13039_v58, %v6727_v14  ;;  %v7192_v28 = vor.u32 1.1754944e-38, %v7191_v26 }
 0x5d0   : > { %v8695_v15 = vpop.eup %8694  ;;  %v7169_v51 = vadd.f32 %v8693_v12, %v7168_v4  ;;  %v7996_v19 = vmul.f32 -1.442695, %v13053_v31 }
 0x5d1   : > { %v8697_v41 = vpop.eup %8696  ;;  %v6869_v49 = vadd.f32 1.0, %v8695_v15 }
 0x5d2   : > { %v7173_v48 = vsel %vm7172_vm3, %v8693_v12, %v7169_v51  ;;  %v7181_v52 = vmul.f32 %v8697_v41, %v13046_v25  ;;  %vm7186_vm5 = vweird.f32 %v8697_v41 }
 0x5d3   : > { %v7178_v46 = vsel %vm7175_vm4, %v7177_v59, %v7173_v48  ;;  %8698 = vrcp.f32 %v6869_v49  ;;  %vm7187_vm8 = vmor %vm7185_vm10, %vm7186_vm5  ;;  %v7206_v47 = vand.u32 2147483648, %v6869_v49  ;;  %v7204_v24 = vand.u32 2147483647, %v6869_v49 }
 0x5d4   : > { %v7379_v5 = vmul.f32 %v7178_v46, %v13010_v29  ;;  %v7182_v32 = vsub.f32 1.0, %v7181_v52  ;;  %8700 = vpow2.f32 %v7996_v19  ;;  %v7189_v29 = vand.u32 2147483647, %v13046_v25 }
 0x5d5   : > { %v6729_v2 = vpop.f32.mrf.mxu0  ;;  %vm7200_vm12 = vweird.f32 %v6869_v49  ;;  %v7207_v43 = vor.u32 1.1754944e-38, %v7206_v47  ;;  %vm7205_vm15 = vcmp.eq.f32.partialorder %v7204_v24, 8.507059e+37 }
 0x5d6   : > { %v8128_v39 = vpack.c.bf16 %v7379_v5, %v7378_v22  ;;  %v7183_v17 = vmul.f32 %v8697_v41, %v7182_v32  ;;  %v13060_v38 = vadd.f32 %v13039_v58, %v6729_v2  ;;  %vm7190_vm11 = vcmp.eq.f32.partialorder %v7189_v29, 8.507059e+37 }
 0x5d8   : > { %8168 = vst [vmem:[%s12785_s22 + $0x48] sm:$0xff] %v8128_v39   ;;  %v7997_v13 = vmul.f32 -1.442695, %v13060_v38  ;;  %v7184_v62 = vadd.f32 %v8697_v41, %v7183_v17 }
 0x5d9   : > { %v8699_v33 = vpop.eup %8698 }
 0x5da   : > { %v8701_v35 = vpop.eup %8700  ;;  %v7196_v42 = vmul.f32 %v8699_v33, %v6869_v49  ;;  %8702 = vpow2.f32 %v7997_v13  ;;  %v7188_v50 = vsel %vm7187_vm8, %v8697_v41, %v7184_v62  ;;  %vm7201_vm9 = vweird.f32 %v8699_v33 }
 0x5db   : > { %v6870_v54 = vadd.f32 1.0, %v8701_v35  ;;  %v7193_v21 = vsel %vm7190_vm11, %v7192_v28, %v7188_v50  ;;  %vm7202_vm14 = vmor %vm7200_vm12, %vm7201_vm9 }
 0x5dc   : > { %v7197_v27 = vsub.f32 1.0, %v7196_v42  ;;  %v7380_v53 = vmul.f32 %v7193_v21, %v13027_v7 }
 0x5dd   : > { %8704 = vrcp.f32 %v6870_v54  ;;  %v6732_v36 = vpop.f32.mrf.mxu0  ;;  %vm7215_vm13 = vweird.f32 %v6870_v54  ;;  %v7219_v6 = vand.u32 2147483647, %v6870_v54 }
 0x5de   : > { %v7198_v23 = vmul.f32 %v8699_v33, %v7197_v27  ;;  %v13068_v3 = vadd.f32 %v13039_v58, %v6732_v36 }
 0x5df   : > { %vm7220_vm6 = vcmp.eq.f32.partialorder %v7219_v6, 8.507059e+37 }
 0x5e0   : > { %v7199_v60 = vadd.f32 %v8699_v33, %v7198_v23  ;;  %v8703_v45 = vpop.eup %8702  ;;  %v7998_v30 = vmul.f32 -1.442695, %v13068_v3 }
 0x5e1   : > { %v6871_v20 = vadd.f32 1.0, %v8703_v45 }
 0x5e2   : > { %v7203_v56 = vsel %vm7202_vm14, %v8699_v33, %v7199_v60  ;;  %8706 = vpow2.f32 %v7998_v30 }
 0x5e3   : > { %v8705_v0 = vpop.eup %8704  ;;  %v7208_v40 = vsel %vm7205_vm15, %v7207_v43, %v7203_v56  ;;  %8708 = vrcp.f32 %v6871_v20  ;;  %v7234_v14 = vand.u32 2147483647, %v6871_v20  ;;  %v7236_v55 = vand.u32 2147483648, %v6871_v20 }
 0x5e4   : > { %v7381_v8 = vmul.f32 %v7208_v40, %v13042_v63  ;;  %v7211_v61 = vmul.f32 %v8705_v0, %v6870_v54  ;;  %vm7216_vm0 = vweird.f32 %v8705_v0  ;;  %v7221_v63 = vand.u32 2147483648, %v6870_v54 }
 0x5e5   : > { %v6734_v12 = vpop.f32.mrf.mxu0  ;;  %vm13081_vm1 = vmor %vm7215_vm13, %vm7216_vm0  ;;  %vm7230_vm7 = vweird.f32 %v6871_v20  ;;  %v7237_v22 = vor.u32 1.1754944e-38, %v7236_v55  ;;  %vm7235_vm4 = vcmp.eq.f32.partialorder %v7234_v14, 8.507059e+37 }
 0x5e6   : > { %v8133_v37 = vpack.c.bf16 %v7381_v8, %v7380_v53  ;;  %v7212_v10 = vsub.f32 1.0, %v7211_v61  ;;  %v13074_v25 = vadd.f32 %v13039_v58, %v6734_v12  ;;  %v7222_v59 = vor.u32 1.1754944e-38, %v7221_v63 }
 0x5e8   : > { %8169 = vst [vmem:[%s12785_s22 + $0x50] sm:$0xff] %v8133_v37   ;;  %v7213_v34 = vmul.f32 %v8705_v0, %v7212_v10  ;;  %v8707_v11 = vpop.eup %8706  ;;  %v7999_v57 = vmul.f32 -1.442695, %v13074_v25 }
 0x5e9   : > { %v8709_v18 = vpop.eup %8708  ;;  %v13078_v1 = vadd.f32 1.0, %v8707_v11 }
 0x5ea   : > { %v7214_v44 = vadd.f32 %v8705_v0, %v7213_v34  ;;  %v7226_v7 = vmul.f32 %v8709_v18, %v6871_v20  ;;  %8710 = vpow2.f32 %v7999_v57  ;;  %vm7231_vm2 = vweird.f32 %v8709_v18 }
 0x5eb   : > { %8712 = vrcp.f32 %v13078_v1  ;;  %vm7232_vm3 = vmor %vm7230_vm7, %vm7231_vm2  ;;  %vm7245_vm10 = vweird.f32 %v13078_v1 }
 0x5ec   : > { %v7227_v4 = vsub.f32 1.0, %v7226_v7  ;;  %v7218_v51 = vsel %vm13081_vm1, %v8705_v0, %v7214_v44 }
 0x5ed   : > { %v6737_v15 = vpop.f32.mrf.mxu0  ;;  %v7223_v46 = vsel %vm7220_vm6, %v7222_v59, %v7218_v51 }
 0x5ee   : > { %v7228_v41 = vmul.f32 %v8709_v18, %v7227_v4  ;;  %v13088_v16 = vadd.f32 %v13039_v58, %v6737_v15  ;;  %v7382_v2 = vmul.f32 %v7223_v46, %v13053_v31  ;;  %v7251_v31 = vand.u32 2147483648, %v13078_v1 }
 0x5f0   : > { %v8711_v49 = vpop.eup %8710  ;;  %v7229_v19 = vadd.f32 %v8709_v18, %v7228_v41  ;;  %v8000_v48 = vmul.f32 -1.442695, %v13088_v16  ;;  %v7252_v56 = vor.u32 1.1754944e-38, %v7251_v31 }
 0x5f1   : > { %v8713_v52 = vpop.eup %8712  ;;  %v6873_v5 = vadd.f32 1.0, %v8711_v49 }
 0x5f2   : > { %v7233_v32 = vsel %vm7232_vm3, %v8709_v18, %v7229_v19  ;;  %v7241_v39 = vmul.f32 %v8713_v52, %v13078_v1  ;;  %8714 = vpow2.f32 %v8000_v48  ;;  %vm7246_vm5 = vweird.f32 %v8713_v52 }
 0x5f3   : > { %v7238_v17 = vsel %vm7235_vm4, %v7237_v22, %v7233_v32  ;;  %8716 = vrcp.f32 %v6873_v5  ;;  %vm13105_vm8 = vmor %vm7245_vm10, %vm7246_vm5  ;;  %v7264_v28 = vand.u32 2147483647, %v6873_v5  ;;  %v7266_v60 = vand.u32 2147483648, %v6873_v5 }
 0x5f4   : > { %v7383_v33 = vmul.f32 %v7238_v17, %v13060_v38  ;;  %v7242_v13 = vsub.f32 1.0, %v7241_v39  ;;  %v7249_v38 = vand.u32 2147483647, %v13078_v1  ;;  %vm7260_vm12 = vweird.f32 %v6873_v5 }
 0x5f5   : > { %v6739_v35 = vpop.f32.mrf.mxu0  ;;  %v7267_v61 = vor.u32 1.1754944e-38, %v7266_v60  ;;  %vm7265_vm15 = vcmp.eq.f32.partialorder %v7264_v28, 8.507059e+37 }
 0x5f6   : > { %v8138_v62 = vpack.c.bf16 %v7383_v33, %v7382_v2  ;;  %v7243_v42 = vmul.f32 %v8713_v52, %v7242_v13  ;;  %v13095_v26 = vadd.f32 %v13039_v58, %v6739_v35  ;;  %vm7250_vm11 = vcmp.eq.f32.partialorder %v7249_v38, 8.507059e+37 }
 0x5f8   : > { %v8715_v54 = vpop.eup %8714  ;;  %8170 = vst [vmem:[%s12785_s22 + $0x58] sm:$0xff] %v8138_v62   ;;  %v8001_v29 = vmul.f32 -1.442695, %v13095_v26  ;;  %v7244_v50 = vadd.f32 %v8713_v52, %v7243_v42 }
 0x5f9   : > { %v8717_v27 = vpop.eup %8716  ;;  %v13099_v47 = vadd.f32 1.0, %v8715_v54 }
 0x5fa   : > { %v7256_v23 = vmul.f32 %v8717_v27, %v6873_v5  ;;  %8718 = vpow2.f32 %v8001_v29  ;;  %v7248_v21 = vsel %vm13105_vm8, %v8713_v52, %v7244_v50  ;;  %vm7261_vm9 = vweird.f32 %v8717_v27 }
 0x5fb   : > { %8720 = vrcp.f32 %v13099_v47  ;;  %v7253_v8 = vsel %vm7250_vm11, %v7252_v56, %v7248_v21  ;;  %vm7262_vm14 = vmor %vm7260_vm12, %vm7261_vm9  ;;  %vm7275_vm13 = vweird.f32 %v13099_v47 }
 0x5fc   : > { %v7257_v24 = vsub.f32 1.0, %v7256_v23  ;;  %v7384_v11 = vmul.f32 %v7253_v8, %v13068_v3  ;;  %v7281_v3 = vand.u32 2147483648, %v13099_v47 }
 0x5fd   : > { %v6742_v45 = vpop.f32.mrf.mxu0 }
 0x5fe   : > { %v7258_v43 = vmul.f32 %v8717_v27, %v7257_v24  ;;  %v13112_v30 = vadd.f32 %v13039_v58, %v6742_v45  ;;  %v7282_v48 = vor.u32 1.1754944e-38, %v7281_v3 }
 0x600   : > { %v8719_v20 = vpop.eup %8718  ;;  %v7259_v0 = vadd.f32 %v8717_v27, %v7258_v43  ;;  %v8002_v40 = vmul.f32 -1.442695, %v13112_v30 }
 0x601   : > { %v8721_v53 = vpop.eup %8720  ;;  %v6875_v37 = vadd.f32 1.0, %v8719_v20 }
 0x602   : > { %v7263_v10 = vsel %vm7262_vm14, %v8717_v27, %v7259_v0  ;;  %v7271_v12 = vmul.f32 %v8721_v53, %v13099_v47  ;;  %8722 = vpow2.f32 %v8002_v40  ;;  %vm7276_vm0 = vweird.f32 %v8721_v53 }
 0x603   : > { %v7268_v34 = vsel %vm7265_vm15, %v7267_v61, %v7263_v10  ;;  %8724 = vrcp.f32 %v6875_v37  ;;  %vm7277_vm1 = vmor %vm7275_vm13, %vm7276_vm0  ;;  %v7296_v41 = vand.u32 2147483648, %v6875_v37  ;;  %v7294_v19 = vand.u32 2147483647, %v6875_v37 }
 0x604   : > { %v7385_v57 = vmul.f32 %v7268_v34, %v13074_v25  ;;  %v7272_v18 = vsub.f32 1.0, %v7271_v12  ;;  %v7279_v25 = vand.u32 2147483647, %v13099_v47  ;;  %vm7290_vm7 = vweird.f32 %v6875_v37 }
 0x605   : > { %v6744_v1 = vpop.f32.mrf.mxu0  ;;  %v7297_v32 = vor.u32 1.1754944e-38, %v7296_v41  ;;  %vm7295_vm4 = vcmp.eq.f32.partialorder %v7294_v19, 8.507059e+37 }
 0x606   : > { %v8143_v44 = vpack.c.bf16 %v7385_v57, %v7384_v11  ;;  %v7273_v7 = vmul.f32 %v8721_v53, %v7272_v18  ;;  %v13119_v63 = vadd.f32 %v13039_v58, %v6744_v1  ;;  %vm7280_vm6 = vcmp.eq.f32.partialorder %v7279_v25, 8.507059e+37 }
 0x608   : > { %v8723_v6 = vpop.eup %8722  ;;  %8171 = vst [vmem:[%s12785_s22 + $0x60] sm:$0xff] %v8143_v44   ;;  %v8003_v4 = vmul.f32 -1.442695, %v13119_v63  ;;  %v7274_v55 = vadd.f32 %v8721_v53, %v7273_v7 }
 0x609   : > { %v8725_v9 = vpop.eup %8724  ;;  %v6876_v14 = vadd.f32 1.0, %v8723_v6 }
 0x60a   : > { %v7286_v15 = vmul.f32 %v8725_v9, %v6875_v37  ;;  %8726 = vpow2.f32 %v8003_v4  ;;  %v7278_v59 = vsel %vm7277_vm1, %v8721_v53, %v7274_v55  ;;  %vm7291_vm2 = vweird.f32 %v8725_v9 }
 0x60b   : > { %8728 = vrcp.f32 %v6876_v14  ;;  %v7283_v5 = vsel %vm7280_vm6, %v7282_v48, %v7278_v59  ;;  %vm7292_vm3 = vmor %vm7290_vm7, %vm7291_vm2  ;;  %v7311_v50 = vand.u32 2147483648, %v6876_v14  ;;  %vm7305_vm10 = vweird.f32 %v6876_v14 }
 0x60c   : > { %v7287_v51 = vsub.f32 1.0, %v7286_v15  ;;  %v7386_v13 = vmul.f32 %v7283_v5, %v13088_v16  ;;  %v7309_v23 = vand.u32 2147483647, %v6876_v14 }
 0x60e   : > { %v7288_v49 = vmul.f32 %v8725_v9, %v7287_v51  ;;  %vm7310_vm11 = vcmp.eq.f32.partialorder %v7309_v23, 8.507059e+37 }
 0x610   : > { %v8727_v52 = vpop.eup %8726  ;;  %v7289_v46 = vadd.f32 %v8725_v9, %v7288_v49 }
 0x611   : > { %v8729_v22 = vpop.eup %8728  ;;  %v6877_v39 = vadd.f32 1.0, %v8727_v52 }
 0x612   : > { %v7293_v17 = vsel %vm7292_vm3, %v8725_v9, %v7289_v46  ;;  %v7301_v2 = vmul.f32 %v8729_v22, %v6876_v14  ;;  %vm7306_vm5 = vweird.f32 %v8729_v22 }
 0x613   : > { %v7298_v33 = vsel %vm7295_vm4, %v7297_v32, %v7293_v17  ;;  %8730 = vrcp.f32 %v6877_v39  ;;  %vm7307_vm8 = vmor %vm7305_vm10, %vm7306_vm5  ;;  %v7326_v38 = vand.u32 2147483648, %v6877_v39  ;;  %v7324_v16 = vand.u32 2147483647, %v6877_v39 }
 0x614   : > { %v7387_v35 = vmul.f32 %v7298_v33, %v13095_v26  ;;  %v7302_v62 = vsub.f32 1.0, %v7301_v2  ;;  %v7312_v26 = vor.u32 1.1754944e-38, %v7311_v50  ;;  %vm7320_vm12 = vweird.f32 %v6877_v39 }
 0x615   : > { %v7327_v45 = vor.u32 1.1754944e-38, %v7326_v38  ;;  %vm7325_vm15 = vcmp.eq.f32.partialorder %v7324_v16, 8.507059e+37 }
 0x616   : > { %v8148_v42 = vpack.c.bf16 %v7387_v35, %v7386_v13  ;;  %v7303_v54 = vmul.f32 %v8729_v22, %v7302_v62 }
 0x618   : > { %8172 = vst [vmem:[%s12785_s22 + $0x68] sm:$0xff] %v8148_v42   ;;  %v7304_v27 = vadd.f32 %v8729_v22, %v7303_v54 }
 0x619   : > { %v8731_v29 = vpop.eup %8730 }
 0x61a   : > { %v7316_v47 = vmul.f32 %v8731_v29, %v6877_v39  ;;  %v7308_v24 = vsel %vm7307_vm8, %v8729_v22, %v7304_v27  ;;  %vm7321_vm9 = vweird.f32 %v8731_v29 }
 0x61b   : > { %v7313_v60 = vsel %vm7310_vm11, %v7312_v26, %v7308_v24  ;;  %vm7322_vm14 = vmor %vm7320_vm12, %vm7321_vm9 }
 0x61c   : > { %v7317_v31 = vsub.f32 1.0, %v7316_v47  ;;  %v7388_v56 = vmul.f32 %v7313_v60, %v13112_v30 }
 0x61e   : > { %v7318_v36 = vmul.f32 %v8731_v29, %v7317_v31 }
 0x620   : > { %v7319_v28 = vadd.f32 %v8731_v29, %v7318_v36 }
 0x622   : > { %v7323_v21 = vsel %vm7322_vm14, %v8731_v29, %v7319_v28 }
 0x623   : > { %v7328_v43 = vsel %vm7325_vm15, %v7327_v45, %v7323_v21 }
 0x624   : > { %v7389_v20 = vmul.f32 %v7328_v43, %v13119_v63 }
 0x626   : > { %v8153_v0 = vpack.c.bf16 %v7389_v20, %v7388_v56 }
 0x628   : > { %8173 = vst [vmem:[%s12785_s22 + $0x70] sm:$0xff] %v8153_v0  }
 0x63e   : > { %v6747_v40 = vpop.f32.mrf.mxu0 }
 0x63f   : > { %v6748_v53 = vadd.f32 %v13039_v58, %v6747_v40 }
 0x641   : > { %v8004_v8 = vmul.f32 -1.442695, %v6748_v53 }
 0x643   : > { %8732 = vpow2.f32 %v8004_v8 }
 0x646   : > { %v6749_v61 = vpop.f32.mrf.mxu0 }
 0x647   : > { %v6750_v37 = vadd.f32 %v13039_v58, %v6749_v61 }
 0x649   : > { %v8733_v10 = vpop.eup %8732  ;;  %v8005_v12 = vmul.f32 -1.442695, %v6750_v37 }
 0x64a   : > { %v6878_v34 = vadd.f32 1.0, %v8733_v10 }
 0x64b   : > { %8734 = vpow2.f32 %v8005_v12 }
 0x64c   : > { %8736 = vrcp.f32 %v6878_v34  ;;  %v7341_v4 = vand.u32 2147483648, %v6878_v34  ;;  %vm7335_vm13 = vweird.f32 %v6878_v34  ;;  %v7339_v58 = vand.u32 2147483647, %v6878_v34 }
 0x64e   : > { %v7342_v25 = vor.u32 1.1754944e-38, %v7341_v4  ;;  %vm7340_vm6 = vcmp.eq.f32.partialorder %v7339_v58, 8.507059e+37 }
 0x651   : > { %v8735_v11 = vpop.eup %8734 }
 0x652   : > { %v8737_v57 = vpop.eup %8736  ;;  %v6879_v30 = vadd.f32 1.0, %v8735_v11 }
 0x653   : > { %v7331_v18 = vmul.f32 %v8737_v57, %v6878_v34  ;;  %vm7336_vm0 = vweird.f32 %v8737_v57 }
 0x654   : > { %8738 = vrcp.f32 %v6879_v30  ;;  %vm7337_vm1 = vmor %vm7335_vm13, %vm7336_vm0  ;;  %v7356_v14 = vand.u32 2147483648, %v6879_v30  ;;  %v7354_v3 = vand.u32 2147483647, %v6879_v30  ;;  %vm7350_vm7 = vweird.f32 %v6879_v30 }
 0x655   : > { %v7332_v1 = vsub.f32 1.0, %v7331_v18 }
 0x656   : > { %v7357_v59 = vor.u32 1.1754944e-38, %v7356_v14  ;;  %vm7355_vm4 = vcmp.eq.f32.partialorder %v7354_v3, 8.507059e+37 }
 0x657   : > { %v7333_v44 = vmul.f32 %v8737_v57, %v7332_v1 }
 0x659   : > { %v7334_v63 = vadd.f32 %v8737_v57, %v7333_v44 }
 0x65a   : > { %v8739_v7 = vpop.eup %8738 }
 0x65b   : > { %v7346_v6 = vmul.f32 %v8739_v7, %v6879_v30  ;;  %v7338_v55 = vsel %vm7337_vm1, %v8737_v57, %v7334_v63  ;;  %vm7351_vm2 = vweird.f32 %v8739_v7 }
 0x65c   : > { %v7343_v41 = vsel %vm7340_vm6, %v7342_v25, %v7338_v55  ;;  %vm7352_vm3 = vmor %vm7350_vm7, %vm7351_vm2 }
 0x65d   : > { %v7347_v9 = vsub.f32 1.0, %v7346_v6  ;;  %v7390_v48 = vmul.f32 %v7343_v41, %v6748_v53 }
 0x65f   : > { %v7348_v15 = vmul.f32 %v8739_v7, %v7347_v9 }
 0x661   : > { %v7349_v51 = vadd.f32 %v8739_v7, %v7348_v15 }
 0x663   : > { %v7353_v49 = vsel %vm7352_vm3, %v8739_v7, %v7349_v51 }
 0x664   : > { %v7358_v19 = vsel %vm7355_vm4, %v7357_v59, %v7353_v49 }
 0x665   : > { %v7391_v52 = vmul.f32 %v7358_v19, %v6750_v37 }
 0x667   : > { %v8158_v46 = vpack.c.bf16 %v7391_v52, %v7390_v48 }
 0x669   : > { %8174 = vst [vmem:[%s12785_s22 + $0x78] sm:$0xff] %v8158_v46  }
 0x66a   : > { %8773 = shalt.err (!%p8770_p3)
}
 0x66b   : > { %s8814_s21 = smov 4  }
 0x66c   : > { %8180 = dma.vmem_to_hbm [thread:$0]  (%p8903_p5), %s7470_s13, 2048, %s7472_s23, %s7457_s17, %s8813_s24, %s8813_s24, %s8814_s21  }
 0x66d PF: > { %p8186_p4 = scmp.ge.s32.totalorder %s8808_s12, 2  ;;  %s7486_s22 = sand.u32 1, %s8796_s30  }
 0x66e   : > { %s7487_s25 = scalar_lea.sflag [#allocation3], %s7486_s22 }
 0x66f   : > { %p8183_p7 = pnand %p8186_p4, %p8907_p6 }
 0x671   : > { %p8184_p8 = pneg %p8183_p7 }
 0x673   : > { %8791 = dma.done.wait (%p8184_p8), %s7487_s25, 2048  }
 0x674   : > { %8793 = vsyncadd (%p8184_p8), %s7487_s25, 4294965248  ;;  %p19_p9 = scmp.ge.s32.totalorder %s8890_s15, 4   ;;  %s13410_s30 = smov %s8800_s10 }
 0x675   : > { %s13411_s10 = smov %s8804_s11  ;;  %s13412_s11 = smov %s8901_s18 }
 0x676   : > { %s13413_s12 = smov %s8890_s15  ;;  %21 = sbr.rel (!%p19_p9) target bundleno = 3 (0x3), region = 91 }
 0x67b   :  { %7493 = vsyncpa [#allocation3], 1 }
 0x67c   :  { %7495 = vsyncpa [#allocation3 + $0x1], 1 }

</bundles_post_ra>
